<compile_context>
chip_gen: v6e
topology: v6e:2x2x1
jax: 0.10.0
libtpu: 0.0.40
codegen_flags: <defaults>
</compile_context>

<pallas_src>
import functools

import jax
import jax.numpy as jnp
from jax.experimental import pallas as pl
from jax.experimental.pallas import tpu as pltpu

LANE = 128
BN_EPS = 1e-5
NEG_SLOPE = 0.2
CONV_TARGET_ROWS = 2048          # im2col rows (M) per conv grid step
BN_TARGET_ROWS = 8192            # rows per step for the memory-bound BN pass
VMEM_LIMIT = 48 * 1024 * 1024    # above 32MiB default, < v7x 64MiB physical


def _round_up(x, m):
    return (x + m - 1) // m * m


def _pick_tile(n, cap, mult=1):
    """Largest divisor of n that is <= cap and (a multiple of `mult` or == n)."""
    cap = max(1, min(n, cap))
    for d in range(cap, 0, -1):
        if n % d == 0 and (d == n or d % mult == 0):
            return d
    return n


# ----------------------------------------------------------------------------
# Kernels
# ----------------------------------------------------------------------------
def _conv_quad(stack, w_ref, *, ho, wo):
    """4 accumulated MXU dots (K = 4*Cin) for one 4x4 / stride-2 conv tile.

    stack: (tn, Hq, Wq, 4*ck) bf16 value — four zero-pad phases concatenated
    along channels. Window offset (dy,dx) multiplies weight slab 2*dy+dx of
    shape (4*ck, cout). Accumulation is value-based (no scratch RMW).
    """
    tn = stack.shape[0]
    ck4 = stack.shape[-1]
    m = tn * ho * wo
    acc = None
    for dy in range(2):
        for dx in range(2):
            xs = stack[:, dy:dy + ho, dx:dx + wo, :].reshape(m, ck4)
            d = jnp.dot(xs, w_ref[2 * dy + dx],
                        preferred_element_type=jnp.float32)
            acc = d if acc is None else acc + d
    return acc


def _conv_bias_act_kernel(stack_ref, w_ref, b_ref, o_ref, *, ho, wo, act):
    """Conv + bias + activation (layers without BatchNorm)."""
    y = _conv_quad(stack_ref[...], w_ref, ho=ho, wo=wo) + b_ref[...]
    if act == "leaky":
        y = jnp.maximum(y, NEG_SLOPE * y)
    elif act == "sigmoid":
        y = pl.reciprocal(1.0 + jnp.exp(-y), approx=True)
    o_ref[...] = y.astype(o_ref.dtype)


def _conv_stats_kernel(stack_ref, w_ref, y_ref, s_ref, *, ho, wo):
    """Conv (bias skipped: cancelled by BN) + per-tile per-channel sum/sum-sq.

    y is stored as bf16; the stats are taken from the f32 accumulator."""
    acc = _conv_quad(stack_ref[...], w_ref, ho=ho, wo=wo)
    y_ref[...] = acc.astype(y_ref.dtype)
    ssum = jnp.sum(acc, axis=0, keepdims=True)
    ssq = jnp.sum(acc * acc, axis=0, keepdims=True)
    filler = jnp.zeros((6, acc.shape[1]), jnp.float32)       # sublane pad -> 8
    s_ref[0] = jnp.concatenate([ssum, ssq, filler], axis=0)


def _bn_leaky_kernel(y_ref, scale_ref, shift_ref, o_ref):
    """y * scale + shift  ->  LeakyReLU(0.2), tiled over M (bf16 in / bf16 out)."""
    y = y_ref[...].astype(jnp.float32) * scale_ref[...] + shift_ref[...]
    o_ref[...] = jnp.maximum(y, NEG_SLOPE * y).astype(o_ref.dtype)


def _bn_leaky_head_kernel(y_ref, scale_ref, shift_ref, w_ref, b_ref, o_ref):
    """Fused tail: BN(layer 3) + LeakyReLU + final 4x4 valid conv (one
    K = 16*Cin matmul) + Sigmoid."""
    x = y_ref[...].astype(jnp.float32) * scale_ref[...] + shift_ref[...]
    x = jnp.maximum(x, NEG_SLOPE * x).astype(jnp.bfloat16)
    y = jnp.dot(x, w_ref[...], preferred_element_type=jnp.float32) + b_ref[...]
    o_ref[...] = pl.reciprocal(1.0 + jnp.exp(-y), approx=True).astype(o_ref.dtype)


# ----------------------------------------------------------------------------
# Wrappers
# ----------------------------------------------------------------------------
def _phase_stack(x, pad, ck):
    """(N,H,W,C) -> (N, Hq, Wq, 4*ck) bf16: the four (row,col) parities of the
    zero-padded input concatenated along channels (no data duplication).
    Channel block b = 2*py + px holds phase (py,px); per-phase channels are
    zero-padded from C to ck (only used for layer 0, C=3 -> 8)."""
    n, h, w, c = x.shape
    if pad:
        x = jnp.pad(x, ((0, 0), (pad, pad), (pad, pad), (0, 0)))
    if ck != c:
        x = jnp.pad(x, ((0, 0), (0, 0), (0, 0), (0, ck - c)))
    x = x.astype(jnp.bfloat16)
    phases = [x[:, py::2, px::2, :] for py in range(2) for px in range(2)]
    return jnp.concatenate(phases, axis=-1)


def _prep_weight_quads(w, ck, cout_store):
    """PyTorch (Cout,Cin,4,4) -> (4, 4*ck, cout_store) bf16 per-offset slabs.

    Slab q = 2*dy+dx holds tap (ky,kx) = (2*dy+py, 2*dx+px) in channel block
    b = 2*py+px, matching the phase-stacked input layout."""
    cout, cin, _, _ = w.shape
    wt = jnp.transpose(w, (2, 3, 1, 0)).astype(jnp.float32)   # (ky,kx,Cin,Cout)
    out = jnp.zeros((4, 4 * ck, cout_store), jnp.float32)
    for dy in range(2):
        for dx in range(2):
            for py in range(2):
                for px in range(2):
                    b = 2 * py + px
                    out = out.at[2 * dy + dx, b * ck:b * ck + cin, :cout].set(
                        wt[2 * dy + py, 2 * dx + px])
    return out.astype(jnp.bfloat16)


def _prep_vec(v, cpad):
    out = jnp.zeros((1, cpad), jnp.float32)
    return out.at[:, :v.shape[0]].set(v.astype(jnp.float32))


def _conv4x4_s2(x, w, b, *, pad, act_bias, cin_pad_to=None, cout_store=None):
    """Fused 4x4/stride-2 conv on a phase-stacked input.

    act_bias in ("leaky","sigmoid"): bias+activation fused, returns
      (N, Ho, Wo, cout_store) activated output.
    act_bias is None (BatchNorm follows): bias skipped, returns
      (y_2d (M, cout) bf16, (N, Ho, Wo), mean, biased var).
    """
    n, h, wd, cin = x.shape
    cout = w.shape[0]
    if cout_store is None:
        cout_store = cout
    ho = (h + 2 * pad - 4) // 2 + 1
    wo = (wd + 2 * pad - 4) // 2 + 1
    ck = cin if cin_pad_to is None else max(cin, cin_pad_to)

    stack = _phase_stack(x, pad, ck)               # (n, hq, wq, 4*ck) bf16
    hq, wq = stack.shape[1], stack.shape[2]
    wt = _prep_weight_quads(w, ck, cout_store)     # (4, 4*ck, cout_store)

    row_mult = 1 if (ho * wo) % 8 == 0 else 8
    cap = max(1, CONV_TARGET_ROWS // (ho * wo))
    if n >= 2:
        cap = min(cap, n // 2)        # keep >= 2 grid steps (v7x megacore)
    tn = _pick_tile(n, cap, row_mult)
    grid = (n // tn,)
    tm = tn * ho * wo
    m = n * ho * wo

    stack_spec = pl.BlockSpec((tn, hq, wq, 4 * ck), lambda g: (g, 0, 0, 0))
    w_spec = pl.BlockSpec((4, 4 * ck, cout_store), lambda g: (0, 0, 0))
    vec_spec = pl.BlockSpec((1, cout_store), lambda g: (0, 0))
    row_spec = pl.BlockSpec((tm, cout_store), lambda g: (g, 0))

    flops = 2 * m * 16 * ck * cout_store
    in_bytes = stack.size * 2 + wt.size * 2
    comp = pltpu.CompilerParams(dimension_semantics=("parallel",),
                                vmem_limit_bytes=VMEM_LIMIT)

    if act_bias is not None:
        out_dtype = jnp.float32 if act_bias == "sigmoid" else jnp.bfloat16
        kern = functools.partial(_conv_bias_act_kernel, ho=ho, wo=wo,
                                 act=act_bias)
        y = pl.pallas_call(
            kern,
            grid=grid,
            in_specs=[stack_spec, w_spec, vec_spec],
            out_specs=row_spec,
            out_shape=jax.ShapeDtypeStruct((m, cout_store), out_dtype),
            compiler_params=comp,
            cost_estimate=pl.CostEstimate(
                flops=flops,
                transcendentals=m * cout_store if act_bias == "sigmoid" else 0,
                bytes_accessed=in_bytes + m * cout_store * 2),
        )(stack, wt, _prep_vec(b, cout_store))
        return y.reshape(n, ho, wo, cout_store)

    # BatchNorm follows: emit pre-BN conv output (bf16) + per-tile stats.
    kern = functools.partial(_conv_stats_kernel, ho=ho, wo=wo)
    stats_spec = pl.BlockSpec((1, 8, cout_store), lambda g: (g, 0, 0))
    y2d, stats = pl.pallas_call(
        kern,
        grid=grid,
        in_specs=[stack_spec, w_spec],
        out_specs=(row_spec, stats_spec),
        out_shape=(jax.ShapeDtypeStruct((m, cout_store), jnp.bfloat16),
                   jax.ShapeDtypeStruct((grid[0], 8, cout_store), jnp.float32)),
        compiler_params=comp,
        cost_estimate=pl.CostEstimate(
            flops=flops, transcendentals=0,
            bytes_accessed=in_bytes + m * cout_store * 2),
    )(stack, wt)

    ssum = jnp.sum(stats[:, 0, :], axis=0)
    ssq = jnp.sum(stats[:, 1, :], axis=0)
    mean = ssum / m
    # TODO(synk): E[x^2]-E[x]^2 can cancel for large-mean activations; a
    # shifted sum-of-squared-deviations accumulation would be more robust.
    var = jnp.maximum(ssq / m - mean * mean, 0.0)   # biased var (BN train mode)
    return y2d, (n, ho, wo), mean, var


def _bn_leaky(y2d, mean, var, gamma, beta, nhw, cout):
    n, ho, wo = nhw
    m = n * ho * wo
    scale1 = gamma.astype(jnp.float32) * jax.lax.rsqrt(var + BN_EPS)
    shift1 = beta.astype(jnp.float32) - mean * scale1
    scale = scale1.reshape(1, cout)
    shift = shift1.reshape(1, cout)

    tm = _pick_tile(m, BN_TARGET_ROWS, 8)
    if m // tm < 2:                          # keep >= 2 grid steps if possible
        tm = _pick_tile(m, max(8, m // 2), 8)
    grid = (m // tm,)
    row_spec = pl.BlockSpec((tm, cout), lambda i: (i, 0))
    vec_spec = pl.BlockSpec((1, cout), lambda i: (0, 0))
    out = pl.pallas_call(
        _bn_leaky_kernel,
        grid=grid,
        in_specs=[row_spec, vec_spec, vec_spec],
        out_specs=row_spec,
        out_shape=jax.ShapeDtypeStruct((m, cout), jnp.bfloat16),
        compiler_params=pltpu.CompilerParams(
            dimension_semantics=("parallel",), vmem_limit_bytes=VMEM_LIMIT),
    )(y2d, scale, shift)
    return out.reshape(n, ho, wo, cout)


def _bn_leaky_conv_head(y2d, mean, var, gamma, beta, nhw, cin, w4, b4):
    """BN(layer3) + LeakyReLU fused with the final 4x4 valid conv + Sigmoid.

    The 4x4 window is flattened in the wrapper so the kernel runs a single
    K = 16*cin matmul (lane-dense LHS, no per-tap slices)."""
    n, ho, wo = nhw                     # ho == wo == 4 on this path
    k = ho * wo * cin
    cout_pad = LANE                     # real Cout = 1, padded for lane-dense store
    scale1 = gamma.astype(jnp.float32) * jax.lax.rsqrt(var + BN_EPS)
    shift1 = beta.astype(jnp.float32) - mean * scale1
    scale = jnp.tile(scale1, ho * wo).reshape(1, k)
    shift = jnp.tile(shift1, ho * wo).reshape(1, k)
    yflat = y2d.reshape(n, k)           # rows ordered (n, h, w, c) -> (n, K)

    wt = jnp.transpose(w4, (2, 3, 1, 0)).astype(jnp.float32).reshape(k, -1)
    wflat = jnp.zeros((k, cout_pad), jnp.float32).at[:, :w4.shape[0]].set(wt)
    wflat = wflat.astype(jnp.bfloat16)
    bt = _prep_vec(b4, cout_pad)

    cap = 512
    if n >= 2:
        cap = min(cap, n // 2)
    tn = _pick_tile(n, cap, 8)
    grid = (n // tn,)
    out = pl.pallas_call(
        _bn_leaky_head_kernel,
        grid=grid,
        in_specs=[pl.BlockSpec((tn, k), lambda g: (g, 0)),
                  pl.BlockSpec((1, k), lambda g: (0, 0)),
                  pl.BlockSpec((1, k), lambda g: (0, 0)),
                  pl.BlockSpec((k, cout_pad), lambda g: (0, 0)),
                  pl.BlockSpec((1, cout_pad), lambda g: (0, 0))],
        out_specs=pl.BlockSpec((tn, cout_pad), lambda g: (g, 0)),
        out_shape=jax.ShapeDtypeStruct((n, cout_pad), jnp.float32),
        compiler_params=pltpu.CompilerParams(
            dimension_semantics=("parallel",), vmem_limit_bytes=VMEM_LIMIT),
    )(yflat, scale, shift, wflat, bt)
    return out[:, :1]


# ----------------------------------------------------------------------------
# Discriminator forward
# ----------------------------------------------------------------------------
def init_params(key, img_channels, features_d):
    fd = features_d
    chans = [(img_channels, fd), (fd, 2 * fd), (2 * fd, 4 * fd),
             (4 * fd, 8 * fd), (8 * fd, 1)]
    params = []
    for cin, cout in chans:
        key, kw_, kb_ = jax.random.split(key, 3)
        w = 0.05 * jax.random.normal(kw_, (cout, cin, 4, 4), jnp.float32)
        b = 0.05 * jax.random.normal(kb_, (cout,), jnp.float32)
        gamma = jnp.ones((cout,), jnp.float32)   # BN weight (unused layers 0,4)
        beta = jnp.zeros((cout,), jnp.float32)   # BN bias
        params.append((w, b, gamma, beta))
    return params


def discriminator_forward(params, x_nchw):
    # NCHW -> NHWC once; activations stay NHWC with REAL channel counts.
    x = jnp.transpose(x_nchw, (0, 2, 3, 1)).astype(jnp.float32)

    # Layer 0: Conv(c -> fd, 4, 2, 1) + LeakyReLU(0.2)   (bias + act fused).
    w0, b0, _, _ = params[0]
    x = _conv4x4_s2(x, w0, b0, pad=1, act_bias="leaky",
                    cin_pad_to=8 if w0.shape[1] < 8 else None)

    # Layers 1, 2: Conv + BatchNorm(batch stats) + LeakyReLU (two-pass BN).
    # TODO(synk): the pad + phase-stack for the next layer is still an XLA-side
    # re-layout between pallas_calls; fusing it into the producer kernels would
    # save one HBM round-trip of each activation per layer.
    for li in (1, 2):
        w, b, gamma, beta = params[li]
        y2d, nhw, mean, var = _conv4x4_s2(x, w, b, pad=1, act_bias=None)
        x = _bn_leaky(y2d, mean, var, gamma, beta, nhw, w.shape[0])

    # Layer 3 conv, then fused tail (BN3 + LeakyReLU + Conv(8fd->1) + Sigmoid).
    w3, b3, gamma3, beta3 = params[3]
    w4, b4, _, _ = params[4]
    y2d, nhw, mean, var = _conv4x4_s2(x, w3, b3, pad=1, act_bias=None)
    n3, h3, w3o = nhw
    if h3 == 4 and w3o == 4:
        out = _bn_leaky_conv_head(y2d, mean, var, gamma3, beta3, nhw,
                                  w3.shape[0], w4, b4)
        return out.reshape(n3, 1, 1, 1)          # matches PyTorch (N,1,1,1)

    # Generic fallback for non-64x64 inputs: separate BN kernel + final conv.
    x = _bn_leaky(y2d, mean, var, gamma3, beta3, nhw, w3.shape[0])
    y = _conv4x4_s2(x, w4, b4, pad=0, act_bias="sigmoid", cout_store=LANE)
    return jnp.transpose(y[..., :1], (0, 3, 1, 2))


if __name__ == "__main__":
    key = jax.random.PRNGKey(0)
    k_params, k_x = jax.random.split(key)

    img_channels, features_d = 3, 8
    batch, spatial = 2, 64          # DCGAN discriminator expects 64x64 inputs

    params = init_params(k_params, img_channels, features_d)
    x = jax.random.normal(k_x, (batch, img_channels, spatial, spatial),
                          jnp.float32)

    out = jax.jit(discriminator_forward)(params, x)
    out = jax.block_until_ready(out)

    assert out.shape == (batch, 1, 1, 1), out.shape
    assert bool(jnp.all(jnp.isfinite(out)))
    # approx-EUP reciprocal sigmoid: allow a few ulp of slack around [0, 1]
    assert bool(jnp.all((out >= -1e-3) & (out <= 1.0 + 1e-3)))
    print("KERNEL_OK")
</pallas_src>

<mosaic_0001>
module attributes {stable_mosaic.version = 11 : i64} {
  func.func @_conv_bias_act_kernel(%arg0: i32, %arg1: memref<1x33x33x32xbf16, #tpu.memory_space<vmem>>, %arg2: memref<4x32x8xbf16, #tpu.memory_space<vmem>>, %arg3: memref<1x8xf32, #tpu.memory_space<vmem>>, %arg4: memref<1024x8xbf16, #tpu.memory_space<vmem>>) attributes {dimension_semantics = [#tpu.dimension_semantics<parallel>], iteration_bounds = array<i64: 2>, scalar_prefetch = 0 : i64, scratch_operands = 0 : i64, tpu.core_type = #tpu.core_type<tc>, window_params = [{transform_indices = @transform_0, window_bounds = array<i64: 1, 33, 33, 32>}, {pipeline_mode = #tpu.pipeline_mode<synchronous>, transform_indices = @transform_1, window_bounds = array<i64: 4, 32, 8>}, {pipeline_mode = #tpu.pipeline_mode<synchronous>, transform_indices = @transform_2, window_bounds = array<i64: 1, 8>}, {transform_indices = @transform_3, window_bounds = array<i64: 1024, 8>}]} {
    %c0 = arith.constant 0 : index
    %c0_0 = arith.constant 0 : index
    %c0_1 = arith.constant 0 : index
    %c0_2 = arith.constant 0 : index
    %0 = vector.load %arg1[%c0, %c0_0, %c0_1, %c0_2] : memref<1x33x33x32xbf16, #tpu.memory_space<vmem>>, vector<1x33x33x32xbf16>
    %1 = vector.extract_strided_slice %0 {offsets = [0, 0, 0, 0], sizes = [1, 32, 32, 32], strides = [1, 1, 1, 1]} : vector<1x33x33x32xbf16> to vector<1x32x32x32xbf16>
    %2 = vector.shape_cast %1 : vector<1x32x32x32xbf16> to vector<1024x32xbf16>
    %c0_3 = arith.constant 0 : index
    %c0_4 = arith.constant 0 : index
    %c0_5 = arith.constant 0 : index
    %3 = vector.load %arg2[%c0_3, %c0_4, %c0_5] : memref<4x32x8xbf16, #tpu.memory_space<vmem>>, vector<1x32x8xbf16>
    %4 = vector.shape_cast %3 : vector<1x32x8xbf16> to vector<32x8xbf16>
    %cst = arith.constant dense<0.000000e+00> : vector<1024x8xf32>
    %5 = tpu.matmul %2, %4, %cst {dimension_numbers = #tpu.dot_dimension_numbers<[1], [0], [0], [1], [0, 0, 1, 1], [], []>} : vector<1024x32xbf16>, vector<32x8xbf16>, vector<1024x8xf32> -> vector<1024x8xf32>
    %6 = vector.extract_strided_slice %0 {offsets = [0, 0, 1, 0], sizes = [1, 32, 32, 32], strides = [1, 1, 1, 1]} : vector<1x33x33x32xbf16> to vector<1x32x32x32xbf16>
    %7 = vector.shape_cast %6 : vector<1x32x32x32xbf16> to vector<1024x32xbf16>
    %c1 = arith.constant 1 : index
    %c0_6 = arith.constant 0 : index
    %c0_7 = arith.constant 0 : index
    %8 = vector.load %arg2[%c1, %c0_6, %c0_7] : memref<4x32x8xbf16, #tpu.memory_space<vmem>>, vector<1x32x8xbf16>
    %9 = vector.shape_cast %8 : vector<1x32x8xbf16> to vector<32x8xbf16>
    %cst_8 = arith.constant dense<0.000000e+00> : vector<1024x8xf32>
    %10 = tpu.matmul %7, %9, %cst_8 {dimension_numbers = #tpu.dot_dimension_numbers<[1], [0], [0], [1], [0, 0, 1, 1], [], []>} : vector<1024x32xbf16>, vector<32x8xbf16>, vector<1024x8xf32> -> vector<1024x8xf32>
    %11 = arith.addf %5, %10 : vector<1024x8xf32>
    %12 = vector.extract_strided_slice %0 {offsets = [0, 1, 0, 0], sizes = [1, 32, 32, 32], strides = [1, 1, 1, 1]} : vector<1x33x33x32xbf16> to vector<1x32x32x32xbf16>
    %13 = vector.shape_cast %12 : vector<1x32x32x32xbf16> to vector<1024x32xbf16>
    %c2 = arith.constant 2 : index
    %c0_9 = arith.constant 0 : index
    %c0_10 = arith.constant 0 : index
    %14 = vector.load %arg2[%c2, %c0_9, %c0_10] : memref<4x32x8xbf16, #tpu.memory_space<vmem>>, vector<1x32x8xbf16>
    %15 = vector.shape_cast %14 : vector<1x32x8xbf16> to vector<32x8xbf16>
    %cst_11 = arith.constant dense<0.000000e+00> : vector<1024x8xf32>
    %16 = tpu.matmul %13, %15, %cst_11 {dimension_numbers = #tpu.dot_dimension_numbers<[1], [0], [0], [1], [0, 0, 1, 1], [], []>} : vector<1024x32xbf16>, vector<32x8xbf16>, vector<1024x8xf32> -> vector<1024x8xf32>
    %17 = arith.addf %11, %16 : vector<1024x8xf32>
    %18 = vector.extract_strided_slice %0 {offsets = [0, 1, 1, 0], sizes = [1, 32, 32, 32], strides = [1, 1, 1, 1]} : vector<1x33x33x32xbf16> to vector<1x32x32x32xbf16>
    %19 = vector.shape_cast %18 : vector<1x32x32x32xbf16> to vector<1024x32xbf16>
    %c3 = arith.constant 3 : index
    %c0_12 = arith.constant 0 : index
    %c0_13 = arith.constant 0 : index
    %20 = vector.load %arg2[%c3, %c0_12, %c0_13] : memref<4x32x8xbf16, #tpu.memory_space<vmem>>, vector<1x32x8xbf16>
    %21 = vector.shape_cast %20 : vector<1x32x8xbf16> to vector<32x8xbf16>
    %cst_14 = arith.constant dense<0.000000e+00> : vector<1024x8xf32>
    %22 = tpu.matmul %19, %21, %cst_14 {dimension_numbers = #tpu.dot_dimension_numbers<[1], [0], [0], [1], [0, 0, 1, 1], [], []>} : vector<1024x32xbf16>, vector<32x8xbf16>, vector<1024x8xf32> -> vector<1024x8xf32>
    %23 = arith.addf %17, %22 : vector<1024x8xf32>
    %c0_15 = arith.constant 0 : index
    %c0_16 = arith.constant 0 : index
    %24 = vector.load %arg3[%c0_15, %c0_16] : memref<1x8xf32, #tpu.memory_space<vmem>>, vector<1x8xf32>
    %25 = vector.broadcast %24 : vector<1x8xf32> to vector<1024x8xf32>
    %26 = arith.addf %23, %25 : vector<1024x8xf32>
    %cst_17 = arith.constant 2.000000e-01 : f32
    %27 = vector.broadcast %cst_17 : f32 to vector<1024x8xf32>
    %28 = arith.mulf %27, %26 : vector<1024x8xf32>
    %29 = arith.maximumf %26, %28 : vector<1024x8xf32>
    %30 = arith.truncf %29 : vector<1024x8xf32> to vector<1024x8xbf16>
    %c0_18 = arith.constant 0 : index
    %c0_19 = arith.constant 0 : index
    %31 = vector.load %arg4[%c0_18, %c0_19] : memref<1024x8xbf16, #tpu.memory_space<vmem>>, vector<1024x8xbf16>
    tpu.vector_store %arg4[%c0_18, %c0_19], %30 {strides = array<i32>} : memref<1024x8xbf16, #tpu.memory_space<vmem>>, vector<1024x8xbf16>,
    return
  }
  func.func @transform_0(%arg0: i32) -> (i32, i32, i32, i32) {
    %c0_i32 = arith.constant 0 : i32
    %c0_i32_0 = arith.constant 0 : i32
    %c0_i32_1 = arith.constant 0 : i32
    %c0_i32_2 = arith.constant 0 : i32
    return %arg0, %c0_i32, %c0_i32_0, %c0_i32_1 : i32, i32, i32, i32
  }
  func.func @transform_1(%arg0: i32) -> (i32, i32, i32) {
    %c0_i32 = arith.constant 0 : i32
    %c0_i32_0 = arith.constant 0 : i32
    %c0_i32_1 = arith.constant 0 : i32
    %c0_i32_2 = arith.constant 0 : i32
    return %c0_i32, %c0_i32_0, %c0_i32_1 : i32, i32, i32
  }
  func.func @transform_2(%arg0: i32) -> (i32, i32) {
    %c0_i32 = arith.constant 0 : i32
    %c0_i32_0 = arith.constant 0 : i32
    %c0_i32_1 = arith.constant 0 : i32
    return %c0_i32, %c0_i32_0 : i32, i32
  }
  func.func @transform_3(%arg0: i32) -> (i32, i32) {
    %c0_i32 = arith.constant 0 : i32
    %c0_i32_0 = arith.constant 0 : i32
    return %arg0, %c0_i32 : i32, i32
  }
}

module attributes {stable_mosaic.version = 11 : i64} {
  func.func @_conv_stats_kernel(%arg0: i32, %arg1: memref<1x17x17x32xbf16, #tpu.memory_space<vmem>>, %arg2: memref<4x32x16xbf16, #tpu.memory_space<vmem>>, %arg3: memref<256x16xbf16, #tpu.memory_space<vmem>>, %arg4: memref<1x8x16xf32, #tpu.memory_space<vmem>>) attributes {dimension_semantics = [#tpu.dimension_semantics<parallel>], iteration_bounds = array<i64: 2>, scalar_prefetch = 0 : i64, scratch_operands = 0 : i64, tpu.core_type = #tpu.core_type<tc>, window_params = [{transform_indices = @transform_0, window_bounds = array<i64: 1, 17, 17, 32>}, {pipeline_mode = #tpu.pipeline_mode<synchronous>, transform_indices = @transform_1, window_bounds = array<i64: 4, 32, 16>}, {transform_indices = @transform_2, window_bounds = array<i64: 256, 16>}, {transform_indices = @transform_3, window_bounds = array<i64: 1, 8, 16>}]} {
    %c0 = arith.constant 0 : index
    %c0_0 = arith.constant 0 : index
    %c0_1 = arith.constant 0 : index
    %c0_2 = arith.constant 0 : index
    %0 = vector.load %arg1[%c0, %c0_0, %c0_1, %c0_2] : memref<1x17x17x32xbf16, #tpu.memory_space<vmem>>, vector<1x17x17x32xbf16>
    %1 = vector.extract_strided_slice %0 {offsets = [0, 0, 0, 0], sizes = [1, 16, 16, 32], strides = [1, 1, 1, 1]} : vector<1x17x17x32xbf16> to vector<1x16x16x32xbf16>
    %2 = vector.shape_cast %1 : vector<1x16x16x32xbf16> to vector<256x32xbf16>
    %c0_3 = arith.constant 0 : index
    %c0_4 = arith.constant 0 : index
    %c0_5 = arith.constant 0 : index
    %3 = vector.load %arg2[%c0_3, %c0_4, %c0_5] : memref<4x32x16xbf16, #tpu.memory_space<vmem>>, vector<1x32x16xbf16>
    %4 = vector.shape_cast %3 : vector<1x32x16xbf16> to vector<32x16xbf16>
    %cst = arith.constant dense<0.000000e+00> : vector<256x16xf32>
    %5 = tpu.matmul %2, %4, %cst {dimension_numbers = #tpu.dot_dimension_numbers<[1], [0], [0], [1], [0, 0, 1, 1], [], []>} : vector<256x32xbf16>, vector<32x16xbf16>, vector<256x16xf32> -> vector<256x16xf32>
    %6 = vector.extract_strided_slice %0 {offsets = [0, 0, 1, 0], sizes = [1, 16, 16, 32], strides = [1, 1, 1, 1]} : vector<1x17x17x32xbf16> to vector<1x16x16x32xbf16>
    %7 = vector.shape_cast %6 : vector<1x16x16x32xbf16> to vector<256x32xbf16>
    %c1 = arith.constant 1 : index
    %c0_6 = arith.constant 0 : index
    %c0_7 = arith.constant 0 : index
    %8 = vector.load %arg2[%c1, %c0_6, %c0_7] : memref<4x32x16xbf16, #tpu.memory_space<vmem>>, vector<1x32x16xbf16>
    %9 = vector.shape_cast %8 : vector<1x32x16xbf16> to vector<32x16xbf16>
    %cst_8 = arith.constant dense<0.000000e+00> : vector<256x16xf32>
    %10 = tpu.matmul %7, %9, %cst_8 {dimension_numbers = #tpu.dot_dimension_numbers<[1], [0], [0], [1], [0, 0, 1, 1], [], []>} : vector<256x32xbf16>, vector<32x16xbf16>, vector<256x16xf32> -> vector<256x16xf32>
    %11 = arith.addf %5, %10 : vector<256x16xf32>
    %12 = vector.extract_strided_slice %0 {offsets = [0, 1, 0, 0], sizes = [1, 16, 16, 32], strides = [1, 1, 1, 1]} : vector<1x17x17x32xbf16> to vector<1x16x16x32xbf16>
    %13 = vector.shape_cast %12 : vector<1x16x16x32xbf16> to vector<256x32xbf16>
    %c2 = arith.constant 2 : index
    %c0_9 = arith.constant 0 : index
    %c0_10 = arith.constant 0 : index
    %14 = vector.load %arg2[%c2, %c0_9, %c0_10] : memref<4x32x16xbf16, #tpu.memory_space<vmem>>, vector<1x32x16xbf16>
    %15 = vector.shape_cast %14 : vector<1x32x16xbf16> to vector<32x16xbf16>
    %cst_11 = arith.constant dense<0.000000e+00> : vector<256x16xf32>
    %16 = tpu.matmul %13, %15, %cst_11 {dimension_numbers = #tpu.dot_dimension_numbers<[1], [0], [0], [1], [0, 0, 1, 1], [], []>} : vector<256x32xbf16>, vector<32x16xbf16>, vector<256x16xf32> -> vector<256x16xf32>
    %17 = arith.addf %11, %16 : vector<256x16xf32>
    %18 = vector.extract_strided_slice %0 {offsets = [0, 1, 1, 0], sizes = [1, 16, 16, 32], strides = [1, 1, 1, 1]} : vector<1x17x17x32xbf16> to vector<1x16x16x32xbf16>
    %19 = vector.shape_cast %18 : vector<1x16x16x32xbf16> to vector<256x32xbf16>
    %c3 = arith.constant 3 : index
    %c0_12 = arith.constant 0 : index
    %c0_13 = arith.constant 0 : index
    %20 = vector.load %arg2[%c3, %c0_12, %c0_13] : memref<4x32x16xbf16, #tpu.memory_space<vmem>>, vector<1x32x16xbf16>
    %21 = vector.shape_cast %20 : vector<1x32x16xbf16> to vector<32x16xbf16>
    %cst_14 = arith.constant dense<0.000000e+00> : vector<256x16xf32>
    %22 = tpu.matmul %19, %21, %cst_14 {dimension_numbers = #tpu.dot_dimension_numbers<[1], [0], [0], [1], [0, 0, 1, 1], [], []>} : vector<256x32xbf16>, vector<32x16xbf16>, vector<256x16xf32> -> vector<256x16xf32>
    %23 = arith.addf %17, %22 : vector<256x16xf32>
    %24 = arith.truncf %23 : vector<256x16xf32> to vector<256x16xbf16>
    %c0_15 = arith.constant 0 : index
    %c0_16 = arith.constant 0 : index
    %25 = vector.load %arg3[%c0_15, %c0_16] : memref<256x16xbf16, #tpu.memory_space<vmem>>, vector<256x16xbf16>
    tpu.vector_store %arg3[%c0_15, %c0_16], %24 {strides = array<i32>} : memref<256x16xbf16, #tpu.memory_space<vmem>>, vector<256x16xbf16>,
    %cst_17 = arith.constant dense<0.000000e+00> : vector<16xf32>
    %26 = vector.multi_reduction <add>, %23, %cst_17 [0] : vector<256x16xf32> to vector<16xf32>
    %27 = vector.shape_cast %26 : vector<16xf32> to vector<1x16xf32>
    %28 = arith.mulf %23, %23 : vector<256x16xf32>
    %cst_18 = arith.constant dense<0.000000e+00> : vector<16xf32>
    %29 = vector.multi_reduction <add>, %28, %cst_18 [0] : vector<256x16xf32> to vector<16xf32>
    %30 = vector.shape_cast %29 : vector<16xf32> to vector<1x16xf32>
    %cst_19 = arith.constant 0.000000e+00 : f32
    %31 = vector.broadcast %cst_19 : f32 to vector<6x16xf32>
    %32 = tpu.concatenate %27, %30, %31 in 0 : vector<1x16xf32>, vector<1x16xf32>, vector<6x16xf32> -> vector<8x16xf32>
    %c0_20 = arith.constant 0 : index
    %c0_21 = arith.constant 0 : index
    %c0_22 = arith.constant 0 : index
    %33 = vector.load %arg4[%c0_20, %c0_21, %c0_22] : memref<1x8x16xf32, #tpu.memory_space<vmem>>, vector<1x8x16xf32>
    %34 = vector.shape_cast %33 : vector<1x8x16xf32> to vector<8x16xf32>
    %35 = vector.shape_cast %32 : vector<8x16xf32> to vector<1x8x16xf32>
    tpu.vector_store %arg4[%c0_20, %c0_21, %c0_22], %35 {strides = array<i32>} : memref<1x8x16xf32, #tpu.memory_space<vmem>>, vector<1x8x16xf32>,
    return
  }
  func.func @transform_0(%arg0: i32) -> (i32, i32, i32, i32) {
    %c0_i32 = arith.constant 0 : i32
    %c0_i32_0 = arith.constant 0 : i32
    %c0_i32_1 = arith.constant 0 : i32
    %c0_i32_2 = arith.constant 0 : i32
    return %arg0, %c0_i32, %c0_i32_0, %c0_i32_1 : i32, i32, i32, i32
  }
  func.func @transform_1(%arg0: i32) -> (i32, i32, i32) {
    %c0_i32 = arith.constant 0 : i32
    %c0_i32_0 = arith.constant 0 : i32
    %c0_i32_1 = arith.constant 0 : i32
    %c0_i32_2 = arith.constant 0 : i32
    return %c0_i32, %c0_i32_0, %c0_i32_1 : i32, i32, i32
  }
  func.func @transform_2(%arg0: i32) -> (i32, i32) {
    %c0_i32 = arith.constant 0 : i32
    %c0_i32_0 = arith.constant 0 : i32
    return %arg0, %c0_i32 : i32, i32
  }
  func.func @transform_3(%arg0: i32) -> (i32, i32, i32) {
    %c0_i32 = arith.constant 0 : i32
    %c0_i32_0 = arith.constant 0 : i32
    %c0_i32_1 = arith.constant 0 : i32
    return %arg0, %c0_i32, %c0_i32_0 : i32, i32, i32
  }
}

module attributes {stable_mosaic.version = 11 : i64} {
  func.func @_bn_leaky_kernel(%arg0: i32, %arg1: memref<256x16xbf16, #tpu.memory_space<vmem>>, %arg2: memref<1x16xf32, #tpu.memory_space<vmem>>, %arg3: memref<1x16xf32, #tpu.memory_space<vmem>>, %arg4: memref<256x16xbf16, #tpu.memory_space<vmem>>) attributes {dimension_semantics = [#tpu.dimension_semantics<parallel>], iteration_bounds = array<i64: 2>, scalar_prefetch = 0 : i64, scratch_operands = 0 : i64, tpu.core_type = #tpu.core_type<tc>, window_params = [{transform_indices = @transform_0, window_bounds = array<i64: 256, 16>}, {pipeline_mode = #tpu.pipeline_mode<synchronous>, transform_indices = @transform_1, window_bounds = array<i64: 1, 16>}, {pipeline_mode = #tpu.pipeline_mode<synchronous>, transform_indices = @transform_2, window_bounds = array<i64: 1, 16>}, {transform_indices = @transform_3, window_bounds = array<i64: 256, 16>}]} {
    %c0 = arith.constant 0 : index
    %c0_0 = arith.constant 0 : index
    %0 = vector.load %arg1[%c0, %c0_0] : memref<256x16xbf16, #tpu.memory_space<vmem>>, vector<256x16xbf16>
    %1 = arith.extf %0 : vector<256x16xbf16> to vector<256x16xf32>
    %c0_1 = arith.constant 0 : index
    %c0_2 = arith.constant 0 : index
    %2 = vector.load %arg2[%c0_1, %c0_2] : memref<1x16xf32, #tpu.memory_space<vmem>>, vector<1x16xf32>
    %3 = vector.broadcast %2 : vector<1x16xf32> to vector<256x16xf32>
    %4 = arith.mulf %1, %3 : vector<256x16xf32>
    %c0_3 = arith.constant 0 : index
    %c0_4 = arith.constant 0 : index
    %5 = vector.load %arg3[%c0_3, %c0_4] : memref<1x16xf32, #tpu.memory_space<vmem>>, vector<1x16xf32>
    %6 = vector.broadcast %5 : vector<1x16xf32> to vector<256x16xf32>
    %7 = arith.addf %4, %6 : vector<256x16xf32>
    %cst = arith.constant 2.000000e-01 : f32
    %8 = vector.broadcast %cst : f32 to vector<256x16xf32>
    %9 = arith.mulf %8, %7 : vector<256x16xf32>
    %10 = arith.maximumf %7, %9 : vector<256x16xf32>
    %11 = arith.truncf %10 : vector<256x16xf32> to vector<256x16xbf16>
    %c0_5 = arith.constant 0 : index
    %c0_6 = arith.constant 0 : index
    %12 = vector.load %arg4[%c0_5, %c0_6] : memref<256x16xbf16, #tpu.memory_space<vmem>>, vector<256x16xbf16>
    tpu.vector_store %arg4[%c0_5, %c0_6], %11 {strides = array<i32>} : memref<256x16xbf16, #tpu.memory_space<vmem>>, vector<256x16xbf16>,
    return
  }
  func.func @transform_0(%arg0: i32) -> (i32, i32) {
    %c0_i32 = arith.constant 0 : i32
    %c0_i32_0 = arith.constant 0 : i32
    return %arg0, %c0_i32 : i32, i32
  }
  func.func @transform_1(%arg0: i32) -> (i32, i32) {
    %c0_i32 = arith.constant 0 : i32
    %c0_i32_0 = arith.constant 0 : i32
    %c0_i32_1 = arith.constant 0 : i32
    return %c0_i32, %c0_i32_0 : i32, i32
  }
  func.func @transform_2(%arg0: i32) -> (i32, i32) {
    %c0_i32 = arith.constant 0 : i32
    %c0_i32_0 = arith.constant 0 : i32
    %c0_i32_1 = arith.constant 0 : i32
    return %c0_i32, %c0_i32_0 : i32, i32
  }
  func.func @transform_3(%arg0: i32) -> (i32, i32) {
    %c0_i32 = arith.constant 0 : i32
    %c0_i32_0 = arith.constant 0 : i32
    return %arg0, %c0_i32 : i32, i32
  }
}

module attributes {stable_mosaic.version = 11 : i64} {
  func.func @_bn_leaky_kernel(%arg0: i32, %arg1: memref<64x32xbf16, #tpu.memory_space<vmem>>, %arg2: memref<1x32xf32, #tpu.memory_space<vmem>>, %arg3: memref<1x32xf32, #tpu.memory_space<vmem>>, %arg4: memref<64x32xbf16, #tpu.memory_space<vmem>>) attributes {dimension_semantics = [#tpu.dimension_semantics<parallel>], iteration_bounds = array<i64: 2>, scalar_prefetch = 0 : i64, scratch_operands = 0 : i64, tpu.core_type = #tpu.core_type<tc>, window_params = [{transform_indices = @transform_0, window_bounds = array<i64: 64, 32>}, {pipeline_mode = #tpu.pipeline_mode<synchronous>, transform_indices = @transform_1, window_bounds = array<i64: 1, 32>}, {pipeline_mode = #tpu.pipeline_mode<synchronous>, transform_indices = @transform_2, window_bounds = array<i64: 1, 32>}, {transform_indices = @transform_3, window_bounds = array<i64: 64, 32>}]} {
    %c0 = arith.constant 0 : index
    %c0_0 = arith.constant 0 : index
    %0 = vector.load %arg1[%c0, %c0_0] : memref<64x32xbf16, #tpu.memory_space<vmem>>, vector<64x32xbf16>
    %1 = arith.extf %0 : vector<64x32xbf16> to vector<64x32xf32>
    %c0_1 = arith.constant 0 : index
    %c0_2 = arith.constant 0 : index
    %2 = vector.load %arg2[%c0_1, %c0_2] : memref<1x32xf32, #tpu.memory_space<vmem>>, vector<1x32xf32>
    %3 = vector.broadcast %2 : vector<1x32xf32> to vector<64x32xf32>
    %4 = arith.mulf %1, %3 : vector<64x32xf32>
    %c0_3 = arith.constant 0 : index
    %c0_4 = arith.constant 0 : index
    %5 = vector.load %arg3[%c0_3, %c0_4] : memref<1x32xf32, #tpu.memory_space<vmem>>, vector<1x32xf32>
    %6 = vector.broadcast %5 : vector<1x32xf32> to vector<64x32xf32>
    %7 = arith.addf %4, %6 : vector<64x32xf32>
    %cst = arith.constant 2.000000e-01 : f32
    %8 = vector.broadcast %cst : f32 to vector<64x32xf32>
    %9 = arith.mulf %8, %7 : vector<64x32xf32>
    %10 = arith.maximumf %7, %9 : vector<64x32xf32>
    %11 = arith.truncf %10 : vector<64x32xf32> to vector<64x32xbf16>
    %c0_5 = arith.constant 0 : index
    %c0_6 = arith.constant 0 : index
    %12 = vector.load %arg4[%c0_5, %c0_6] : memref<64x32xbf16, #tpu.memory_space<vmem>>, vector<64x32xbf16>
    tpu.vector_store %arg4[%c0_5, %c0_6], %11 {strides = array<i32>} : memref<64x32xbf16, #tpu.memory_space<vmem>>, vector<64x32xbf16>,
    return
  }
  func.func @transform_0(%arg0: i32) -> (i32, i32) {
    %c0_i32 = arith.constant 0 : i32
    %c0_i32_0 = arith.constant 0 : i32
    return %arg0, %c0_i32 : i32, i32
  }
  func.func @transform_1(%arg0: i32) -> (i32, i32) {
    %c0_i32 = arith.constant 0 : i32
    %c0_i32_0 = arith.constant 0 : i32
    %c0_i32_1 = arith.constant 0 : i32
    return %c0_i32, %c0_i32_0 : i32, i32
  }
  func.func @transform_2(%arg0: i32) -> (i32, i32) {
    %c0_i32 = arith.constant 0 : i32
    %c0_i32_0 = arith.constant 0 : i32
    %c0_i32_1 = arith.constant 0 : i32
    return %c0_i32, %c0_i32_0 : i32, i32
  }
  func.func @transform_3(%arg0: i32) -> (i32, i32) {
    %c0_i32 = arith.constant 0 : i32
    %c0_i32_0 = arith.constant 0 : i32
    return %arg0, %c0_i32 : i32, i32
  }
}

module attributes {stable_mosaic.version = 11 : i64} {
  func.func @_conv_stats_kernel(%arg0: i32, %arg1: memref<1x9x9x64xbf16, #tpu.memory_space<vmem>>, %arg2: memref<4x64x32xbf16, #tpu.memory_space<vmem>>, %arg3: memref<64x32xbf16, #tpu.memory_space<vmem>>, %arg4: memref<1x8x32xf32, #tpu.memory_space<vmem>>) attributes {dimension_semantics = [#tpu.dimension_semantics<parallel>], iteration_bounds = array<i64: 2>, scalar_prefetch = 0 : i64, scratch_operands = 0 : i64, tpu.core_type = #tpu.core_type<tc>, window_params = [{transform_indices = @transform_0, window_bounds = array<i64: 1, 9, 9, 64>}, {pipeline_mode = #tpu.pipeline_mode<synchronous>, transform_indices = @transform_1, window_bounds = array<i64: 4, 64, 32>}, {transform_indices = @transform_2, window_bounds = array<i64: 64, 32>}, {transform_indices = @transform_3, window_bounds = array<i64: 1, 8, 32>}]} {
    %c0 = arith.constant 0 : index
    %c0_0 = arith.constant 0 : index
    %c0_1 = arith.constant 0 : index
    %c0_2 = arith.constant 0 : index
    %0 = vector.load %arg1[%c0, %c0_0, %c0_1, %c0_2] : memref<1x9x9x64xbf16, #tpu.memory_space<vmem>>, vector<1x9x9x64xbf16>
    %1 = vector.extract_strided_slice %0 {offsets = [0, 0, 0, 0], sizes = [1, 8, 8, 64], strides = [1, 1, 1, 1]} : vector<1x9x9x64xbf16> to vector<1x8x8x64xbf16>
    %2 = vector.shape_cast %1 : vector<1x8x8x64xbf16> to vector<64x64xbf16>
    %c0_3 = arith.constant 0 : index
    %c0_4 = arith.constant 0 : index
    %c0_5 = arith.constant 0 : index
    %3 = vector.load %arg2[%c0_3, %c0_4, %c0_5] : memref<4x64x32xbf16, #tpu.memory_space<vmem>>, vector<1x64x32xbf16>
    %4 = vector.shape_cast %3 : vector<1x64x32xbf16> to vector<64x32xbf16>
    %cst = arith.constant dense<0.000000e+00> : vector<64x32xf32>
    %5 = tpu.matmul %2, %4, %cst {dimension_numbers = #tpu.dot_dimension_numbers<[1], [0], [0], [1], [0, 0, 1, 1], [], []>} : vector<64x64xbf16>, vector<64x32xbf16>, vector<64x32xf32> -> vector<64x32xf32>
    %6 = vector.extract_strided_slice %0 {offsets = [0, 0, 1, 0], sizes = [1, 8, 8, 64], strides = [1, 1, 1, 1]} : vector<1x9x9x64xbf16> to vector<1x8x8x64xbf16>
    %7 = vector.shape_cast %6 : vector<1x8x8x64xbf16> to vector<64x64xbf16>
    %c1 = arith.constant 1 : index
    %c0_6 = arith.constant 0 : index
    %c0_7 = arith.constant 0 : index
    %8 = vector.load %arg2[%c1, %c0_6, %c0_7] : memref<4x64x32xbf16, #tpu.memory_space<vmem>>, vector<1x64x32xbf16>
    %9 = vector.shape_cast %8 : vector<1x64x32xbf16> to vector<64x32xbf16>
    %cst_8 = arith.constant dense<0.000000e+00> : vector<64x32xf32>
    %10 = tpu.matmul %7, %9, %cst_8 {dimension_numbers = #tpu.dot_dimension_numbers<[1], [0], [0], [1], [0, 0, 1, 1], [], []>} : vector<64x64xbf16>, vector<64x32xbf16>, vector<64x32xf32> -> vector<64x32xf32>
    %11 = arith.addf %5, %10 : vector<64x32xf32>
    %12 = vector.extract_strided_slice %0 {offsets = [0, 1, 0, 0], sizes = [1, 8, 8, 64], strides = [1, 1, 1, 1]} : vector<1x9x9x64xbf16> to vector<1x8x8x64xbf16>
    %13 = vector.shape_cast %12 : vector<1x8x8x64xbf16> to vector<64x64xbf16>
    %c2 = arith.constant 2 : index
    %c0_9 = arith.constant 0 : index
    %c0_10 = arith.constant 0 : index
    %14 = vector.load %arg2[%c2, %c0_9, %c0_10] : memref<4x64x32xbf16, #tpu.memory_space<vmem>>, vector<1x64x32xbf16>
    %15 = vector.shape_cast %14 : vector<1x64x32xbf16> to vector<64x32xbf16>
    %cst_11 = arith.constant dense<0.000000e+00> : vector<64x32xf32>
    %16 = tpu.matmul %13, %15, %cst_11 {dimension_numbers = #tpu.dot_dimension_numbers<[1], [0], [0], [1], [0, 0, 1, 1], [], []>} : vector<64x64xbf16>, vector<64x32xbf16>, vector<64x32xf32> -> vector<64x32xf32>
    %17 = arith.addf %11, %16 : vector<64x32xf32>
    %18 = vector.extract_strided_slice %0 {offsets = [0, 1, 1, 0], sizes = [1, 8, 8, 64], strides = [1, 1, 1, 1]} : vector<1x9x9x64xbf16> to vector<1x8x8x64xbf16>
    %19 = vector.shape_cast %18 : vector<1x8x8x64xbf16> to vector<64x64xbf16>
    %c3 = arith.constant 3 : index
    %c0_12 = arith.constant 0 : index
    %c0_13 = arith.constant 0 : index
    %20 = vector.load %arg2[%c3, %c0_12, %c0_13] : memref<4x64x32xbf16, #tpu.memory_space<vmem>>, vector<1x64x32xbf16>
    %21 = vector.shape_cast %20 : vector<1x64x32xbf16> to vector<64x32xbf16>
    %cst_14 = arith.constant dense<0.000000e+00> : vector<64x32xf32>
    %22 = tpu.matmul %19, %21, %cst_14 {dimension_numbers = #tpu.dot_dimension_numbers<[1], [0], [0], [1], [0, 0, 1, 1], [], []>} : vector<64x64xbf16>, vector<64x32xbf16>, vector<64x32xf32> -> vector<64x32xf32>
    %23 = arith.addf %17, %22 : vector<64x32xf32>
    %24 = arith.truncf %23 : vector<64x32xf32> to vector<64x32xbf16>
    %c0_15 = arith.constant 0 : index
    %c0_16 = arith.constant 0 : index
    %25 = vector.load %arg3[%c0_15, %c0_16] : memref<64x32xbf16, #tpu.memory_space<vmem>>, vector<64x32xbf16>
    tpu.vector_store %arg3[%c0_15, %c0_16], %24 {strides = array<i32>} : memref<64x32xbf16, #tpu.memory_space<vmem>>, vector<64x32xbf16>,
    %cst_17 = arith.constant dense<0.000000e+00> : vector<32xf32>
    %26 = vector.multi_reduction <add>, %23, %cst_17 [0] : vector<64x32xf32> to vector<32xf32>
    %27 = vector.shape_cast %26 : vector<32xf32> to vector<1x32xf32>
    %28 = arith.mulf %23, %23 : vector<64x32xf32>
    %cst_18 = arith.constant dense<0.000000e+00> : vector<32xf32>
    %29 = vector.multi_reduction <add>, %28, %cst_18 [0] : vector<64x32xf32> to vector<32xf32>
    %30 = vector.shape_cast %29 : vector<32xf32> to vector<1x32xf32>
    %cst_19 = arith.constant 0.000000e+00 : f32
    %31 = vector.broadcast %cst_19 : f32 to vector<6x32xf32>
    %32 = tpu.concatenate %27, %30, %31 in 0 : vector<1x32xf32>, vector<1x32xf32>, vector<6x32xf32> -> vector<8x32xf32>
    %c0_20 = arith.constant 0 : index
    %c0_21 = arith.constant 0 : index
    %c0_22 = arith.constant 0 : index
    %33 = vector.load %arg4[%c0_20, %c0_21, %c0_22] : memref<1x8x32xf32, #tpu.memory_space<vmem>>, vector<1x8x32xf32>
    %34 = vector.shape_cast %33 : vector<1x8x32xf32> to vector<8x32xf32>
    %35 = vector.shape_cast %32 : vector<8x32xf32> to vector<1x8x32xf32>
    tpu.vector_store %arg4[%c0_20, %c0_21, %c0_22], %35 {strides = array<i32>} : memref<1x8x32xf32, #tpu.memory_space<vmem>>, vector<1x8x32xf32>,
    return
  }
  func.func @transform_0(%arg0: i32) -> (i32, i32, i32, i32) {
    %c0_i32 = arith.constant 0 : i32
    %c0_i32_0 = arith.constant 0 : i32
    %c0_i32_1 = arith.constant 0 : i32
    %c0_i32_2 = arith.constant 0 : i32
    return %arg0, %c0_i32, %c0_i32_0, %c0_i32_1 : i32, i32, i32, i32
  }
  func.func @transform_1(%arg0: i32) -> (i32, i32, i32) {
    %c0_i32 = arith.constant 0 : i32
    %c0_i32_0 = arith.constant 0 : i32
    %c0_i32_1 = arith.constant 0 : i32
    %c0_i32_2 = arith.constant 0 : i32
    return %c0_i32, %c0_i32_0, %c0_i32_1 : i32, i32, i32
  }
  func.func @transform_2(%arg0: i32) -> (i32, i32) {
    %c0_i32 = arith.constant 0 : i32
    %c0_i32_0 = arith.constant 0 : i32
    return %arg0, %c0_i32 : i32, i32
  }
  func.func @transform_3(%arg0: i32) -> (i32, i32, i32) {
    %c0_i32 = arith.constant 0 : i32
    %c0_i32_0 = arith.constant 0 : i32
    %c0_i32_1 = arith.constant 0 : i32
    return %arg0, %c0_i32, %c0_i32_0 : i32, i32, i32
  }
}

module attributes {stable_mosaic.version = 11 : i64} {
  func.func @_conv_stats_kernel(%arg0: i32, %arg1: memref<1x5x5x128xbf16, #tpu.memory_space<vmem>>, %arg2: memref<4x128x64xbf16, #tpu.memory_space<vmem>>, %arg3: memref<16x64xbf16, #tpu.memory_space<vmem>>, %arg4: memref<1x8x64xf32, #tpu.memory_space<vmem>>) attributes {dimension_semantics = [#tpu.dimension_semantics<parallel>], iteration_bounds = array<i64: 2>, scalar_prefetch = 0 : i64, scratch_operands = 0 : i64, tpu.core_type = #tpu.core_type<tc>, window_params = [{transform_indices = @transform_0, window_bounds = array<i64: 1, 5, 5, 128>}, {pipeline_mode = #tpu.pipeline_mode<synchronous>, transform_indices = @transform_1, window_bounds = array<i64: 4, 128, 64>}, {transform_indices = @transform_2, window_bounds = array<i64: 16, 64>}, {transform_indices = @transform_3, window_bounds = array<i64: 1, 8, 64>}]} {
    %c0 = arith.constant 0 : index
    %c0_0 = arith.constant 0 : index
    %c0_1 = arith.constant 0 : index
    %c0_2 = arith.constant 0 : index
    %0 = vector.load %arg1[%c0, %c0_0, %c0_1, %c0_2] : memref<1x5x5x128xbf16, #tpu.memory_space<vmem>>, vector<1x5x5x128xbf16>
    %1 = vector.extract_strided_slice %0 {offsets = [0, 0, 0, 0], sizes = [1, 4, 4, 128], strides = [1, 1, 1, 1]} : vector<1x5x5x128xbf16> to vector<1x4x4x128xbf16>
    %2 = vector.shape_cast %1 : vector<1x4x4x128xbf16> to vector<16x128xbf16>
    %c0_3 = arith.constant 0 : index
    %c0_4 = arith.constant 0 : index
    %c0_5 = arith.constant 0 : index
    %3 = vector.load %arg2[%c0_3, %c0_4, %c0_5] : memref<4x128x64xbf16, #tpu.memory_space<vmem>>, vector<1x128x64xbf16>
    %4 = vector.shape_cast %3 : vector<1x128x64xbf16> to vector<128x64xbf16>
    %cst = arith.constant dense<0.000000e+00> : vector<16x64xf32>
    %5 = tpu.matmul %2, %4, %cst {dimension_numbers = #tpu.dot_dimension_numbers<[1], [0], [0], [1], [0, 0, 1, 1], [], []>} : vector<16x128xbf16>, vector<128x64xbf16>, vector<16x64xf32> -> vector<16x64xf32>
    %6 = vector.extract_strided_slice %0 {offsets = [0, 0, 1, 0], sizes = [1, 4, 4, 128], strides = [1, 1, 1, 1]} : vector<1x5x5x128xbf16> to vector<1x4x4x128xbf16>
    %7 = vector.shape_cast %6 : vector<1x4x4x128xbf16> to vector<16x128xbf16>
    %c1 = arith.constant 1 : index
    %c0_6 = arith.constant 0 : index
    %c0_7 = arith.constant 0 : index
    %8 = vector.load %arg2[%c1, %c0_6, %c0_7] : memref<4x128x64xbf16, #tpu.memory_space<vmem>>, vector<1x128x64xbf16>
    %9 = vector.shape_cast %8 : vector<1x128x64xbf16> to vector<128x64xbf16>
    %cst_8 = arith.constant dense<0.000000e+00> : vector<16x64xf32>
    %10 = tpu.matmul %7, %9, %cst_8 {dimension_numbers = #tpu.dot_dimension_numbers<[1], [0], [0], [1], [0, 0, 1, 1], [], []>} : vector<16x128xbf16>, vector<128x64xbf16>, vector<16x64xf32> -> vector<16x64xf32>
    %11 = arith.addf %5, %10 : vector<16x64xf32>
    %12 = vector.extract_strided_slice %0 {offsets = [0, 1, 0, 0], sizes = [1, 4, 4, 128], strides = [1, 1, 1, 1]} : vector<1x5x5x128xbf16> to vector<1x4x4x128xbf16>
    %13 = vector.shape_cast %12 : vector<1x4x4x128xbf16> to vector<16x128xbf16>
    %c2 = arith.constant 2 : index
    %c0_9 = arith.constant 0 : index
    %c0_10 = arith.constant 0 : index
    %14 = vector.load %arg2[%c2, %c0_9, %c0_10] : memref<4x128x64xbf16, #tpu.memory_space<vmem>>, vector<1x128x64xbf16>
    %15 = vector.shape_cast %14 : vector<1x128x64xbf16> to vector<128x64xbf16>
    %cst_11 = arith.constant dense<0.000000e+00> : vector<16x64xf32>
    %16 = tpu.matmul %13, %15, %cst_11 {dimension_numbers = #tpu.dot_dimension_numbers<[1], [0], [0], [1], [0, 0, 1, 1], [], []>} : vector<16x128xbf16>, vector<128x64xbf16>, vector<16x64xf32> -> vector<16x64xf32>
    %17 = arith.addf %11, %16 : vector<16x64xf32>
    %18 = vector.extract_strided_slice %0 {offsets = [0, 1, 1, 0], sizes = [1, 4, 4, 128], strides = [1, 1, 1, 1]} : vector<1x5x5x128xbf16> to vector<1x4x4x128xbf16>
    %19 = vector.shape_cast %18 : vector<1x4x4x128xbf16> to vector<16x128xbf16>
    %c3 = arith.constant 3 : index
    %c0_12 = arith.constant 0 : index
    %c0_13 = arith.constant 0 : index
    %20 = vector.load %arg2[%c3, %c0_12, %c0_13] : memref<4x128x64xbf16, #tpu.memory_space<vmem>>, vector<1x128x64xbf16>
    %21 = vector.shape_cast %20 : vector<1x128x64xbf16> to vector<128x64xbf16>
    %cst_14 = arith.constant dense<0.000000e+00> : vector<16x64xf32>
    %22 = tpu.matmul %19, %21, %cst_14 {dimension_numbers = #tpu.dot_dimension_numbers<[1], [0], [0], [1], [0, 0, 1, 1], [], []>} : vector<16x128xbf16>, vector<128x64xbf16>, vector<16x64xf32> -> vector<16x64xf32>
    %23 = arith.addf %17, %22 : vector<16x64xf32>
    %24 = arith.truncf %23 : vector<16x64xf32> to vector<16x64xbf16>
    %c0_15 = arith.constant 0 : index
    %c0_16 = arith.constant 0 : index
    %25 = vector.load %arg3[%c0_15, %c0_16] : memref<16x64xbf16, #tpu.memory_space<vmem>>, vector<16x64xbf16>
    tpu.vector_store %arg3[%c0_15, %c0_16], %24 {strides = array<i32>} : memref<16x64xbf16, #tpu.memory_space<vmem>>, vector<16x64xbf16>,
    %cst_17 = arith.constant dense<0.000000e+00> : vector<64xf32>
    %26 = vector.multi_reduction <add>, %23, %cst_17 [0] : vector<16x64xf32> to vector<64xf32>
    %27 = vector.shape_cast %26 : vector<64xf32> to vector<1x64xf32>
    %28 = arith.mulf %23, %23 : vector<16x64xf32>
    %cst_18 = arith.constant dense<0.000000e+00> : vector<64xf32>
    %29 = vector.multi_reduction <add>, %28, %cst_18 [0] : vector<16x64xf32> to vector<64xf32>
    %30 = vector.shape_cast %29 : vector<64xf32> to vector<1x64xf32>
    %cst_19 = arith.constant 0.000000e+00 : f32
    %31 = vector.broadcast %cst_19 : f32 to vector<6x64xf32>
    %32 = tpu.concatenate %27, %30, %31 in 0 : vector<1x64xf32>, vector<1x64xf32>, vector<6x64xf32> -> vector<8x64xf32>
    %c0_20 = arith.constant 0 : index
    %c0_21 = arith.constant 0 : index
    %c0_22 = arith.constant 0 : index
    %33 = vector.load %arg4[%c0_20, %c0_21, %c0_22] : memref<1x8x64xf32, #tpu.memory_space<vmem>>, vector<1x8x64xf32>
    %34 = vector.shape_cast %33 : vector<1x8x64xf32> to vector<8x64xf32>
    %35 = vector.shape_cast %32 : vector<8x64xf32> to vector<1x8x64xf32>
    tpu.vector_store %arg4[%c0_20, %c0_21, %c0_22], %35 {strides = array<i32>} : memref<1x8x64xf32, #tpu.memory_space<vmem>>, vector<1x8x64xf32>,
    return
  }
  func.func @transform_0(%arg0: i32) -> (i32, i32, i32, i32) {
    %c0_i32 = arith.constant 0 : i32
    %c0_i32_0 = arith.constant 0 : i32
    %c0_i32_1 = arith.constant 0 : i32
    %c0_i32_2 = arith.constant 0 : i32
    return %arg0, %c0_i32, %c0_i32_0, %c0_i32_1 : i32, i32, i32, i32
  }
  func.func @transform_1(%arg0: i32) -> (i32, i32, i32) {
    %c0_i32 = arith.constant 0 : i32
    %c0_i32_0 = arith.constant 0 : i32
    %c0_i32_1 = arith.constant 0 : i32
    %c0_i32_2 = arith.constant 0 : i32
    return %c0_i32, %c0_i32_0, %c0_i32_1 : i32, i32, i32
  }
  func.func @transform_2(%arg0: i32) -> (i32, i32) {
    %c0_i32 = arith.constant 0 : i32
    %c0_i32_0 = arith.constant 0 : i32
    return %arg0, %c0_i32 : i32, i32
  }
  func.func @transform_3(%arg0: i32) -> (i32, i32, i32) {
    %c0_i32 = arith.constant 0 : i32
    %c0_i32_0 = arith.constant 0 : i32
    %c0_i32_1 = arith.constant 0 : i32
    return %arg0, %c0_i32, %c0_i32_0 : i32, i32, i32
  }
}

module attributes {stable_mosaic.version = 11 : i64} {
  func.func @_bn_leaky_head_kernel(%arg0: i32, %arg1: memref<2x1024xbf16, #tpu.memory_space<vmem>>, %arg2: memref<1x1024xf32, #tpu.memory_space<vmem>>, %arg3: memref<1x1024xf32, #tpu.memory_space<vmem>>, %arg4: memref<1024x128xbf16, #tpu.memory_space<vmem>>, %arg5: memref<1x128xf32, #tpu.memory_space<vmem>>, %arg6: memref<2x128xf32, #tpu.memory_space<vmem>>) attributes {dimension_semantics = [#tpu.dimension_semantics<parallel>], iteration_bounds = array<i64: 1>, scalar_prefetch = 0 : i64, scratch_operands = 0 : i64, tpu.core_type = #tpu.core_type<tc>, window_params = [{transform_indices = @transform_0, window_bounds = array<i64: 2, 1024>}, {pipeline_mode = #tpu.pipeline_mode<synchronous>, transform_indices = @transform_1, window_bounds = array<i64: 1, 1024>}, {pipeline_mode = #tpu.pipeline_mode<synchronous>, transform_indices = @transform_2, window_bounds = array<i64: 1, 1024>}, {pipeline_mode = #tpu.pipeline_mode<synchronous>, transform_indices = @transform_3, window_bounds = array<i64: 1024, 128>}, {pipeline_mode = #tpu.pipeline_mode<synchronous>, transform_indices = @transform_4, window_bounds = array<i64: 1, 128>}, {transform_indices = @transform_5, window_bounds = array<i64: 2, 128>}]} {
    %c0 = arith.constant 0 : index
    %c0_0 = arith.constant 0 : index
    %0 = vector.load %arg1[%c0, %c0_0] : memref<2x1024xbf16, #tpu.memory_space<vmem>>, vector<2x1024xbf16>
    %1 = arith.extf %0 : vector<2x1024xbf16> to vector<2x1024xf32>
    %c0_1 = arith.constant 0 : index
    %c0_2 = arith.constant 0 : index
    %2 = vector.load %arg2[%c0_1, %c0_2] : memref<1x1024xf32, #tpu.memory_space<vmem>>, vector<1x1024xf32>
    %3 = vector.broadcast %2 : vector<1x1024xf32> to vector<2x1024xf32>
    %4 = arith.mulf %1, %3 : vector<2x1024xf32>
    %c0_3 = arith.constant 0 : index
    %c0_4 = arith.constant 0 : index
    %5 = vector.load %arg3[%c0_3, %c0_4] : memref<1x1024xf32, #tpu.memory_space<vmem>>, vector<1x1024xf32>
    %6 = vector.broadcast %5 : vector<1x1024xf32> to vector<2x1024xf32>
    %7 = arith.addf %4, %6 : vector<2x1024xf32>
    %cst = arith.constant 2.000000e-01 : f32
    %8 = vector.broadcast %cst : f32 to vector<2x1024xf32>
    %9 = arith.mulf %8, %7 : vector<2x1024xf32>
    %10 = arith.maximumf %7, %9 : vector<2x1024xf32>
    %11 = arith.truncf %10 : vector<2x1024xf32> to vector<2x1024xbf16>
    %c0_5 = arith.constant 0 : index
    %c0_6 = arith.constant 0 : index
    %12 = vector.load %arg4[%c0_5, %c0_6] : memref<1024x128xbf16, #tpu.memory_space<vmem>>, vector<1024x128xbf16>
    %cst_7 = arith.constant dense<0.000000e+00> : vector<2x128xf32>
    %13 = tpu.matmul %11, %12, %cst_7 {dimension_numbers = #tpu.dot_dimension_numbers<[1], [0], [0], [1], [0, 0, 1, 1], [], []>} : vector<2x1024xbf16>, vector<1024x128xbf16>, vector<2x128xf32> -> vector<2x128xf32>
    %c0_8 = arith.constant 0 : index
    %c0_9 = arith.constant 0 : index
    %14 = vector.load %arg5[%c0_8, %c0_9] : memref<1x128xf32, #tpu.memory_space<vmem>>, vector<1x128xf32>
    %15 = vector.broadcast %14 : vector<1x128xf32> to vector<2x128xf32>
    %16 = arith.addf %13, %15 : vector<2x128xf32>
    %cst_10 = arith.constant 0.000000e+00 : f32
    %17 = vector.broadcast %cst_10 : f32 to vector<2x128xf32>
    %18 = arith.subf %17, %16 : vector<2x128xf32>
    %19 = math.exp %18 : vector<2x128xf32>
    %cst_11 = arith.constant 1.000000e+00 : f32
    %20 = vector.broadcast %cst_11 : f32 to vector<2x128xf32>
    %21 = arith.addf %20, %19 : vector<2x128xf32>
    %22 = tpu.reciprocal %21 {approx = true} : vector<2x128xf32> -> vector<2x128xf32>
    %c0_12 = arith.constant 0 : index
    %c0_13 = arith.constant 0 : index
    %23 = vector.load %arg6[%c0_12, %c0_13] : memref<2x128xf32, #tpu.memory_space<vmem>>, vector<2x128xf32>
    tpu.vector_store %arg6[%c0_12, %c0_13], %22 {strides = array<i32>} : memref<2x128xf32, #tpu.memory_space<vmem>>, vector<2x128xf32>,
    return
  }
  func.func @transform_0(%arg0: i32) -> (i32, i32) {
    %c0_i32 = arith.constant 0 : i32
    %c0_i32_0 = arith.constant 0 : i32
    return %arg0, %c0_i32 : i32, i32
  }
  func.func @transform_1(%arg0: i32) -> (i32, i32) {
    %c0_i32 = arith.constant 0 : i32
    %c0_i32_0 = arith.constant 0 : i32
    %c0_i32_1 = arith.constant 0 : i32
    return %c0_i32, %c0_i32_0 : i32, i32
  }
  func.func @transform_2(%arg0: i32) -> (i32, i32) {
    %c0_i32 = arith.constant 0 : i32
    %c0_i32_0 = arith.constant 0 : i32
    %c0_i32_1 = arith.constant 0 : i32
    return %c0_i32, %c0_i32_0 : i32, i32
  }
  func.func @transform_3(%arg0: i32) -> (i32, i32) {
    %c0_i32 = arith.constant 0 : i32
    %c0_i32_0 = arith.constant 0 : i32
    %c0_i32_1 = arith.constant 0 : i32
    return %c0_i32, %c0_i32_0 : i32, i32
  }
  func.func @transform_4(%arg0: i32) -> (i32, i32) {
    %c0_i32 = arith.constant 0 : i32
    %c0_i32_0 = arith.constant 0 : i32
    %c0_i32_1 = arith.constant 0 : i32
    return %c0_i32, %c0_i32_0 : i32, i32
  }
  func.func @transform_5(%arg0: i32) -> (i32, i32) {
    %c0_i32 = arith.constant 0 : i32
    %c0_i32_0 = arith.constant 0 : i32
    return %arg0, %c0_i32 : i32, i32
  }
}

</mosaic_0001>

<bundles_post_ra>
// kernel: discriminator_forward.7
= control target key start
LH: loop header
LB: loop body
LE: loop exit
PB: predicated region body
PF: predicated region fallthrough
CT: control target
= control target key end

     0   :  { %s7887_s12 = smov 0   ;;  %s10231_s0 = inlined_call_operand.vmem [shape: bf16[2,33,33,32], index: 0, kind: input, shape index: {}]   ;;  %s10232_s1 = inlined_call_operand.vmem [shape: bf16[4,32,8], index: 1, kind: input, shape index: {}]   ;;  %s10233_s2 = inlined_call_operand.vmem [shape: f32[1,8], index: 2, kind: input, shape index: {}]   ;;  %s10234_s3 = inlined_call_operand.vmem [shape: bf16[2048,8], index: 3, kind: output, shape index: {}]  }
   0x1 LB: > { %s7893_s13 = sadd.s32 4294967295, %s7865_s12   ;;  %p6313_p0 = scmp.ge.s32.totalorder %s7865_s12, 1  ;;  %s7865_s12 = sphi %s7887_s12, %s13_s12  }
   0x2   : > { %p137_p1 = scmp.lt.s32.totalorder %s7865_s12, 3 }
   0x4   : > { %p138_p2 = pnand %p6313_p0, %p137_p1 }
   0x6   : > { %141 = sbr.rel (%p138_p2) target bundleno = 773 (0x305), region = 32 }
   0xb   : > { %v7785_v0 = vld [vmem:[%s10232_s1 + $0x8] sm:$0xff]   ;;  %p161_p3 = scmp.lt.s32.totalorder %s7893_s13, 1  ;;  %v7786_v1 = vld [vmem:[%s10232_s1 + $0x18] sm:$0xff]   ;;  %v7787_v2 = vld [vmem:[%s10232_s1] sm:$0xff]   ;;  %vm342_vm0 = vsmask.f32 3328 }
   0xc   : > { %7380 = vmatprep.subr.bf16.mxu1 %v7785_v0  ;;  %7248 = vmatprep.subr.bf16.mxu0 %v7786_v1  ;;  %v7788_v3 = vld [vmem:[%s10232_s1 + $0x10] sm:$0xff]   ;;  %vm343_vm1 = vsmask.f32 7440  ;;  %v7914_v4 = vld [vmem:[%s10232_s1 + $0x28] sm:$0xff]   ;;  %vm1962_vm2 = vcmask 261120   ;;  %v7792_v5 = vld [vmem:[%s10232_s1 + $0x38] sm:$0xff]  }
   0xd   : > { %s162_s20 = scalar_select %p161_p3, %s7893_s13, 1  ;;  %7381 = vmatpush3.bf16.msra.mxu1 %v7785_v0  ;;  %7249 = vmatpush3.bf16.msra.mxu0 %v7786_v1  ;;  %vm7936_vm3 = vmor %vm342_vm0, %vm343_vm1  ;;  %vm6124_vm4 = vcmask 60416  }
   0xe   : > { %7382 = vmatprep.subr.bf16.mxu1 %v7787_v2  ;;  %7250 = vmatprep.subr.bf16.mxu0 %v7788_v3  ;;  %s6315_s8 = sshll.u32 %s7893_s13, 7 }
   0xf   : > { %s7776_s23 = smul.u32 660, %s162_s20  ;;  %p167_p4 = scmp.lt.s32.totalorder %s6315_s8, 255 }
  0x11   : > { %s7919_s28 = scalar_lea.vmem %s10231_s0, %s7776_s23  ;;  %7383 = vmatpush3.bf16.msra.mxu1 %v7787_v2  ;;  %7251 = vmatpush3.bf16.msra.mxu0 %v7788_v3  ;;  %s10750_s8 = smov (!%p167_p4, %s6315_s8), 255 }
  0x12   : > { %v173_v6 = vld [vmem:[%s7919_s28] sm:$0xf]  ;;  %v174_v7 = vld [vmem:[%s7919_s28 + $0x4] sm:$0xf]  ;;  %v175_v8 = vld [vmem:[%s7919_s28 + $0x8] sm:$0xf]  ;;  %7644 = vmatprep.subr.bf16.mxu1 %v7792_v5  ;;  %7512 = vmatprep.subr.bf16.mxu0 %v7914_v4 }
  0x13   : > { %v346_v9 = vshrl.u32 %v173_v6, 16  ;;  %v349_v10 = vshll.u32 %v173_v6, 16  ;;  %v355_v11 = vshll.u32 %v174_v7, 16  ;;  %v359_v12 = vshrl.u32 %v174_v7, 16  ;;  %v176_v13 = vld [vmem:[%s7919_s28 + $0xc] sm:$0xf] }
  0x14   : > { %v6451_v14 = vcombine.low %v173_v6, %v174_v7  ;;  %v375_v15 = vshll.u32 %v176_v13, 16  ;;  %v379_v16 = vshrl.u32 %v176_v13, 16  ;;  %v6452_v17 = vcombine.low %v175_v8, %v176_v13  ;;  %v177_v18 = vld [vmem:[%s7919_s28 + $0x10] sm:$0x1]  ;;  %v178_v19 = vld [vmem:[%s7919_s28 + $0x14] sm:$0xf] }
  0x15   : > { %v348_v20 = vrot.slane %v346_v9, 4  ;;  %v351_v21 = vrot.slane %v349_v10, 5  ;;  %v357_v22 = vrot.slane %v355_v11, 5  ;;  %v361_v23 = vrot.slane %v359_v12, 4  ;;  %v179_v31 = vld [vmem:[%s7919_s28 + $0x18] sm:$0xf] }
  0x16   : > { %7384 = vmatprep.mubr.msk.bf16.mxu1 %vm1962_vm2, %v6451_v14  ;;  %v377_v24 = vrot.slane %v375_v15, 5  ;;  %v381_v25 = vrot.slane %v379_v16, 4  ;;  %v365_v26 = vshll.u32 %v175_v8, 16  ;;  %v369_v27 = vshrl.u32 %v175_v8, 16  ;;  %v180_v42 = vld [vmem:[%s7919_s28 + $0x1c] sm:$0xf] }
  0x17   : > { %7385 = vmatmul.mubr.msk.bf16.vlgmr.msra.gmra.mxu1 %vm1962_vm2, %v6452_v17  ;;  %v352_v28 = vor.u32 %v351_v21, %v348_v20  ;;  %v362_v29 = vor.u32 %v361_v23, %v357_v22  ;;  %v385_v30 = vshll.u32 %v177_v18, 16  ;;  %v390_v32 = vshrl.u32 %v178_v19, 16  ;;  %v181_v47 = vld [vmem:[%s7919_s28 + $0x20] sm:$0xf]  ;;  %v182_v60 = vld [vmem:[%s7919_s28 + $0x24] sm:$0x1] }
  0x18   : > { %v367_v34 = vrot.slane %v365_v26, 5  ;;  %v371_v35 = vrot.slane %v369_v27, 4  ;;  %v382_v36 = vor.u32 %v381_v25, %v377_v24  ;;  %7645 = vmatpush3.bf16.msra.mxu1 %v7792_v5  ;;  %v393_v37 = vshll.u32 %v178_v19, 16  ;;  %v183_v1 = vld [vmem:[%s7919_s28 + $0x28] sm:$0xf]  ;;  %s6316_s11 = sshll.u32 %s10750_s8, 2 }
  0x19   : > { %v353_v38 = vrot.slane %v352_v28, 4  ;;  %v363_v39 = vrot.slane %v362_v29, 4  ;;  %v387_v40 = vrot.slane %v385_v30, 5  ;;  %v392_v41 = vrot.slane %v390_v32, 4  ;;  %v184_v2 = vld [vmem:[%s7919_s28 + $0x2c] sm:$0xf]  ;;  %s9468_s15 = scalar_lea.vmem %s10234_s3, %s6316_s11 }
  0x1a   : > { %v372_v43 = vor.u32 %v371_v35, %v367_v34  ;;  %v383_v44 = vrot.slane %v382_v36, 4  ;;  %v395_v45 = vrot.slane %v393_v37, 5  ;;  %v399_v46 = vshll.u32 %v179_v31, 16  ;;  %v185_v20 = vld [vmem:[%s7919_s28 + $0x30] sm:$0xf] }
  0x1b   : > { %v358_v48 = vsel %vm7936_vm3, %v353_v38, %v357_v22  ;;  %v368_v49 = vsel %vm7936_vm3, %v363_v39, %v367_v34  ;;  %v403_v50 = vshrl.u32 %v179_v31, 16  ;;  %v7946_v51 = vcombine.low %v178_v19, %v179_v31  ;;  %v186_v25 = vld [vmem:[%s7919_s28 + $0x34] sm:$0xf]  ;;  %v187_v34 = vld [vmem:[%s7919_s28 + $0x38] sm:$0x1] }
  0x1c   : > { %v373_v52 = vrot.slane %v372_v43, 4  ;;  %v6321_v53 = vcombine.low %v358_v48, %v368_v49  ;;  %v388_v54 = vsel %vm7936_vm3, %v383_v44, %v387_v40  ;;  %v401_v55 = vrot.slane %v399_v46, 5  ;;  %v188_v39 = vld [vmem:[%s7919_s28 + $0x3c] sm:$0xf]  ;;  %v7825_v40 = vld [vmem:[%s10232_s1 + $0x20] sm:$0xff]  }
  0x1d   : > { %v405_v56 = vrot.slane %v403_v50, 4  ;;  %7388 = vmatprep.mubr.msk.bf16.mxu1 %vm1962_vm2, %v7946_v51  ;;  %v409_v57 = vshll.u32 %v180_v42, 16  ;;  %v413_v58 = vshrl.u32 %v180_v42, 16  ;;  %v419_v59 = vshll.u32 %v181_v47, 16 }
  0x1e   : > { %7252 = vmatprep.mubr.msk.bf16.mxu0 %vm1962_vm2, %v6321_v53  ;;  %v378_v61 = vsel %vm7936_vm3, %v373_v52, %v377_v24  ;;  %v423_v62 = vshrl.u32 %v181_v47, 16  ;;  %v7956_v63 = vcombine.low %v180_v42, %v181_v47  ;;  %v396_v0 = vor.u32 %v395_v45, %v392_v41  ;;  %v189_v45 = vld [vmem:[%s7919_s28 + $0x40] sm:$0xf] }
  0x1f   : > { %v6322_v3 = vcombine.low %v378_v61, %v388_v54  ;;  %v411_v5 = vrot.slane %v409_v57, 5  ;;  %v415_v6 = vrot.slane %v413_v58, 4  ;;  %v421_v7 = vrot.slane %v419_v59, 5 }
  0x20   : > { %v425_v8 = vrot.slane %v423_v62, 4  ;;  %7389 = vmatmul.mubr.msk.bf16.gmra.mxu1 %vm1962_vm2, %v7956_v63  ;;  %v397_v9 = vrot.slane %v396_v0, 4  ;;  %v406_v10 = vor.u32 %v405_v56, %v401_v55  ;;  %v429_v11 = vshll.u32 %v182_v60, 16  ;;  %v190_v60 = vld [vmem:[%s7919_s28 + $0x44] sm:$0xf] }
  0x21   : > { %7253 = vmatmul.mubr.msk.bf16.vlgmr.msra.gmra.mxu0 %vm1962_vm2, %v6322_v3  ;;  %v416_v12 = vor.u32 %v415_v6, %v411_v5  ;;  %v434_v13 = vshrl.u32 %v183_v1, 16  ;;  %v437_v14 = vshll.u32 %v183_v1, 16  ;;  %v443_v15 = vshll.u32 %v184_v2, 16 }
  0x22   : > { %7513 = vmatpush3.bf16.msra.mxu0 %v7914_v4  ;;  %v402_v16 = vsel %vm7936_vm3, %v397_v9, %v401_v55  ;;  %v407_v17 = vrot.slane %v406_v10, 4  ;;  %v426_v18 = vor.u32 %v425_v8, %v421_v7  ;;  %v431_v19 = vrot.slane %v429_v11, 5  ;;  %v7826_v55 = vld [vmem:[%s10232_s1 + $0x30] sm:$0xff]  }
  0x23   : > { %v417_v21 = vrot.slane %v416_v12, 4  ;;  %v436_v22 = vrot.slane %v434_v13, 4  ;;  %v439_v23 = vrot.slane %v437_v14, 5  ;;  %v445_v24 = vrot.slane %v443_v15, 5  ;;  %7514 = vmatprep.subr.bf16.mxu0 %v7825_v40  ;;  %7646 = vmatprep.subr.bf16.mxu1 %v7826_v55  ;;  %v192_v12 = vld [vmem:[%s7919_s28 + $0x4c] sm:$0x1] }
  0x24   : > { %v412_v26 = vsel %vm7936_vm3, %v407_v17, %v411_v5  ;;  %v427_v27 = vrot.slane %v426_v18, 4  ;;  %v447_v28 = vshrl.u32 %v184_v2, 16  ;;  %v7970_v4 = vcombine.low %v183_v1, %v184_v2  ;;  %v191_v2 = vld [vmem:[%s7919_s28 + $0x48] sm:$0xf]  ;;  %7647 = vmatpush3.bf16.msra.mxu1 %v7826_v55  ;;  %v193_v17 = vld [vmem:[%s7919_s28 + $0x50] sm:$0xf] }
  0x25   : > { %v7972_v29 = vcombine.low %v402_v16, %v412_v26  ;;  %v422_v30 = vsel %vm7936_vm3, %v417_v21, %v421_v7  ;;  %v453_v31 = vshll.u32 %v185_v20, 16  ;;  %v457_v32 = vshrl.u32 %v185_v20, 16 }
  0x26   : > { %v432_v35 = vsel %vm7936_vm3, %v427_v27, %v431_v19  ;;  %v449_v36 = vrot.slane %v447_v28, 4  ;;  %7392 = vmatprep.mubr.msk.bf16.mxu1 %vm1962_vm2, %v7970_v4  ;;  %v463_v37 = vshll.u32 %v186_v25, 16  ;;  %v467_v38 = vshrl.u32 %v186_v25, 16  ;;  %7515 = vmatpush3.bf16.msra.mxu0 %v7825_v40 }
  0x27   : > { %7256 = vmatprep.mubr.msk.bf16.mxu0 %vm1962_vm2, %v7972_v29  ;;  %v7987_v41 = vcombine.low %v422_v30, %v432_v35  ;;  %v455_v42 = vrot.slane %v453_v31, 5  ;;  %v459_v43 = vrot.slane %v457_v32, 4  ;;  %v7989_v44 = vcombine.low %v185_v20, %v186_v25 }
  0x28   : > { %v465_v46 = vrot.slane %v463_v37, 5  ;;  %v469_v47 = vrot.slane %v467_v38, 4  ;;  %v440_v48 = vor.u32 %v439_v23, %v436_v22  ;;  %v450_v49 = vor.u32 %v449_v36, %v445_v24  ;;  %v194_v22 = vld [vmem:[%s7919_s28 + $0x54] sm:$0xf] }
  0x29   : > { %7257 = vmatmul.mubr.msk.bf16.gmra.mxu0 %vm1962_vm2, %v7987_v41  ;;  %7393 = vmatmul.mubr.msk.bf16.gmra.mxu1 %vm1962_vm2, %v7989_v44  ;;  %v460_v50 = vor.u32 %v459_v43, %v455_v42  ;;  %v473_v52 = vshll.u32 %v187_v34, 16  ;;  %v478_v53 = vshrl.u32 %v188_v39, 16  ;;  %v481_v54 = vshll.u32 %v188_v39, 16 }
  0x2a   : > { %v441_v56 = vrot.slane %v440_v48, 4  ;;  %v451_v57 = vrot.slane %v450_v49, 4  ;;  %v470_v58 = vor.u32 %v469_v47, %v465_v46  ;;  %v487_v59 = vshll.u32 %v189_v45, 16  ;;  %v196_v48 = vld [vmem:[%s7919_s28 + $0x5c] sm:$0xf] }
  0x2b   : > { %v461_v61 = vrot.slane %v460_v50, 4  ;;  %v475_v62 = vrot.slane %v473_v52, 5  ;;  %v480_v0 = vrot.slane %v478_v53, 4  ;;  %v483_v1 = vrot.slane %v481_v54, 5 }
  0x2c   : > { %v446_v3 = vsel %vm7936_vm3, %v441_v56, %v445_v24  ;;  %v456_v5 = vsel %vm7936_vm3, %v451_v57, %v455_v42  ;;  %v471_v6 = vrot.slane %v470_v58, 4  ;;  %v489_v7 = vrot.slane %v487_v59, 5  ;;  %v195_v42 = vld [vmem:[%s7919_s28 + $0x58] sm:$0xf]  ;;  %v197_v58 = vld [vmem:[%s7919_s28 + $0x60] sm:$0x1] }
  0x2d   : > { %v8005_v8 = vcombine.low %v446_v3, %v456_v5  ;;  %v466_v9 = vsel %vm7936_vm3, %v461_v61, %v465_v46  ;;  %v491_v10 = vshrl.u32 %v189_v45, 16  ;;  %v8009_v11 = vcombine.low %v188_v39, %v189_v45 }
  0x2e   : > { %v476_v13 = vsel %vm7936_vm3, %v471_v6, %v475_v62  ;;  %v497_v14 = vshll.u32 %v190_v60, 16  ;;  %v501_v15 = vshrl.u32 %v190_v60, 16  ;;  %v507_v16 = vshll.u32 %v191_v2, 16  ;;  %v199_v6 = vld [vmem:[%s7919_s28 + $0x68] sm:$0xf] }
  0x2f   : > { %7260 = vmatprep.mubr.msk.bf16.mxu0 %vm1962_vm2, %v8005_v8  ;;  %v8017_v18 = vcombine.low %v466_v9, %v476_v13  ;;  %v493_v19 = vrot.slane %v491_v10, 4  ;;  %7396 = vmatprep.mubr.msk.bf16.mxu1 %vm1962_vm2, %v8009_v11  ;;  %v511_v20 = vshrl.u32 %v191_v2, 16  ;;  %v8021_v21 = vcombine.low %v190_v60, %v191_v2 }
  0x30   : > { %v499_v23 = vrot.slane %v497_v14, 5  ;;  %v503_v24 = vrot.slane %v501_v15, 4  ;;  %v509_v25 = vrot.slane %v507_v16, 5  ;;  %v484_v26 = vor.u32 %v483_v1, %v480_v0  ;;  %v198_v0 = vld [vmem:[%s7919_s28 + $0x64] sm:$0xf] }
  0x31   : > { %7261 = vmatmul.mubr.msk.bf16.gmra.mxu0 %vm1962_vm2, %v8017_v18  ;;  %v513_v27 = vrot.slane %v511_v20, 4  ;;  %7397 = vmatmul.mubr.msk.bf16.gmra.mxu1 %vm1962_vm2, %v8021_v21  ;;  %v494_v28 = vor.u32 %v493_v19, %v489_v7  ;;  %v517_v30 = vshll.u32 %v192_v12, 16  ;;  %v522_v31 = vshrl.u32 %v193_v17, 16 }
  0x32   : > { %v485_v32 = vrot.slane %v484_v26, 4  ;;  %v504_v34 = vor.u32 %v503_v24, %v499_v23  ;;  %v525_v35 = vshll.u32 %v193_v17, 16  ;;  %v531_v36 = vshll.u32 %v194_v22, 16 }
  0x33   : > { %v495_v37 = vrot.slane %v494_v28, 4  ;;  %v514_v38 = vor.u32 %v513_v27, %v509_v25  ;;  %v519_v39 = vrot.slane %v517_v30, 5  ;;  %v524_v40 = vrot.slane %v522_v31, 4  ;;  %v201_v28 = vld [vmem:[%s7919_s28 + $0x70] sm:$0xf] }
  0x34   : > { %v490_v43 = vsel %vm7936_vm3, %v485_v32, %v489_v7  ;;  %v505_v45 = vrot.slane %v504_v34, 4  ;;  %v527_v46 = vrot.slane %v525_v35, 5  ;;  %v533_v47 = vrot.slane %v531_v36, 5 }
  0x35   : > { %v500_v49 = vsel %vm7936_vm3, %v495_v37, %v499_v23  ;;  %v515_v50 = vrot.slane %v514_v38, 4  ;;  %v535_v52 = vshrl.u32 %v194_v22, 16  ;;  %v8034_v53 = vcombine.low %v193_v17, %v194_v22  ;;  %v200_v23 = vld [vmem:[%s7919_s28 + $0x6c] sm:$0xf] }
  0x36   : > { %v8036_v54 = vcombine.low %v490_v43, %v500_v49  ;;  %v510_v55 = vsel %vm7936_vm3, %v505_v45, %v509_v25  ;;  %v541_v56 = vshll.u32 %v195_v42, 16  ;;  %v545_v57 = vshrl.u32 %v195_v42, 16 }
  0x37   : > { %v520_v59 = vsel %vm7936_vm3, %v515_v50, %v519_v39  ;;  %v537_v60 = vrot.slane %v535_v52, 4  ;;  %7400 = vmatprep.mubr.msk.bf16.mxu1 %vm1962_vm2, %v8034_v53  ;;  %v551_v61 = vshll.u32 %v196_v48, 16  ;;  %v555_v62 = vshrl.u32 %v196_v48, 16  ;;  %v202_v39 = vld [vmem:[%s7919_s28 + $0x74] sm:$0x1] }
  0x38   : > { %7264 = vmatprep.mubr.msk.bf16.mxu0 %vm1962_vm2, %v8036_v54  ;;  %v8048_v1 = vcombine.low %v510_v55, %v520_v59  ;;  %v543_v2 = vrot.slane %v541_v56, 5  ;;  %v547_v3 = vrot.slane %v545_v57, 4  ;;  %v8050_v5 = vcombine.low %v195_v42, %v196_v48  ;;  %v204_v52 = vld [vmem:[%s7919_s28 + $0x7c] sm:$0xf] }
  0x39   : > { %v553_v7 = vrot.slane %v551_v61, 5  ;;  %v557_v9 = vrot.slane %v555_v62, 4  ;;  %v528_v10 = vor.u32 %v527_v46, %v524_v40  ;;  %v538_v12 = vor.u32 %v537_v60, %v533_v47  ;;  %v203_v46 = vld [vmem:[%s7919_s28 + $0x78] sm:$0xf] }
  0x3a   : > { %7265 = vmatmul.mubr.msk.bf16.gmra.mxu0 %vm1962_vm2, %v8048_v1  ;;  %7401 = vmatmul.mubr.msk.bf16.gmra.mxu1 %vm1962_vm2, %v8050_v5  ;;  %v548_v13 = vor.u32 %v547_v3, %v543_v2  ;;  %v561_v14 = vshll.u32 %v197_v58, 16  ;;  %v566_v15 = vshrl.u32 %v198_v0, 16  ;;  %v569_v16 = vshll.u32 %v198_v0, 16 }
  0x3b   : > { %v529_v17 = vrot.slane %v528_v10, 4  ;;  %v539_v19 = vrot.slane %v538_v12, 4  ;;  %v558_v20 = vor.u32 %v557_v9, %v553_v7  ;;  %v575_v22 = vshll.u32 %v199_v6, 16 }
  0x3c   : > { %v549_v24 = vrot.slane %v548_v13, 4  ;;  %v563_v25 = vrot.slane %v561_v14, 5  ;;  %v568_v26 = vrot.slane %v566_v15, 4  ;;  %v571_v27 = vrot.slane %v569_v16, 5  ;;  %v205_v13 = vld [vmem:[%s7919_s28 + $0x80] sm:$0xf] }
  0x3d   : > { %v534_v30 = vsel %vm7936_vm3, %v529_v17, %v533_v47  ;;  %v544_v31 = vsel %vm7936_vm3, %v539_v19, %v543_v2  ;;  %v559_v32 = vrot.slane %v558_v20, 4  ;;  %v577_v34 = vrot.slane %v575_v22, 5  ;;  %v206_v19 = vld [vmem:[%s7919_s28 + $0x84] sm:$0xf] }
  0x3e   : > { %v8063_v35 = vcombine.low %v534_v30, %v544_v31  ;;  %v554_v36 = vsel %vm7936_vm3, %v549_v24, %v553_v7  ;;  %v579_v37 = vshrl.u32 %v199_v6, 16  ;;  %v8067_v38 = vcombine.low %v198_v0, %v199_v6  ;;  %v207_v30 = vld [vmem:[%s7919_s28 + $0x88] sm:$0x1] }
  0x3f   : > { %v564_v40 = vsel %vm7936_vm3, %v559_v32, %v563_v25  ;;  %v585_v42 = vshll.u32 %v200_v23, 16  ;;  %v589_v43 = vshrl.u32 %v200_v23, 16  ;;  %v595_v45 = vshll.u32 %v201_v28, 16 }
  0x40   : > { %7268 = vmatprep.mubr.msk.bf16.mxu0 %vm1962_vm2, %v8063_v35  ;;  %v8075_v47 = vcombine.low %v554_v36, %v564_v40  ;;  %v581_v48 = vrot.slane %v579_v37, 4  ;;  %7404 = vmatprep.mubr.msk.bf16.mxu1 %vm1962_vm2, %v8067_v38  ;;  %v599_v49 = vshrl.u32 %v201_v28, 16  ;;  %v8079_v50 = vcombine.low %v200_v23, %v201_v28  ;;  %v208_v37 = vld [vmem:[%s7919_s28 + $0x8c] sm:$0xf] }
  0x41   : > { %v587_v55 = vrot.slane %v585_v42, 5  ;;  %v591_v56 = vrot.slane %v589_v43, 4  ;;  %v597_v57 = vrot.slane %v595_v45, 5  ;;  %v572_v58 = vor.u32 %v571_v27, %v568_v26  ;;  %v209_v45 = vld [vmem:[%s7919_s28 + $0x90] sm:$0xf] }
  0x42   : > { %10333 = vst [vmem:[#allocation2_spill] sm:$0xff] %v8079_v50  ;;  %7269 = vmatmul.mubr.msk.bf16.gmra.mxu0 %vm1962_vm2, %v8075_v47  ;;  %v601_v59 = vrot.slane %v599_v49, 4  ;;  %7405 = vmatmul.mubr.msk.bf16.gmra.mxu1 %vm1962_vm2, %v8079_v50  ;;  %v582_v60 = vor.u32 %v581_v48, %v577_v34  ;;  %v605_v61 = vshll.u32 %v202_v39, 16  ;;  %v610_v62 = vshrl.u32 %v203_v46, 16 }
  0x43   : > { %v573_v0 = vrot.slane %v572_v58, 4  ;;  %v592_v2 = vor.u32 %v591_v56, %v587_v55  ;;  %v613_v3 = vshll.u32 %v203_v46, 16  ;;  %v619_v6 = vshll.u32 %v204_v52, 16 }
  0x44   : > { %v583_v7 = vrot.slane %v582_v60, 4  ;;  %v602_v9 = vor.u32 %v601_v59, %v597_v57  ;;  %v607_v10 = vrot.slane %v605_v61, 5  ;;  %v612_v12 = vrot.slane %v610_v62, 4  ;;  %v210_v59 = vld [vmem:[%s7919_s28 + $0x94] sm:$0xf] }
  0x45   : > { %v578_v14 = vsel %vm7936_vm3, %v573_v0, %v577_v34  ;;  %v593_v15 = vrot.slane %v592_v2, 4  ;;  %v615_v16 = vrot.slane %v613_v3, 5  ;;  %v621_v17 = vrot.slane %v619_v6, 5  ;;  %v211_v60 = vld [vmem:[%s7919_s28 + $0x98] sm:$0xf] }
  0x46   : > { %v588_v20 = vsel %vm7936_vm3, %v583_v7, %v587_v55  ;;  %v603_v22 = vrot.slane %v602_v9, 4  ;;  %v623_v23 = vshrl.u32 %v204_v52, 16  ;;  %v8092_v24 = vcombine.low %v203_v46, %v204_v52 }
  0x47   : > { %v8094_v25 = vcombine.low %v578_v14, %v588_v20  ;;  %v598_v26 = vsel %vm7936_vm3, %v593_v15, %v597_v57  ;;  %v629_v27 = vshll.u32 %v205_v13, 16  ;;  %v633_v28 = vshrl.u32 %v205_v13, 16 }
  0x48   : > { %10334 = vst [vmem:[#allocation3_spill] sm:$0xff] %v8092_v24  ;;  %v608_v31 = vsel %vm7936_vm3, %v603_v22, %v607_v10  ;;  %v625_v32 = vrot.slane %v623_v23, 4  ;;  %7408 = vmatprep.mubr.msk.bf16.mxu1 %vm1962_vm2, %v8092_v24  ;;  %v639_v34 = vshll.u32 %v206_v19, 16  ;;  %v643_v36 = vshrl.u32 %v206_v19, 16  ;;  %v212_v22 = vld [vmem:[%s7919_s28 + $0x9c] sm:$0x1] }
  0x49   : > { %7272 = vmatprep.mubr.msk.bf16.mxu0 %vm1962_vm2, %v8094_v25  ;;  %v8106_v39 = vcombine.low %v598_v26, %v608_v31  ;;  %v631_v40 = vrot.slane %v629_v27, 5  ;;  %v635_v42 = vrot.slane %v633_v28, 4  ;;  %v8108_v43 = vcombine.low %v205_v13, %v206_v19  ;;  %v213_v28 = vld [vmem:[%s7919_s28 + $0xa0] sm:$0xf] }
  0x4a   : > { %v641_v46 = vrot.slane %v639_v34, 5  ;;  %v645_v48 = vrot.slane %v643_v36, 4  ;;  %v616_v49 = vor.u32 %v615_v16, %v612_v12  ;;  %v626_v52 = vor.u32 %v625_v32, %v621_v17  ;;  %v214_v36 = vld [vmem:[%s7919_s28 + $0xa4] sm:$0xf] }
  0x4b   : > { %10335 = vst [vmem:[#allocation4_spill] sm:$0xff] %v8108_v43  ;;  %7273 = vmatmul.mubr.msk.bf16.gmra.mxu0 %vm1962_vm2, %v8106_v39  ;;  %7409 = vmatmul.mubr.msk.bf16.gmra.mxu1 %vm1962_vm2, %v8108_v43  ;;  %v636_v55 = vor.u32 %v635_v42, %v631_v40  ;;  %v649_v56 = vshll.u32 %v207_v30, 16  ;;  %v654_v57 = vshrl.u32 %v208_v37, 16  ;;  %v657_v58 = vshll.u32 %v208_v37, 16 }
  0x4c   : > { %v617_v61 = vrot.slane %v616_v49, 4  ;;  %v627_v62 = vrot.slane %v626_v52, 4  ;;  %v646_v0 = vor.u32 %v645_v48, %v641_v46  ;;  %v663_v2 = vshll.u32 %v209_v45, 16 }
  0x4d   : > { %v637_v3 = vrot.slane %v636_v55, 4  ;;  %v651_v6 = vrot.slane %v649_v56, 5  ;;  %v656_v7 = vrot.slane %v654_v57, 4  ;;  %v659_v9 = vrot.slane %v657_v58, 5 }
  0x4e   : > { %v622_v10 = vsel %vm7936_vm3, %v617_v61, %v621_v17  ;;  %v632_v12 = vsel %vm7936_vm3, %v627_v62, %v631_v40  ;;  %v647_v13 = vrot.slane %v646_v0, 4  ;;  %v665_v14 = vrot.slane %v663_v2, 5  ;;  %v215_v0 = vld [vmem:[%s7919_s28 + $0xa8] sm:$0xf] }
  0x4f   : > { %v8121_v15 = vcombine.low %v622_v10, %v632_v12  ;;  %v642_v16 = vsel %vm7936_vm3, %v637_v3, %v641_v46  ;;  %v667_v19 = vshrl.u32 %v209_v45, 16  ;;  %v8125_v20 = vcombine.low %v208_v37, %v209_v45 }
  0x50   : > { %v652_v23 = vsel %vm7936_vm3, %v647_v13, %v651_v6  ;;  %v673_v26 = vshll.u32 %v210_v59, 16  ;;  %v677_v17 = vshrl.u32 %v210_v59, 16  ;;  %v683_v27 = vshll.u32 %v211_v60, 16 }
  0x51   : > { %10336 = vst [vmem:[#allocation5_spill] sm:$0xff] %v8125_v20  ;;  %7276 = vmatprep.mubr.msk.bf16.mxu0 %vm1962_vm2, %v8121_v15  ;;  %v8133_v30 = vcombine.low %v642_v16, %v652_v23  ;;  %v669_v31 = vrot.slane %v667_v19, 4  ;;  %7412 = vmatprep.mubr.msk.bf16.mxu1 %vm1962_vm2, %v8125_v20  ;;  %v687_v32 = vshrl.u32 %v211_v60, 16  ;;  %v8137_v34 = vcombine.low %v210_v59, %v211_v60 }
  0x52   : > { %v675_v37 = vrot.slane %v673_v26, 5  ;;  %v679_v40 = vrot.slane %v677_v17, 4  ;;  %v685_v42 = vrot.slane %v683_v27, 5  ;;  %v660_v45 = vor.u32 %v659_v9, %v656_v7  ;;  %v216_v9 = vld [vmem:[%s7919_s28 + $0xac] sm:$0xf] }
  0x53   : > { %10337 = vst [vmem:[#allocation6_spill] sm:$0xff] %v8137_v34  ;;  %7277 = vmatmul.mubr.msk.bf16.gmra.mxu0 %vm1962_vm2, %v8133_v30  ;;  %v689_v46 = vrot.slane %v687_v32, 4  ;;  %7413 = vmatmul.mubr.msk.bf16.gmra.mxu1 %vm1962_vm2, %v8137_v34  ;;  %v670_v48 = vor.u32 %v669_v31, %v665_v14  ;;  %v693_v49 = vshll.u32 %v212_v22, 16  ;;  %v698_v52 = vshrl.u32 %v213_v28, 16  ;;  %v217_v26 = vld [vmem:[%s7919_s28 + $0xb0] sm:$0x1] }
  0x54   : > { %v661_v55 = vrot.slane %v660_v45, 4  ;;  %v680_v56 = vor.u32 %v679_v40, %v675_v37  ;;  %v701_v57 = vshll.u32 %v213_v28, 16  ;;  %v707_v58 = vshll.u32 %v214_v36, 16  ;;  %v219_v45 = vld [vmem:[%s7919_s28 + $0xb8] sm:$0xf] }
  0x55   : > { %v671_v59 = vrot.slane %v670_v48, 4  ;;  %v690_v60 = vor.u32 %v689_v46, %v685_v42  ;;  %v695_v61 = vrot.slane %v693_v49, 5  ;;  %v700_v62 = vrot.slane %v698_v52, 4 }
  0x56   : > { %v666_v2 = vsel %vm7936_vm3, %v661_v55, %v665_v14  ;;  %v681_v3 = vrot.slane %v680_v56, 4  ;;  %v703_v6 = vrot.slane %v701_v57, 5  ;;  %v709_v7 = vrot.slane %v707_v58, 5 }
  0x57   : > { %v676_v10 = vsel %vm7936_vm3, %v671_v59, %v675_v37  ;;  %v691_v12 = vrot.slane %v690_v60, 4  ;;  %v711_v13 = vshrl.u32 %v214_v36, 16  ;;  %v8150_v16 = vcombine.low %v213_v28, %v214_v36  ;;  %v218_v28 = vld [vmem:[%s7919_s28 + $0xb4] sm:$0xf] }
  0x58   : > { %v8152_v19 = vcombine.low %v666_v2, %v676_v10  ;;  %v686_v22 = vsel %vm7936_vm3, %v681_v3, %v685_v42  ;;  %v717_v23 = vshll.u32 %v215_v0, 16  ;;  %v721_v14 = vshrl.u32 %v215_v0, 16  ;;  %v220_v2 = vld [vmem:[%s7919_s28 + $0xbc] sm:$0xf]  ;;  %v221_v10 = vld [vmem:[%s7919_s28 + $0xc0] sm:$0xf] }
  0x59   : > { %10338 = vst [vmem:[#allocation7_spill] sm:$0xff] %v8150_v16  ;;  %v696_v17 = vsel %vm7936_vm3, %v691_v12, %v695_v61  ;;  %v713_v27 = vrot.slane %v711_v13, 4  ;;  %7416 = vmatprep.mubr.msk.bf16.mxu1 %vm1962_vm2, %v8150_v16  ;;  %v727_v31 = vshll.u32 %v216_v9, 16  ;;  %v731_v32 = vshrl.u32 %v216_v9, 16  ;;  %v299_v16 = vld [vmem:[%s7919_s28 + $0x1f8] sm:$0xf] }
  0x5a   : > { %7280 = vmatprep.mubr.msk.bf16.mxu0 %vm1962_vm2, %v8152_v19  ;;  %v8164_v36 = vcombine.low %v686_v22, %v696_v17  ;;  %v719_v37 = vrot.slane %v717_v23, 5  ;;  %v723_v40 = vrot.slane %v721_v14, 4  ;;  %v8166_v42 = vcombine.low %v215_v0, %v216_v9 }
  0x5b   : > { %v729_v46 = vrot.slane %v727_v31, 5  ;;  %v733_v48 = vrot.slane %v731_v32, 4  ;;  %v704_v49 = vor.u32 %v703_v6, %v700_v62  ;;  %v714_v52 = vor.u32 %v713_v27, %v709_v7  ;;  %v222_v31 = vld [vmem:[%s7919_s28 + $0xc4] sm:$0x1] }
  0x5c   : > { %10339 = vst [vmem:[#allocation8_spill] sm:$0xff] %v8164_v36  ;;  %10340 = vst [vmem:[#allocation9_spill] sm:$0xff] %v8166_v42  ;;  %7281 = vmatmul.mubr.msk.bf16.gmra.mxu0 %vm1962_vm2, %v8164_v36  ;;  %7417 = vmatmul.mubr.msk.bf16.gmra.mxu1 %vm1962_vm2, %v8166_v42  ;;  %v724_v55 = vor.u32 %v723_v40, %v719_v37  ;;  %v737_v56 = vshll.u32 %v217_v26, 16  ;;  %v742_v57 = vshrl.u32 %v218_v28, 16  ;;  %v745_v58 = vshll.u32 %v218_v28, 16 }
  0x5d   : > { %v705_v59 = vrot.slane %v704_v49, 4  ;;  %v715_v60 = vrot.slane %v714_v52, 4  ;;  %v734_v61 = vor.u32 %v733_v48, %v729_v46  ;;  %v751_v0 = vshll.u32 %v219_v45, 16  ;;  %v223_v49 = vld [vmem:[%s7919_s28 + $0xc8] sm:$0xf] }
  0x5e   : > { %v725_v3 = vrot.slane %v724_v55, 4  ;;  %v739_v62 = vrot.slane %v737_v56, 5  ;;  %v744_v6 = vrot.slane %v742_v57, 4  ;;  %v747_v9 = vrot.slane %v745_v58, 5  ;;  %v296_v42 = vld [vmem:[%s7919_s28 + $0x1ec] sm:$0xf] }
  0x5f   : > { %v710_v12 = vsel %vm7936_vm3, %v705_v59, %v709_v7  ;;  %v720_v13 = vsel %vm7936_vm3, %v715_v60, %v719_v37  ;;  %v735_v22 = vrot.slane %v734_v61, 4  ;;  %v753_v23 = vrot.slane %v751_v0, 5 }
  0x60   : > { %v8179_v14 = vcombine.low %v710_v12, %v720_v13  ;;  %v730_v26 = vsel %vm7936_vm3, %v725_v3, %v729_v46  ;;  %v755_v17 = vshrl.u32 %v219_v45, 16  ;;  %v8183_v27 = vcombine.low %v218_v28, %v219_v45  ;;  %v224_v45 = vld [vmem:[%s7919_s28 + $0xcc] sm:$0xf] }
  0x61   : > { %v740_v32 = vsel %vm7936_vm3, %v735_v22, %v739_v62  ;;  %v761_v40 = vshll.u32 %v220_v2, 16  ;;  %v765_v7 = vshrl.u32 %v220_v2, 16  ;;  %v771_v48 = vshll.u32 %v221_v10, 16 }
  0x62   : > { %10341 = vst [vmem:[#allocation10_spill] sm:$0xff] %v8179_v14  ;;  %10342 = vst [vmem:[#allocation11_spill] sm:$0xff] %v8183_v27  ;;  %7284 = vmatprep.mubr.msk.bf16.mxu0 %vm1962_vm2, %v8179_v14  ;;  %v8191_v37 = vcombine.low %v730_v26, %v740_v32  ;;  %v757_v52 = vrot.slane %v755_v17, 4  ;;  %7420 = vmatprep.mubr.msk.bf16.mxu1 %vm1962_vm2, %v8183_v27  ;;  %v775_v46 = vshrl.u32 %v221_v10, 16  ;;  %v781_v61 = vshll.u32 %v222_v31, 16 }
  0x63   : > { %v8195_v28 = vcombine.low %v220_v2, %v221_v10  ;;  %v763_v55 = vrot.slane %v761_v40, 5  ;;  %v767_v56 = vrot.slane %v765_v7, 4  ;;  %v773_v57 = vrot.slane %v771_v48, 5  ;;  %v226_v7 = vld [vmem:[%s7919_s28 + $0xd4] sm:$0xf] }
  0x64   : > { %10343 = vst [vmem:[#allocation12_spill] sm:$0xff] %v8191_v37  ;;  %v748_v58 = vor.u32 %v747_v9, %v744_v6  ;;  %7285 = vmatmul.mubr.msk.bf16.gmra.mxu0 %vm1962_vm2, %v8191_v37  ;;  %v777_v59 = vrot.slane %v775_v46, 4  ;;  %v758_v60 = vor.u32 %v757_v52, %v753_v23  ;;  %v786_v0 = vshrl.u32 %v223_v49, 16  ;;  %v225_v9 = vld [vmem:[%s7919_s28 + $0xd0] sm:$0xf] }
  0x65   : > { %10344 = vst [vmem:[#allocation13_spill] sm:$0xff] %v8195_v28  ;;  %7421 = vmatmul.mubr.msk.bf16.gmra.mxu1 %vm1962_vm2, %v8195_v28  ;;  %v768_v2 = vor.u32 %v767_v56, %v763_v55  ;;  %v789_v62 = vshll.u32 %v223_v49, 16  ;;  %v795_v10 = vshll.u32 %v224_v45, 16  ;;  %v783_v22 = vrot.slane %v781_v61, 5  ;;  %v295_v27 = vld [vmem:[%s7919_s28 + $0x1e8] sm:$0xf] }
  0x66   : > { %v749_v3 = vrot.slane %v748_v58, 4  ;;  %v759_v12 = vrot.slane %v758_v60, 4  ;;  %v778_v13 = vor.u32 %v777_v59, %v773_v57  ;;  %v788_v6 = vrot.slane %v786_v0, 4  ;;  %v227_v60 = vld [vmem:[%s7919_s28 + $0xd8] sm:$0x1] }
  0x67   : > { %v769_v17 = vrot.slane %v768_v2, 4  ;;  %v791_v32 = vrot.slane %v789_v62, 5  ;;  %v797_v40 = vrot.slane %v795_v10, 5  ;;  %v799_v52 = vshrl.u32 %v224_v45, 16  ;;  %v229_v10 = vld [vmem:[%s7919_s28 + $0xe0] sm:$0xf] }
  0x68   : > { %v754_v26 = vsel %vm7936_vm3, %v749_v3, %v753_v23  ;;  %v764_v31 = vsel %vm7936_vm3, %v759_v12, %v763_v55  ;;  %v779_v48 = vrot.slane %v778_v13, 4  ;;  %v8208_v46 = vcombine.low %v223_v49, %v224_v45  ;;  %v228_v49 = vld [vmem:[%s7919_s28 + $0xdc] sm:$0xf] }
  0x69   : > { %v8210_v56 = vcombine.low %v754_v26, %v764_v31  ;;  %v774_v58 = vsel %vm7936_vm3, %v769_v17, %v773_v57  ;;  %v805_v59 = vshll.u32 %v225_v9, 16  ;;  %v809_v23 = vshrl.u32 %v225_v9, 16 }
  0x6a   : > { %10345 = vst [vmem:[#allocation14_spill] sm:$0xff] %v8208_v46  ;;  %v784_v61 = vsel %vm7936_vm3, %v779_v48, %v783_v22  ;;  %v801_v0 = vrot.slane %v799_v52, 4  ;;  %7424 = vmatprep.mubr.msk.bf16.mxu1 %vm1962_vm2, %v8208_v46  ;;  %v815_v55 = vshll.u32 %v226_v7, 16  ;;  %v819_v3 = vshrl.u32 %v226_v7, 16  ;;  %v233_v46 = vld [vmem:[%s7919_s28 + $0xf0] sm:$0xf] }
  0x6b   : > { %10346 = vst [vmem:[#allocation15_spill] sm:$0xff] %v8210_v56  ;;  %7288 = vmatprep.mubr.msk.bf16.mxu0 %vm1962_vm2, %v8210_v56  ;;  %v8222_v45 = vcombine.low %v774_v58, %v784_v61  ;;  %v807_v2 = vrot.slane %v805_v59, 5  ;;  %v811_v57 = vrot.slane %v809_v23, 4  ;;  %v8224_v62 = vcombine.low %v225_v9, %v226_v7  ;;  %v230_v23 = vld [vmem:[%s7919_s28 + $0xe4] sm:$0xf] }
  0x6c   : > { %v817_v12 = vrot.slane %v815_v55, 5  ;;  %v821_v13 = vrot.slane %v819_v3, 4  ;;  %v792_v22 = vor.u32 %v791_v32, %v788_v6  ;;  %v802_v26 = vor.u32 %v801_v0, %v797_v40  ;;  %v231_v55 = vld [vmem:[%s7919_s28 + $0xe8] sm:$0xf] }
  0x6d   : > { %10347 = vst [vmem:[#allocation16_spill] sm:$0xff] %v8222_v45  ;;  %10348 = vst [vmem:[#allocation17_spill] sm:$0xff] %v8224_v62  ;;  %7289 = vmatmul.mubr.msk.bf16.gmra.mxu0 %vm1962_vm2, %v8222_v45  ;;  %7425 = vmatmul.mubr.msk.bf16.gmra.mxu1 %vm1962_vm2, %v8224_v62  ;;  %v812_v17 = vor.u32 %v811_v57, %v807_v2  ;;  %v825_v31 = vshll.u32 %v227_v60, 16  ;;  %v830_v48 = vshrl.u32 %v228_v49, 16  ;;  %v833_v52 = vshll.u32 %v228_v49, 16 }
  0x6e   : > { %v793_v58 = vrot.slane %v792_v22, 4  ;;  %v803_v9 = vrot.slane %v802_v26, 4  ;;  %v822_v7 = vor.u32 %v821_v13, %v817_v12  ;;  %v839_v59 = vshll.u32 %v229_v10, 16 }
  0x6f   : > { %v813_v61 = vrot.slane %v812_v17, 4  ;;  %v827_v6 = vrot.slane %v825_v31, 5  ;;  %v832_v32 = vrot.slane %v830_v48, 4  ;;  %v835_v0 = vrot.slane %v833_v52, 5  ;;  %v232_v31 = vld [vmem:[%s7919_s28 + $0xec] sm:$0x1] }
  0x70   : > { %v798_v3 = vsel %vm7936_vm3, %v793_v58, %v797_v40  ;;  %v808_v60 = vsel %vm7936_vm3, %v803_v9, %v807_v2  ;;  %v823_v57 = vrot.slane %v822_v7, 4  ;;  %v841_v62 = vrot.slane %v839_v59, 5 }
  0x71   : > { %v8237_v22 = vcombine.low %v798_v3, %v808_v60  ;;  %v818_v13 = vsel %vm7936_vm3, %v813_v61, %v817_v12  ;;  %v843_v26 = vshrl.u32 %v229_v10, 16  ;;  %v8241_v17 = vcombine.low %v228_v49, %v229_v10  ;;  %v234_v10 = vld [vmem:[%s7919_s28 + $0xf4] sm:$0xf] }
  0x72   : > { %v828_v48 = vsel %vm7936_vm3, %v823_v57, %v827_v6  ;;  %v849_v52 = vshll.u32 %v230_v23, 16  ;;  %v853_v40 = vshrl.u32 %v230_v23, 16  ;;  %v859_v58 = vshll.u32 %v231_v55, 16 }
  0x73   : > { %10349 = vst [vmem:[#allocation18_spill] sm:$0xff] %v8237_v22  ;;  %10350 = vst [vmem:[#allocation19_spill] sm:$0xff] %v8241_v17  ;;  %7292 = vmatprep.mubr.msk.bf16.mxu0 %vm1962_vm2, %v8237_v22  ;;  %v8249_v2 = vcombine.low %v818_v13, %v828_v48  ;;  %v845_v9 = vrot.slane %v843_v26, 4  ;;  %7428 = vmatprep.mubr.msk.bf16.mxu1 %vm1962_vm2, %v8241_v17  ;;  %v863_v12 = vshrl.u32 %v231_v55, 16  ;;  %v869_v57 = vshll.u32 %v232_v31, 16 }
  0x74   : > { %v8253_v49 = vcombine.low %v230_v23, %v231_v55  ;;  %v851_v7 = vrot.slane %v849_v52, 5  ;;  %v855_v59 = vrot.slane %v853_v40, 4  ;;  %v861_v61 = vrot.slane %v859_v58, 5 }
  0x75   : > { %10351 = vst [vmem:[#allocation20_spill] sm:$0xff] %v8249_v2  ;;  %v836_v6 = vor.u32 %v835_v0, %v832_v32  ;;  %7293 = vmatmul.mubr.msk.bf16.gmra.mxu0 %vm1962_vm2, %v8249_v2  ;;  %v865_v3 = vrot.slane %v863_v12, 4  ;;  %v846_v60 = vor.u32 %v845_v9, %v841_v62  ;;  %v874_v13 = vshrl.u32 %v233_v46, 16  ;;  %v235_v0 = vld [vmem:[%s7919_s28 + $0xf8] sm:$0xf] }
  0x76   : > { %10352 = vst [vmem:[#allocation21_spill] sm:$0xff] %v8253_v49  ;;  %7429 = vmatmul.mubr.msk.bf16.gmra.mxu1 %vm1962_vm2, %v8253_v49  ;;  %v856_v23 = vor.u32 %v855_v59, %v851_v7  ;;  %v877_v55 = vshll.u32 %v233_v46, 16  ;;  %v883_v48 = vshll.u32 %v234_v10, 16  ;;  %v871_v58 = vrot.slane %v869_v57, 5  ;;  %v236_v9 = vld [vmem:[%s7919_s28 + $0xfc] sm:$0xf] }
  0x77   : > { %v837_v26 = vrot.slane %v836_v6, 4  ;;  %v847_v52 = vrot.slane %v846_v60, 4  ;;  %v866_v40 = vor.u32 %v865_v3, %v861_v61  ;;  %v876_v32 = vrot.slane %v874_v13, 4  ;;  %v237_v13 = vld [vmem:[%s7919_s28 + $0x100] sm:$0x1] }
  0x78   : > { %v857_v17 = vrot.slane %v856_v23, 4  ;;  %v879_v28 = vrot.slane %v877_v55, 5  ;;  %v885_v49 = vrot.slane %v883_v48, 5  ;;  %v887_v6 = vshrl.u32 %v234_v10, 16 }
  0x79   : > { %v842_v12 = vsel %vm7936_vm3, %v837_v26, %v841_v62  ;;  %v852_v31 = vsel %vm7936_vm3, %v847_v52, %v851_v7  ;;  %v867_v59 = vrot.slane %v866_v40, 4  ;;  %v8266_v2 = vcombine.low %v233_v46, %v234_v10  ;;  %v238_v46 = vld [vmem:[%s7919_s28 + $0x104] sm:$0xf]  ;;  %v239_v52 = vld [vmem:[%s7919_s28 + $0x108] sm:$0xf] }
  0x7a   : > { %v8268_v3 = vcombine.low %v842_v12, %v852_v31  ;;  %v862_v60 = vsel %vm7936_vm3, %v857_v17, %v861_v61  ;;  %v893_v57 = vshll.u32 %v235_v0, 16  ;;  %v897_v62 = vshrl.u32 %v235_v0, 16 }
  0x7b   : > { %10353 = vst [vmem:[#allocation22_spill] sm:$0xff] %v8266_v2  ;;  %v872_v26 = vsel %vm7936_vm3, %v867_v59, %v871_v58  ;;  %v889_v23 = vrot.slane %v887_v6, 4  ;;  %7432 = vmatprep.mubr.msk.bf16.mxu1 %vm1962_vm2, %v8266_v2  ;;  %v903_v7 = vshll.u32 %v236_v9, 16  ;;  %v907_v55 = vshrl.u32 %v236_v9, 16  ;;  %v241_v2 = vld [vmem:[%s7919_s28 + $0x110] sm:$0xf] }
  0x7c   : > { %10354 = vst [vmem:[#allocation23_spill] sm:$0xff] %v8268_v3  ;;  %7296 = vmatprep.mubr.msk.bf16.mxu0 %vm1962_vm2, %v8268_v3  ;;  %v8280_v10 = vcombine.low %v862_v60, %v872_v26  ;;  %v895_v48 = vrot.slane %v893_v57, 5  ;;  %v899_v17 = vrot.slane %v897_v62, 4  ;;  %v8282_v61 = vcombine.low %v235_v0, %v236_v9  ;;  %v243_v3 = vld [vmem:[%s7919_s28 + $0x118] sm:$0xf] }
  0x7d   : > { %v905_v40 = vrot.slane %v903_v7, 5  ;;  %v909_v58 = vrot.slane %v907_v55, 4  ;;  %v880_v12 = vor.u32 %v879_v28, %v876_v32  ;;  %v890_v31 = vor.u32 %v889_v23, %v885_v49  ;;  %v240_v7 = vld [vmem:[%s7919_s28 + $0x10c] sm:$0xf] }
  0x7e   : > { %10355 = vst [vmem:[#allocation24_spill] sm:$0xff] %v8280_v10  ;;  %10356 = vst [vmem:[#allocation25_spill] sm:$0xff] %v8282_v61  ;;  %7297 = vmatmul.mubr.msk.bf16.gmra.mxu0 %vm1962_vm2, %v8280_v10  ;;  %7433 = vmatmul.mubr.msk.bf16.gmra.mxu1 %vm1962_vm2, %v8282_v61  ;;  %v900_v59 = vor.u32 %v899_v17, %v895_v48  ;;  %v913_v6 = vshll.u32 %v237_v13, 16  ;;  %v918_v60 = vshrl.u32 %v238_v46, 16  ;;  %v921_v57 = vshll.u32 %v238_v46, 16 }
  0x7f   : > { %v881_v62 = vrot.slane %v880_v12, 4  ;;  %v891_v0 = vrot.slane %v890_v31, 4  ;;  %v910_v9 = vor.u32 %v909_v58, %v905_v40  ;;  %v927_v26 = vshll.u32 %v239_v52, 16 }
  0x80   : > { %v901_v55 = vrot.slane %v900_v59, 4  ;;  %v915_v28 = vrot.slane %v913_v6, 5  ;;  %v920_v32 = vrot.slane %v918_v60, 4  ;;  %v923_v23 = vrot.slane %v921_v57, 5  ;;  %v242_v6 = vld [vmem:[%s7919_s28 + $0x114] sm:$0x1] }
  0x81   : > { %v886_v10 = vsel %vm7936_vm3, %v881_v62, %v885_v49  ;;  %v896_v13 = vsel %vm7936_vm3, %v891_v0, %v895_v48  ;;  %v911_v17 = vrot.slane %v910_v9, 4  ;;  %v929_v61 = vrot.slane %v927_v26, 5 }
  0x82   : > { %v8295_v12 = vcombine.low %v886_v10, %v896_v13  ;;  %v906_v58 = vsel %vm7936_vm3, %v901_v55, %v905_v40  ;;  %v931_v31 = vshrl.u32 %v239_v52, 16  ;;  %v8299_v59 = vcombine.low %v238_v46, %v239_v52  ;;  %v244_v52 = vld [vmem:[%s7919_s28 + $0x11c] sm:$0xf] }
  0x83   : > { %v916_v60 = vsel %vm7936_vm3, %v911_v17, %v915_v28  ;;  %v937_v57 = vshll.u32 %v240_v7, 16  ;;  %v941_v49 = vshrl.u32 %v240_v7, 16  ;;  %v947_v62 = vshll.u32 %v241_v2, 16 }
  0x84   : > { %10357 = vst [vmem:[#allocation26_spill] sm:$0xff] %v8295_v12  ;;  %10358 = vst [vmem:[#allocation27_spill] sm:$0xff] %v8299_v59  ;;  %7300 = vmatprep.mubr.msk.bf16.mxu0 %vm1962_vm2, %v8295_v12  ;;  %v8307_v10 = vcombine.low %v906_v58, %v916_v60  ;;  %v933_v48 = vrot.slane %v931_v31, 4  ;;  %7436 = vmatprep.mubr.msk.bf16.mxu1 %vm1962_vm2, %v8299_v59  ;;  %v951_v40 = vshrl.u32 %v241_v2, 16  ;;  %v957_v17 = vshll.u32 %v242_v6, 16 }
  0x85   : > { %v8311_v46 = vcombine.low %v240_v7, %v241_v2  ;;  %v939_v0 = vrot.slane %v937_v57, 5  ;;  %v943_v9 = vrot.slane %v941_v49, 4  ;;  %v949_v26 = vrot.slane %v947_v62, 5 }
  0x86   : > { %10359 = vst [vmem:[#allocation28_spill] sm:$0xff] %v8307_v10  ;;  %v924_v55 = vor.u32 %v923_v23, %v920_v32  ;;  %7301 = vmatmul.mubr.msk.bf16.gmra.mxu0 %vm1962_vm2, %v8307_v10  ;;  %v953_v28 = vrot.slane %v951_v40, 4  ;;  %v934_v13 = vor.u32 %v933_v48, %v929_v61  ;;  %v962_v58 = vshrl.u32 %v243_v3, 16  ;;  %v245_v23 = vld [vmem:[%s7919_s28 + $0x120] sm:$0xf] }
  0x87   : > { %10360 = vst [vmem:[#allocation29_spill] sm:$0xff] %v8311_v46  ;;  %7437 = vmatmul.mubr.msk.bf16.gmra.mxu1 %vm1962_vm2, %v8311_v46  ;;  %v944_v2 = vor.u32 %v943_v9, %v939_v0  ;;  %v965_v7 = vshll.u32 %v243_v3, 16  ;;  %v971_v60 = vshll.u32 %v244_v52, 16  ;;  %v959_v62 = vrot.slane %v957_v17, 5  ;;  %v246_v48 = vld [vmem:[%s7919_s28 + $0x124] sm:$0xf] }
  0x88   : > { %v925_v31 = vrot.slane %v924_v55, 4  ;;  %v935_v57 = vrot.slane %v934_v13, 4  ;;  %v954_v49 = vor.u32 %v953_v28, %v949_v26  ;;  %v964_v32 = vrot.slane %v962_v58, 4  ;;  %v247_v58 = vld [vmem:[%s7919_s28 + $0x128] sm:$0x1] }
  0x89   : > { %v945_v59 = vrot.slane %v944_v2, 4  ;;  %v967_v10 = vrot.slane %v965_v7, 5  ;;  %v973_v46 = vrot.slane %v971_v60, 5  ;;  %v975_v55 = vshrl.u32 %v244_v52, 16 }
  0x8a   : > { %v930_v40 = vsel %vm7936_vm3, %v925_v31, %v929_v61  ;;  %v940_v6 = vsel %vm7936_vm3, %v935_v57, %v939_v0  ;;  %v955_v9 = vrot.slane %v954_v49, 4  ;;  %v8324_v12 = vcombine.low %v243_v3, %v244_v52  ;;  %v248_v3 = vld [vmem:[%s7919_s28 + $0x12c] sm:$0xf]  ;;  %v249_v57 = vld [vmem:[%s7919_s28 + $0x130] sm:$0xf] }
  0x8b   : > { %v8326_v28 = vcombine.low %v930_v40, %v940_v6  ;;  %v950_v13 = vsel %vm7936_vm3, %v945_v59, %v949_v26  ;;  %v981_v17 = vshll.u32 %v245_v23, 16  ;;  %v985_v61 = vshrl.u32 %v245_v23, 16 }
  0x8c   : > { %10361 = vst [vmem:[#allocation30_spill] sm:$0xff] %v8324_v12  ;;  %v960_v31 = vsel %vm7936_vm3, %v955_v9, %v959_v62  ;;  %v977_v2 = vrot.slane %v975_v55, 4  ;;  %7440 = vmatprep.mubr.msk.bf16.mxu1 %vm1962_vm2, %v8324_v12  ;;  %v991_v0 = vshll.u32 %v246_v48, 16  ;;  %v995_v7 = vshrl.u32 %v246_v48, 16  ;;  %v251_v12 = vld [vmem:[%s7919_s28 + $0x138] sm:$0xf] }
  0x8d   : > { %10362 = vst [vmem:[#allocation31_spill] sm:$0xff] %v8326_v28  ;;  %7304 = vmatprep.mubr.msk.bf16.mxu0 %vm1962_vm2, %v8326_v28  ;;  %v8338_v52 = vcombine.low %v950_v13, %v960_v31  ;;  %v983_v60 = vrot.slane %v981_v17, 5  ;;  %v987_v59 = vrot.slane %v985_v61, 4  ;;  %v8340_v26 = vcombine.low %v245_v23, %v246_v48  ;;  %v253_v28 = vld [vmem:[%s7919_s28 + $0x140] sm:$0xf] }
  0x8e   : > { %v993_v49 = vrot.slane %v991_v0, 5  ;;  %v997_v62 = vrot.slane %v995_v7, 4  ;;  %v968_v40 = vor.u32 %v967_v10, %v964_v32  ;;  %v978_v6 = vor.u32 %v977_v2, %v973_v46  ;;  %v250_v0 = vld [vmem:[%s7919_s28 + $0x134] sm:$0xf] }
  0x8f   : > { %10363 = vst [vmem:[#allocation32_spill] sm:$0xff] %v8338_v52  ;;  %10364 = vst [vmem:[#allocation33_spill] sm:$0xff] %v8340_v26  ;;  %7305 = vmatmul.mubr.msk.bf16.gmra.mxu0 %vm1962_vm2, %v8338_v52  ;;  %7441 = vmatmul.mubr.msk.bf16.gmra.mxu1 %vm1962_vm2, %v8340_v26  ;;  %v988_v9 = vor.u32 %v987_v59, %v983_v60  ;;  %v1001_v55 = vshll.u32 %v247_v58, 16  ;;  %v1006_v13 = vshrl.u32 %v248_v3, 16  ;;  %v1009_v17 = vshll.u32 %v248_v3, 16 }
  0x90   : > { %v969_v61 = vrot.slane %v968_v40, 4  ;;  %v979_v23 = vrot.slane %v978_v6, 4  ;;  %v998_v48 = vor.u32 %v997_v62, %v993_v49  ;;  %v1015_v31 = vshll.u32 %v249_v57, 16 }
  0x91   : > { %v989_v7 = vrot.slane %v988_v9, 4  ;;  %v1003_v10 = vrot.slane %v1001_v55, 5  ;;  %v1008_v32 = vrot.slane %v1006_v13, 4  ;;  %v1011_v2 = vrot.slane %v1009_v17, 5  ;;  %v252_v55 = vld [vmem:[%s7919_s28 + $0x13c] sm:$0x1] }
  0x92   : > { %v974_v52 = vsel %vm7936_vm3, %v969_v61, %v973_v46  ;;  %v984_v58 = vsel %vm7936_vm3, %v979_v23, %v983_v60  ;;  %v999_v59 = vrot.slane %v998_v48, 4  ;;  %v1017_v26 = vrot.slane %v1015_v31, 5 }
  0x93   : > { %v8353_v40 = vcombine.low %v974_v52, %v984_v58  ;;  %v994_v62 = vsel %vm7936_vm3, %v989_v7, %v993_v49  ;;  %v1019_v6 = vshrl.u32 %v249_v57, 16  ;;  %v8357_v9 = vcombine.low %v248_v3, %v249_v57  ;;  %v254_v57 = vld [vmem:[%s7919_s28 + $0x144] sm:$0xf] }
  0x94   : > { %v1004_v13 = vsel %vm7936_vm3, %v999_v59, %v1003_v10  ;;  %v1025_v17 = vshll.u32 %v250_v0, 16  ;;  %v1029_v46 = vshrl.u32 %v250_v0, 16  ;;  %v1035_v61 = vshll.u32 %v251_v12, 16 }
  0x95   : > { %10365 = vst [vmem:[#allocation34_spill] sm:$0xff] %v8353_v40  ;;  %10366 = vst [vmem:[#allocation35_spill] sm:$0xff] %v8357_v9  ;;  %7308 = vmatprep.mubr.msk.bf16.mxu0 %vm1962_vm2, %v8353_v40  ;;  %v8365_v52 = vcombine.low %v994_v62, %v1004_v13  ;;  %v1021_v60 = vrot.slane %v1019_v6, 4  ;;  %7444 = vmatprep.mubr.msk.bf16.mxu1 %vm1962_vm2, %v8357_v9  ;;  %v1039_v49 = vshrl.u32 %v251_v12, 16  ;;  %v1045_v59 = vshll.u32 %v252_v55, 16 }
  0x96   : > { %v8369_v3 = vcombine.low %v250_v0, %v251_v12  ;;  %v1027_v23 = vrot.slane %v1025_v17, 5  ;;  %v1031_v48 = vrot.slane %v1029_v46, 4  ;;  %v1037_v31 = vrot.slane %v1035_v61, 5 }
  0x97   : > { %10367 = vst [vmem:[#allocation36_spill] sm:$0xff] %v8365_v52  ;;  %v1012_v7 = vor.u32 %v1011_v2, %v1008_v32  ;;  %7309 = vmatmul.mubr.msk.bf16.gmra.mxu0 %vm1962_vm2, %v8365_v52  ;;  %v1041_v10 = vrot.slane %v1039_v49, 4  ;;  %v1022_v58 = vor.u32 %v1021_v60, %v1017_v26  ;;  %v1050_v62 = vshrl.u32 %v253_v28, 16  ;;  %v255_v2 = vld [vmem:[%s7919_s28 + $0x148] sm:$0xf] }
  0x98   : > { %10368 = vst [vmem:[#allocation37_spill] sm:$0xff] %v8369_v3  ;;  %7445 = vmatmul.mubr.msk.bf16.gmra.mxu1 %vm1962_vm2, %v8369_v3  ;;  %v1032_v12 = vor.u32 %v1031_v48, %v1027_v23  ;;  %v1053_v0 = vshll.u32 %v253_v28, 16  ;;  %v1059_v13 = vshll.u32 %v254_v57, 16  ;;  %v1047_v61 = vrot.slane %v1045_v59, 5  ;;  %v256_v60 = vld [vmem:[%s7919_s28 + $0x14c] sm:$0xf] }
  0x99   : > { %v1013_v6 = vrot.slane %v1012_v7, 4  ;;  %v1023_v17 = vrot.slane %v1022_v58, 4  ;;  %v1042_v46 = vor.u32 %v1041_v10, %v1037_v31  ;;  %v1052_v32 = vrot.slane %v1050_v62, 4  ;;  %v257_v62 = vld [vmem:[%s7919_s28 + $0x150] sm:$0x1] }
  0x9a   : > { %v1033_v9 = vrot.slane %v1032_v12, 4  ;;  %v1055_v52 = vrot.slane %v1053_v0, 5  ;;  %v1061_v3 = vrot.slane %v1059_v13, 5  ;;  %v1063_v7 = vshrl.u32 %v254_v57, 16 }
  0x9b   : > { %v1018_v49 = vsel %vm7936_vm3, %v1013_v6, %v1017_v26  ;;  %v1028_v55 = vsel %vm7936_vm3, %v1023_v17, %v1027_v23  ;;  %v1043_v48 = vrot.slane %v1042_v46, 4  ;;  %v8382_v40 = vcombine.low %v253_v28, %v254_v57  ;;  %v258_v28 = vld [vmem:[%s7919_s28 + $0x154] sm:$0xf]  ;;  %v259_v17 = vld [vmem:[%s7919_s28 + $0x158] sm:$0xf] }
  0x9c   : > { %v8384_v10 = vcombine.low %v1018_v49, %v1028_v55  ;;  %v1038_v58 = vsel %vm7936_vm3, %v1033_v9, %v1037_v31  ;;  %v1069_v59 = vshll.u32 %v255_v2, 16  ;;  %v1073_v26 = vshrl.u32 %v255_v2, 16 }
  0x9d   : > { %10369 = vst [vmem:[#allocation38_spill] sm:$0xff] %v8382_v40  ;;  %v1048_v6 = vsel %vm7936_vm3, %v1043_v48, %v1047_v61  ;;  %v1065_v12 = vrot.slane %v1063_v7, 4  ;;  %7448 = vmatprep.mubr.msk.bf16.mxu1 %vm1962_vm2, %v8382_v40  ;;  %v1079_v23 = vshll.u32 %v256_v60, 16  ;;  %v1083_v0 = vshrl.u32 %v256_v60, 16  ;;  %v261_v40 = vld [vmem:[%s7919_s28 + $0x160] sm:$0xf] }
  0x9e   : > { %10370 = vst [vmem:[#allocation39_spill] sm:$0xff] %v8384_v10  ;;  %7312 = vmatprep.mubr.msk.bf16.mxu0 %vm1962_vm2, %v8384_v10  ;;  %v8396_v57 = vcombine.low %v1038_v58, %v1048_v6  ;;  %v1071_v13 = vrot.slane %v1069_v59, 5  ;;  %v1075_v9 = vrot.slane %v1073_v26, 4  ;;  %v8398_v31 = vcombine.low %v255_v2, %v256_v60  ;;  %v263_v10 = vld [vmem:[%s7919_s28 + $0x168] sm:$0xf] }
  0x9f   : > { %v1081_v46 = vrot.slane %v1079_v23, 5  ;;  %v1085_v61 = vrot.slane %v1083_v0, 4  ;;  %v1056_v49 = vor.u32 %v1055_v52, %v1052_v32  ;;  %v1066_v55 = vor.u32 %v1065_v12, %v1061_v3  ;;  %v260_v23 = vld [vmem:[%s7919_s28 + $0x15c] sm:$0xf] }
  0xa0   : > { %10371 = vst [vmem:[#allocation40_spill] sm:$0xff] %v8396_v57  ;;  %10372 = vst [vmem:[#allocation41_spill] sm:$0xff] %v8398_v31  ;;  %7313 = vmatmul.mubr.msk.bf16.gmra.mxu0 %vm1962_vm2, %v8396_v57  ;;  %7449 = vmatmul.mubr.msk.bf16.gmra.mxu1 %vm1962_vm2, %v8398_v31  ;;  %v1076_v48 = vor.u32 %v1075_v9, %v1071_v13  ;;  %v1089_v7 = vshll.u32 %v257_v62, 16  ;;  %v1094_v58 = vshrl.u32 %v258_v28, 16  ;;  %v1097_v59 = vshll.u32 %v258_v28, 16 }
  0xa1   : > { %v1057_v26 = vrot.slane %v1056_v49, 4  ;;  %v1067_v2 = vrot.slane %v1066_v55, 4  ;;  %v1086_v60 = vor.u32 %v1085_v61, %v1081_v46  ;;  %v1103_v6 = vshll.u32 %v259_v17, 16 }
  0xa2   : > { %v1077_v0 = vrot.slane %v1076_v48, 4  ;;  %v1091_v52 = vrot.slane %v1089_v7, 5  ;;  %v1096_v32 = vrot.slane %v1094_v58, 4  ;;  %v1099_v12 = vrot.slane %v1097_v59, 5  ;;  %v262_v7 = vld [vmem:[%s7919_s28 + $0x164] sm:$0x1] }
  0xa3   : > { %v1062_v57 = vsel %vm7936_vm3, %v1057_v26, %v1061_v3  ;;  %v1072_v62 = vsel %vm7936_vm3, %v1067_v2, %v1071_v13  ;;  %v1087_v9 = vrot.slane %v1086_v60, 4  ;;  %v1105_v31 = vrot.slane %v1103_v6, 5 }
  0xa4   : > { %v8411_v49 = vcombine.low %v1062_v57, %v1072_v62  ;;  %v1082_v61 = vsel %vm7936_vm3, %v1077_v0, %v1081_v46  ;;  %v1107_v55 = vshrl.u32 %v259_v17, 16  ;;  %v8415_v48 = vcombine.low %v258_v28, %v259_v17  ;;  %v264_v17 = vld [vmem:[%s7919_s28 + $0x16c] sm:$0xf] }
  0xa5   : > { %v1092_v58 = vsel %vm7936_vm3, %v1087_v9, %v1091_v52  ;;  %v1113_v59 = vshll.u32 %v260_v23, 16  ;;  %v1117_v3 = vshrl.u32 %v260_v23, 16  ;;  %v1123_v26 = vshll.u32 %v261_v40, 16 }
  0xa6   : > { %10373 = vst [vmem:[#allocation42_spill] sm:$0xff] %v8411_v49  ;;  %10374 = vst [vmem:[#allocation43_spill] sm:$0xff] %v8415_v48  ;;  %7316 = vmatprep.mubr.msk.bf16.mxu0 %vm1962_vm2, %v8411_v49  ;;  %v8423_v57 = vcombine.low %v1082_v61, %v1092_v58  ;;  %v1109_v13 = vrot.slane %v1107_v55, 4  ;;  %7452 = vmatprep.mubr.msk.bf16.mxu1 %vm1962_vm2, %v8415_v48  ;;  %v1127_v46 = vshrl.u32 %v261_v40, 16  ;;  %v1133_v9 = vshll.u32 %v262_v7, 16 }
  0xa7   : > { %v8427_v28 = vcombine.low %v260_v23, %v261_v40  ;;  %v1115_v2 = vrot.slane %v1113_v59, 5  ;;  %v1119_v60 = vrot.slane %v1117_v3, 4  ;;  %v1125_v6 = vrot.slane %v1123_v26, 5 }
  0xa8   : > { %10375 = vst [vmem:[#allocation44_spill] sm:$0xff] %v8423_v57  ;;  %v1100_v0 = vor.u32 %v1099_v12, %v1096_v32  ;;  %7317 = vmatmul.mubr.msk.bf16.gmra.mxu0 %vm1962_vm2, %v8423_v57  ;;  %v1129_v52 = vrot.slane %v1127_v46, 4  ;;  %v1110_v62 = vor.u32 %v1109_v13, %v1105_v31  ;;  %v1138_v61 = vshrl.u32 %v263_v10, 16  ;;  %v265_v12 = vld [vmem:[%s7919_s28 + $0x170] sm:$0xf] }
  0xa9   : > { %10376 = vst [vmem:[#allocation45_spill] sm:$0xff] %v8427_v28  ;;  %7453 = vmatmul.mubr.msk.bf16.gmra.mxu1 %vm1962_vm2, %v8427_v28  ;;  %v1120_v40 = vor.u32 %v1119_v60, %v1115_v2  ;;  %v1141_v23 = vshll.u32 %v263_v10, 16  ;;  %v1147_v58 = vshll.u32 %v264_v17, 16  ;;  %v1135_v26 = vrot.slane %v1133_v9, 5  ;;  %v266_v13 = vld [vmem:[%s7919_s28 + $0x174] sm:$0xf] }
  0xaa   : > { %v1101_v55 = vrot.slane %v1100_v0, 4  ;;  %v1111_v59 = vrot.slane %v1110_v62, 4  ;;  %v1130_v3 = vor.u32 %v1129_v52, %v1125_v6  ;;  %v1140_v32 = vrot.slane %v1138_v61, 4  ;;  %v267_v61 = vld [vmem:[%s7919_s28 + $0x178] sm:$0x1] }
  0xab   : > { %v1121_v48 = vrot.slane %v1120_v40, 4  ;;  %v1143_v57 = vrot.slane %v1141_v23, 5  ;;  %v1149_v28 = vrot.slane %v1147_v58, 5  ;;  %v1151_v0 = vshrl.u32 %v264_v17, 16 }
  0xac   : > { %v1106_v46 = vsel %vm7936_vm3, %v1101_v55, %v1105_v31  ;;  %v1116_v7 = vsel %vm7936_vm3, %v1111_v59, %v1115_v2  ;;  %v1131_v60 = vrot.slane %v1130_v3, 4  ;;  %v8440_v49 = vcombine.low %v263_v10, %v264_v17  ;;  %v268_v10 = vld [vmem:[%s7919_s28 + $0x17c] sm:$0xf]  ;;  %v269_v59 = vld [vmem:[%s7919_s28 + $0x180] sm:$0xf] }
  0xad   : > { %v8442_v52 = vcombine.low %v1106_v46, %v1116_v7  ;;  %v1126_v62 = vsel %vm7936_vm3, %v1121_v48, %v1125_v6  ;;  %v1157_v9 = vshll.u32 %v265_v12, 16  ;;  %v1161_v31 = vshrl.u32 %v265_v12, 16 }
  0xae   : > { %10377 = vst [vmem:[#allocation46_spill] sm:$0xff] %v8440_v49  ;;  %v1136_v55 = vsel %vm7936_vm3, %v1131_v60, %v1135_v26  ;;  %v1153_v40 = vrot.slane %v1151_v0, 4  ;;  %7456 = vmatprep.mubr.msk.bf16.mxu1 %vm1962_vm2, %v8440_v49  ;;  %v1167_v2 = vshll.u32 %v266_v13, 16  ;;  %v1171_v23 = vshrl.u32 %v266_v13, 16  ;;  %v271_v49 = vld [vmem:[%s7919_s28 + $0x188] sm:$0xf] }
  0xaf   : > { %10378 = vst [vmem:[#allocation47_spill] sm:$0xff] %v8442_v52  ;;  %7320 = vmatprep.mubr.msk.bf16.mxu0 %vm1962_vm2, %v8442_v52  ;;  %v8454_v17 = vcombine.low %v1126_v62, %v1136_v55  ;;  %v1159_v58 = vrot.slane %v1157_v9, 5  ;;  %v1163_v48 = vrot.slane %v1161_v31, 4  ;;  %v8456_v6 = vcombine.low %v265_v12, %v266_v13  ;;  %v273_v52 = vld [vmem:[%s7919_s28 + $0x190] sm:$0xf] }
  0xb0   : > { %v1169_v3 = vrot.slane %v1167_v2, 5  ;;  %v1173_v26 = vrot.slane %v1171_v23, 4  ;;  %v1144_v46 = vor.u32 %v1143_v57, %v1140_v32  ;;  %v1154_v7 = vor.u32 %v1153_v40, %v1149_v28  ;;  %v270_v2 = vld [vmem:[%s7919_s28 + $0x184] sm:$0xf] }
  0xb1   : > { %10379 = vst [vmem:[#allocation48_spill] sm:$0xff] %v8454_v17  ;;  %10380 = vst [vmem:[#allocation49_spill] sm:$0xff] %v8456_v6  ;;  %7321 = vmatmul.mubr.msk.bf16.gmra.mxu0 %vm1962_vm2, %v8454_v17  ;;  %7457 = vmatmul.mubr.msk.bf16.gmra.mxu1 %vm1962_vm2, %v8456_v6  ;;  %v1164_v60 = vor.u32 %v1163_v48, %v1159_v58  ;;  %v1177_v0 = vshll.u32 %v267_v61, 16  ;;  %v1182_v62 = vshrl.u32 %v268_v10, 16  ;;  %v1185_v9 = vshll.u32 %v268_v10, 16 }
  0xb2   : > { %v1145_v31 = vrot.slane %v1144_v46, 4  ;;  %v1155_v12 = vrot.slane %v1154_v7, 4  ;;  %v1174_v13 = vor.u32 %v1173_v26, %v1169_v3  ;;  %v1191_v55 = vshll.u32 %v269_v59, 16 }
  0xb3   : > { %v1165_v23 = vrot.slane %v1164_v60, 4  ;;  %v1179_v57 = vrot.slane %v1177_v0, 5  ;;  %v1184_v32 = vrot.slane %v1182_v62, 4  ;;  %v1187_v40 = vrot.slane %v1185_v9, 5  ;;  %v272_v0 = vld [vmem:[%s7919_s28 + $0x18c] sm:$0x1] }
  0xb4   : > { %v1150_v17 = vsel %vm7936_vm3, %v1145_v31, %v1149_v28  ;;  %v1160_v61 = vsel %vm7936_vm3, %v1155_v12, %v1159_v58  ;;  %v1175_v48 = vrot.slane %v1174_v13, 4  ;;  %v1193_v6 = vrot.slane %v1191_v55, 5 }
  0xb5   : > { %v8469_v46 = vcombine.low %v1150_v17, %v1160_v61  ;;  %v1170_v26 = vsel %vm7936_vm3, %v1165_v23, %v1169_v3  ;;  %v1195_v7 = vshrl.u32 %v269_v59, 16  ;;  %v8473_v60 = vcombine.low %v268_v10, %v269_v59  ;;  %v274_v59 = vld [vmem:[%s7919_s28 + $0x194] sm:$0xf] }
  0xb6   : > { %v1180_v62 = vsel %vm7936_vm3, %v1175_v48, %v1179_v57  ;;  %v1201_v9 = vshll.u32 %v270_v2, 16  ;;  %v1205_v28 = vshrl.u32 %v270_v2, 16  ;;  %v1211_v31 = vshll.u32 %v271_v49, 16 }
  0xb7   : > { %10381 = vst [vmem:[#allocation50_spill] sm:$0xff] %v8469_v46  ;;  %10382 = vst [vmem:[#allocation51_spill] sm:$0xff] %v8473_v60  ;;  %7324 = vmatprep.mubr.msk.bf16.mxu0 %vm1962_vm2, %v8469_v46  ;;  %v8481_v17 = vcombine.low %v1170_v26, %v1180_v62  ;;  %v1197_v58 = vrot.slane %v1195_v7, 4  ;;  %7460 = vmatprep.mubr.msk.bf16.mxu1 %vm1962_vm2, %v8473_v60  ;;  %v1215_v3 = vshrl.u32 %v271_v49, 16  ;;  %v1221_v48 = vshll.u32 %v272_v0, 16 }
  0xb8   : > { %v8485_v10 = vcombine.low %v270_v2, %v271_v49  ;;  %v1203_v12 = vrot.slane %v1201_v9, 5  ;;  %v1207_v13 = vrot.slane %v1205_v28, 4  ;;  %v1213_v55 = vrot.slane %v1211_v31, 5 }
  0xb9   : > { %10383 = vst [vmem:[#allocation52_spill] sm:$0xff] %v8481_v17  ;;  %v1188_v23 = vor.u32 %v1187_v40, %v1184_v32  ;;  %7325 = vmatmul.mubr.msk.bf16.gmra.mxu0 %vm1962_vm2, %v8481_v17  ;;  %v1217_v57 = vrot.slane %v1215_v3, 4  ;;  %v1198_v61 = vor.u32 %v1197_v58, %v1193_v6  ;;  %v1226_v26 = vshrl.u32 %v273_v52, 16  ;;  %v275_v40 = vld [vmem:[%s7919_s28 + $0x198] sm:$0xf] }
  0xba   : > { %10384 = vst [vmem:[#allocation53_spill] sm:$0xff] %v8485_v10  ;;  %7461 = vmatmul.mubr.msk.bf16.gmra.mxu1 %vm1962_vm2, %v8485_v10  ;;  %v1208_v49 = vor.u32 %v1207_v13, %v1203_v12  ;;  %v1229_v2 = vshll.u32 %v273_v52, 16  ;;  %v1235_v62 = vshll.u32 %v274_v59, 16  ;;  %v1223_v31 = vrot.slane %v1221_v48, 5  ;;  %v276_v58 = vld [vmem:[%s7919_s28 + $0x19c] sm:$0xf] }
  0xbb   : > { %v1189_v7 = vrot.slane %v1188_v23, 4  ;;  %v1199_v9 = vrot.slane %v1198_v61, 4  ;;  %v1218_v28 = vor.u32 %v1217_v57, %v1213_v55  ;;  %v1228_v32 = vrot.slane %v1226_v26, 4  ;;  %v277_v26 = vld [vmem:[%s7919_s28 + $0x1a0] sm:$0x1] }
  0xbc   : > { %v1209_v60 = vrot.slane %v1208_v49, 4  ;;  %v1231_v17 = vrot.slane %v1229_v2, 5  ;;  %v1237_v10 = vrot.slane %v1235_v62, 5  ;;  %v1239_v23 = vshrl.u32 %v274_v59, 16 }
  0xbd   : > { %v1194_v3 = vsel %vm7936_vm3, %v1189_v7, %v1193_v6  ;;  %v1204_v0 = vsel %vm7936_vm3, %v1199_v9, %v1203_v12  ;;  %v1219_v13 = vrot.slane %v1218_v28, 4  ;;  %v8498_v46 = vcombine.low %v273_v52, %v274_v59  ;;  %v278_v52 = vld [vmem:[%s7919_s28 + $0x1a4] sm:$0xf]  ;;  %v279_v9 = vld [vmem:[%s7919_s28 + $0x1a8] sm:$0xf] }
  0xbe   : > { %v8500_v57 = vcombine.low %v1194_v3, %v1204_v0  ;;  %v1214_v61 = vsel %vm7936_vm3, %v1209_v60, %v1213_v55  ;;  %v1245_v48 = vshll.u32 %v275_v40, 16  ;;  %v1249_v6 = vshrl.u32 %v275_v40, 16 }
  0xbf   : > { %10385 = vst [vmem:[#allocation54_spill] sm:$0xff] %v8498_v46  ;;  %v1224_v7 = vsel %vm7936_vm3, %v1219_v13, %v1223_v31  ;;  %v1241_v49 = vrot.slane %v1239_v23, 4  ;;  %7464 = vmatprep.mubr.msk.bf16.mxu1 %vm1962_vm2, %v8498_v46  ;;  %v1255_v12 = vshll.u32 %v276_v58, 16  ;;  %v1259_v2 = vshrl.u32 %v276_v58, 16  ;;  %v281_v46 = vld [vmem:[%s7919_s28 + $0x1b0] sm:$0xf] }
  0xc0   : > { %10386 = vst [vmem:[#allocation55_spill] sm:$0xff] %v8500_v57  ;;  %7328 = vmatprep.mubr.msk.bf16.mxu0 %vm1962_vm2, %v8500_v57  ;;  %v8512_v59 = vcombine.low %v1214_v61, %v1224_v7  ;;  %v1247_v62 = vrot.slane %v1245_v48, 5  ;;  %v1251_v60 = vrot.slane %v1249_v6, 4  ;;  %v8514_v55 = vcombine.low %v275_v40, %v276_v58  ;;  %v283_v57 = vld [vmem:[%s7919_s28 + $0x1b8] sm:$0xf] }
  0xc1   : > { %v1257_v28 = vrot.slane %v1255_v12, 5  ;;  %v1261_v31 = vrot.slane %v1259_v2, 4  ;;  %v1232_v3 = vor.u32 %v1231_v17, %v1228_v32  ;;  %v1242_v0 = vor.u32 %v1241_v49, %v1237_v10  ;;  %v280_v12 = vld [vmem:[%s7919_s28 + $0x1ac] sm:$0xf] }
  0xc2   : > { %10387 = vst [vmem:[#allocation56_spill] sm:$0xff] %v8512_v59  ;;  %10388 = vst [vmem:[#allocation57_spill] sm:$0xff] %v8514_v55  ;;  %7329 = vmatmul.mubr.msk.bf16.gmra.mxu0 %vm1962_vm2, %v8512_v59  ;;  %7465 = vmatmul.mubr.msk.bf16.gmra.mxu1 %vm1962_vm2, %v8514_v55  ;;  %v1252_v13 = vor.u32 %v1251_v60, %v1247_v62  ;;  %v1265_v23 = vshll.u32 %v277_v26, 16  ;;  %v1270_v61 = vshrl.u32 %v278_v52, 16  ;;  %v1273_v48 = vshll.u32 %v278_v52, 16 }
  0xc3   : > { %v1233_v6 = vrot.slane %v1232_v3, 4  ;;  %v1243_v40 = vrot.slane %v1242_v0, 4  ;;  %v1262_v58 = vor.u32 %v1261_v31, %v1257_v28  ;;  %v1279_v7 = vshll.u32 %v279_v9, 16 }
  0xc4   : > { %v1253_v2 = vrot.slane %v1252_v13, 4  ;;  %v1267_v17 = vrot.slane %v1265_v23, 5  ;;  %v1272_v32 = vrot.slane %v1270_v61, 4  ;;  %v1275_v49 = vrot.slane %v1273_v48, 5  ;;  %v282_v23 = vld [vmem:[%s7919_s28 + $0x1b4] sm:$0x1] }
  0xc5   : > { %v1238_v59 = vsel %vm7936_vm3, %v1233_v6, %v1237_v10  ;;  %v1248_v26 = vsel %vm7936_vm3, %v1243_v40, %v1247_v62  ;;  %v1263_v60 = vrot.slane %v1262_v58, 4  ;;  %v1281_v55 = vrot.slane %v1279_v7, 5 }
  0xc6   : > { %v8527_v3 = vcombine.low %v1238_v59, %v1248_v26  ;;  %v1258_v31 = vsel %vm7936_vm3, %v1253_v2, %v1257_v28  ;;  %v1283_v0 = vshrl.u32 %v279_v9, 16  ;;  %v8531_v13 = vcombine.low %v278_v52, %v279_v9  ;;  %v284_v9 = vld [vmem:[%s7919_s28 + $0x1bc] sm:$0xf] }
  0xc7   : > { %v1268_v61 = vsel %vm7936_vm3, %v1263_v60, %v1267_v17  ;;  %v1289_v48 = vshll.u32 %v280_v12, 16  ;;  %v1293_v10 = vshrl.u32 %v280_v12, 16  ;;  %v1299_v6 = vshll.u32 %v281_v46, 16 }
  0xc8   : > { %10389 = vst [vmem:[#allocation58_spill] sm:$0xff] %v8527_v3  ;;  %10390 = vst [vmem:[#allocation59_spill] sm:$0xff] %v8531_v13  ;;  %7332 = vmatprep.mubr.msk.bf16.mxu0 %vm1962_vm2, %v8527_v3  ;;  %v8539_v59 = vcombine.low %v1258_v31, %v1268_v61  ;;  %v1285_v62 = vrot.slane %v1283_v0, 4  ;;  %7468 = vmatprep.mubr.msk.bf16.mxu1 %vm1962_vm2, %v8531_v13  ;;  %v1303_v28 = vshrl.u32 %v281_v46, 16  ;;  %v1309_v60 = vshll.u32 %v282_v23, 16 }
  0xc9   : > { %v8543_v52 = vcombine.low %v280_v12, %v281_v46  ;;  %v1291_v40 = vrot.slane %v1289_v48, 5  ;;  %v1295_v58 = vrot.slane %v1293_v10, 4  ;;  %v1301_v7 = vrot.slane %v1299_v6, 5 }
  0xca   : > { %10391 = vst [vmem:[#allocation60_spill] sm:$0xff] %v8539_v59  ;;  %v1276_v2 = vor.u32 %v1275_v49, %v1272_v32  ;;  %7333 = vmatmul.mubr.msk.bf16.gmra.mxu0 %vm1962_vm2, %v8539_v59  ;;  %v1305_v17 = vrot.slane %v1303_v28, 4  ;;  %v1286_v26 = vor.u32 %v1285_v62, %v1281_v55  ;;  %v1314_v31 = vshrl.u32 %v283_v57, 16  ;;  %v285_v49 = vld [vmem:[%s7919_s28 + $0x1c0] sm:$0xf] }
  0xcb   : > { %10392 = vst [vmem:[#allocation61_spill] sm:$0xff] %v8543_v52  ;;  %7469 = vmatmul.mubr.msk.bf16.gmra.mxu1 %vm1962_vm2, %v8543_v52  ;;  %v1296_v46 = vor.u32 %v1295_v58, %v1291_v40  ;;  %v1317_v12 = vshll.u32 %v283_v57, 16  ;;  %v1323_v61 = vshll.u32 %v284_v9, 16  ;;  %v1311_v6 = vrot.slane %v1309_v60, 5  ;;  %v286_v62 = vld [vmem:[%s7919_s28 + $0x1c4] sm:$0xf] }
  0xcc   : > { %v1277_v0 = vrot.slane %v1276_v2, 4  ;;  %v1287_v48 = vrot.slane %v1286_v26, 4  ;;  %v1306_v10 = vor.u32 %v1305_v17, %v1301_v7  ;;  %v1316_v32 = vrot.slane %v1314_v31, 4  ;;  %v287_v31 = vld [vmem:[%s7919_s28 + $0x1c8] sm:$0x1] }
  0xcd   : > { %v1297_v13 = vrot.slane %v1296_v46, 4  ;;  %v1319_v59 = vrot.slane %v1317_v12, 5  ;;  %v1325_v52 = vrot.slane %v1323_v61, 5  ;;  %v1327_v2 = vshrl.u32 %v284_v9, 16 }
  0xce   : > { %v1282_v28 = vsel %vm7936_vm3, %v1277_v0, %v1281_v55  ;;  %v1292_v23 = vsel %vm7936_vm3, %v1287_v48, %v1291_v40  ;;  %v1307_v58 = vrot.slane %v1306_v10, 4  ;;  %v8556_v3 = vcombine.low %v283_v57, %v284_v9  ;;  %v288_v57 = vld [vmem:[%s7919_s28 + $0x1cc] sm:$0xf]  ;;  %v289_v48 = vld [vmem:[%s7919_s28 + $0x1d0] sm:$0xf] }
  0xcf   : > { %v8558_v17 = vcombine.low %v1282_v28, %v1292_v23  ;;  %v1302_v26 = vsel %vm7936_vm3, %v1297_v13, %v1301_v7  ;;  %v1333_v60 = vshll.u32 %v285_v49, 16  ;;  %v1337_v55 = vshrl.u32 %v285_v49, 16 }
  0xd0   : > { %10393 = vst [vmem:[#allocation62_spill] sm:$0xff] %v8556_v3  ;;  %v1312_v0 = vsel %vm7936_vm3, %v1307_v58, %v1311_v6  ;;  %v1329_v46 = vrot.slane %v1327_v2, 4  ;;  %7472 = vmatprep.mubr.msk.bf16.mxu1 %vm1962_vm2, %v8556_v3  ;;  %v1343_v40 = vshll.u32 %v286_v62, 16  ;;  %v1347_v12 = vshrl.u32 %v286_v62, 16  ;;  %v291_v3 = vld [vmem:[%s7919_s28 + $0x1d8] sm:$0xf] }
  0xd1   : > { %10394 = vst [vmem:[#allocation63_spill] sm:$0xff] %v8558_v17  ;;  %7336 = vmatprep.mubr.msk.bf16.mxu0 %vm1962_vm2, %v8558_v17  ;;  %v8570_v9 = vcombine.low %v1302_v26, %v1312_v0  ;;  %v1335_v61 = vrot.slane %v1333_v60, 5  ;;  %v1339_v13 = vrot.slane %v1337_v55, 4  ;;  %v8572_v7 = vcombine.low %v285_v49, %v286_v62 }
  0xd2   : > { %v1345_v10 = vrot.slane %v1343_v40, 5  ;;  %v1349_v6 = vrot.slane %v1347_v12, 4  ;;  %v1320_v28 = vor.u32 %v1319_v59, %v1316_v32  ;;  %v1330_v23 = vor.u32 %v1329_v46, %v1325_v52  ;;  %v290_v40 = vld [vmem:[%s7919_s28 + $0x1d4] sm:$0xf] }
  0xd3   : > { %10395 = vst [vmem:[#allocation64_spill] sm:$0xff] %v8570_v9  ;;  %10396 = vst [vmem:[#allocation65_spill] sm:$0xff] %v8572_v7  ;;  %7337 = vmatmul.mubr.msk.bf16.gmra.mxu0 %vm1962_vm2, %v8570_v9  ;;  %7473 = vmatmul.mubr.msk.bf16.gmra.mxu1 %vm1962_vm2, %v8572_v7  ;;  %v1340_v58 = vor.u32 %v1339_v13, %v1335_v61  ;;  %v1353_v2 = vshll.u32 %v287_v31, 16  ;;  %v1358_v26 = vshrl.u32 %v288_v57, 16  ;;  %v1361_v60 = vshll.u32 %v288_v57, 16 }
  0xd4   : > { %v1321_v55 = vrot.slane %v1320_v28, 4  ;;  %v1331_v49 = vrot.slane %v1330_v23, 4  ;;  %v1350_v62 = vor.u32 %v1349_v6, %v1345_v10  ;;  %v1367_v0 = vshll.u32 %v289_v48, 16 }
  0xd5   : > { %v1341_v12 = vrot.slane %v1340_v58, 4  ;;  %v1355_v59 = vrot.slane %v1353_v2, 5  ;;  %v1360_v32 = vrot.slane %v1358_v26, 4  ;;  %v1363_v46 = vrot.slane %v1361_v60, 5  ;;  %v292_v2 = vld [vmem:[%s7919_s28 + $0x1dc] sm:$0x1] }
  0xd6   : > { %v1326_v9 = vsel %vm7936_vm3, %v1321_v55, %v1325_v52  ;;  %v1336_v31 = vsel %vm7936_vm3, %v1331_v49, %v1335_v61  ;;  %v1351_v13 = vrot.slane %v1350_v62, 4  ;;  %v1369_v7 = vrot.slane %v1367_v0, 5  ;;  %v293_v49 = vld [vmem:[%s7919_s28 + $0x1e0] sm:$0xf]  ;;  %v294_v62 = vld [vmem:[%s7919_s28 + $0x1e4] sm:$0xf] }
  0xd7   : > { %v8585_v28 = vcombine.low %v1326_v9, %v1336_v31  ;;  %v1346_v6 = vsel %vm7936_vm3, %v1341_v12, %v1345_v10  ;;  %v1371_v23 = vshrl.u32 %v289_v48, 16  ;;  %v8589_v58 = vcombine.low %v288_v57, %v289_v48  ;;  %v8592_v26 = vpop.f32.mrf.mxu1 }
  0xd8   : > { %v1356_v52 = vsel %vm7936_vm3, %v1351_v13, %v1355_v59  ;;  %v1377_v60 = vshll.u32 %v290_v40, 16  ;;  %v1381_v55 = vshrl.u32 %v290_v40, 16  ;;  %v1387_v61 = vshll.u32 %v291_v3, 16 }
  0xd9   : > { %10397 = vst [vmem:[#allocation66_spill] sm:$0xff] %v8585_v28  ;;  %10398 = vst [vmem:[#allocation67_spill] sm:$0xff] %v8589_v58  ;;  %7340 = vmatprep.mubr.msk.bf16.mxu0 %vm1962_vm2, %v8585_v28  ;;  %v8599_v9 = vcombine.low %v1346_v6, %v1356_v52  ;;  %v1373_v10 = vrot.slane %v1371_v23, 4  ;;  %7476 = vmatprep.mubr.msk.bf16.mxu1 %vm1962_vm2, %v8589_v58  ;;  %v1391_v57 = vshrl.u32 %v291_v3, 16  ;;  %v3258_v0 = vpop.f32.mrf.mxu1  ;;  %v1397_v23 = vshll.u32 %v292_v2, 16 }
  0xda   : > { %v8603_v48 = vcombine.low %v290_v40, %v291_v3  ;;  %v1379_v12 = vrot.slane %v1377_v60, 5  ;;  %v1383_v59 = vrot.slane %v1381_v55, 4  ;;  %v1389_v31 = vrot.slane %v1387_v61, 5 }
  0xdb   : > { %10399 = vst [vmem:[#allocation68_spill] sm:$0xff] %v8599_v9  ;;  %v1364_v13 = vor.u32 %v1363_v46, %v1360_v32  ;;  %7341 = vmatmul.mubr.msk.bf16.gmra.mxu0 %vm1962_vm2, %v8599_v9  ;;  %v1393_v28 = vrot.slane %v1391_v57, 4  ;;  %v1374_v6 = vor.u32 %v1373_v10, %v1369_v7  ;;  %v1402_v52 = vshrl.u32 %v293_v49, 16  ;;  %v8610_v3 = vpop.f32.mrf.mxu1 }
  0xdc   : > { %10400 = vst [vmem:[#allocation69_spill] sm:$0xff] %v8603_v48  ;;  %7477 = vmatmul.mubr.msk.bf16.gmra.mxu1 %vm1962_vm2, %v8603_v48  ;;  %v1384_v58 = vor.u32 %v1383_v59, %v1379_v12  ;;  %v1405_v60 = vshll.u32 %v293_v49, 16  ;;  %v1411_v55 = vshll.u32 %v294_v62, 16  ;;  %v1399_v46 = vrot.slane %v1397_v23, 5 }
  0xdd   : > { %v1365_v40 = vrot.slane %v1364_v13, 4  ;;  %v1375_v61 = vrot.slane %v1374_v6, 4  ;;  %v1394_v32 = vor.u32 %v1393_v28, %v1389_v31  ;;  %v1404_v17 = vrot.slane %v1402_v52, 4  ;;  %v8613_v9 = vpop.f32.mrf.mxu1 }
  0xde   : > { %v1385_v10 = vrot.slane %v1384_v58, 4  ;;  %v1407_v2 = vrot.slane %v1405_v60, 5  ;;  %v1413_v48 = vrot.slane %v1411_v55, 5  ;;  %v1415_v22 = vshrl.u32 %v294_v62, 16  ;;  %v297_v55 = vld [vmem:[%s7919_s28 + $0x1f0] sm:$0x1] }
  0xdf   : > { %v1370_v57 = vsel %vm7936_vm3, %v1365_v40, %v1369_v7  ;;  %v1380_v59 = vsel %vm7936_vm3, %v1375_v61, %v1379_v12  ;;  %v1395_v13 = vrot.slane %v1394_v32, 4  ;;  %v8620_v6 = vcombine.low %v293_v49, %v294_v62 }
  0xe0   : > { %v8622_v28 = vcombine.low %v1370_v57, %v1380_v59  ;;  %v1390_v23 = vsel %vm7936_vm3, %v1385_v10, %v1389_v31  ;;  %v1421_v52 = vshll.u32 %v295_v27, 16  ;;  %v1425_v7 = vshrl.u32 %v295_v27, 16  ;;  %v8626_v58 = vpop.f32.mrf.mxu1  ;;  %v298_v10 = vld [vmem:[%s7919_s28 + $0x1f4] sm:$0xf] }
  0xe1   : > { %10401 = vst [vmem:[#allocation70_spill] sm:$0xff] %v8620_v6  ;;  %v1400_v40 = vsel %vm7936_vm3, %v1395_v13, %v1399_v46  ;;  %v1417_v60 = vrot.slane %v1415_v22, 4  ;;  %7480 = vmatprep.mubr.msk.bf16.mxu1 %vm1962_vm2, %v8620_v6  ;;  %v1431_v12 = vshll.u32 %v296_v42, 16  ;;  %v1435_v49 = vshrl.u32 %v296_v42, 16  ;;  %v7254_v62 = vpop.f32.mrf.mxu0 }
  0xe2   : > { %10402 = vst [vmem:[#allocation71_spill] sm:$0xff] %v8622_v28  ;;  %7344 = vmatprep.mubr.msk.bf16.mxu0 %vm1962_vm2, %v8622_v28  ;;  %v8635_v31 = vcombine.low %v1390_v23, %v1400_v40  ;;  %v1423_v61 = vrot.slane %v1421_v52, 5  ;;  %v1427_v32 = vrot.slane %v1425_v7, 4  ;;  %v8637_v57 = vcombine.low %v295_v27, %v296_v42  ;;  %v8640_v46 = vpop.f32.mrf.mxu1 }
  0xe3   : > { %v1433_v22 = vrot.slane %v1431_v12, 5  ;;  %v1437_v59 = vrot.slane %v1435_v49, 4  ;;  %v1408_v13 = vor.u32 %v1407_v2, %v1404_v17  ;;  %v1418_v6 = vor.u32 %v1417_v60, %v1413_v48  ;;  %v2189_v45 = vpop.f32.mrf.mxu0 }
  0xe4   : > { %10403 = vst [vmem:[#allocation72_spill] sm:$0xff] %v8635_v31  ;;  %10404 = vst [vmem:[#allocation73_spill] sm:$0xff] %v8637_v57  ;;  %7345 = vmatmul.mubr.msk.bf16.gmra.mxu0 %vm1962_vm2, %v8635_v31  ;;  %7481 = vmatmul.mubr.msk.bf16.gmra.mxu1 %vm1962_vm2, %v8637_v57  ;;  %v8648_v23 = vadd.f32 %v8592_v26, %v7254_v62  ;;  %v1428_v42 = vor.u32 %v1427_v32, %v1423_v61  ;;  %v1441_v27 = vshll.u32 %v297_v55, 16  ;;  %v8652_v7 = vpop.f32.mrf.mxu1  ;;  %v300_v55 = vld [vmem:[%s7919_s28 + $0x1fc] sm:$0xf] }
  0xe5   : > { %v8650_v52 = vadd.f32 %v3258_v0, %v2189_v45  ;;  %v1409_v17 = vrot.slane %v1408_v13, 4  ;;  %v1419_v2 = vrot.slane %v1418_v6, 4  ;;  %v1438_v40 = vor.u32 %v1437_v59, %v1433_v22  ;;  %v7255_v12 = vpop.f32.mrf.mxu0  ;;  %v301_v32 = vld [vmem:[%s7919_s28 + $0x200] sm:$0xf] }
  0xe6   : > { %10405 = vst [vmem:[#allocation74_spill] sm:$0xff] %v8648_v23  ;;  %v1446_v60 = vshrl.u32 %v298_v10, 16  ;;  %v1429_v49 = vrot.slane %v1428_v42, 4  ;;  %v1443_v31 = vrot.slane %v1441_v27, 5  ;;  %v1449_v28 = vshll.u32 %v298_v10, 16  ;;  %v8654_v34 = vpop.f32.mrf.mxu1 }
  0xe7   : > { %10406 = vst [vmem:[#allocation75_spill] sm:$0xff] %v8650_v52  ;;  %v1455_v57 = vshll.u32 %v299_v16, 16  ;;  %v1414_v26 = vsel %vm7936_vm3, %v1409_v17, %v1413_v48  ;;  %v1424_v45 = vsel %vm7936_vm3, %v1419_v2, %v1423_v61  ;;  %v1439_v0 = vrot.slane %v1438_v40, 4  ;;  %v2192_v6 = vpop.f32.mrf.mxu0 }
  0xe8   : > { %v1448_v62 = vrot.slane %v1446_v60, 4  ;;  %v8662_v59 = vcombine.low %v1414_v26, %v1424_v45  ;;  %v1434_v13 = vsel %vm7936_vm3, %v1429_v49, %v1433_v22  ;;  %v1451_v42 = vrot.slane %v1449_v28, 5  ;;  %v302_v49 = vld [vmem:[%s7919_s28 + $0x204] sm:$0x1]  ;;  %v303_v26 = vld [vmem:[%s7919_s28 + $0x208] sm:$0xf] }
  0xe9   : > { %v1457_v27 = vrot.slane %v1455_v57, 5  ;;  %v1444_v52 = vsel %vm7936_vm3, %v1439_v0, %v1443_v31  ;;  %v1459_v48 = vshrl.u32 %v299_v16, 16  ;;  %v8668_v17 = vcombine.low %v298_v10, %v299_v16  ;;  %v7258_v2 = vpop.f32.mrf.mxu0  ;;  %v8673_v40 = vpop.f32.mrf.mxu1 }
  0xea   : > { %10407 = vst [vmem:[#allocation76_spill] sm:$0xff] %v8662_v59  ;;  %v8671_v61 = vadd.f32 %v8610_v3, %v7255_v12  ;;  %7348 = vmatprep.mubr.msk.bf16.mxu0 %vm1962_vm2, %v8662_v59  ;;  %v8677_v60 = vcombine.low %v1434_v13, %v1444_v52  ;;  %v1465_v28 = vshll.u32 %v300_v55, 16  ;;  %v1469_v57 = vshrl.u32 %v300_v55, 16 }
  0xeb   : > { %10408 = vst [vmem:[#allocation77_spill] sm:$0xff] %v8668_v17  ;;  %v1475_v22 = vshll.u32 %v301_v32, 16  ;;  %v1461_v31 = vrot.slane %v1459_v48, 4  ;;  %7484 = vmatprep.mubr.msk.bf16.mxu1 %vm1962_vm2, %v8668_v17  ;;  %v1479_v16 = vshrl.u32 %v301_v32, 16  ;;  %v8682_v3 = vcombine.low %v300_v55, %v301_v32  ;;  %v2205_v12 = vpop.f32.mrf.mxu0  ;;  %v8688_v45 = vpop.f32.mrf.mxu1 }
  0xec   : > { %10409 = vst [vmem:[#allocation78_spill] sm:$0xff] %v8671_v61  ;;  %10410 = vst [vmem:[#allocation79_spill] sm:$0xff] %v8677_v60  ;;  %v8685_v10 = vadd.f32 %v8613_v9, %v2192_v6  ;;  %7349 = vmatmul.mubr.msk.bf16.gmra.mxu0 %vm1962_vm2, %v8677_v60  ;;  %v1467_v52 = vrot.slane %v1465_v28, 5  ;;  %v1471_v0 = vrot.slane %v1469_v57, 4  ;;  %v1452_v48 = vor.u32 %v1451_v42, %v1448_v62  ;;  %v304_v6 = vld [vmem:[%s7919_s28 + $0x20c] sm:$0xf] }
  0xed   : > { %10411 = vst [vmem:[#allocation80_spill] sm:$0xff] %v8682_v3  ;;  %v1477_v13 = vrot.slane %v1475_v22, 5  ;;  %v1481_v61 = vrot.slane %v1479_v16, 4  ;;  %7485 = vmatmul.mubr.msk.bf16.gmra.mxu1 %vm1962_vm2, %v8682_v3  ;;  %v1462_v55 = vor.u32 %v1461_v31, %v1457_v27  ;;  %v8695_v32 = vadd.f32 %v8626_v58, %v7258_v2  ;;  %v8698_v23 = vpop.f32.mrf.mxu1 }
  0xee   : > { %10412 = vst [vmem:[#allocation81_spill] sm:$0xff] %v8685_v10  ;;  %v1485_v9 = vshll.u32 %v302_v49, 16  ;;  %v7259_v10 = vpop.f32.mrf.mxu0  ;;  %v1453_v17 = vrot.slane %v1452_v48, 4  ;;  %v1472_v60 = vor.u32 %v1471_v0, %v1467_v52  ;;  %v8701_v28 = vadd.f32 %v8640_v46, %v2205_v12  ;;  %v305_v48 = vld [vmem:[%s7919_s28 + $0x210] sm:$0xf] }
  0xef   : > { %10413 = vst [vmem:[#allocation82_spill] sm:$0xff] %v8695_v32  ;;  %v1490_v62 = vshrl.u32 %v303_v26, 16  ;;  %v1463_v42 = vrot.slane %v1462_v55, 4  ;;  %v1482_v57 = vor.u32 %v1481_v61, %v1477_v13  ;;  %v1493_v31 = vshll.u32 %v303_v26, 16  ;;  %v8703_v58 = vpop.f32.mrf.mxu1  ;;  %v306_v55 = vld [vmem:[%s7919_s28 + $0x214] sm:$0xf] }
  0xf0   : > { %10414 = vst [vmem:[#allocation83_spill] sm:$0xff] %v8701_v28  ;;  %v1487_v22 = vrot.slane %v1485_v9, 5  ;;  %v2208_v16 = vpop.f32.mrf.mxu0  ;;  %v1458_v2 = vsel %vm7936_vm3, %v1453_v17, %v1457_v27  ;;  %v1473_v49 = vrot.slane %v1472_v60, 4  ;;  %v1499_v3 = vshll.u32 %v304_v6, 16 }
  0xf1   : > { %v1492_v32 = vrot.slane %v1490_v62, 4  ;;  %v1468_v46 = vsel %vm7936_vm3, %v1463_v42, %v1467_v52  ;;  %v1483_v12 = vrot.slane %v1482_v57, 4  ;;  %v1495_v0 = vrot.slane %v1493_v31, 5  ;;  %v8711_v9 = vpop.f32.mrf.mxu1 }
  0xf2   : > { %v1503_v28 = vshrl.u32 %v304_v6, 16  ;;  %v7262_v61 = vpop.f32.mrf.mxu0  ;;  %v8713_v59 = vcombine.low %v1458_v2, %v1468_v46  ;;  %v1478_v27 = vsel %vm7936_vm3, %v1473_v49, %v1477_v13  ;;  %v1501_v17 = vrot.slane %v1499_v3, 5  ;;  %v308_v49 = vld [vmem:[%s7919_s28 + $0x21c] sm:$0xf] }
  0xf3   : > { %v8717_v60 = vcombine.low %v303_v26, %v304_v6  ;;  %v1488_v62 = vsel %vm7936_vm3, %v1483_v12, %v1487_v22  ;;  %v8722_v42 = vadd.f32 %v8652_v7, %v7259_v10  ;;  %v1509_v57 = vshll.u32 %v305_v48, 16  ;;  %v8724_v56 = vpop.f32.mrf.mxu1  ;;  %v307_v6 = vld [vmem:[%s7919_s28 + $0x218] sm:$0x1] }
  0xf4   : > { %10415 = vst [vmem:[#allocation84_spill] sm:$0xff] %v8713_v59  ;;  %v1505_v52 = vrot.slane %v1503_v28, 4  ;;  %v2221_v31 = vpop.f32.mrf.mxu0  ;;  %7352 = vmatprep.mubr.msk.bf16.mxu0 %vm1962_vm2, %v8713_v59  ;;  %v8728_v2 = vcombine.low %v1478_v27, %v1488_v62  ;;  %v1513_v3 = vshrl.u32 %v305_v48, 16  ;;  %v1519_v26 = vshll.u32 %v306_v55, 16  ;;  %v309_v59 = vld [vmem:[%s7919_s28 + $0x220] sm:$0xf] }
  0xf5   : > { %10416 = vst [vmem:[#allocation85_spill] sm:$0xff] %v8717_v60  ;;  %10417 = vst [vmem:[#allocation86_spill] sm:$0xff] %v8722_v42  ;;  %7488 = vmatprep.mubr.msk.bf16.mxu1 %vm1962_vm2, %v8717_v60  ;;  %v1523_v13 = vshrl.u32 %v306_v55, 16  ;;  %v1511_v28 = vrot.slane %v1509_v57, 5  ;;  %v8733_v7 = vcombine.low %v305_v48, %v306_v55  ;;  %v8736_v10 = vadd.f32 %v8654_v34, %v2208_v16  ;;  %v8739_v12 = vpop.f32.mrf.mxu1 }
  0xf6   : > { %10418 = vst [vmem:[#allocation87_spill] sm:$0xff] %v8728_v2  ;;  %v1496_v22 = vor.u32 %v1495_v0, %v1492_v32  ;;  %v7263_v46 = vpop.f32.mrf.mxu0  ;;  %7353 = vmatmul.mubr.msk.bf16.gmra.mxu0 %vm1962_vm2, %v8728_v2  ;;  %v1515_v27 = vrot.slane %v1513_v3, 4  ;;  %v1521_v62 = vrot.slane %v1519_v26, 5  ;;  %v1506_v60 = vor.u32 %v1505_v52, %v1501_v17 }
  0xf7   : > { %10419 = vst [vmem:[#allocation88_spill] sm:$0xff] %v8733_v7  ;;  %10420 = vst [vmem:[#allocation89_spill] sm:$0xff] %v8736_v10  ;;  %v1525_v42 = vrot.slane %v1523_v13, 4  ;;  %7489 = vmatmul.mubr.msk.bf16.gmra.mxu1 %vm1962_vm2, %v8733_v7  ;;  %v8747_v34 = vadd.f32 %v8673_v40, %v7262_v61  ;;  %v1529_v32 = vshll.u32 %v307_v6, 16  ;;  %v8750_v16 = vadd.f32 %v8688_v45, %v2221_v31  ;;  %v8752_v55 = vpop.f32.mrf.mxu1 }
  0xf8   : > { %v1497_v48 = vrot.slane %v1496_v22, 4  ;;  %v2224_v0 = vpop.f32.mrf.mxu0  ;;  %v1507_v57 = vrot.slane %v1506_v60, 4  ;;  %v1516_v3 = vor.u32 %v1515_v27, %v1511_v28  ;;  %v1534_v52 = vshrl.u32 %v308_v49, 16 }
  0xf9   : > { %10421 = vst [vmem:[#allocation90_spill] sm:$0xff] %v8747_v34  ;;  %10422 = vst [vmem:[#allocation91_spill] sm:$0xff] %v8750_v16  ;;  %v1526_v26 = vor.u32 %v1525_v42, %v1521_v62  ;;  %v1531_v22 = vrot.slane %v1529_v32, 5  ;;  %v1537_v10 = vshll.u32 %v308_v49, 16  ;;  %v1543_v40 = vshll.u32 %v309_v59, 16 }
  0xfa   : > { %v1502_v13 = vsel %vm7936_vm3, %v1497_v48, %v1501_v17  ;;  %v1512_v61 = vsel %vm7936_vm3, %v1507_v57, %v1511_v28  ;;  %v1517_v6 = vrot.slane %v1516_v3, 4  ;;  %v1536_v31 = vrot.slane %v1534_v52, 4  ;;  %v310_v16 = vld [vmem:[%s7919_s28 + $0x224] sm:$0xf]  ;;  %v7266_v34 = vpop.f32.mrf.mxu0  ;;  %v8759_v7 = vpop.f32.mrf.mxu1  ;;  %v311_v17 = vld [vmem:[%s7919_s28 + $0x228] sm:$0xf] }
  0xfb   : > { %v1527_v45 = vrot.slane %v1526_v26, 4  ;;  %v8761_v60 = vcombine.low %v1502_v13, %v1512_v61  ;;  %v1539_v42 = vrot.slane %v1537_v10, 5  ;;  %v1545_v27 = vrot.slane %v1543_v40, 5  ;;  %v312_v40 = vld [vmem:[%s7919_s28 + $0x22c] sm:$0x1] }
  0xfc   : > { %v1547_v2 = vshrl.u32 %v309_v59, 16  ;;  %v1522_v48 = vsel %vm7936_vm3, %v1517_v6, %v1521_v62  ;;  %v8768_v32 = vcombine.low %v308_v49, %v309_v59  ;;  %v8771_v57 = vadd.f32 %v8698_v23, %v7263_v46  ;;  %v2237_v3 = vpop.f32.mrf.mxu0  ;;  %v8773_v26 = vpop.f32.mrf.mxu1 }
  0xfd   : > { %10423 = vst [vmem:[#allocation92_spill] sm:$0xff] %v8761_v60  ;;  %v1532_v28 = vsel %vm7936_vm3, %v1527_v45, %v1531_v22  ;;  %7356 = vmatprep.mubr.msk.bf16.mxu0 %vm1962_vm2, %v8761_v60  ;;  %v1553_v13 = vshll.u32 %v310_v16, 16  ;;  %v1557_v62 = vshrl.u32 %v310_v16, 16  ;;  %v1563_v59 = vshll.u32 %v311_v17, 16 }
  0xfe   : > { %10424 = vst [vmem:[#allocation93_spill] sm:$0xff] %v8768_v32  ;;  %10425 = vst [vmem:[#allocation94_spill] sm:$0xff] %v8771_v57  ;;  %v8777_v10 = vcombine.low %v1522_v48, %v1532_v28  ;;  %v1549_v52 = vrot.slane %v1547_v2, 4  ;;  %7492 = vmatprep.mubr.msk.bf16.mxu1 %vm1962_vm2, %v8768_v32  ;;  %v1567_v49 = vshrl.u32 %v311_v17, 16  ;;  %v8782_v23 = vcombine.low %v310_v16, %v311_v17  ;;  %v7267_v22 = vpop.f32.mrf.mxu0  ;;  %v8787_v61 = vpop.f32.mrf.mxu1  ;;  %v313_v28 = vld [vmem:[%s7919_s28 + $0x230] sm:$0xf] }
  0xff   : > { %v8785_v46 = vadd.f32 %v8703_v58, %v2224_v0  ;;  %v1555_v2 = vrot.slane %v1553_v13, 5  ;;  %v1559_v6 = vrot.slane %v1557_v62, 4  ;;  %v1540_v45 = vor.u32 %v1539_v42, %v1536_v31  ;;  %v314_v0 = vld [vmem:[%s7919_s28 + $0x234] sm:$0xf] }
 0x100   : > { %10426 = vst [vmem:[#allocation95_spill] sm:$0xff] %v8777_v10  ;;  %10427 = vst [vmem:[#allocation96_spill] sm:$0xff] %v8782_v23  ;;  %7357 = vmatmul.mubr.msk.bf16.gmra.mxu0 %vm1962_vm2, %v8777_v10  ;;  %v1550_v48 = vor.u32 %v1549_v52, %v1545_v27  ;;  %v1565_v57 = vrot.slane %v1563_v59, 5  ;;  %v1569_v32 = vrot.slane %v1567_v49, 4  ;;  %7493 = vmatmul.mubr.msk.bf16.gmra.mxu1 %vm1962_vm2, %v8782_v23  ;;  %v1573_v58 = vshll.u32 %v312_v40, 16  ;;  %v2240_v17 = vpop.f32.mrf.mxu0 }
 0x101   : > { %10428 = vst [vmem:[#allocation97_spill] sm:$0xff] %v8785_v46  ;;  %v8795_v16 = vadd.f32 %v8711_v9, %v7266_v34  ;;  %v8798_v46 = vpop.f32.mrf.mxu1  ;;  %v1541_v13 = vrot.slane %v1540_v45, 4  ;;  %v1560_v31 = vor.u32 %v1559_v6, %v1555_v2  ;;  %v8801_v42 = vadd.f32 %v8724_v56, %v2237_v3  ;;  %v316_v6 = vld [vmem:[%s7919_s28 + $0x23c] sm:$0xf] }
 0x102   : > { %v1551_v62 = vrot.slane %v1550_v48, 4  ;;  %v1570_v52 = vor.u32 %v1569_v32, %v1565_v57  ;;  %v1575_v59 = vrot.slane %v1573_v58, 5  ;;  %v1578_v49 = vshrl.u32 %v313_v28, 16  ;;  %v7270_v10 = vpop.f32.mrf.mxu0  ;;  %v315_v48 = vld [vmem:[%s7919_s28 + $0x238] sm:$0xf] }
 0x103   : > { %10429 = vst [vmem:[#allocation98_spill] sm:$0xff] %v8795_v16  ;;  %10430 = vst [vmem:[#allocation99_spill] sm:$0xff] %v8801_v42  ;;  %v1581_v23 = vshll.u32 %v313_v28, 16  ;;  %v8803_v9 = vpop.f32.mrf.mxu1  ;;  %v1546_v34 = vsel %vm7936_vm3, %v1541_v13, %v1545_v27  ;;  %v1561_v16 = vrot.slane %v1560_v31, 4  ;;  %v1587_v45 = vshll.u32 %v314_v0, 16 }
 0x104   : > { %v1556_v40 = vsel %vm7936_vm3, %v1551_v62, %v1555_v2  ;;  %v1571_v56 = vrot.slane %v1570_v52, 4  ;;  %v1580_v32 = vrot.slane %v1578_v49, 4  ;;  %v2253_v58 = vpop.f32.mrf.mxu0  ;;  %v1591_v13 = vshrl.u32 %v314_v0, 16 }
 0x105   : > { %v8811_v60 = vcombine.low %v1546_v34, %v1556_v40  ;;  %v1583_v3 = vrot.slane %v1581_v23, 5  ;;  %v8813_v42 = vpop.f32.mrf.mxu1  ;;  %v1566_v37 = vsel %vm7936_vm3, %v1561_v16, %v1565_v57  ;;  %v1589_v27 = vrot.slane %v1587_v45, 5  ;;  %v318_v45 = vld [vmem:[%s7919_s28 + $0x244] sm:$0xf] }
 0x106   : > { %v8817_v20 = vcombine.low %v313_v28, %v314_v0  ;;  %v1576_v2 = vsel %vm7936_vm3, %v1571_v56, %v1575_v59  ;;  %v8824_v23 = vadd.f32 %v8739_v12, %v7267_v22  ;;  %v1601_v62 = vshrl.u32 %v315_v48, 16  ;;  %v7271_v52 = vpop.f32.mrf.mxu0  ;;  %v317_v59 = vld [vmem:[%s7919_s28 + $0x240] sm:$0x1] }
 0x107   : > { %10431 = vst [vmem:[#allocation100_spill] sm:$0xff] %v8811_v60  ;;  %7360 = vmatprep.mubr.msk.bf16.mxu0 %vm1962_vm2, %v8811_v60  ;;  %v1607_v31 = vshll.u32 %v316_v6, 16  ;;  %v8826_v49 = vpop.f32.mrf.mxu1  ;;  %v8828_v57 = vcombine.low %v1566_v37, %v1576_v2  ;;  %v1593_v16 = vrot.slane %v1591_v13, 4  ;;  %v1611_v28 = vshrl.u32 %v316_v6, 16 }
 0x108   : > { %10432 = vst [vmem:[#allocation101_spill] sm:$0xff] %v8817_v20  ;;  %10433 = vst [vmem:[#allocation102_spill] sm:$0xff] %v8824_v23  ;;  %7496 = vmatprep.mubr.msk.bf16.mxu1 %vm1962_vm2, %v8817_v20  ;;  %v8832_v0 = vcombine.low %v315_v48, %v316_v6  ;;  %v8836_v12 = vadd.f32 %v8752_v55, %v2240_v17  ;;  %v1584_v22 = vor.u32 %v1583_v3, %v1580_v32  ;;  %v2256_v56 = vpop.f32.mrf.mxu0  ;;  %v319_v55 = vld [vmem:[%s7919_s28 + $0x248] sm:$0xf] }
 0x109   : > { %10434 = vst [vmem:[#allocation103_spill] sm:$0xff] %v8828_v57  ;;  %v1609_v34 = vrot.slane %v1607_v31, 5  ;;  %v1597_v40 = vshll.u32 %v315_v48, 16  ;;  %v8839_v23 = vpop.f32.mrf.mxu1  ;;  %7361 = vmatmul.mubr.msk.bf16.gmra.mxu0 %vm1962_vm2, %v8828_v57  ;;  %v1613_v37 = vrot.slane %v1611_v28, 4  ;;  %v1594_v6 = vor.u32 %v1593_v16, %v1589_v27 }
 0x10a   : > { %10435 = vst [vmem:[#allocation104_spill] sm:$0xff] %v8832_v0  ;;  %10436 = vst [vmem:[#allocation105_spill] sm:$0xff] %v8836_v12  ;;  %7497 = vmatmul.mubr.msk.bf16.gmra.mxu1 %vm1962_vm2, %v8832_v0  ;;  %v1603_v13 = vrot.slane %v1601_v62, 4  ;;  %v8846_v2 = vadd.f32 %v8759_v7, %v7270_v10  ;;  %v1585_v17 = vrot.slane %v1584_v22, 4  ;;  %v1617_v32 = vshll.u32 %v317_v59, 16 }
 0x10b   : > { %v1599_v48 = vrot.slane %v1597_v40, 5  ;;  %v8850_v3 = vadd.f32 %v8773_v26, %v2253_v58  ;;  %v1595_v31 = vrot.slane %v1594_v6, 4  ;;  %v1614_v12 = vor.u32 %v1613_v37, %v1609_v34  ;;  %v7274_v57 = vpop.f32.mrf.mxu0  ;;  %v8852_v0 = vpop.f32.mrf.mxu1  ;;  %v320_v22 = vld [vmem:[%s7919_s28 + $0x24c] sm:$0xf]  ;;  %v321_v6 = vld [vmem:[%s7919_s28 + $0x250] sm:$0xf] }
 0x10c   : > { %10437 = vst [vmem:[#allocation106_spill] sm:$0xff] %v8846_v2  ;;  %v1622_v28 = vshrl.u32 %v318_v45, 16  ;;  %v1625_v20 = vshll.u32 %v318_v45, 16  ;;  %v1590_v7 = vsel %vm7936_vm3, %v1585_v17, %v1589_v27  ;;  %v1619_v62 = vrot.slane %v1617_v32, 5 }
 0x10d   : > { %10438 = vst [vmem:[#allocation107_spill] sm:$0xff] %v8850_v3  ;;  %v1604_v10 = vor.u32 %v1603_v13, %v1599_v48  ;;  %v1631_v16 = vshll.u32 %v319_v55, 16  ;;  %v1600_v59 = vsel %vm7936_vm3, %v1595_v31, %v1599_v48  ;;  %v1615_v26 = vrot.slane %v1614_v12, 4  ;;  %v2269_v37 = vpop.f32.mrf.mxu0  ;;  %v8860_v3 = vpop.f32.mrf.mxu1 }
 0x10e   : > { %v1624_v58 = vrot.slane %v1622_v28, 4  ;;  %v1627_v40 = vrot.slane %v1625_v20, 5  ;;  %v8862_v60 = vcombine.low %v1590_v7, %v1600_v59  ;;  %v1635_v27 = vshrl.u32 %v319_v55, 16 }
 0x10f   : > { %v1605_v2 = vrot.slane %v1604_v10, 4  ;;  %v1633_v43 = vrot.slane %v1631_v16, 5  ;;  %v1620_v13 = vsel %vm7936_vm3, %v1615_v26, %v1619_v62  ;;  %v8866_v17 = vcombine.low %v318_v45, %v319_v55  ;;  %v7275_v20 = vpop.f32.mrf.mxu0  ;;  %v8871_v32 = vpop.f32.mrf.mxu1  ;;  %v322_v62 = vld [vmem:[%s7919_s28 + $0x254] sm:$0x1] }
 0x110   : > { %10439 = vst [vmem:[#allocation108_spill] sm:$0xff] %v8862_v60  ;;  %v8869_v48 = vadd.f32 %v8787_v61, %v7271_v52  ;;  %v1645_v12 = vshrl.u32 %v320_v22, 16  ;;  %7364 = vmatprep.mubr.msk.bf16.mxu0 %vm1962_vm2, %v8862_v60  ;;  %v1637_v28 = vrot.slane %v1635_v27, 4  ;;  %v1651_v7 = vshll.u32 %v321_v6, 16 }
 0x111   : > { %10440 = vst [vmem:[#allocation109_spill] sm:$0xff] %v8866_v17  ;;  %v1610_v31 = vsel %vm7936_vm3, %v1605_v2, %v1609_v34  ;;  %v1655_v10 = vshrl.u32 %v321_v6, 16  ;;  %7500 = vmatprep.mubr.msk.bf16.mxu1 %vm1962_vm2, %v8866_v17  ;;  %v8882_v61 = vcombine.low %v320_v22, %v321_v6  ;;  %v8885_v52 = vadd.f32 %v8798_v46, %v2256_v56  ;;  %v2272_v16 = vpop.f32.mrf.mxu0  ;;  %v8887_v59 = vpop.f32.mrf.mxu1 }
 0x112   : > { %10441 = vst [vmem:[#allocation110_spill] sm:$0xff] %v8869_v48  ;;  %v8878_v45 = vcombine.low %v1610_v31, %v1620_v13  ;;  %v1628_v55 = vor.u32 %v1627_v40, %v1624_v58  ;;  %v1653_v34 = vrot.slane %v1651_v7, 5  ;;  %v1638_v26 = vor.u32 %v1637_v28, %v1633_v43  ;;  %v323_v48 = vld [vmem:[%s7919_s28 + $0x258] sm:$0xf]  ;;  %v324_v58 = vld [vmem:[%s7919_s28 + $0x25c] sm:$0xf] }
 0x113   : > { %10443 = vst [vmem:[#allocation112_spill] sm:$0xff] %v8882_v61  ;;  %10444 = vst [vmem:[#allocation113_spill] sm:$0xff] %v8885_v52  ;;  %v1657_v2 = vrot.slane %v1655_v10, 4  ;;  %v1641_v27 = vshll.u32 %v320_v22, 16  ;;  %7501 = vmatmul.mubr.msk.bf16.gmra.mxu1 %vm1962_vm2, %v8882_v61  ;;  %v1647_v13 = vrot.slane %v1645_v12, 4  ;;  %v8895_v46 = vadd.f32 %v8803_v9, %v7274_v57  ;;  %v7278_v40 = vpop.f32.mrf.mxu0  ;;  %v8898_v31 = vpop.f32.mrf.mxu1 }
 0x114   : > { %10442 = vst [vmem:[#allocation111_spill] sm:$0xff] %v8878_v45  ;;  %7365 = vmatmul.mubr.msk.bf16.gmra.mxu0 %vm1962_vm2, %v8878_v45  ;;  %v1629_v6 = vrot.slane %v1628_v55, 4  ;;  %v1661_v56 = vshll.u32 %v322_v62, 16  ;;  %v1639_v22 = vrot.slane %v1638_v26, 4  ;;  %v8901_v10 = vadd.f32 %v8813_v42, %v2269_v37 }
 0x115   : > { %10445 = vst [vmem:[#allocation114_spill] sm:$0xff] %v8895_v46  ;;  %v1643_v28 = vrot.slane %v1641_v27, 5  ;;  %v1658_v7 = vor.u32 %v1657_v2, %v1653_v34  ;;  %v1666_v52 = vshrl.u32 %v323_v48, 16  ;;  %v1669_v9 = vshll.u32 %v323_v48, 16  ;;  %v2285_v57 = vpop.f32.mrf.mxu0  ;;  %v8905_v62 = vpop.f32.mrf.mxu1  ;;  %v325_v27 = vld [vmem:[%s7919_s28 + $0x260] sm:$0xf] }
 0x116   : > { %10446 = vst [vmem:[#allocation115_spill] sm:$0xff] %v8901_v10  ;;  %v1634_v55 = vsel %vm7936_vm3, %v1629_v6, %v1633_v43  ;;  %v1663_v12 = vrot.slane %v1661_v56, 5  ;;  %v1675_v26 = vshll.u32 %v324_v58, 16  ;;  %v326_v2 = vld [vmem:[%s7919_s28 + $0x264] sm:$0xf]  ;;  %v1679_v10 = vshrl.u32 %v324_v58, 16 }
 0x117   : > { %v1644_v46 = vsel %vm7936_vm3, %v1639_v22, %v1643_v28  ;;  %v1648_v61 = vor.u32 %v1647_v13, %v1643_v28  ;;  %v1659_v17 = vrot.slane %v1658_v7, 4  ;;  %v1668_v42 = vrot.slane %v1666_v52, 4  ;;  %v7279_v43 = vpop.f32.mrf.mxu0  ;;  %v8913_v6 = vpop.f32.mrf.mxu1 }
 0x118   : > { %v8911_v45 = vcombine.low %v1634_v55, %v1644_v46  ;;  %v1671_v37 = vrot.slane %v1669_v9, 5  ;;  %v1677_v14 = vrot.slane %v1675_v26, 5  ;;  %v8917_v22 = vcombine.low %v323_v48, %v324_v58  ;;  %v328_v26 = vld [vmem:[%s7919_s28 + $0x26c] sm:$0xf] }
 0x119   : > { %v1649_v56 = vrot.slane %v1648_v61, 4  ;;  %v1664_v60 = vsel %vm7936_vm3, %v1659_v17, %v1663_v12  ;;  %v1681_v13 = vrot.slane %v1679_v10, 4  ;;  %v8922_v52 = vadd.f32 %v8826_v49, %v7275_v20  ;;  %v2288_v7 = vpop.f32.mrf.mxu0  ;;  %v8924_v55 = vpop.f32.mrf.mxu1  ;;  %v327_v49 = vld [vmem:[%s7919_s28 + $0x268] sm:$0x1] }
 0x11a   : > { %10447 = vst [vmem:[#allocation116_spill] sm:$0xff] %v8911_v45  ;;  %10448 = vst [vmem:[#allocation117_spill] sm:$0xff] %v8917_v22  ;;  %7368 = vmatprep.mubr.msk.bf16.mxu0 %vm1962_vm2, %v8911_v45  ;;  %v1689_v46 = vshrl.u32 %v325_v27, 16  ;;  %v1695_v28 = vshll.u32 %v326_v2, 16  ;;  %7504 = vmatprep.mubr.msk.bf16.mxu1 %vm1962_vm2, %v8917_v22  ;;  %v1699_v17 = vshrl.u32 %v326_v2, 16  ;;  %v8930_v48 = vcombine.low %v325_v27, %v326_v2 }
 0x11b   : > { %10449 = vst [vmem:[#allocation118_spill] sm:$0xff] %v8922_v52  ;;  %v1654_v61 = vsel %vm7936_vm3, %v1649_v56, %v1653_v34  ;;  %v8933_v58 = vadd.f32 %v8839_v23, %v2272_v16  ;;  %v1672_v12 = vor.u32 %v1671_v37, %v1668_v42  ;;  %v1682_v9 = vor.u32 %v1681_v13, %v1677_v14  ;;  %v329_v2 = vld [vmem:[%s7919_s28 + $0x270] sm:$0xf] }
 0x11c   : > { %10450 = vst [vmem:[#allocation119_spill] sm:$0xff] %v8930_v48  ;;  %v8936_v20 = vcombine.low %v1654_v61, %v1664_v60  ;;  %v1697_v10 = vrot.slane %v1695_v28, 5  ;;  %v1701_v52 = vrot.slane %v1699_v17, 4  ;;  %7505 = vmatmul.mubr.msk.bf16.gmra.mxu1 %vm1962_vm2, %v8930_v48  ;;  %v1685_v34 = vshll.u32 %v325_v27, 16  ;;  %v7282_v45 = vpop.f32.mrf.mxu0  ;;  %v8945_v23 = vpop.f32.mrf.mxu1 }
 0x11d   : > { %10451 = vst [vmem:[#allocation120_spill] sm:$0xff] %v8933_v58  ;;  %v1691_v56 = vrot.slane %v1689_v46, 4  ;;  %v8942_v22 = vadd.f32 %v8852_v0, %v7278_v40  ;;  %v1673_v60 = vrot.slane %v1672_v12, 4  ;;  %v1683_v16 = vrot.slane %v1682_v9, 4 }
 0x11e   : > { %10452 = vst [vmem:[#allocation121_spill] sm:$0xff] %v8936_v20  ;;  %7369 = vmatmul.mubr.msk.bf16.gmra.mxu0 %vm1962_vm2, %v8936_v20  ;;  %v1705_v42 = vshll.u32 %v327_v49, 16  ;;  %v8950_v37 = vadd.f32 %v8860_v3, %v2285_v57  ;;  %v1687_v27 = vrot.slane %v1685_v34, 5  ;;  %v1702_v13 = vor.u32 %v1701_v52, %v1697_v10  ;;  %v2301_v40 = vpop.f32.mrf.mxu0  ;;  %v8952_v28 = vpop.f32.mrf.mxu1  ;;  %v331_v34 = vld [vmem:[%s7919_s28 + $0x278] sm:$0xf] }
 0x11f   : > { %10453 = vst [vmem:[#allocation122_spill] sm:$0xff] %v8942_v22  ;;  %v1710_v46 = vshrl.u32 %v328_v26, 16  ;;  %v1713_v0 = vshll.u32 %v328_v26, 16  ;;  %v1678_v61 = vsel %vm7936_vm3, %v1673_v60, %v1677_v14  ;;  %v1719_v22 = vshll.u32 %v329_v2, 16 }
 0x120   : > { %10454 = vst [vmem:[#allocation123_spill] sm:$0xff] %v8950_v37  ;;  %v1707_v17 = vrot.slane %v1705_v42, 5  ;;  %v1723_v12 = vshrl.u32 %v329_v2, 16  ;;  %v1688_v49 = vsel %vm7936_vm3, %v1683_v16, %v1687_v27  ;;  %v1692_v9 = vor.u32 %v1691_v56, %v1687_v27  ;;  %v330_v37 = vld [vmem:[%s7919_s28 + $0x274] sm:$0xf]  ;;  %v7283_v52 = vpop.f32.mrf.mxu0  ;;  %v7419_v58 = vpop.f32.mrf.mxu1 }
 0x121   : > { %v1703_v3 = vrot.slane %v1702_v13, 4  ;;  %v1712_v57 = vrot.slane %v1710_v46, 4  ;;  %v8960_v48 = vcombine.low %v1678_v61, %v1688_v49  ;;  %v1715_v20 = vrot.slane %v1713_v0, 5 }
 0x122   : > { %v1721_v36 = vrot.slane %v1719_v22, 5  ;;  %v1725_v24 = vrot.slane %v1723_v12, 4  ;;  %v1693_v50 = vrot.slane %v1692_v9, 4  ;;  %v8964_v60 = vcombine.low %v328_v26, %v329_v2  ;;  %v2304_v16 = vpop.f32.mrf.mxu0  ;;  %v3389_v42 = vpop.f32.mrf.mxu1  ;;  %v332_v2 = vld [vmem:[%s7919_s28 + $0x27c] sm:$0x1] }
 0x123   : > { %v1708_v14 = vsel %vm7936_vm3, %v1703_v3, %v1707_v17  ;;  %v8967_v56 = vadd.f32 %v8871_v32, %v7279_v43  ;;  %7372 = vmatprep.mubr.msk.bf16.mxu0 %vm1962_vm2, %v8960_v48  ;;  %v1733_v27 = vshrl.u32 %v330_v37, 16  ;;  %v1739_v13 = vshll.u32 %v331_v34, 16 }
 0x124   : > { %v1743_v46 = vshrl.u32 %v331_v34, 16  ;;  %v8971_v22 = vcombine.low %v330_v37, %v331_v34  ;;  %v1698_v0 = vsel %vm7936_vm3, %v1693_v50, %v1697_v10  ;;  %7508 = vmatprep.mubr.msk.bf16.mxu1 %vm1962_vm2, %v8964_v60  ;;  %v8978_v26 = vadd.f32 %v8887_v59, %v2288_v7  ;;  %v7286_v61 = vpop.f32.mrf.mxu0 }
 0x125   : > { %10455 = vst [vmem:[#allocation124_spill] sm:$0xff] %v8967_v56  ;;  %v1716_v32 = vor.u32 %v1715_v20, %v1712_v57  ;;  %v1726_v43 = vor.u32 %v1725_v24, %v1721_v36  ;;  %v7422_v17 = vpop.f32.mrf.mxu1  ;;  %v8981_v12 = vcombine.low %v1698_v0, %v1708_v14  ;;  %v1741_v49 = vrot.slane %v1739_v13, 5 }
 0x126   : > { %v1745_v9 = vrot.slane %v1743_v46, 4  ;;  %7509 = vmatmul.mubr.msk.bf16.gmra.mxu1 %vm1962_vm2, %v8971_v22  ;;  %v1729_v3 = vshll.u32 %v330_v37, 16  ;;  %v1735_v34 = vrot.slane %v1733_v27, 4  ;;  %v8986_v56 = vadd.f32 %v8898_v31, %v7282_v45  ;;  %v2317_v24 = vpop.f32.mrf.mxu0 }
 0x127   : > { %v1717_v50 = vrot.slane %v1716_v32, 4  ;;  %v1727_v10 = vrot.slane %v1726_v43, 4  ;;  %7648 = vmatprep.mubr.msk.bf16.mxu1 %vm1962_vm2, %v7972_v29  ;;  %v3402_v59 = vpop.f32.mrf.mxu1  ;;  %7373 = vmatmul.mubr.msk.bf16.gmra.mxu0 %vm1962_vm2, %v8981_v12  ;;  %v1749_v57 = vshll.u32 %v332_v2, 16  ;;  %v8993_v14 = vadd.f32 %v8905_v62, %v2301_v40 }
 0x128   : > { %v1731_v7 = vrot.slane %v1729_v3, 5  ;;  %v1746_v20 = vor.u32 %v1745_v9, %v1741_v49  ;;  %v8998_v45 = vadd.f32 %v8913_v6, %v7283_v52  ;;  %v9001_v31 = vadd.f32 %v8924_v55, %v2304_v16  ;;  %v7287_v27 = vpop.f32.mrf.mxu0 }
 0x129   : > { %v1722_v37 = vsel %vm7936_vm3, %v1717_v50, %v1721_v36  ;;  %v9004_v29 = vadd.f32 %v8945_v23, %v7286_v61  ;;  %v7423_v13 = vpop.f32.mrf.mxu1  ;;  %v1751_v40 = vrot.slane %v1749_v57, 5  ;;  %v9011_v36 = vadd.f32 %v8952_v28, %v2317_v24 }
 0x12a   : > { %v1732_v46 = vsel %vm7936_vm3, %v1727_v10, %v1731_v7  ;;  %v1736_v0 = vor.u32 %v1735_v34, %v1731_v7  ;;  %v1747_v62 = vrot.slane %v1746_v20, 4  ;;  %v9013_v6 = vadd.f32 %v7419_v58, %v7287_v27  ;;  %v2320_v55 = vpop.f32.mrf.mxu0 }
 0x12b   : > { %v9008_v32 = vcombine.low %v1722_v37, %v1732_v46  ;;  %v3405_v52 = vpop.f32.mrf.mxu1  ;;  %v9017_v43 = vadd.f32 %v3389_v42, %v2320_v55 }
 0x12c   : > { %v1737_v16 = vrot.slane %v1736_v0, 4  ;;  %v1752_v23 = vsel %vm7936_vm3, %v1747_v62, %v1751_v40 }
 0x12d   : > { %7376 = vmatprep.mubr.msk.bf16.mxu0 %vm1962_vm2, %v9008_v32  ;;  %v7290_v28 = vpop.f32.mrf.mxu0  ;;  %v7426_v58 = vpop.f32.mrf.mxu1 }
 0x12e   : > { %v1742_v2 = vsel %vm7936_vm3, %v1737_v16, %v1741_v49  ;;  %7649 = vmatmul.mubr.msk.bf16.vlgmr.msra.gmra.mxu1 %vm1962_vm2, %v7987_v41  ;;  %v9029_v9 = vadd.f32 %v7422_v17, %v7290_v28 }
 0x12f   : > { %v9025_v61 = vcombine.low %v1742_v2, %v1752_v23  ;;  %7652 = vmatprep.mubr.msk.bf16.mxu1 %vm1962_vm2, %v8005_v8  ;;  %v2333_v42 = vpop.f32.mrf.mxu0  ;;  %v3418_v3 = vpop.f32.mrf.mxu1 }
 0x130   : > { %v9033_v50 = vadd.f32 %v3402_v59, %v2333_v42 }
 0x131   : > { %7377 = vmatmul.mubr.msk.bf16.gmra.mxu0 %vm1962_vm2, %v9025_v61  ;;  %v7291_v41 = vpop.f32.mrf.mxu0  ;;  %v7427_v49 = vpop.f32.mrf.mxu1 }
 0x132   : > { %7516 = vmatprep.mubr.msk.bf16.mxu0 %vm1962_vm2, %v7946_v51  ;;  %v9037_v10 = vadd.f32 %v7423_v13, %v7291_v41 }
 0x133   : > { %v2336_v34 = vpop.f32.mrf.mxu0  ;;  %v3421_v24 = vpop.f32.mrf.mxu1 }
 0x134   : > { %v9039_v7 = vadd.f32 %v3405_v52, %v2336_v34 }
 0x135   : > { %v7294_v8 = vpop.f32.mrf.mxu0 }
 0x136   : > { %7653 = vmatmul.mubr.msk.bf16.gmra.mxu1 %vm1962_vm2, %v8017_v18  ;;  %v7430_v17 = vpop.f32.mrf.mxu1  ;;  %v9045_v59 = vadd.f32 %v7426_v58, %v7294_v8 }
 0x137   : > { %7656 = vmatprep.mubr.msk.bf16.mxu1 %vm1962_vm2, %v8036_v54  ;;  %v2349_v20 = vpop.f32.mrf.mxu0 }
 0x138   : > { %v3434_v51 = vpop.f32.mrf.mxu1  ;;  %v9049_v57 = vadd.f32 %v3418_v3, %v2349_v20 }
 0x139   : > { %7517 = vmatmul.mubr.msk.bf16.vlgmr.msra.gmra.mxu0 %vm1962_vm2, %v7956_v63  ;;  %v7295_v37 = vpop.f32.mrf.mxu0 }
 0x13a   : > { %7520 = vmatprep.mubr.msk.bf16.mxu0 %vm1962_vm2, %v7970_v4  ;;  %v7431_v27 = vpop.f32.mrf.mxu1  ;;  %v9053_v18 = vadd.f32 %v7427_v49, %v7295_v37 }
 0x13b   : > { %v2352_v13 = vpop.f32.mrf.mxu0 }
 0x13c   : > { %v3437_v46 = vpop.f32.mrf.mxu1  ;;  %v9055_v0 = vadd.f32 %v3421_v24, %v2352_v13 }
 0x13e   : > { %10456 = vst [vmem:[#allocation125_spill] sm:$0xff] %v9055_v0  ;;  %7657 = vmatmul.mubr.msk.bf16.gmra.mxu1 %vm1962_vm2, %v8048_v1  ;;  %v7298_v63 = vpop.f32.mrf.mxu0  ;;  %v7434_v54 = vpop.f32.mrf.mxu1 }
 0x13f   : > { %7660 = vmatprep.mubr.msk.bf16.mxu1 %vm1962_vm2, %v8063_v35  ;;  %v9061_v62 = vadd.f32 %v7430_v17, %v7298_v63  ;;  %v10469_v63 = vld [vmem:[#allocation2_spill] sm:$0xff] }
 0x140   : > { %v2365_v4 = vpop.f32.mrf.mxu0  ;;  %v3450_v40 = vpop.f32.mrf.mxu1 }
 0x141   : > { %10457 = vst [vmem:[#allocation126_spill] sm:$0xff] %v9061_v62  ;;  %7521 = vmatmul.mubr.msk.bf16.gmra.mxu0 %vm1962_vm2, %v7989_v44  ;;  %v9067_v55 = vadd.f32 %v3434_v51, %v2365_v4  ;;  %v10471_v4 = vld [vmem:[#allocation3_spill] sm:$0xff] }
 0x142   : > { %7524 = vmatprep.mubr.msk.bf16.mxu0 %vm1962_vm2, %v8009_v11  ;;  %v7299_v52 = vpop.f32.mrf.mxu0  ;;  %v7435_v16 = vpop.f32.mrf.mxu1 }
 0x143   : > { %10458 = vst [vmem:[#allocation127_spill] sm:$0xff] %v9067_v55  ;;  %v9069_v1 = vadd.f32 %v7431_v27, %v7299_v52 }
 0x144   : > { %v2368_v23 = vpop.f32.mrf.mxu0  ;;  %v3453_v35 = vpop.f32.mrf.mxu1 }
 0x145   : > { %10459 = vst [vmem:[#allocation128_spill] sm:$0xff] %v9069_v1  ;;  %v9073_v2 = vadd.f32 %v3437_v46, %v2368_v23  ;;  %v10634_v1 = vld [vmem:[#allocation111_spill] sm:$0xff] }
 0x146   : > { %7661 = vmatmul.mubr.msk.bf16.gmra.mxu1 %vm1962_vm2, %v8075_v47  ;;  %v7302_v44 = vpop.f32.mrf.mxu0 }
 0x147   : > { %10460 = vst [vmem:[#allocation129_spill] sm:$0xff] %v9073_v2  ;;  %7664 = vmatprep.mubr.msk.bf16.mxu1 %vm1962_vm2, %v8094_v25  ;;  %v7438_v28 = vpop.f32.mrf.mxu1  ;;  %v9077_v58 = vadd.f32 %v7434_v54, %v7302_v44 }
 0x148   : > { %v2381_v11 = vpop.f32.mrf.mxu0 }
 0x149   : > { %10461 = vst [vmem:[#allocation130_spill] sm:$0xff] %v9077_v58  ;;  %7525 = vmatmul.mubr.msk.bf16.gmra.mxu0 %vm1962_vm2, %v8021_v21  ;;  %v3466_v42 = vpop.f32.mrf.mxu1  ;;  %v9083_v3 = vadd.f32 %v3450_v40, %v2381_v11  ;;  %v10475_v11 = vld [vmem:[#allocation10_spill] sm:$0xff] }
 0x14a   : > { %7528 = vmatprep.mubr.msk.bf16.mxu0 %vm1962_vm2, %v8034_v53  ;;  %v7303_v47 = vpop.f32.mrf.mxu0 }
 0x14b   : > { %10462 = vst [vmem:[#allocation131_spill] sm:$0xff] %v9083_v3  ;;  %v7439_v41 = vpop.f32.mrf.mxu1  ;;  %v9085_v49 = vadd.f32 %v7435_v16, %v7303_v47  ;;  %v10477_v47 = vld [vmem:[#allocation4_spill] sm:$0xff] }
 0x14c   : > { %v2384_v34 = vpop.f32.mrf.mxu0 }
 0x14d   : > { %10463 = vst [vmem:[#allocation132_spill] sm:$0xff] %v9085_v49  ;;  %v3469_v25 = vpop.f32.mrf.mxu1  ;;  %v9089_v24 = vadd.f32 %v3453_v35, %v2384_v34 }
 0x14e   : > { %7665 = vmatmul.mubr.msk.bf16.gmra.mxu1 %vm1962_vm2, %v8106_v39 }
 0x14f   : > { %10464 = vst [vmem:[#allocation133_spill] sm:$0xff] %v9089_v24  ;;  %7668 = vmatprep.mubr.msk.bf16.mxu1 %vm1962_vm2, %v8121_v15  ;;  %v7306_v21 = vpop.f32.mrf.mxu0  ;;  %v7442_v8 = vpop.f32.mrf.mxu1  ;;  %v10632_v24 = vld [vmem:[#allocation83_spill] sm:$0xff] }
 0x150   : > { %v9095_v53 = vadd.f32 %v7438_v28, %v7306_v21 }
 0x151   : > { %7529 = vmatmul.mubr.msk.bf16.gmra.mxu0 %vm1962_vm2, %v8050_v5  ;;  %v2397_v17 = vpop.f32.mrf.mxu0  ;;  %v3482_v20 = vpop.f32.mrf.mxu1 }
 0x152   : > { %10465 = vst [vmem:[#allocation134_spill] sm:$0xff] %v9095_v53  ;;  %7532 = vmatprep.mubr.msk.bf16.mxu0 %vm1962_vm2, %v8067_v38  ;;  %v9099_v51 = vadd.f32 %v3466_v42, %v2397_v17 }
 0x153   : > { %v7307_v39 = vpop.f32.mrf.mxu0  ;;  %v7443_v37 = vpop.f32.mrf.mxu1 }
 0x154   : > { %10466 = vst [vmem:[#allocation135_spill] sm:$0xff] %v9099_v51  ;;  %v9101_v27 = vadd.f32 %v7439_v41, %v7307_v39 }
 0x155   : > { %v2400_v15 = vpop.f32.mrf.mxu0  ;;  %v3485_v13 = vpop.f32.mrf.mxu1 }
 0x156   : > { %10467 = vst [vmem:[#allocation136_spill] sm:$0xff] %v9101_v27  ;;  %7669 = vmatmul.mubr.msk.bf16.gmra.mxu1 %vm1962_vm2, %v8133_v30  ;;  %v9107_v5 = vadd.f32 %v3469_v25, %v2400_v15  ;;  %v10478_v25 = vld [vmem:[#allocation5_spill] sm:$0xff]  ;;  %v10481_v15 = vld [vmem:[#allocation12_spill] sm:$0xff] }
 0x157   : > { %7672 = vmatprep.mubr.msk.bf16.mxu1 %vm1962_vm2, %v8152_v19  ;;  %v7310_v46 = vpop.f32.mrf.mxu0  ;;  %v10474_v19 = vld [vmem:[#allocation8_spill] sm:$0xff] }
 0x158   : > { %10468 = vst [vmem:[#allocation137_spill] sm:$0xff] %v9107_v5  ;;  %v7446_v38 = vpop.f32.mrf.mxu1  ;;  %v9111_v54 = vadd.f32 %v7442_v8, %v7310_v46  ;;  %v10483_v46 = vld [vmem:[#allocation15_spill] sm:$0xff] }
 0x159   : > { %7533 = vmatmul.mubr.msk.bf16.gmra.mxu0 %vm1962_vm2, %v10469_v63  ;;  %v2413_v40 = vpop.f32.mrf.mxu0 }
 0x15a   : > { %10470 = vst [vmem:[#allocation2_spill] sm:$0xff] %v9111_v54  ;;  %7536 = vmatprep.mubr.msk.bf16.mxu0 %vm1962_vm2, %v10471_v4  ;;  %v3498_v52 = vpop.f32.mrf.mxu1  ;;  %v9115_v30 = vadd.f32 %v3482_v20, %v2413_v40 }
 0x15b   : > { %v7311_v16 = vpop.f32.mrf.mxu0 }
 0x15c   : > { %10472 = vst [vmem:[#allocation3_spill] sm:$0xff] %v9115_v30  ;;  %v7447_v23 = vpop.f32.mrf.mxu1  ;;  %v9117_v35 = vadd.f32 %v7443_v37, %v7311_v16 }
 0x15d   : > { %v2416_v44 = vpop.f32.mrf.mxu0 }
 0x15e   : > { %10473 = vst [vmem:[#allocation138_spill] sm:$0xff] %v9117_v35  ;;  %7673 = vmatmul.mubr.msk.bf16.gmra.mxu1 %vm1962_vm2, %v10474_v19  ;;  %v3501_v28 = vpop.f32.mrf.mxu1  ;;  %v9123_v42 = vadd.f32 %v3485_v13, %v2416_v44  ;;  %v10486_v19 = vld [vmem:[#allocation7_spill] sm:$0xff] }
 0x15f   : > { %7676 = vmatprep.mubr.msk.bf16.mxu1 %vm1962_vm2, %v10475_v11 }
 0x160   : > { %10476 = vst [vmem:[#allocation8_spill] sm:$0xff] %v9123_v42  ;;  %v7314_v41 = vpop.f32.mrf.mxu0  ;;  %v7450_v34 = vpop.f32.mrf.mxu1 }
 0x161   : > { %7537 = vmatmul.mubr.msk.bf16.gmra.mxu0 %vm1962_vm2, %v10477_v47  ;;  %v9129_v21 = vadd.f32 %v7446_v38, %v7314_v41  ;;  %v10485_v38 = vld [vmem:[#allocation6_spill] sm:$0xff] }
 0x162   : > { %7540 = vmatprep.mubr.msk.bf16.mxu0 %vm1962_vm2, %v10478_v25  ;;  %v2429_v8 = vpop.f32.mrf.mxu0  ;;  %v3514_v17 = vpop.f32.mrf.mxu1 }
 0x163   : > { %10479 = vst [vmem:[#allocation10_spill] sm:$0xff] %v9129_v21  ;;  %v9131_v20 = vadd.f32 %v3498_v52, %v2429_v8  ;;  %v10489_v8 = vld [vmem:[#allocation16_spill] sm:$0xff] }
 0x164   : > { %v7315_v39 = vpop.f32.mrf.mxu0  ;;  %v7451_v37 = vpop.f32.mrf.mxu1  ;;  %v10629_v21 = vld [vmem:[#allocation88_spill] sm:$0xff] }
 0x165   : > { %10480 = vst [vmem:[#allocation4_spill] sm:$0xff] %v9131_v20  ;;  %v9135_v13 = vadd.f32 %v7447_v23, %v7315_v39  ;;  %v10491_v39 = vld [vmem:[#allocation18_spill] sm:$0xff] }
 0x166   : > { %7677 = vmatmul.mubr.msk.bf16.gmra.mxu1 %vm1962_vm2, %v10481_v15  ;;  %v2432_v63 = vpop.f32.mrf.mxu0  ;;  %v3517_v4 = vpop.f32.mrf.mxu1  ;;  %v9443_v20 = vld [vmem:[%s7919_s28 + $0x284] sm:$0xf] }
 0x167   : > { %10482 = vst [vmem:[#allocation5_spill] sm:$0xff] %v9135_v13  ;;  %7680 = vmatprep.mubr.msk.bf16.mxu1 %vm1962_vm2, %v10483_v46  ;;  %v9139_v40 = vadd.f32 %v3501_v28, %v2432_v63  ;;  %v9440_v13 = vld [vmem:[%s7919_s28 + $0x280] sm:$0xf]  ;;  %v4485_v35 = vshll.u32 %v9443_v20, 16 }
 0x168   : > { %v7318_v16 = vpop.f32.mrf.mxu0  ;;  %v4476_v42 = vshrl.u32 %v9440_v13, 16 }
 0x169   : > { %10484 = vst [vmem:[#allocation12_spill] sm:$0xff] %v9139_v40  ;;  %7541 = vmatmul.mubr.msk.bf16.gmra.mxu0 %vm1962_vm2, %v10485_v38  ;;  %v7454_v52 = vpop.f32.mrf.mxu1  ;;  %v9145_v44 = vadd.f32 %v7450_v34, %v7318_v16  ;;  %v10493_v34 = vld [vmem:[#allocation9_spill] sm:$0xff]  ;;  %v10494_v38 = vld [vmem:[#allocation11_spill] sm:$0xff] }
 0x16a   : > { %7544 = vmatprep.mubr.msk.bf16.mxu0 %vm1962_vm2, %v10486_v19  ;;  %v2445_v11 = vpop.f32.mrf.mxu0  ;;  %v10626_v40 = vld [vmem:[#allocation103_spill] sm:$0xff] }
 0x16b   : > { %10487 = vst [vmem:[#allocation15_spill] sm:$0xff] %v9145_v44  ;;  %v3530_v23 = vpop.f32.mrf.mxu1  ;;  %v9147_v47 = vadd.f32 %v3514_v17, %v2445_v11 }
 0x16c   : > { %v7319_v41 = vpop.f32.mrf.mxu0 }
 0x16d   : > { %10488 = vst [vmem:[#allocation6_spill] sm:$0xff] %v9147_v47  ;;  %v7455_v25 = vpop.f32.mrf.mxu1  ;;  %v9151_v28 = vadd.f32 %v7451_v37, %v7319_v41 }
 0x16e   : > { %7681 = vmatmul.mubr.msk.bf16.gmra.mxu1 %vm1962_vm2, %v10489_v8  ;;  %v2448_v15 = vpop.f32.mrf.mxu0  ;;  %v10497_v8 = vld [vmem:[#allocation20_spill] sm:$0xff] }
 0x16f   : > { %10490 = vst [vmem:[#allocation7_spill] sm:$0xff] %v9151_v28  ;;  %7684 = vmatprep.mubr.msk.bf16.mxu1 %vm1962_vm2, %v10491_v39  ;;  %v3533_v46 = vpop.f32.mrf.mxu1  ;;  %v9155_v63 = vadd.f32 %v3517_v4, %v2448_v15  ;;  %v10498_v15 = vld [vmem:[#allocation23_spill] sm:$0xff]  ;;  %v10500_v28 = vld [vmem:[#allocation13_spill] sm:$0xff] }
 0x171   : > { %10492 = vst [vmem:[#allocation16_spill] sm:$0xff] %v9155_v63  ;;  %7545 = vmatmul.mubr.msk.bf16.gmra.mxu0 %vm1962_vm2, %v10493_v34  ;;  %v7322_v17 = vpop.f32.mrf.mxu0  ;;  %v7458_v16 = vpop.f32.mrf.mxu1 }
 0x172   : > { %7548 = vmatprep.mubr.msk.bf16.mxu0 %vm1962_vm2, %v10494_v38  ;;  %v9161_v19 = vadd.f32 %v7454_v52, %v7322_v17  ;;  %v10502_v17 = vld [vmem:[#allocation14_spill] sm:$0xff] }
 0x173   : > { %v2461_v11 = vpop.f32.mrf.mxu0  ;;  %v3546_v37 = vpop.f32.mrf.mxu1 }
 0x174   : > { %10495 = vst [vmem:[#allocation18_spill] sm:$0xff] %v9161_v19  ;;  %v9163_v41 = vadd.f32 %v3530_v23, %v2461_v11 }
 0x175   : > { %v7323_v39 = vpop.f32.mrf.mxu0  ;;  %v7459_v4 = vpop.f32.mrf.mxu1 }
 0x176   : > { %10496 = vst [vmem:[#allocation9_spill] sm:$0xff] %v9163_v41  ;;  %7685 = vmatmul.mubr.msk.bf16.gmra.mxu1 %vm1962_vm2, %v10497_v8  ;;  %v9169_v34 = vadd.f32 %v7455_v25, %v7323_v39  ;;  %v10505_v25 = vld [vmem:[#allocation24_spill] sm:$0xff] }
 0x177   : > { %7688 = vmatprep.mubr.msk.bf16.mxu1 %vm1962_vm2, %v10498_v15  ;;  %v2464_v63 = vpop.f32.mrf.mxu0  ;;  %v3549_v38 = vpop.f32.mrf.mxu1 }
 0x178   : > { %10499 = vst [vmem:[#allocation11_spill] sm:$0xff] %v9169_v34  ;;  %v9173_v52 = vadd.f32 %v3533_v46, %v2464_v63  ;;  %v10506_v34 = vld [vmem:[#allocation26_spill] sm:$0xff] }
 0x179   : > { %7549 = vmatmul.mubr.msk.bf16.gmra.mxu0 %vm1962_vm2, %v10500_v28  ;;  %v7326_v23 = vpop.f32.mrf.mxu0 }
 0x17a   : > { %10501 = vst [vmem:[#allocation20_spill] sm:$0xff] %v9173_v52  ;;  %7552 = vmatprep.mubr.msk.bf16.mxu0 %vm1962_vm2, %v10502_v17  ;;  %v7462_v11 = vpop.f32.mrf.mxu1  ;;  %v9177_v8 = vadd.f32 %v7458_v16, %v7326_v23  ;;  %v10508_v17 = vld [vmem:[#allocation17_spill] sm:$0xff]  ;;  %v10510_v23 = vld [vmem:[#allocation19_spill] sm:$0xff]  ;;  %v10512_v52 = vld [vmem:[#allocation28_spill] sm:$0xff] }
 0x17b   : > { %v2477_v41 = vpop.f32.mrf.mxu0 }
 0x17c   : > { %10503 = vst [vmem:[#allocation23_spill] sm:$0xff] %v9177_v8  ;;  %v3562_v19 = vpop.f32.mrf.mxu1  ;;  %v9179_v47 = vadd.f32 %v3546_v37, %v2477_v41 }
 0x17d   : > { %v7327_v39 = vpop.f32.mrf.mxu0 }
 0x17e   : > { %10504 = vst [vmem:[#allocation13_spill] sm:$0xff] %v9179_v47  ;;  %7689 = vmatmul.mubr.msk.bf16.gmra.mxu1 %vm1962_vm2, %v10505_v25  ;;  %v7463_v15 = vpop.f32.mrf.mxu1  ;;  %v9185_v28 = vadd.f32 %v7459_v4, %v7327_v39 }
 0x17f   : > { %7692 = vmatprep.mubr.msk.bf16.mxu1 %vm1962_vm2, %v10506_v34  ;;  %v2480_v46 = vpop.f32.mrf.mxu0  ;;  %v10514_v34 = vld [vmem:[#allocation31_spill] sm:$0xff] }
 0x180   : > { %10507 = vst [vmem:[#allocation14_spill] sm:$0xff] %v9185_v28  ;;  %v3565_v63 = vpop.f32.mrf.mxu1  ;;  %v9189_v16 = vadd.f32 %v3549_v38, %v2480_v46 }
 0x181   : > { %7553 = vmatmul.mubr.msk.bf16.gmra.mxu0 %vm1962_vm2, %v10508_v17  ;;  %v10516_v17 = vld [vmem:[#allocation21_spill] sm:$0xff] }
 0x182   : > { %10509 = vst [vmem:[#allocation24_spill] sm:$0xff] %v9189_v16  ;;  %7556 = vmatprep.mubr.msk.bf16.mxu0 %vm1962_vm2, %v10510_v23  ;;  %v7330_v37 = vpop.f32.mrf.mxu0  ;;  %v7466_v41 = vpop.f32.mrf.mxu1  ;;  %v10520_v16 = vld [vmem:[#allocation32_spill] sm:$0xff] }
 0x183   : > { %v9193_v25 = vadd.f32 %v7462_v11, %v7330_v37  ;;  %v10517_v37 = vld [vmem:[#allocation22_spill] sm:$0xff] }
 0x184   : > { %v2493_v47 = vpop.f32.mrf.mxu0  ;;  %v3578_v8 = vpop.f32.mrf.mxu1 }
 0x185   : > { %10511 = vst [vmem:[#allocation26_spill] sm:$0xff] %v9193_v25  ;;  %v9197_v4 = vadd.f32 %v3562_v19, %v2493_v47 }
 0x186   : > { %7693 = vmatmul.mubr.msk.bf16.gmra.mxu1 %vm1962_vm2, %v10512_v52  ;;  %v7331_v39 = vpop.f32.mrf.mxu0  ;;  %v7467_v38 = vpop.f32.mrf.mxu1 }
 0x187   : > { %10513 = vst [vmem:[#allocation17_spill] sm:$0xff] %v9197_v4  ;;  %7696 = vmatprep.mubr.msk.bf16.mxu1 %vm1962_vm2, %v10514_v34  ;;  %v9201_v46 = vadd.f32 %v7463_v15, %v7331_v39  ;;  %v10522_v39 = vld [vmem:[#allocation34_spill] sm:$0xff] }
 0x188   : > { %v2496_v23 = vpop.f32.mrf.mxu0  ;;  %v3581_v11 = vpop.f32.mrf.mxu1 }
 0x189   : > { %10515 = vst [vmem:[#allocation19_spill] sm:$0xff] %v9201_v46  ;;  %7557 = vmatmul.mubr.msk.bf16.gmra.mxu0 %vm1962_vm2, %v10516_v17  ;;  %v9207_v25 = vadd.f32 %v3565_v63, %v2496_v23  ;;  %v10524_v63 = vld [vmem:[#allocation25_spill] sm:$0xff] }
 0x18a   : > { %7560 = vmatprep.mubr.msk.bf16.mxu0 %vm1962_vm2, %v10517_v37  ;;  %v7334_v52 = vpop.f32.mrf.mxu0  ;;  %v10525_v37 = vld [vmem:[#allocation27_spill] sm:$0xff] }
 0x18b   : > { %10518 = vst [vmem:[#allocation28_spill] sm:$0xff] %v9207_v25  ;;  %v7470_v47 = vpop.f32.mrf.mxu1  ;;  %v9209_v19 = vadd.f32 %v7466_v41, %v7334_v52  ;;  %v10531_v25 = vld [vmem:[#allocation29_spill] sm:$0xff] }
 0x18c   : > { %v2509_v4 = vpop.f32.mrf.mxu0 }
 0x18d   : > { %10519 = vst [vmem:[#allocation31_spill] sm:$0xff] %v9209_v19  ;;  %v3594_v34 = vpop.f32.mrf.mxu1  ;;  %v9213_v15 = vadd.f32 %v3578_v8, %v2509_v4 }
 0x18e   : > { %7697 = vmatmul.mubr.msk.bf16.gmra.mxu1 %vm1962_vm2, %v10520_v16  ;;  %v7335_v17 = vpop.f32.mrf.mxu0 }
 0x18f   : > { %10521 = vst [vmem:[#allocation21_spill] sm:$0xff] %v9213_v15  ;;  %7700 = vmatprep.mubr.msk.bf16.mxu1 %vm1962_vm2, %v10522_v39  ;;  %v7471_v46 = vpop.f32.mrf.mxu1  ;;  %v9217_v28 = vadd.f32 %v7467_v38, %v7335_v17  ;;  %v10528_v15 = vld [vmem:[#allocation36_spill] sm:$0xff] }
 0x190   : > { %v2512_v23 = vpop.f32.mrf.mxu0 }
 0x191   : > { %10523 = vst [vmem:[#allocation22_spill] sm:$0xff] %v9217_v28  ;;  %7561 = vmatmul.mubr.msk.bf16.gmra.mxu0 %vm1962_vm2, %v10524_v63  ;;  %v3597_v41 = vpop.f32.mrf.mxu1  ;;  %v9223_v52 = vadd.f32 %v3581_v11, %v2512_v23  ;;  %v10530_v28 = vld [vmem:[#allocation39_spill] sm:$0xff]  ;;  %v10533_v23 = vld [vmem:[#allocation30_spill] sm:$0xff] }
 0x192   : > { %7564 = vmatprep.mubr.msk.bf16.mxu0 %vm1962_vm2, %v10525_v37 }
 0x193   : > { %10526 = vst [vmem:[#allocation32_spill] sm:$0xff] %v9223_v52  ;;  %v7338_v16 = vpop.f32.mrf.mxu0  ;;  %v7474_v8 = vpop.f32.mrf.mxu1 }
 0x194   : > { %v9225_v4 = vadd.f32 %v7470_v47, %v7338_v16 }
 0x195   : > { %v2525_v39 = vpop.f32.mrf.mxu0  ;;  %v3610_v38 = vpop.f32.mrf.mxu1 }
 0x196   : > { %10527 = vst [vmem:[#allocation34_spill] sm:$0xff] %v9225_v4  ;;  %7701 = vmatmul.mubr.msk.bf16.gmra.mxu1 %vm1962_vm2, %v10528_v15  ;;  %v9229_v17 = vadd.f32 %v3594_v34, %v2525_v39 }
 0x197   : > { %7704 = vmatprep.mubr.msk.bf16.mxu1 %vm1962_vm2, %v10530_v28  ;;  %v7339_v63 = vpop.f32.mrf.mxu0  ;;  %v7475_v19 = vpop.f32.mrf.mxu1 }
 0x198   : > { %10529 = vst [vmem:[#allocation25_spill] sm:$0xff] %v9229_v17  ;;  %v9235_v11 = vadd.f32 %v7471_v46, %v7339_v63  ;;  %v10536_v17 = vld [vmem:[#allocation40_spill] sm:$0xff] }
 0x199   : > { %7565 = vmatmul.mubr.msk.bf16.gmra.mxu0 %vm1962_vm2, %v10531_v25  ;;  %v2528_v47 = vpop.f32.mrf.mxu0  ;;  %v3613_v37 = vpop.f32.mrf.mxu1  ;;  %v10538_v25 = vld [vmem:[#allocation42_spill] sm:$0xff] }
 0x19a   : > { %10532 = vst [vmem:[#allocation27_spill] sm:$0xff] %v9235_v11  ;;  %7568 = vmatprep.mubr.msk.bf16.mxu0 %vm1962_vm2, %v10533_v23  ;;  %v9239_v15 = vadd.f32 %v3597_v41, %v2528_v47  ;;  %v10539_v23 = vld [vmem:[#allocation33_spill] sm:$0xff]  ;;  %v10541_v47 = vld [vmem:[#allocation35_spill] sm:$0xff] }
 0x19b   : > { %v7342_v16 = vpop.f32.mrf.mxu0  ;;  %v10610_v11 = vld [vmem:[#allocation87_spill] sm:$0xff] }
 0x19c   : > { %10534 = vst [vmem:[#allocation36_spill] sm:$0xff] %v9239_v15  ;;  %v7478_v34 = vpop.f32.mrf.mxu1  ;;  %v9241_v39 = vadd.f32 %v7474_v8, %v7342_v16  ;;  %v10545_v15 = vld [vmem:[#allocation47_spill] sm:$0xff] }
 0x19d   : > { %v2541_v28 = vpop.f32.mrf.mxu0 }
 0x19e   : > { %10535 = vst [vmem:[#allocation39_spill] sm:$0xff] %v9241_v39  ;;  %7705 = vmatmul.mubr.msk.bf16.gmra.mxu1 %vm1962_vm2, %v10536_v17  ;;  %v3626_v4 = vpop.f32.mrf.mxu1  ;;  %v9245_v52 = vadd.f32 %v3610_v38, %v2541_v28  ;;  %v10543_v28 = vld [vmem:[#allocation44_spill] sm:$0xff] }
 0x19f   : > { %7708 = vmatprep.mubr.msk.bf16.mxu1 %vm1962_vm2, %v10538_v25  ;;  %v7343_v46 = vpop.f32.mrf.mxu0 }
 0x1a0   : > { %10537 = vst [vmem:[#allocation29_spill] sm:$0xff] %v9245_v52  ;;  %v7479_v63 = vpop.f32.mrf.mxu1  ;;  %v9251_v41 = vadd.f32 %v7475_v19, %v7343_v46 }
 0x1a1   : > { %7569 = vmatmul.mubr.msk.bf16.gmra.mxu0 %vm1962_vm2, %v10539_v23  ;;  %v2544_v8 = vpop.f32.mrf.mxu0  ;;  %v10547_v23 = vld [vmem:[#allocation37_spill] sm:$0xff] }
 0x1a2   : > { %10540 = vst [vmem:[#allocation30_spill] sm:$0xff] %v9251_v41  ;;  %7572 = vmatprep.mubr.msk.bf16.mxu0 %vm1962_vm2, %v10541_v47  ;;  %v3629_v16 = vpop.f32.mrf.mxu1  ;;  %v9255_v17 = vadd.f32 %v3613_v37, %v2544_v8  ;;  %v10548_v8 = vld [vmem:[#allocation38_spill] sm:$0xff]  ;;  %v10551_v41 = vld [vmem:[#allocation48_spill] sm:$0xff] }
 0x1a4   : > { %10542 = vst [vmem:[#allocation40_spill] sm:$0xff] %v9255_v17  ;;  %v7346_v39 = vpop.f32.mrf.mxu0  ;;  %v7482_v38 = vpop.f32.mrf.mxu1 }
 0x1a5   : > { %v9259_v25 = vadd.f32 %v7478_v34, %v7346_v39 }
 0x1a6   : > { %7709 = vmatmul.mubr.msk.bf16.gmra.mxu1 %vm1962_vm2, %v10543_v28  ;;  %v2557_v52 = vpop.f32.mrf.mxu0  ;;  %v3642_v19 = vpop.f32.mrf.mxu1 }
 0x1a7   : > { %10544 = vst [vmem:[#allocation42_spill] sm:$0xff] %v9259_v25  ;;  %7712 = vmatprep.mubr.msk.bf16.mxu1 %vm1962_vm2, %v10545_v15  ;;  %v9263_v46 = vadd.f32 %v3626_v4, %v2557_v52 }
 0x1a8   : > { %v7347_v47 = vpop.f32.mrf.mxu0  ;;  %v7483_v37 = vpop.f32.mrf.mxu1 }
 0x1a9   : > { %10546 = vst [vmem:[#allocation33_spill] sm:$0xff] %v9263_v46  ;;  %7573 = vmatmul.mubr.msk.bf16.gmra.mxu0 %vm1962_vm2, %v10547_v23  ;;  %v9269_v17 = vadd.f32 %v7479_v63, %v7347_v47  ;;  %v10553_v23 = vld [vmem:[#allocation50_spill] sm:$0xff]  ;;  %v10555_v63 = vld [vmem:[#allocation41_spill] sm:$0xff] }
 0x1aa   : > { %7576 = vmatprep.mubr.msk.bf16.mxu0 %vm1962_vm2, %v10548_v8  ;;  %v2560_v28 = vpop.f32.mrf.mxu0  ;;  %v3645_v34 = vpop.f32.mrf.mxu1 }
 0x1ab   : > { %10549 = vst [vmem:[#allocation35_spill] sm:$0xff] %v9269_v17  ;;  %v9271_v39 = vadd.f32 %v3629_v16, %v2560_v28  ;;  %v10556_v16 = vld [vmem:[#allocation43_spill] sm:$0xff]  ;;  %v10566_v17 = vld [vmem:[#allocation56_spill] sm:$0xff] }
 0x1ac   : > { %v7350_v25 = vpop.f32.mrf.mxu0 }
 0x1ad   : > { %10550 = vst [vmem:[#allocation44_spill] sm:$0xff] %v9271_v39  ;;  %v9275_v52 = vadd.f32 %v7482_v38, %v7350_v25  ;;  %v7486_v4 = vpop.f32.mrf.mxu1  ;;  %v10559_v39 = vld [vmem:[#allocation52_spill] sm:$0xff] }
 0x1ae   : > { %7713 = vmatmul.mubr.msk.bf16.gmra.mxu1 %vm1962_vm2, %v10551_v41  ;;  %v2573_v15 = vpop.f32.mrf.mxu0 }
 0x1af   : > { %10552 = vst [vmem:[#allocation47_spill] sm:$0xff] %v9275_v52  ;;  %7716 = vmatprep.mubr.msk.bf16.mxu1 %vm1962_vm2, %v10553_v23  ;;  %v9279_v46 = vadd.f32 %v3642_v19, %v2573_v15  ;;  %v3658_v8 = vpop.f32.mrf.mxu1  ;;  %v10560_v15 = vld [vmem:[#allocation55_spill] sm:$0xff] }
 0x1b0   : > { %v7351_v47 = vpop.f32.mrf.mxu0 }
 0x1b1   : > { %10554 = vst [vmem:[#allocation37_spill] sm:$0xff] %v9279_v46  ;;  %7577 = vmatmul.mubr.msk.bf16.gmra.mxu0 %vm1962_vm2, %v10555_v63  ;;  %v9285_v28 = vadd.f32 %v7483_v37, %v7351_v47  ;;  %v7487_v41 = vpop.f32.mrf.mxu1  ;;  %v10562_v46 = vld [vmem:[#allocation45_spill] sm:$0xff]  ;;  %v10563_v47 = vld [vmem:[#allocation46_spill] sm:$0xff] }
 0x1b2   : > { %7580 = vmatprep.mubr.msk.bf16.mxu0 %vm1962_vm2, %v10556_v16  ;;  %v2576_v38 = vpop.f32.mrf.mxu0 }
 0x1b3   : > { %10557 = vst [vmem:[#allocation38_spill] sm:$0xff] %v9285_v28  ;;  %v9287_v25 = vadd.f32 %v3645_v34, %v2576_v38  ;;  %v3661_v52 = vpop.f32.mrf.mxu1 }
 0x1b5   : > { %10558 = vst [vmem:[#allocation48_spill] sm:$0xff] %v9287_v25 }
 0x1b6   : > { %7717 = vmatmul.mubr.msk.bf16.gmra.mxu1 %vm1962_vm2, %v10559_v39  ;;  %v7354_v19 = vpop.f32.mrf.mxu0 }
 0x1b7   : > { %7720 = vmatprep.mubr.msk.bf16.mxu1 %vm1962_vm2, %v10560_v15  ;;  %v9293_v23 = vadd.f32 %v7486_v4, %v7354_v19  ;;  %v7490_v63 = vpop.f32.mrf.mxu1  ;;  %v10568_v15 = vld [vmem:[#allocation58_spill] sm:$0xff] }
 0x1b8   : > { %v2589_v37 = vpop.f32.mrf.mxu0 }
 0x1b9   : > { %10561 = vst [vmem:[#allocation50_spill] sm:$0xff] %v9293_v23  ;;  %7581 = vmatmul.mubr.msk.bf16.gmra.mxu0 %vm1962_vm2, %v10562_v46  ;;  %v9299_v34 = vadd.f32 %v3658_v8, %v2589_v37  ;;  %v3674_v16 = vpop.f32.mrf.mxu1  ;;  %v10569_v23 = vld [vmem:[#allocation49_spill] sm:$0xff] }
 0x1ba   : > { %7584 = vmatprep.mubr.msk.bf16.mxu0 %vm1962_vm2, %v10563_v47  ;;  %v7355_v38 = vpop.f32.mrf.mxu0 }
 0x1bb   : > { %10564 = vst [vmem:[#allocation41_spill] sm:$0xff] %v9299_v34  ;;  %v9301_v25 = vadd.f32 %v7487_v41, %v7355_v38  ;;  %v7491_v39 = vpop.f32.mrf.mxu1  ;;  %v10571_v41 = vld [vmem:[#allocation51_spill] sm:$0xff] }
 0x1bc   : > { %v2592_v28 = vpop.f32.mrf.mxu0 }
 0x1bd   : > { %10565 = vst [vmem:[#allocation43_spill] sm:$0xff] %v9301_v25  ;;  %v9305_v4 = vadd.f32 %v3661_v52, %v2592_v28  ;;  %v3677_v19 = vpop.f32.mrf.mxu1  ;;  %v10574_v25 = vld [vmem:[#allocation60_spill] sm:$0xff] }
 0x1be   : > { %7721 = vmatmul.mubr.msk.bf16.gmra.mxu1 %vm1962_vm2, %v10566_v17 }
 0x1bf   : > { %10567 = vst [vmem:[#allocation52_spill] sm:$0xff] %v9305_v4  ;;  %7724 = vmatprep.mubr.msk.bf16.mxu1 %vm1962_vm2, %v10568_v15 }
 0x1c0   : > { %v7358_v46 = vpop.f32.mrf.mxu0  ;;  %v7494_v37 = vpop.f32.mrf.mxu1 }
 0x1c1   : > { %7585 = vmatmul.mubr.msk.bf16.gmra.mxu0 %vm1962_vm2, %v10569_v23  ;;  %v9311_v8 = vadd.f32 %v7490_v63, %v7358_v46  ;;  %v10576_v63 = vld [vmem:[#allocation63_spill] sm:$0xff]  ;;  %v10577_v46 = vld [vmem:[#allocation53_spill] sm:$0xff] }
 0x1c2   : > { %7588 = vmatprep.mubr.msk.bf16.mxu0 %vm1962_vm2, %v10571_v41  ;;  %v2605_v47 = vpop.f32.mrf.mxu0  ;;  %v3690_v17 = vpop.f32.mrf.mxu1 }
 0x1c3   : > { %10570 = vst [vmem:[#allocation55_spill] sm:$0xff] %v9311_v8  ;;  %v9315_v38 = vadd.f32 %v3674_v16, %v2605_v47  ;;  %v10578_v16 = vld [vmem:[#allocation54_spill] sm:$0xff]  ;;  %v10584_v8 = vld [vmem:[#allocation57_spill] sm:$0xff] }
 0x1c4   : > { %v7359_v52 = vpop.f32.mrf.mxu0  ;;  %v7495_v4 = vpop.f32.mrf.mxu1 }
 0x1c5   : > { %10572 = vst [vmem:[#allocation45_spill] sm:$0xff] %v9315_v38  ;;  %v9317_v28 = vadd.f32 %v7491_v39, %v7359_v52  ;;  %v10583_v38 = vld [vmem:[#allocation66_spill] sm:$0xff] }
 0x1c6   : > { %7725 = vmatmul.mubr.msk.bf16.gmra.mxu1 %vm1962_vm2, %v10574_v25  ;;  %v2608_v15 = vpop.f32.mrf.mxu0  ;;  %v3693_v23 = vpop.f32.mrf.mxu1 }
 0x1c7   : > { %10573 = vst [vmem:[#allocation46_spill] sm:$0xff] %v9317_v28  ;;  %v9321_v34 = vadd.f32 %v3677_v19, %v2608_v15  ;;  %7728 = vmatprep.mubr.msk.bf16.mxu1 %vm1962_vm2, %v10576_v63  ;;  %v10581_v15 = vld [vmem:[#allocation64_spill] sm:$0xff] }
 0x1c9   : > { %10575 = vst [vmem:[#allocation56_spill] sm:$0xff] %v9321_v34  ;;  %7589 = vmatmul.mubr.msk.bf16.gmra.mxu0 %vm1962_vm2, %v10577_v46  ;;  %v7362_v41 = vpop.f32.mrf.mxu0 }
 0x1ca   : > { %7592 = vmatprep.mubr.msk.bf16.mxu0 %vm1962_vm2, %v10578_v16  ;;  %v7498_v39 = vpop.f32.mrf.mxu1  ;;  %v9329_v47 = vadd.f32 %v7494_v37, %v7362_v41  ;;  %v10586_v41 = vld [vmem:[#allocation59_spill] sm:$0xff] }
 0x1cb   : > { %v2621_v52 = vpop.f32.mrf.mxu0 }
 0x1cc   : > { %10579 = vst [vmem:[#allocation58_spill] sm:$0xff] %v9329_v47  ;;  %v3706_v28 = vpop.f32.mrf.mxu1  ;;  %v9331_v25 = vadd.f32 %v3690_v17, %v2621_v52  ;;  %v10597_v47 = vld [vmem:[#allocation76_spill] sm:$0xff] }
 0x1cd   : > { %v7363_v19 = vpop.f32.mrf.mxu0 }
 0x1ce   : > { %10580 = vst [vmem:[#allocation49_spill] sm:$0xff] %v9331_v25  ;;  %7729 = vmatmul.mubr.msk.bf16.gmra.mxu1 %vm1962_vm2, %v10581_v15  ;;  %v7499_v34 = vpop.f32.mrf.mxu1  ;;  %v9335_v63 = vadd.f32 %v7495_v4, %v7363_v19  ;;  %v10588_v4 = vld [vmem:[#allocation68_spill] sm:$0xff] }
 0x1cf   : > { %7732 = vmatprep.mubr.msk.bf16.mxu1 %vm1962_vm2, %v10583_v38  ;;  %v2624_v46 = vpop.f32.mrf.mxu0 }
 0x1d0   : > { %10582 = vst [vmem:[#allocation51_spill] sm:$0xff] %v9335_v63  ;;  %v3709_v16 = vpop.f32.mrf.mxu1  ;;  %v9341_v37 = vadd.f32 %v3693_v23, %v2624_v46  ;;  %v10590_v63 = vld [vmem:[#allocation71_spill] sm:$0xff]  ;;  %v10591_v46 = vld [vmem:[#allocation61_spill] sm:$0xff] }
 0x1d1   : > { %7593 = vmatmul.mubr.msk.bf16.gmra.mxu0 %vm1962_vm2, %v10584_v8 }
 0x1d2   : > { %10585 = vst [vmem:[#allocation60_spill] sm:$0xff] %v9341_v37  ;;  %7596 = vmatprep.mubr.msk.bf16.mxu0 %vm1962_vm2, %v10586_v41 }
 0x1d3   : > { %v7502_v52 = vpop.f32.mrf.mxu1 }
 0x1d4   : > { %v7366_v17 = vpop.f32.mrf.mxu0 }
 0x1d5   : > { %v9345_v25 = vadd.f32 %v7498_v39, %v7366_v17  ;;  %v3722_v19 = vpop.f32.mrf.mxu1  ;;  %v10593_v39 = vld [vmem:[#allocation62_spill] sm:$0xff] }
 0x1d6   : > { %v2637_v15 = vpop.f32.mrf.mxu0  ;;  %7733 = vmatmul.mubr.msk.bf16.gmra.mxu1 %vm1962_vm2, %v10588_v4 }
 0x1d7   : > { %10587 = vst [vmem:[#allocation63_spill] sm:$0xff] %v9345_v25  ;;  %v9349_v38 = vadd.f32 %v3706_v28, %v2637_v15  ;;  %7736 = vmatprep.mubr.msk.bf16.mxu1 %vm1962_vm2, %v10590_v63  ;;  %v7503_v23 = vpop.f32.mrf.mxu1  ;;  %v10595_v15 = vld [vmem:[#allocation72_spill] sm:$0xff] }
 0x1d8   : > { %v7367_v8 = vpop.f32.mrf.mxu0 }
 0x1d9   : > { %10589 = vst [vmem:[#allocation53_spill] sm:$0xff] %v9349_v38  ;;  %7597 = vmatmul.mubr.msk.bf16.gmra.mxu0 %vm1962_vm2, %v10591_v46  ;;  %v9355_v41 = vadd.f32 %v7499_v34, %v7367_v8  ;;  %v3725_v17 = vpop.f32.mrf.mxu1  ;;  %v10598_v8 = vld [vmem:[#allocation65_spill] sm:$0xff] }
 0x1da   : > { %v2640_v37 = vpop.f32.mrf.mxu0  ;;  %7600 = vmatprep.mubr.msk.bf16.mxu0 %vm1962_vm2, %v10593_v39 }
 0x1db   : > { %10592 = vst [vmem:[#allocation54_spill] sm:$0xff] %v9355_v41  ;;  %v9359_v25 = vadd.f32 %v3709_v16, %v2640_v37  ;;  %v10600_v37 = vld [vmem:[#allocation67_spill] sm:$0xff] }
 0x1dc   : > { %v7506_v4 = vpop.f32.mrf.mxu1  ;;  %v10603_v41 = vld [vmem:[#allocation79_spill] sm:$0xff] }
 0x1dd   : > { %10594 = vst [vmem:[#allocation64_spill] sm:$0xff] %v9359_v25 }
 0x1de   : > { %v7370_v28 = vpop.f32.mrf.mxu0  ;;  %7737 = vmatmul.mubr.msk.bf16.gmra.mxu1 %vm1962_vm2, %v10595_v15  ;;  %v3738_v38 = vpop.f32.mrf.mxu1 }
 0x1df   : > { %v9363_v63 = vadd.f32 %v7502_v52, %v7370_v28  ;;  %7740 = vmatprep.mubr.msk.bf16.mxu1 %vm1962_vm2, %v10597_v47  ;;  %v10604_v47 = vld [vmem:[#allocation84_spill] sm:$0xff] }
 0x1e0   : > { %v2653_v34 = vpop.f32.mrf.mxu0  ;;  %v7507_v39 = vpop.f32.mrf.mxu1 }
 0x1e1   : > { %10596 = vst [vmem:[#allocation66_spill] sm:$0xff] %v9363_v63  ;;  %7601 = vmatmul.mubr.msk.bf16.gmra.mxu0 %vm1962_vm2, %v10598_v8  ;;  %v9369_v46 = vadd.f32 %v3722_v19, %v2653_v34 }
 0x1e2   : > { %v7371_v16 = vpop.f32.mrf.mxu0  ;;  %7604 = vmatprep.mubr.msk.bf16.mxu0 %vm1962_vm2, %v10600_v37  ;;  %v3741_v15 = vpop.f32.mrf.mxu1 }
 0x1e3   : > { %10599 = vst [vmem:[#allocation57_spill] sm:$0xff] %v9369_v46  ;;  %v9373_v25 = vadd.f32 %v7503_v23, %v7371_v16  ;;  %v10606_v46 = vld [vmem:[#allocation69_spill] sm:$0xff]  ;;  %v10607_v16 = vld [vmem:[#allocation70_spill] sm:$0xff] }
 0x1e4   : > { %v2656_v52 = vpop.f32.mrf.mxu0 }
 0x1e5   : > { %10601 = vst [vmem:[#allocation59_spill] sm:$0xff] %v9373_v25  ;;  %v9375_v28 = vadd.f32 %v3725_v17, %v2656_v52 }
 0x1e6   : > { %v7510_v63 = vpop.f32.mrf.mxu1  ;;  %7741 = vmatmul.mubr.msk.bf16.gmra.mxu1 %vm1962_vm2, %v10603_v41 }
 0x1e7   : > { %10602 = vst [vmem:[#allocation68_spill] sm:$0xff] %v9375_v28  ;;  %7744 = vmatprep.mubr.msk.bf16.mxu1 %vm1962_vm2, %v10604_v47  ;;  %v7374_v19 = vpop.f32.mrf.mxu0 }
 0x1e8   : > { %v3754_v34 = vpop.f32.mrf.mxu1  ;;  %v9381_v8 = vadd.f32 %v7506_v4, %v7374_v19 }
 0x1e9   : > { %7605 = vmatmul.mubr.msk.bf16.gmra.mxu0 %vm1962_vm2, %v10606_v46  ;;  %v2669_v23 = vpop.f32.mrf.mxu0  ;;  %v10612_v46 = vld [vmem:[#allocation92_spill] sm:$0xff] }
 0x1ea   : > { %10605 = vst [vmem:[#allocation71_spill] sm:$0xff] %v9381_v8  ;;  %7608 = vmatprep.mubr.msk.bf16.mxu0 %vm1962_vm2, %v10607_v16  ;;  %v7511_v17 = vpop.f32.mrf.mxu1  ;;  %v9387_v37 = vadd.f32 %v3738_v38, %v2669_v23  ;;  %v10613_v8 = vld [vmem:[#allocation73_spill] sm:$0xff] }
 0x1eb   : > { %v7375_v52 = vpop.f32.mrf.mxu0 }
 0x1ec   : > { %10608 = vst [vmem:[#allocation61_spill] sm:$0xff] %v9387_v37  ;;  %v3757_v28 = vpop.f32.mrf.mxu1  ;;  %v9389_v41 = vadd.f32 %v7507_v39, %v7375_v52  ;;  %v10615_v39 = vld [vmem:[#allocation77_spill] sm:$0xff] }
 0x1ed   : > { %v2672_v47 = vpop.f32.mrf.mxu0 }
 0x1ee   : > { %10609 = vst [vmem:[#allocation62_spill] sm:$0xff] %v9389_v41  ;;  %v7650_v25 = vpop.f32.mrf.mxu1  ;;  %7745 = vmatmul.mubr.msk.bf16.gmra.mxu1 %vm1962_vm2, %v10610_v11  ;;  %v9393_v4 = vadd.f32 %v3741_v15, %v2672_v47 }
 0x1ef   : > { %7748 = vmatprep.mubr.msk.bf16.mxu1 %vm1962_vm2, %v10612_v46 }
 0x1f0   : > { %10611 = vst [vmem:[#allocation72_spill] sm:$0xff] %v9393_v4  ;;  %v4582_v19 = vpop.f32.mrf.mxu1  ;;  %v10618_v4 = vld [vmem:[#allocation95_spill] sm:$0xff] }
 0x1f1   : > { %v7378_v16 = vpop.f32.mrf.mxu0  ;;  %7609 = vmatmul.mubr.msk.bf16.gmra.mxu0 %vm1962_vm2, %v10613_v8  ;;  %v10619_v8 = vld [vmem:[#allocation100_spill] sm:$0xff] }
 0x1f2   : > { %v9399_v38 = vadd.f32 %v7510_v63, %v7378_v16  ;;  %7612 = vmatprep.mubr.msk.bf16.mxu0 %vm1962_vm2, %v10615_v39  ;;  %v7651_v23 = vpop.f32.mrf.mxu1  ;;  %v10621_v39 = vld [vmem:[#allocation80_spill] sm:$0xff] }
 0x1f3   : > { %v2685_v52 = vpop.f32.mrf.mxu0 }
 0x1f4   : > { %10614 = vst [vmem:[#allocation76_spill] sm:$0xff] %v9399_v38  ;;  %v9403_v41 = vadd.f32 %v3754_v34, %v2685_v52  ;;  %v4585_v11 = vpop.f32.mrf.mxu1  ;;  %v10622_v52 = vld [vmem:[#allocation74_spill] sm:$0xff] }
 0x1f5   : > { %v7379_v15 = vpop.f32.mrf.mxu0 }
 0x1f6   : > { %10616 = vst [vmem:[#allocation65_spill] sm:$0xff] %v9403_v41  ;;  %v9406_v47 = vadd.f32 %v7511_v17, %v7379_v15  ;;  %v7654_v46 = vpop.f32.mrf.mxu1  ;;  %7749 = vmatmul.mubr.msk.bf16.gmra.mxu1 %vm1962_vm2, %v10618_v4  ;;  %v10623_v15 = vld [vmem:[#allocation85_spill] sm:$0xff]  ;;  %v10625_v41 = vld [vmem:[#allocation78_spill] sm:$0xff] }
 0x1f7   : > { %v2688_v37 = vpop.f32.mrf.mxu0  ;;  %7752 = vmatprep.mubr.msk.bf16.mxu1 %vm1962_vm2, %v10619_v8 }
 0x1f8   : > { %10617 = vst [vmem:[#allocation67_spill] sm:$0xff] %v9406_v47  ;;  %v9412_v63 = vadd.f32 %v3757_v28, %v2688_v37  ;;  %v9414_v16 = vpop.f32.mrf.mxu1  ;;  %v9426_v28 = vld [vmem:[%s10233_s2] ss:$0 sm:$0xff] }
 0x1f9   : > { %v7518_v34 = vpop.f32.mrf.mxu0  ;;  %7613 = vmatmul.mubr.msk.bf16.gmra.mxu0 %vm1962_vm2, %v10621_v39  ;;  %v10624_v39 = vld [vmem:[#allocation75_spill] sm:$0xff] }
 0x1fa   : > { %10620 = vst [vmem:[#allocation79_spill] sm:$0xff] %v9412_v63  ;;  %v4349_v17 = vadd.f32 %v7518_v34, %v10622_v52  ;;  %7616 = vmatprep.mubr.msk.bf16.mxu0 %vm1962_vm2, %v10623_v15  ;;  %v9421_v4 = vpop.f32.mrf.mxu1 }
 0x1fb   : > { %v3836_v37 = vpop.f32.mrf.mxu0 }
 0x1fc   : > { %v5095_v8 = vadd.f32 %v7650_v25, %v4349_v17  ;;  %v4347_v63 = vadd.f32 %v3836_v37, %v10624_v39  ;;  %v9431_v47 = vpop.f32.mrf.mxu1  ;;  %v10627_v17 = vld [vmem:[#allocation108_spill] sm:$0xff] }
 0x1fd   : > { %v7519_v34 = vpop.f32.mrf.mxu0 }
 0x1fe   : > { %v5230_v52 = vadd.f32 %v9426_v28, %v5095_v8  ;;  %v5093_v15 = vadd.f32 %v4582_v19, %v4347_v63  ;;  %v4350_v38 = vadd.f32 %v7519_v34, %v10625_v41  ;;  %v9435_v44 = vpop.f32.mrf.mxu1  ;;  %7753 = vmatmul.mubr.msk.bf16.gmra.mxu1 %vm1962_vm2, %v10626_v40  ;;  %v10628_v63 = vld [vmem:[#allocation81_spill] sm:$0xff]  ;;  %v9453_v34 = vld [vmem:[%s7919_s28 + $0x288] sm:$0xf] }
 0x1ff   : > { %v3839_v25 = vpop.f32.mrf.mxu0  ;;  %7756 = vmatprep.mubr.msk.bf16.mxu1 %vm1962_vm2, %v10627_v17  ;;  %v4479_v17 = vshll.u32 %v9440_v13, 16 }
 0x200   : > { %v5358_v37 = vmul.f32 0.2, %v5230_v52  ;;  %v5228_v8 = vadd.f32 %v9426_v28, %v5093_v15  ;;  %v5096_v19 = vadd.f32 %v7651_v23, %v4350_v38  ;;  %v4348_v41 = vadd.f32 %v3839_v25, %v10628_v63  ;;  %v9450_v39 = vpop.f32.mrf.mxu1  ;;  %v10630_v25 = vld [vmem:[#allocation93_spill] sm:$0xff] }
 0x201   : > { %v7522_v40 = vpop.f32.mrf.mxu0  ;;  %7617 = vmatmul.mubr.msk.bf16.gmra.mxu0 %vm1962_vm2, %v10629_v21  ;;  %v10631_v21 = vld [vmem:[#allocation82_spill] sm:$0xff] }
 0x202   : > { %v5486_v30 = vmax.f32 %v5230_v52, %v5358_v37  ;;  %v5356_v15 = vmul.f32 0.2, %v5228_v8  ;;  %v5231_v38 = vadd.f32 %v9426_v28, %v5096_v19  ;;  %v5094_v23 = vadd.f32 %v4585_v11, %v4348_v41  ;;  %7620 = vmatprep.mubr.msk.bf16.mxu0 %vm1962_vm2, %v10630_v25  ;;  %v9463_v63 = vpop.f32.mrf.mxu1 }
 0x203   : > { %v4353_v54 = vadd.f32 %v7522_v40, %v10631_v21  ;;  %v3852_v5 = vpop.f32.mrf.mxu0  ;;  %v4489_v52 = vshrl.u32 %v9443_v20, 16  ;;  %v4495_v37 = vshll.u32 %v9453_v34, 16  ;;  %v4499_v11 = vshrl.u32 %v9453_v34, 16 }
 0x204   : > { %v6858_v19 = vpack.c.bf16 %v5486_v30, %v5486_v30  ;;  %v5484_v41 = vmax.f32 %v5228_v8, %v5356_v15  ;;  %v5359_v25 = vmul.f32 0.2, %v5231_v38  ;;  %v5229_v27 = vadd.f32 %v9426_v28, %v5094_v23  ;;  %v9475_v51 = vpop.f32.mrf.mxu1  ;;  %v10633_v8 = vld [vmem:[#allocation86_spill] sm:$0xff] }
 0x205   : > { %v5099_v53 = vadd.f32 %v7654_v46, %v4353_v54  ;;  %v4351_v49 = vadd.f32 %v3852_v5, %v10632_v24  ;;  %v7523_v3 = vpop.f32.mrf.mxu0  ;;  %v9478_v40 = vrot.slane %v4476_v42, 4  ;;  %v9480_v21 = vrot.slane %v4479_v17, 5  ;;  %v10635_v42 = vld [vmem:[#allocation116_spill] sm:$0xff] }
 0x206   : > { %6127 = vst.msk [vmem:[%s9468_s15 + $0x8] sm:$0xf] %vm6124_vm4, %v6858_v19  ;;  %v6856_v58 = vpack.c.bf16 %v5484_v41, %v5484_v41  ;;  %v5487_v2 = vmax.f32 %v5231_v38, %v5359_v25  ;;  %v5357_v30 = vmul.f32 0.2, %v5229_v27  ;;  %v4354_v15 = vadd.f32 %v7523_v3, %v10633_v8  ;;  %v9485_v23 = vpop.f32.mrf.mxu1  ;;  %7757 = vmatmul.mubr.msk.bf16.gmra.mxu1 %vm1962_vm2, %v10634_v1  ;;  %v10636_v1 = vld [vmem:[#allocation89_spill] sm:$0xff] }
 0x207   : > { %v5234_v24 = vadd.f32 %v9426_v28, %v5099_v53  ;;  %v5097_v5 = vadd.f32 %v9414_v16, %v4351_v49  ;;  %v3855_v54 = vpop.f32.mrf.mxu0  ;;  %7760 = vmatprep.mubr.msk.bf16.mxu1 %vm1962_vm2, %v10635_v42  ;;  %v9493_v46 = vrot.slane %v4485_v35, 5  ;;  %v9495_v17 = vrot.slane %v4489_v52, 4  ;;  %v9504_v49 = vld [vmem:[%s7919_s28 + $0x28c] sm:$0xf]  ;;  %v10637_v35 = vld [vmem:[#allocation96_spill] sm:$0xff] }
 0x208   : > { %6125 = vst.msk [vmem:[%s9468_s15] sm:$0xf] %vm6124_vm4, %v6856_v58  ;;  %v6859_v3 = vpack.c.bf16 %v5487_v2, %v5487_v2  ;;  %v5485_v38 = vmax.f32 %v5229_v27, %v5357_v30  ;;  %v5100_v19 = vadd.f32 %v9421_v4, %v4354_v15  ;;  %v4352_v41 = vadd.f32 %v3855_v54, %v10636_v1  ;;  %v9501_v53 = vpop.f32.mrf.mxu1  ;;  %v10638_v30 = vld [vmem:[#allocation90_spill] sm:$0xff]  ;;  %v10639_v54 = vld [vmem:[#allocation101_spill] sm:$0xff] }
 0x209   : > { %v5362_v16 = vmul.f32 0.2, %v5234_v24  ;;  %v5232_v25 = vadd.f32 %v9426_v28, %v5097_v5  ;;  %v7526_v8 = vpop.f32.mrf.mxu0  ;;  %7621 = vmatmul.mubr.msk.bf16.gmra.mxu0 %vm1962_vm2, %v10637_v35  ;;  %v9509_v52 = vrot.slane %v4495_v37, 5  ;;  %v9511_v2 = vrot.slane %v4499_v11, 4 }
 0x20a   : > { %6128 = vst.msk [vmem:[%s9468_s15 + $0xc] sm:$0xf] %vm6124_vm4, %v6859_v3  ;;  %v6857_v58 = vpack.c.bf16 %v5485_v38, %v5485_v38  ;;  %v5235_v27 = vadd.f32 %v9426_v28, %v5100_v19  ;;  %v5098_v4 = vadd.f32 %v9431_v47, %v4352_v41  ;;  %v4357_v15 = vadd.f32 %v7526_v8, %v10638_v30  ;;  %v9520_v5 = vpop.f32.mrf.mxu1  ;;  %v10640_v19 = vld [vmem:[#allocation91_spill] sm:$0xff] }
 0x20b   : > { %7624 = vmatprep.mubr.msk.bf16.mxu0 %vm1962_vm2, %v10639_v54  ;;  %v5490_v42 = vmax.f32 %v5234_v24, %v5362_v16  ;;  %v5360_v1 = vmul.f32 0.2, %v5232_v25  ;;  %v3868_v37 = vpop.f32.mrf.mxu0  ;;  %v4505_v11 = vshll.u32 %v9504_v49, 16  ;;  %v4509_v35 = vshrl.u32 %v9504_v49, 16 }
 0x20c   : > { %6126 = vst.msk [vmem:[%s9468_s15 + $0x4] sm:$0xf] %vm6124_vm4, %v6857_v58  ;;  %v5363_v3 = vmul.f32 0.2, %v5235_v27  ;;  %v5233_v47 = vadd.f32 %v9426_v28, %v5098_v4  ;;  %v5103_v38 = vadd.f32 %v9435_v44, %v4357_v15  ;;  %v4355_v41 = vadd.f32 %v3868_v37, %v10640_v19  ;;  %v9529_v8 = vpop.f32.mrf.mxu1  ;;  %v10641_v15 = vld [vmem:[#allocation121_spill] sm:$0xff] }
 0x20d   : > { %v6862_v24 = vpack.c.bf16 %v5490_v42, %v5490_v42  ;;  %v5488_v16 = vmax.f32 %v5232_v25, %v5360_v1  ;;  %v7527_v30 = vpop.f32.mrf.mxu0  ;;  %v4482_v54 = vor.u32 %v9480_v21, %v9478_v40  ;;  %v4492_v58 = vor.u32 %v9495_v17, %v9493_v46  ;;  %v9542_v25 = vld [vmem:[%s7919_s28 + $0x290] sm:$0x1]  ;;  %v10642_v21 = vld [vmem:[#allocation94_spill] sm:$0xff] }
 0x20e   : > { %v5491_v55 = vmax.f32 %v5235_v27, %v5363_v3  ;;  %v5361_v62 = vmul.f32 0.2, %v5233_v47  ;;  %v5238_v4 = vadd.f32 %v9426_v28, %v5103_v38  ;;  %v5101_v0 = vadd.f32 %v9450_v39, %v4355_v41  ;;  %v9537_v44 = vpop.f32.mrf.mxu1  ;;  %7761 = vmatmul.mubr.msk.bf16.gmra.mxu1 %vm1962_vm2, %v10641_v15 }
 0x20f   : > { %6131 = vst.msk [vmem:[%s9468_s15 + $0x18] sm:$0xf] %vm6124_vm4, %v6862_v24  ;;  %v6860_v40 = vpack.c.bf16 %v5488_v16, %v5488_v16  ;;  %v4358_v42 = vadd.f32 %v7527_v30, %v10642_v21  ;;  %v3871_v17 = vpop.f32.mrf.mxu0  ;;  %7764 = vmatprep.mubr.msk.bf16.mxu1 %vm1962_vm2, %v8960_v48  ;;  %v4502_v39 = vor.u32 %v9511_v2, %v9509_v52  ;;  %v9551_v27 = vrot.slane %v4505_v11, 5  ;;  %v10643_v24 = vld [vmem:[#allocation97_spill] sm:$0xff]  ;;  %v10644_v48 = vld [vmem:[#allocation104_spill] sm:$0xff] }
 0x210   : > { %v6863_v1 = vpack.c.bf16 %v5491_v55, %v5491_v55  ;;  %v5489_v37 = vmax.f32 %v5233_v47, %v5361_v62  ;;  %v5366_v3 = vmul.f32 0.2, %v5238_v4  ;;  %v5236_v38 = vadd.f32 %v9426_v28, %v5101_v0  ;;  %v9554_v19 = vpop.f32.mrf.mxu1  ;;  %v10645_v47 = vld [vmem:[#allocation98_spill] sm:$0xff] }
 0x211   : > { %6129 = vst.msk [vmem:[%s9468_s15 + $0x10] sm:$0xf] %vm6124_vm4, %v6860_v40  ;;  %v5104_v41 = vadd.f32 %v9463_v63, %v4358_v42  ;;  %v4356_v16 = vadd.f32 %v3871_v17, %v10643_v24  ;;  %v7530_v30 = vpop.f32.mrf.mxu0  ;;  %7625 = vmatmul.mubr.msk.bf16.gmra.mxu0 %vm1962_vm2, %v10644_v48  ;;  %v4511_v2 = vrot.slane %v4509_v35, 4  ;;  %v4515_v55 = vshll.u32 %v9542_v25, 16  ;;  %v10646_v40 = vld [vmem:[#allocation109_spill] sm:$0xff] }
 0x212   : > { %6132 = vst.msk [vmem:[%s9468_s15 + $0x1c] sm:$0xf] %vm6124_vm4, %v6863_v1  ;;  %v6861_v62 = vpack.c.bf16 %v5489_v37, %v5489_v37  ;;  %v5494_v0 = vmax.f32 %v5238_v4, %v5366_v3  ;;  %v5364_v11 = vmul.f32 0.2, %v5236_v38  ;;  %v4361_v15 = vadd.f32 %v7530_v30, %v10645_v47  ;;  %7628 = vmatprep.mubr.msk.bf16.mxu0 %vm1962_vm2, %v10646_v40  ;;  %v9568_v63 = vpop.f32.mrf.mxu1  ;;  %v10647_v3 = vld [vmem:[#allocation99_spill] sm:$0xff] }
 0x213   : > { %v5239_v21 = vadd.f32 %v9426_v28, %v5104_v41  ;;  %v5102_v42 = vadd.f32 %v9475_v51, %v4356_v16  ;;  %v3884_v35 = vpop.f32.mrf.mxu0  ;;  %v4483_v17 = vrot.slane %v4482_v54, 4  ;;  %v4493_v25 = vrot.slane %v4492_v58, 4 }
 0x214   : > { %6130 = vst.msk [vmem:[%s9468_s15 + $0x14] sm:$0xf] %vm6124_vm4, %v6861_v62  ;;  %v6866_v1 = vpack.c.bf16 %v5494_v0, %v5494_v0  ;;  %v5492_v4 = vmax.f32 %v5236_v38, %v5364_v11  ;;  %v5107_v37 = vadd.f32 %v9485_v23, %v4361_v15  ;;  %v4359_v24 = vadd.f32 %v3884_v35, %v10647_v3  ;;  %v9576_v30 = vpop.f32.mrf.mxu1  ;;  %v10648_v38 = vld [vmem:[#allocation102_spill] sm:$0xff] }
 0x215   : > { %v5367_v48 = vmul.f32 0.2, %v5239_v21  ;;  %v5237_v47 = vadd.f32 %v9426_v28, %v5102_v42  ;;  %v7531_v41 = vpop.f32.mrf.mxu0  ;;  %v9579_v40 = vrot.slane %v4502_v39, 4  ;;  %v4512_v51 = vor.u32 %v4511_v2, %v9551_v27 }
 0x216   : > { %6135 = vst.msk [vmem:[%s9468_s15 + $0x28] sm:$0xf] %vm6124_vm4, %v6866_v1  ;;  %v6864_v54 = vpack.c.bf16 %v5492_v4, %v5492_v4  ;;  %v5242_v58 = vadd.f32 %v9426_v28, %v5107_v37  ;;  %v5105_v23 = vadd.f32 %v9501_v53, %v4359_v24  ;;  %v4362_v16 = vadd.f32 %v7531_v41, %v10648_v38  ;;  %v9587_v62 = vpop.f32.mrf.mxu1 }
 0x217   : > { %7765 = vmatmul.mubr.msk.bf16.gmra.mxu1 %vm1962_vm2, %v8981_v12  ;;  %v5495_v0 = vmax.f32 %v5239_v21, %v5367_v48  ;;  %v5365_v11 = vmul.f32 0.2, %v5237_v47  ;;  %v3887_v39 = vpop.f32.mrf.mxu0  ;;  %v4488_v2 = vsel %vm7936_vm3, %v4483_v17, %v9493_v46  ;;  %v4498_v53 = vsel %vm7936_vm3, %v4493_v25, %v9509_v52  ;;  %v10649_v21 = vld [vmem:[#allocation105_spill] sm:$0xff]  ;;  %v10650_v46 = vld [vmem:[#allocation112_spill] sm:$0xff] }
 0x218   : > { %7768 = vmatprep.mubr.msk.bf16.mxu1 %vm1962_vm2, %v9008_v32  ;;  %6133 = vst.msk [vmem:[%s9468_s15 + $0x20] sm:$0xf] %vm6124_vm4, %v6864_v54  ;;  %v5370_v15 = vmul.f32 0.2, %v5242_v58  ;;  %v5240_v42 = vadd.f32 %v9426_v28, %v5105_v23  ;;  %v5108_v12 = vadd.f32 %v9520_v5, %v4362_v16  ;;  %v4360_v35 = vadd.f32 %v3887_v39, %v10649_v21  ;;  %v9604_v1 = vpop.f32.mrf.mxu1  ;;  %v10651_v5 = vld [vmem:[#allocation117_spill] sm:$0xff]  ;;  %v10652_v54 = vld [vmem:[#allocation106_spill] sm:$0xff] }
 0x219   : > { %v6867_v32 = vpack.c.bf16 %v5495_v0, %v5495_v0  ;;  %v5493_v4 = vmax.f32 %v5237_v47, %v5365_v11  ;;  %v7534_v37 = vpop.f32.mrf.mxu0  ;;  %7629 = vmatmul.mubr.msk.bf16.gmra.mxu0 %vm1962_vm2, %v10650_v46  ;;  %v4513_v17 = vrot.slane %v4512_v51, 4  ;;  %v4517_v52 = vrot.slane %v4515_v55, 5  ;;  %v10653_v39 = vld [vmem:[#allocation107_spill] sm:$0xff] }
 0x21a   : > { %v5498_v25 = vmax.f32 %v5242_v58, %v5370_v15  ;;  %v5368_v3 = vmul.f32 0.2, %v5240_v42  ;;  %v5243_v24 = vadd.f32 %v9426_v28, %v5108_v12  ;;  %v5106_v48 = vadd.f32 %v9529_v8, %v4360_v35  ;;  %7632 = vmatprep.mubr.msk.bf16.mxu0 %vm1962_vm2, %v10651_v5  ;;  %v9612_v41 = vpop.f32.mrf.mxu1  ;;  %v10656_v5 = vld [vmem:[#allocation119_spill] sm:$0xff] }
 0x21b   : > { %6136 = vst.msk [vmem:[%s9468_s15 + $0x2c] sm:$0xf] %vm6124_vm4, %v6867_v32  ;;  %v6865_v47 = vpack.c.bf16 %v5493_v4, %v5493_v4  ;;  %v4365_v23 = vadd.f32 %v7534_v37, %v10652_v54  ;;  %v3900_v51 = vpop.f32.mrf.mxu0  ;;  %v6657_v55 = vcombine.low %v4488_v2, %v4498_v53  ;;  %v4508_v2 = vsel %vm7936_vm3, %v9579_v40, %v9551_v27  ;;  %v10654_v32 = vld [vmem:[#allocation110_spill] sm:$0xff] }
 0x21c   : > { %v6870_v58 = vpack.c.bf16 %v5498_v25, %v5498_v25  ;;  %v5496_v38 = vmax.f32 %v5240_v42, %v5368_v3  ;;  %v5371_v16 = vmul.f32 0.2, %v5243_v24  ;;  %v5241_v0 = vadd.f32 %v9426_v28, %v5106_v48  ;;  %v9618_v11 = vpop.f32.mrf.mxu1 }
 0x21d   : > { %6134 = vst.msk [vmem:[%s9468_s15 + $0x24] sm:$0xf] %vm6124_vm4, %v6865_v47  ;;  %v5111_v8 = vadd.f32 %v9537_v44, %v4365_v23  ;;  %v4363_v15 = vadd.f32 %v3900_v51, %v10653_v39  ;;  %v7535_v12 = vpop.f32.mrf.mxu0  ;;  %v4518_v53 = vsel %vm7936_vm3, %v4513_v17, %v4517_v52  ;;  %v10655_v52 = vld [vmem:[#allocation113_spill] sm:$0xff]  ;;  %v10657_v23 = vld [vmem:[#allocation114_spill] sm:$0xff] }
 0x21e   : > { %6139 = vst.msk [vmem:[%s9468_s15 + $0x38] sm:$0xf] %vm6124_vm4, %v6870_v58  ;;  %v6868_v42 = vpack.c.bf16 %v5496_v38, %v5496_v38  ;;  %v5499_v21 = vmax.f32 %v5243_v24, %v5371_v16  ;;  %v5369_v35 = vmul.f32 0.2, %v5241_v0  ;;  %v4366_v4 = vadd.f32 %v7535_v12, %v10654_v32  ;;  %v9633_v44 = vpop.f32.mrf.mxu1 }
 0x21f   : > { %7769 = vmatmul.mubr.msk.bf16.gmra.mxu1 %vm1962_vm2, %v9025_v61  ;;  %v5246_v37 = vadd.f32 %v9426_v28, %v5111_v8  ;;  %v5109_v27 = vadd.f32 %v9554_v19, %v4363_v15  ;;  %v3903_v40 = vpop.f32.mrf.mxu0  ;;  %v6658_v19 = vcombine.low %v4508_v2, %v4518_v53  ;;  %v10658_v15 = vld [vmem:[#allocation115_spill] sm:$0xff] }
 0x220   : > { %7772 = vmatprep.mubr.msk.bf16.mxu1 %vm1962_vm2, %v6657_v55  ;;  %6137 = vst.msk [vmem:[%s9468_s15 + $0x30] sm:$0xf] %vm6124_vm4, %v6868_v42  ;;  %v6871_v33 = vpack.c.bf16 %v5499_v21, %v5499_v21  ;;  %v5497_v46 = vmax.f32 %v5241_v0, %v5369_v35  ;;  %v5112_v17 = vadd.f32 %v9568_v63, %v4366_v4  ;;  %v9644_v3 = vpop.f32.mrf.mxu1 }
 0x221   : > { %v4364_v25 = vadd.f32 %v3903_v40, %v10655_v52  ;;  %v5374_v61 = vmul.f32 0.2, %v5246_v37  ;;  %v5244_v24 = vadd.f32 %v9426_v28, %v5109_v27  ;;  %v7538_v48 = vpop.f32.mrf.mxu0  ;;  %7633 = vmatmul.mubr.msk.bf16.gmra.mxu0 %vm1962_vm2, %v10656_v5  ;;  %v6585_v42 = vcombine.low %v9440_v13, %v9443_v20  ;;  %v10659_v27 = vld [vmem:[#allocation118_spill] sm:$0xff] }
 0x222   : > { %6140 = vst.msk [vmem:[%s9468_s15 + $0x3c] sm:$0xf] %vm6124_vm4, %v6871_v33  ;;  %v6869_v47 = vpack.c.bf16 %v5497_v46, %v5497_v46  ;;  %v5247_v54 = vadd.f32 %v9426_v28, %v5112_v17  ;;  %v4369_v51 = vadd.f32 %v7538_v48, %v10657_v23  ;;  %7636 = vmatprep.mubr.msk.bf16.mxu0 %vm1962_vm2, %v8964_v60  ;;  %v9656_v55 = vpop.f32.mrf.mxu1 }
 0x223   : > { %v5110_v63 = vadd.f32 %v9576_v30, %v4364_v25  ;;  %v5502_v58 = vmax.f32 %v5246_v37, %v5374_v61  ;;  %v5372_v38 = vmul.f32 0.2, %v5244_v24  ;;  %v3916_v16 = vpop.f32.mrf.mxu0  ;;  %v10660_v25 = vld [vmem:[#allocation120_spill] sm:$0xff] }
 0x224   : > { %6138 = vst.msk [vmem:[%s9468_s15 + $0x34] sm:$0xf] %vm6124_vm4, %v6869_v47  ;;  %v5375_v0 = vmul.f32 0.2, %v5247_v54  ;;  %v5115_v39 = vadd.f32 %v9587_v62, %v4369_v51  ;;  %v4367_v30 = vadd.f32 %v3916_v16, %v10658_v15  ;;  %v9663_v12 = vpop.f32.mrf.mxu1  ;;  %v10661_v47 = vld [vmem:[#allocation122_spill] sm:$0xff]  ;;  %v10662_v16 = vld [vmem:[#allocation123_spill] sm:$0xff] }
 0x225   : > { %v5245_v8 = vadd.f32 %v9426_v28, %v5110_v63  ;;  %v6874_v2 = vpack.c.bf16 %v5502_v58, %v5502_v58  ;;  %v5500_v53 = vmax.f32 %v5244_v24, %v5372_v38  ;;  %v7539_v60 = vpop.f32.mrf.mxu0 }
 0x226   : > { %v5503_v21 = vmax.f32 %v5247_v54, %v5375_v0  ;;  %v5250_v32 = vadd.f32 %v9426_v28, %v5115_v39  ;;  %v5113_v4 = vadd.f32 %v9604_v1, %v4367_v30  ;;  %v9669_v37 = vpop.f32.mrf.mxu1  ;;  %v4370_v40 = vadd.f32 %v7539_v60, %v10659_v27 }
 0x227   : > { %v5373_v35 = vmul.f32 0.2, %v5245_v8  ;;  %7773 = vmatmul.mubr.msk.bf16.gmra.mxu1 %vm1962_vm2, %v6658_v19  ;;  %6143 = vst.msk [vmem:[%s9468_s15 + $0x48] sm:$0xf] %vm6124_vm4, %v6874_v2  ;;  %v6872_v62 = vpack.c.bf16 %v5500_v53, %v5500_v53  ;;  %v3919_v33 = vpop.f32.mrf.mxu0  ;;  %v6586_v2 = vcombine.low %v9453_v34, %v9504_v49 }
 0x228   : > { %v6875_v46 = vpack.c.bf16 %v5503_v21, %v5503_v21  ;;  %v5378_v13 = vmul.f32 0.2, %v5250_v32  ;;  %v5248_v17 = vadd.f32 %v9426_v28, %v5113_v4  ;;  %v9676_v52 = vpop.f32.mrf.mxu1  ;;  %v5116_v1 = vadd.f32 %v9612_v41, %v4370_v40 }
 0x229   : > { %v5501_v20 = vmax.f32 %v5245_v8, %v5373_v35  ;;  %6141 = vst.msk [vmem:[%s9468_s15 + $0x40] sm:$0xf] %vm6124_vm4, %v6872_v62  ;;  %v4368_v61 = vadd.f32 %v3919_v33, %v10660_v25  ;;  %v7542_v24 = vpop.f32.mrf.mxu0  ;;  %7637 = vmatmul.mubr.msk.bf16.gmra.mxu0 %vm1962_vm2, %v8971_v22 }
 0x22a   : > { %6144 = vst.msk [vmem:[%s9468_s15 + $0x4c] sm:$0xf] %vm6124_vm4, %v6875_v46  ;;  %v5506_v5 = vmax.f32 %v5250_v32, %v5378_v13  ;;  %v5376_v19 = vmul.f32 0.2, %v5248_v17  ;;  %v4373_v54 = vadd.f32 %v7542_v24, %v10661_v47  ;;  %7640 = vmatprep.mubr.msk.bf16.mxu0 %vm1962_vm2, %v6585_v42  ;;  %v9688_v63 = vpop.f32.mrf.mxu1  ;;  %v5251_v41 = vadd.f32 %v9426_v28, %v5116_v1 }
 0x22b   : > { %v6873_v48 = vpack.c.bf16 %v5501_v20, %v5501_v20  ;;  %v5114_v23 = vadd.f32 %v9618_v11, %v4368_v61  ;;  %v3932_v51 = vpop.f32.mrf.mxu0 }
 0x22c   : > { %v6878_v22 = vpack.c.bf16 %v5506_v5, %v5506_v5  ;;  %v5504_v58 = vmax.f32 %v5248_v17, %v5376_v19  ;;  %v5119_v38 = vadd.f32 %v9633_v44, %v4373_v54  ;;  %v4371_v0 = vadd.f32 %v3932_v51, %v10662_v16  ;;  %v9696_v8 = vpop.f32.mrf.mxu1  ;;  %v10663_v44 = vld [vmem:[#allocation124_spill] sm:$0xff] }
 0x22d   : > { %6142 = vst.msk [vmem:[%s9468_s15 + $0x44] sm:$0xf] %vm6124_vm4, %v6873_v48  ;;  %v5379_v39 = vmul.f32 0.2, %v5251_v41  ;;  %v5249_v15 = vadd.f32 %v9426_v28, %v5114_v23  ;;  %v7543_v30 = vpop.f32.mrf.mxu0 }
 0x22e   : > { %6147 = vst.msk [vmem:[%s9468_s15 + $0x58] sm:$0xf] %vm6124_vm4, %v6878_v22  ;;  %v6876_v11 = vpack.c.bf16 %v5504_v58, %v5504_v58  ;;  %v5254_v53 = vadd.f32 %v9426_v28, %v5119_v38  ;;  %v5117_v60 = vadd.f32 %v9644_v3, %v4371_v0  ;;  %v4374_v42 = vadd.f32 %v7543_v30, %v10663_v44  ;;  %v7682_v21 = vpop.f32.mrf.mxu1 }
 0x22f   : > { %v5507_v35 = vmax.f32 %v5251_v41, %v5379_v39  ;;  %v5377_v32 = vmul.f32 0.2, %v5249_v15  ;;  %v3935_v4 = vpop.f32.mrf.mxu0 }
 0x230   : > { %6145 = vst.msk [vmem:[%s9468_s15 + $0x50] sm:$0xf] %vm6124_vm4, %v6876_v11  ;;  %v5382_v62 = vmul.f32 0.2, %v5254_v53  ;;  %v5252_v27 = vadd.f32 %v9426_v28, %v5117_v60  ;;  %v5120_v34 = vadd.f32 %v9656_v55, %v4374_v42  ;;  %v4372_v49 = vadd.f32 %v3935_v4, %v8978_v26  ;;  %v4710_v40 = vpop.f32.mrf.mxu1 }
 0x231   : > { %v6879_v33 = vpack.c.bf16 %v5507_v35, %v5507_v35  ;;  %v5505_v46 = vmax.f32 %v5249_v15, %v5377_v32  ;;  %v7546_v3 = vpop.f32.mrf.mxu0  ;;  %7641 = vmatmul.mubr.msk.bf16.gmra.mxu0 %vm1962_vm2, %v6586_v2 }
 0x232   : > { %v5510_v20 = vmax.f32 %v5254_v53, %v5382_v62  ;;  %v5380_v13 = vmul.f32 0.2, %v5252_v27  ;;  %v5255_v17 = vadd.f32 %v9426_v28, %v5120_v34  ;;  %v5118_v1 = vadd.f32 %v9663_v12, %v4372_v49  ;;  %v9714_v25 = vpop.f32.mrf.mxu1 }
 0x233   : > { %6148 = vst.msk [vmem:[%s9468_s15 + $0x5c] sm:$0xf] %vm6124_vm4, %v6879_v33  ;;  %v6877_v55 = vpack.c.bf16 %v5505_v46, %v5505_v46  ;;  %v4377_v26 = vadd.f32 %v7546_v3, %v8986_v56  ;;  %v3948_v61 = vpop.f32.mrf.mxu0 }
 0x234   : > { %v6882_v24 = vpack.c.bf16 %v5510_v20, %v5510_v20  ;;  %v5508_v48 = vmax.f32 %v5252_v27, %v5380_v13  ;;  %v5383_v5 = vmul.f32 0.2, %v5255_v17  ;;  %v5253_v19 = vadd.f32 %v9426_v28, %v5118_v1  ;;  %v9720_v47 = vpop.f32.mrf.mxu1 }
 0x235   : > { %6146 = vst.msk [vmem:[%s9468_s15 + $0x54] sm:$0xf] %vm6124_vm4, %v6877_v55  ;;  %v5123_v12 = vadd.f32 %v9669_v37, %v4377_v26  ;;  %v4375_v54 = vadd.f32 %v3948_v61, %v8993_v14  ;;  %v7547_v41 = vpop.f32.mrf.mxu0 }
 0x236   : > { %6151 = vst.msk [vmem:[%s9468_s15 + $0x68] sm:$0xf] %vm6124_vm4, %v6882_v24  ;;  %v6880_v23 = vpack.c.bf16 %v5508_v48, %v5508_v48  ;;  %v5511_v56 = vmax.f32 %v5255_v17, %v5383_v5  ;;  %v5381_v51 = vmul.f32 0.2, %v5253_v19  ;;  %v4378_v22 = vadd.f32 %v7547_v41, %v8998_v45  ;;  %v7686_v58 = vpop.f32.mrf.mxu1 }
 0x237   : > { %v5258_v38 = vadd.f32 %v9426_v28, %v5123_v12  ;;  %v5121_v16 = vadd.f32 %v9676_v52, %v4375_v54  ;;  %v3951_v0 = vpop.f32.mrf.mxu0 }
 0x238   : > { %6149 = vst.msk [vmem:[%s9468_s15 + $0x60] sm:$0xf] %vm6124_vm4, %v6880_v23  ;;  %v6883_v37 = vpack.c.bf16 %v5511_v56, %v5511_v56  ;;  %v5509_v39 = vmax.f32 %v5253_v19, %v5381_v51  ;;  %v5124_v14 = vadd.f32 %v9688_v63, %v4378_v22  ;;  %v4376_v15 = vadd.f32 %v3951_v0, %v9001_v31  ;;  %v4726_v30 = vpop.f32.mrf.mxu1 }
 0x239   : > { %v5386_v2 = vmul.f32 0.2, %v5258_v38  ;;  %v5256_v11 = vadd.f32 %v9426_v28, %v5121_v16  ;;  %v7550_v45 = vpop.f32.mrf.mxu0 }
 0x23a   : > { %6152 = vst.msk [vmem:[%s9468_s15 + $0x6c] sm:$0xf] %vm6124_vm4, %v6883_v37  ;;  %v6881_v53 = vpack.c.bf16 %v5509_v39, %v5509_v39  ;;  %v5259_v52 = vadd.f32 %v9426_v28, %v5124_v14  ;;  %v5122_v60 = vadd.f32 %v9696_v8, %v4376_v15  ;;  %v4381_v44 = vadd.f32 %v7550_v45, %v9004_v29  ;;  %v7687_v42 = vpop.f32.mrf.mxu1 }
 0x23b   : > { %v5514_v35 = vmax.f32 %v5258_v38, %v5386_v2  ;;  %v5384_v32 = vmul.f32 0.2, %v5256_v11  ;;  %v3964_v63 = vpop.f32.mrf.mxu0 }
 0x23c   : > { %6150 = vst.msk [vmem:[%s9468_s15 + $0x64] sm:$0xf] %vm6124_vm4, %v6881_v53  ;;  %v5387_v31 = vmul.f32 0.2, %v5259_v52  ;;  %v5257_v4 = vadd.f32 %v9426_v28, %v5122_v60  ;;  %v5127_v62 = vadd.f32 %v7682_v21, %v4381_v44  ;;  %v4379_v27 = vadd.f32 %v3964_v63, %v9011_v36  ;;  %v4729_v34 = vpop.f32.mrf.mxu1 }
 0x23d   : > { %v6886_v49 = vpack.c.bf16 %v5514_v35, %v5514_v35  ;;  %v5512_v33 = vmax.f32 %v5256_v11, %v5384_v32  ;;  %v7551_v8 = vpop.f32.mrf.mxu0 }
 0x23e   : > { %v5515_v46 = vmax.f32 %v5259_v52, %v5387_v31  ;;  %v5385_v29 = vmul.f32 0.2, %v5257_v4  ;;  %v5262_v3 = vadd.f32 %v9426_v28, %v5127_v62  ;;  %v5125_v20 = vadd.f32 %v4710_v40, %v4379_v27  ;;  %v9746_v13 = vpop.f32.mrf.mxu1 }
 0x23f   : > { %6155 = vst.msk [vmem:[%s9468_s15 + $0x78] sm:$0xf] %vm6124_vm4, %v6886_v49  ;;  %v6884_v17 = vpack.c.bf16 %v5512_v33, %v5512_v33  ;;  %v4382_v21 = vadd.f32 %v7551_v8, %v9013_v6  ;;  %v3967_v1 = vpop.f32.mrf.mxu0 }
 0x240   : > { %v6887_v36 = vpack.c.bf16 %v5515_v46, %v5515_v46  ;;  %v5513_v55 = vmax.f32 %v5257_v4, %v5385_v29  ;;  %v5390_v26 = vmul.f32 0.2, %v5262_v3  ;;  %v5260_v61 = vadd.f32 %v9426_v28, %v5125_v20  ;;  %v9752_v24 = vpop.f32.mrf.mxu1 }
 0x241   : > { %6153 = vst.msk [vmem:[%s9468_s15 + $0x70] sm:$0xf] %vm6124_vm4, %v6884_v17  ;;  %v5128_v40 = vadd.f32 %v9714_v25, %v4382_v21  ;;  %v4380_v48 = vadd.f32 %v3967_v1, %v9017_v43  ;;  %v7554_v5 = vpop.f32.mrf.mxu0 }
 0x242   : > { %6156 = vst.msk [vmem:[%s9468_s15 + $0x7c] sm:$0xf] %vm6124_vm4, %v6887_v36  ;;  %v6885_v19 = vpack.c.bf16 %v5513_v55, %v5513_v55  ;;  %v5518_v6 = vmax.f32 %v5262_v3, %v5390_v26  ;;  %v5388_v12 = vmul.f32 0.2, %v5260_v61  ;;  %v4385_v54 = vadd.f32 %v7554_v5, %v9029_v9  ;;  %v7691_v41 = vpop.f32.mrf.mxu1 }
 0x243   : > { %v5263_v23 = vadd.f32 %v9426_v28, %v5128_v40  ;;  %v5126_v56 = vadd.f32 %v9720_v47, %v4380_v48  ;;  %v3980_v51 = vpop.f32.mrf.mxu0  ;;  %v10664_v48 = vld [vmem:[#allocation125_spill] sm:$0xff] }
 0x244   : > { %6154 = vst.msk [vmem:[%s9468_s15 + $0x74] sm:$0xf] %vm6124_vm4, %v6885_v19  ;;  %v6890_v25 = vpack.c.bf16 %v5518_v6, %v5518_v6  ;;  %v5516_v22 = vmax.f32 %v5260_v61, %v5388_v12  ;;  %v5131_v43 = vadd.f32 %v7686_v58, %v4385_v54  ;;  %v4383_v38 = vadd.f32 %v3980_v51, %v9033_v50  ;;  %v4745_v16 = vpop.f32.mrf.mxu1 }
 0x245   : > { %v5391_v0 = vmul.f32 0.2, %v5263_v23  ;;  %v5261_v37 = vadd.f32 %v9426_v28, %v5126_v56  ;;  %v7555_v39 = vpop.f32.mrf.mxu0  ;;  %v10665_v56 = vld [vmem:[#allocation126_spill] sm:$0xff] }
 0x246   : > { %6159 = vst.msk [vmem:[%s9468_s15 + $0x88] sm:$0xf] %vm6124_vm4, %v6890_v25  ;;  %v6888_v9 = vpack.c.bf16 %v5516_v22, %v5516_v22  ;;  %v5266_v14 = vadd.f32 %v9426_v28, %v5131_v43  ;;  %v5129_v47 = vadd.f32 %v4726_v30, %v4383_v38  ;;  %v4386_v15 = vadd.f32 %v7555_v39, %v9037_v10  ;;  %v7694_v2 = vpop.f32.mrf.mxu1  ;;  %v10666_v39 = vld [vmem:[#allocation127_spill] sm:$0xff] }
 0x247   : > { %v5519_v11 = vmax.f32 %v5263_v23, %v5391_v0  ;;  %v5389_v45 = vmul.f32 0.2, %v5261_v37  ;;  %v3983_v58 = vpop.f32.mrf.mxu0 }
 0x248   : > { %6157 = vst.msk [vmem:[%s9468_s15 + $0x80] sm:$0xf] %vm6124_vm4, %v6888_v9  ;;  %v5394_v50 = vmul.f32 0.2, %v5266_v14  ;;  %v5264_v53 = vadd.f32 %v9426_v28, %v5129_v47  ;;  %v5132_v52 = vadd.f32 %v7687_v42, %v4386_v15  ;;  %v4384_v60 = vadd.f32 %v3983_v58, %v9039_v7  ;;  %v4758_v44 = vpop.f32.mrf.mxu1 }
 0x249   : > { %v6891_v35 = vpack.c.bf16 %v5519_v11, %v5519_v11  ;;  %v5517_v32 = vmax.f32 %v5261_v37, %v5389_v45  ;;  %v7558_v30 = vpop.f32.mrf.mxu0 }
 0x24a   : > { %v5522_v63 = vmax.f32 %v5266_v14, %v5394_v50  ;;  %v5392_v10 = vmul.f32 0.2, %v5264_v53  ;;  %v5267_v31 = vadd.f32 %v9426_v28, %v5132_v52  ;;  %v5130_v4 = vadd.f32 %v4729_v34, %v4384_v60  ;;  %v9776_v62 = vpop.f32.mrf.mxu1  ;;  %v10667_v60 = vld [vmem:[#allocation128_spill] sm:$0xff] }
 0x24b   : > { %6160 = vst.msk [vmem:[%s9468_s15 + $0x8c] sm:$0xf] %vm6124_vm4, %v6891_v35  ;;  %v6889_v27 = vpack.c.bf16 %v5517_v32, %v5517_v32  ;;  %v4389_v42 = vadd.f32 %v7558_v30, %v9045_v59  ;;  %v3996_v49 = vpop.f32.mrf.mxu0 }
 0x24c   : > { %v6894_v7 = vpack.c.bf16 %v5522_v63, %v5522_v63  ;;  %v5520_v33 = vmax.f32 %v5264_v53, %v5392_v10  ;;  %v5395_v8 = vmul.f32 0.2, %v5267_v31  ;;  %v5265_v46 = vadd.f32 %v9426_v28, %v5130_v4  ;;  %v9782_v29 = vpop.f32.mrf.mxu1  ;;  %v10668_v4 = vld [vmem:[#allocation129_spill] sm:$0xff] }
 0x24d   : > { %6158 = vst.msk [vmem:[%s9468_s15 + $0x84] sm:$0xf] %vm6124_vm4, %v6889_v27  ;;  %v5135_v34 = vadd.f32 %v9746_v13, %v4389_v42  ;;  %v4387_v3 = vadd.f32 %v3996_v49, %v9049_v57  ;;  %v7559_v20 = vpop.f32.mrf.mxu0 }
 0x24e   : > { %6163 = vst.msk [vmem:[%s9468_s15 + $0x98] sm:$0xf] %vm6124_vm4, %v6894_v7  ;;  %v6892_v17 = vpack.c.bf16 %v5520_v33, %v5520_v33  ;;  %v5523_v59 = vmax.f32 %v5267_v31, %v5395_v8  ;;  %v5393_v21 = vmul.f32 0.2, %v5265_v46  ;;  %v4390_v1 = vadd.f32 %v7559_v20, %v9053_v18  ;;  %v7698_v36 = vpop.f32.mrf.mxu1  ;;  %v10669_v8 = vld [vmem:[#allocation130_spill] sm:$0xff] }
 0x24f   : > { %v5270_v55 = vadd.f32 %v9426_v28, %v5135_v34  ;;  %v5133_v26 = vadd.f32 %v9752_v24, %v4387_v3  ;;  %v3999_v61 = vpop.f32.mrf.mxu0 }
 0x250   : > { %6161 = vst.msk [vmem:[%s9468_s15 + $0x90] sm:$0xf] %vm6124_vm4, %v6892_v17  ;;  %v6895_v13 = vpack.c.bf16 %v5523_v59, %v5523_v59  ;;  %v5521_v40 = vmax.f32 %v5265_v46, %v5393_v21  ;;  %v5136_v57 = vadd.f32 %v7691_v41, %v4390_v1  ;;  %v4388_v5 = vadd.f32 %v3999_v61, %v10664_v48  ;;  %v4774_v19 = vpop.f32.mrf.mxu1  ;;  %v10670_v1 = vld [vmem:[#allocation131_spill] sm:$0xff] }
 0x251   : > { %v5398_v6 = vmul.f32 0.2, %v5270_v55  ;;  %v5268_v12 = vadd.f32 %v9426_v28, %v5133_v26  ;;  %v7562_v54 = vpop.f32.mrf.mxu0 }
 0x252   : > { %6164 = vst.msk [vmem:[%s9468_s15 + $0x9c] sm:$0xf] %vm6124_vm4, %v6895_v13  ;;  %v6893_v18 = vpack.c.bf16 %v5521_v40, %v5521_v40  ;;  %v5271_v23 = vadd.f32 %v9426_v28, %v5136_v57  ;;  %v5134_v24 = vadd.f32 %v4745_v16, %v4388_v5  ;;  %v4393_v51 = vadd.f32 %v7562_v54, %v10665_v56  ;;  %v7699_v25 = vpop.f32.mrf.mxu1  ;;  %v10671_v5 = vld [vmem:[#allocation132_spill] sm:$0xff] }
 0x253   : > { %v5526_v22 = vmax.f32 %v5270_v55, %v5398_v6  ;;  %v5396_v43 = vmul.f32 0.2, %v5268_v12  ;;  %v4012_v41 = vpop.f32.mrf.mxu0 }
 0x254   : > { %6162 = vst.msk [vmem:[%s9468_s15 + $0x94] sm:$0xf] %vm6124_vm4, %v6893_v18  ;;  %v5399_v38 = vmul.f32 0.2, %v5271_v23  ;;  %v5269_v0 = vadd.f32 %v9426_v28, %v5134_v24  ;;  %v5139_v37 = vadd.f32 %v7694_v2, %v4393_v51  ;;  %v4391_v9 = vadd.f32 %v4012_v41, %v10666_v39  ;;  %v4777_v14 = vpop.f32.mrf.mxu1  ;;  %v10672_v51 = vld [vmem:[#allocation133_spill] sm:$0xff] }
 0x255   : > { %v6898_v47 = vpack.c.bf16 %v5526_v22, %v5526_v22  ;;  %v5524_v15 = vmax.f32 %v5268_v12, %v5396_v43  ;;  %v7563_v16 = vpop.f32.mrf.mxu0  ;;  %v9838_v39 = vld [vmem:[%s10233_s2] ss:$0 sm:$0xff] }
 0x256   : > { %v5527_v11 = vmax.f32 %v5271_v23, %v5399_v38  ;;  %v5397_v45 = vmul.f32 0.2, %v5269_v0  ;;  %v5274_v58 = vadd.f32 %v9426_v28, %v5139_v37  ;;  %v5137_v50 = vadd.f32 %v4758_v44, %v4391_v9  ;;  %v9806_v53 = vpop.f32.mrf.mxu1 }
 0x257   : > { %6167 = vst.msk [vmem:[%s9468_s15 + $0xa8] sm:$0xf] %vm6124_vm4, %v6898_v47  ;;  %v6896_v52 = vpack.c.bf16 %v5524_v15, %v5524_v15  ;;  %v4394_v2 = vadd.f32 %v7563_v16, %v10667_v60  ;;  %v4015_v35 = vpop.f32.mrf.mxu0  ;;  %v10673_v15 = vld [vmem:[#allocation134_spill] sm:$0xff] }
 0x258   : > { %v6899_v32 = vpack.c.bf16 %v5527_v11, %v5527_v11  ;;  %v5525_v30 = vmax.f32 %v5269_v0, %v5397_v45  ;;  %v5402_v63 = vmul.f32 0.2, %v5274_v58  ;;  %v5272_v10 = vadd.f32 %v9426_v28, %v5137_v50  ;;  %v9812_v31 = vpop.f32.mrf.mxu1 }
 0x259   : > { %6165 = vst.msk [vmem:[%s9468_s15 + $0xa0] sm:$0xf] %vm6124_vm4, %v6896_v52  ;;  %v5140_v44 = vadd.f32 %v9776_v62, %v4394_v2  ;;  %v4392_v27 = vadd.f32 %v4015_v35, %v10668_v4  ;;  %v7566_v42 = vpop.f32.mrf.mxu0  ;;  %v10674_v2 = vld [vmem:[#allocation135_spill] sm:$0xff] }
 0x25a   : > { %6168 = vst.msk [vmem:[%s9468_s15 + $0xac] sm:$0xf] %vm6124_vm4, %v6899_v32  ;;  %v6897_v49 = vpack.c.bf16 %v5525_v30, %v5525_v30  ;;  %v5530_v7 = vmax.f32 %v5274_v58, %v5402_v63  ;;  %v5400_v33 = vmul.f32 0.2, %v5272_v10  ;;  %v4397_v46 = vadd.f32 %v7566_v42, %v10669_v8  ;;  %v7703_v34 = vpop.f32.mrf.mxu1 }
 0x25b   : > { %v5275_v3 = vadd.f32 %v9426_v28, %v5140_v44  ;;  %v5138_v20 = vadd.f32 %v9782_v29, %v4392_v27  ;;  %v4028_v17 = vpop.f32.mrf.mxu0  ;;  %v10675_v44 = vld [vmem:[#allocation136_spill] sm:$0xff] }
 0x25c   : > { %6166 = vst.msk [vmem:[%s9468_s15 + $0xa4] sm:$0xf] %vm6124_vm4, %v6897_v49  ;;  %v6902_v62 = vpack.c.bf16 %v5530_v7, %v5530_v7  ;;  %v5528_v59 = vmax.f32 %v5272_v10, %v5400_v33  ;;  %v5143_v21 = vadd.f32 %v7698_v36, %v4397_v46  ;;  %v4395_v55 = vadd.f32 %v4028_v17, %v10670_v1  ;;  %v4793_v26 = vpop.f32.mrf.mxu1  ;;  %v10676_v46 = vld [vmem:[#allocation137_spill] sm:$0xff] }
 0x25d   : > { %v5403_v61 = vmul.f32 0.2, %v5275_v3  ;;  %v5273_v13 = vadd.f32 %v9426_v28, %v5138_v20  ;;  %v7567_v40 = vpop.f32.mrf.mxu0 }
 0x25e   : > { %6171 = vst.msk [vmem:[%s9468_s15 + $0xb8] sm:$0xf] %vm6124_vm4, %v6902_v62  ;;  %v6900_v57 = vpack.c.bf16 %v5528_v59, %v5528_v59  ;;  %v5278_v48 = vadd.f32 %v9426_v28, %v5143_v21  ;;  %v5141_v29 = vadd.f32 %v4774_v19, %v4395_v55  ;;  %v4398_v6 = vadd.f32 %v7567_v40, %v10671_v5  ;;  %v7706_v12 = vpop.f32.mrf.mxu1  ;;  %v10677_v55 = vld [vmem:[#allocation2_spill] sm:$0xff] }
 0x25f   : > { %v5531_v54 = vmax.f32 %v5275_v3, %v5403_v61  ;;  %v5401_v18 = vmul.f32 0.2, %v5273_v13  ;;  %v4031_v23 = vpop.f32.mrf.mxu0 }
 0x260   : > { %6169 = vst.msk [vmem:[%s9468_s15 + $0xb0] sm:$0xf] %vm6124_vm4, %v6900_v57  ;;  %v5406_v36 = vmul.f32 0.2, %v5278_v48  ;;  %v5276_v24 = vadd.f32 %v9426_v28, %v5141_v29  ;;  %v5144_v56 = vadd.f32 %v7699_v25, %v4398_v6  ;;  %v4396_v22 = vadd.f32 %v4031_v23, %v10672_v51  ;;  %v4806_v43 = vpop.f32.mrf.mxu1  ;;  %v10678_v6 = vld [vmem:[#allocation3_spill] sm:$0xff] }
 0x261   : > { %v6903_v41 = vpack.c.bf16 %v5531_v54, %v5531_v54  ;;  %v5529_v38 = vmax.f32 %v5273_v13, %v5401_v18  ;;  %v7570_v0 = vpop.f32.mrf.mxu0 }
 0x262   : > { %v5534_v19 = vmax.f32 %v5278_v48, %v5406_v36  ;;  %v5404_v37 = vmul.f32 0.2, %v5276_v24  ;;  %v5279_v9 = vadd.f32 %v9838_v39, %v5144_v56  ;;  %v5142_v47 = vadd.f32 %v4777_v14, %v4396_v22  ;;  %v9841_v28 = vpop.f32.mrf.mxu1 }
 0x263   : > { %6172 = vst.msk [vmem:[%s9468_s15 + $0xbc] sm:$0xf] %vm6124_vm4, %v6903_v41  ;;  %v6901_v25 = vpack.c.bf16 %v5529_v38, %v5529_v38  ;;  %v4401_v16 = vadd.f32 %v7570_v0, %v10673_v15  ;;  %v4044_v11 = vpop.f32.mrf.mxu0  ;;  %v10679_v0 = vld [vmem:[#allocation138_spill] sm:$0xff] }
 0x264   : > { %v6906_v45 = vpack.c.bf16 %v5534_v19, %v5534_v19  ;;  %v5532_v58 = vmax.f32 %v5276_v24, %v5404_v37  ;;  %v5407_v50 = vmul.f32 0.2, %v5279_v9  ;;  %v5277_v52 = vadd.f32 %v9838_v39, %v5142_v47  ;;  %v9847_v60 = vpop.f32.mrf.mxu1 }
 0x265   : > { %6170 = vst.msk [vmem:[%s9468_s15 + $0xb4] sm:$0xf] %vm6124_vm4, %v6901_v25  ;;  %v5147_v14 = vadd.f32 %v9806_v53, %v4401_v16  ;;  %v4399_v35 = vadd.f32 %v4044_v11, %v10674_v2  ;;  %v7571_v32 = vpop.f32.mrf.mxu0  ;;  %v10680_v16 = vld [vmem:[#allocation8_spill] sm:$0xff] }
 0x266   : > { %6175 = vst.msk [vmem:[%s9468_s15 + $0xc8] sm:$0xf] %vm6124_vm4, %v6906_v45  ;;  %v6904_v30 = vpack.c.bf16 %v5532_v58, %v5532_v58  ;;  %v5535_v63 = vmax.f32 %v5279_v9, %v5407_v50  ;;  %v5405_v10 = vmul.f32 0.2, %v5277_v52  ;;  %v4402_v4 = vadd.f32 %v7571_v32, %v10675_v44  ;;  %v7710_v27 = vpop.f32.mrf.mxu1 }
 0x267   : > { %v5282_v42 = vadd.f32 %v9838_v39, %v5147_v14  ;;  %v5145_v49 = vadd.f32 %v9812_v31, %v4399_v35  ;;  %v4047_v7 = vpop.f32.mrf.mxu0  ;;  %v10681_v14 = vld [vmem:[#allocation10_spill] sm:$0xff] }
 0x268   : > { %6173 = vst.msk [vmem:[%s9468_s15 + $0xc0] sm:$0xf] %vm6124_vm4, %v6904_v30  ;;  %v6907_v53 = vpack.c.bf16 %v5535_v63, %v5535_v63  ;;  %v5533_v33 = vmax.f32 %v5277_v52, %v5405_v10  ;;  %v5148_v8 = vadd.f32 %v7703_v34, %v4402_v4  ;;  %v4400_v3 = vadd.f32 %v4047_v7, %v10676_v46  ;;  %v4822_v20 = vpop.f32.mrf.mxu1  ;;  %v10682_v4 = vld [vmem:[#allocation4_spill] sm:$0xff] }
 0x269   : > { %v5410_v17 = vmul.f32 0.2, %v5282_v42  ;;  %v5280_v62 = vadd.f32 %v9838_v39, %v5145_v49  ;;  %v7574_v59 = vpop.f32.mrf.mxu0 }
 0x26a   : > { %6176 = vst.msk [vmem:[%s9468_s15 + $0xcc] sm:$0xf] %vm6124_vm4, %v6907_v53  ;;  %v6905_v21 = vpack.c.bf16 %v5533_v33, %v5533_v33  ;;  %v5283_v1 = vadd.f32 %v9838_v39, %v5148_v8  ;;  %v5146_v31 = vadd.f32 %v4793_v26, %v4400_v3  ;;  %v4405_v61 = vadd.f32 %v7574_v59, %v10677_v55  ;;  %v7711_v13 = vpop.f32.mrf.mxu1  ;;  %v10683_v3 = vld [vmem:[#allocation5_spill] sm:$0xff] }
 0x26b   : > { %v5538_v40 = vmax.f32 %v5282_v42, %v5410_v17  ;;  %v5408_v57 = vmul.f32 0.2, %v5280_v62  ;;  %v4060_v34 = vpop.f32.mrf.mxu0 }
 0x26c   : > { %6174 = vst.msk [vmem:[%s9468_s15 + $0xc4] sm:$0xf] %vm6124_vm4, %v6905_v21  ;;  %v5411_v48 = vmul.f32 0.2, %v5283_v1  ;;  %v5281_v29 = vadd.f32 %v9838_v39, %v5146_v31  ;;  %v5151_v5 = vadd.f32 %v7706_v12, %v4405_v61  ;;  %v4403_v54 = vadd.f32 %v4060_v34, %v10678_v6  ;;  %v4825_v18 = vpop.f32.mrf.mxu1  ;;  %v10684_v61 = vld [vmem:[#allocation12_spill] sm:$0xff] }
 0x26d   : > { %v6910_v23 = vpack.c.bf16 %v5538_v40, %v5538_v40  ;;  %v5536_v36 = vmax.f32 %v5280_v62, %v5408_v57  ;;  %v7575_v26 = vpop.f32.mrf.mxu0 }
 0x26e   : > { %v5539_v24 = vmax.f32 %v5283_v1, %v5411_v48  ;;  %v5409_v56 = vmul.f32 0.2, %v5281_v29  ;;  %v5286_v51 = vadd.f32 %v9838_v39, %v5151_v5  ;;  %v5149_v22 = vadd.f32 %v4806_v43, %v4403_v54  ;;  %v9871_v41 = vpop.f32.mrf.mxu1 }
 0x26f   : > { %6179 = vst.msk [vmem:[%s9468_s15 + $0xd8] sm:$0xf] %vm6124_vm4, %v6910_v23  ;;  %v6908_v38 = vpack.c.bf16 %v5536_v36, %v5536_v36  ;;  %v4406_v12 = vadd.f32 %v7575_v26, %v10679_v0  ;;  %v4063_v19 = vpop.f32.mrf.mxu0  ;;  %v10685_v26 = vld [vmem:[#allocation15_spill] sm:$0xff] }
 0x270   : > { %v6911_v37 = vpack.c.bf16 %v5539_v24, %v5539_v24  ;;  %v5537_v9 = vmax.f32 %v5281_v29, %v5409_v56  ;;  %v5414_v47 = vmul.f32 0.2, %v5286_v51  ;;  %v5284_v25 = vadd.f32 %v9838_v39, %v5149_v22  ;;  %v9877_v15 = vpop.f32.mrf.mxu1 }
 0x271   : > { %6177 = vst.msk [vmem:[%s9468_s15 + $0xd0] sm:$0xf] %vm6124_vm4, %v6908_v38  ;;  %v5152_v43 = vadd.f32 %v9841_v28, %v4406_v12  ;;  %v4404_v11 = vadd.f32 %v4063_v19, %v10680_v16  ;;  %v7578_v45 = vpop.f32.mrf.mxu0  ;;  %v10686_v12 = vld [vmem:[#allocation6_spill] sm:$0xff] }
 0x272   : > { %6180 = vst.msk [vmem:[%s9468_s15 + $0xdc] sm:$0xf] %vm6124_vm4, %v6911_v37  ;;  %v6909_v58 = vpack.c.bf16 %v5537_v9, %v5537_v9  ;;  %v5542_v50 = vmax.f32 %v5286_v51, %v5414_v47  ;;  %v5412_v52 = vmul.f32 0.2, %v5284_v25  ;;  %v4409_v2 = vadd.f32 %v7578_v45, %v10681_v14  ;;  %v7715_v35 = vpop.f32.mrf.mxu1 }
 0x273   : > { %v5287_v32 = vadd.f32 %v9838_v39, %v5152_v43  ;;  %v5150_v30 = vadd.f32 %v9847_v60, %v4404_v11  ;;  %v4076_v63 = vpop.f32.mrf.mxu0  ;;  %v10687_v43 = vld [vmem:[#allocation7_spill] sm:$0xff] }
 0x274   : > { %6178 = vst.msk [vmem:[%s9468_s15 + $0xd4] sm:$0xf] %vm6124_vm4, %v6909_v58  ;;  %v6914_v28 = vpack.c.bf16 %v5542_v50, %v5542_v50  ;;  %v5540_v10 = vmax.f32 %v5284_v25, %v5412_v52  ;;  %v5155_v44 = vadd.f32 %v7710_v27, %v4409_v2  ;;  %v4407_v42 = vadd.f32 %v4076_v63, %v10682_v4  ;;  %v4841_v49 = vpop.f32.mrf.mxu1  ;;  %v10688_v2 = vld [vmem:[#allocation16_spill] sm:$0xff] }
 0x275   : > { %v5415_v7 = vmul.f32 0.2, %v5287_v32  ;;  %v5285_v53 = vadd.f32 %v9838_v39, %v5150_v30  ;;  %v7579_v33 = vpop.f32.mrf.mxu0 }
 0x276   : > { %6183 = vst.msk [vmem:[%s9468_s15 + $0xe8] sm:$0xf] %vm6124_vm4, %v6914_v28  ;;  %v6912_v8 = vpack.c.bf16 %v5540_v10, %v5540_v10  ;;  %v5290_v46 = vadd.f32 %v9838_v39, %v5155_v44  ;;  %v5153_v60 = vadd.f32 %v4822_v20, %v4407_v42  ;;  %v4410_v17 = vadd.f32 %v7579_v33, %v10683_v3  ;;  %v7718_v62 = vpop.f32.mrf.mxu1  ;;  %v10689_v42 = vld [vmem:[#allocation18_spill] sm:$0xff] }
 0x277   : > { %v5543_v59 = vmax.f32 %v5287_v32, %v5415_v7  ;;  %v5413_v21 = vmul.f32 0.2, %v5285_v53  ;;  %v4079_v27 = vpop.f32.mrf.mxu0 }
 0x278   : > { %6181 = vst.msk [vmem:[%s9468_s15 + $0xe0] sm:$0xf] %vm6124_vm4, %v6912_v8  ;;  %v5418_v1 = vmul.f32 0.2, %v5290_v46  ;;  %v5288_v31 = vadd.f32 %v9838_v39, %v5153_v60  ;;  %v5156_v55 = vadd.f32 %v7711_v13, %v4410_v17  ;;  %v4408_v40 = vadd.f32 %v4079_v27, %v10684_v61  ;;  %v4854_v57 = vpop.f32.mrf.mxu1  ;;  %v10690_v17 = vld [vmem:[#allocation9_spill] sm:$0xff] }
 0x279   : > { %v6915_v34 = vpack.c.bf16 %v5543_v59, %v5543_v59  ;;  %v5541_v48 = vmax.f32 %v5285_v53, %v5413_v21  ;;  %v7582_v20 = vpop.f32.mrf.mxu0 }
 0x27a   : > { %v5546_v29 = vmax.f32 %v5290_v46, %v5418_v1  ;;  %v5416_v5 = vmul.f32 0.2, %v5288_v31  ;;  %v5291_v6 = vadd.f32 %v9838_v39, %v5156_v55  ;;  %v5154_v54 = vadd.f32 %v4825_v18, %v4408_v40  ;;  %v9901_v23 = vpop.f32.mrf.mxu1 }
 0x27b   : > { %6184 = vst.msk [vmem:[%s9468_s15 + $0xec] sm:$0xf] %vm6124_vm4, %v6915_v34  ;;  %v6913_v36 = vpack.c.bf16 %v5541_v48, %v5541_v48  ;;  %v4413_v13 = vadd.f32 %v7582_v20, %v10685_v26  ;;  %v4092_v24 = vpop.f32.mrf.mxu0  ;;  %v10691_v20 = vld [vmem:[#allocation11_spill] sm:$0xff] }
 0x27c   : > { %v6918_v56 = vpack.c.bf16 %v5546_v29, %v5546_v29  ;;  %v5544_v51 = vmax.f32 %v5288_v31, %v5416_v5  ;;  %v5419_v22 = vmul.f32 0.2, %v5291_v6  ;;  %v5289_v38 = vadd.f32 %v9838_v39, %v5154_v54  ;;  %v9907_v0 = vpop.f32.mrf.mxu1 }
 0x27d   : > { %6182 = vst.msk [vmem:[%s9468_s15 + $0xe4] sm:$0xf] %vm6124_vm4, %v6913_v36  ;;  %v5159_v18 = vadd.f32 %v9871_v41, %v4413_v13  ;;  %v4411_v19 = vadd.f32 %v4092_v24, %v10686_v12  ;;  %v7583_v37 = vpop.f32.mrf.mxu0  ;;  %v10692_v13 = vld [vmem:[#allocation20_spill] sm:$0xff] }
 0x27e   : > { %6187 = vst.msk [vmem:[%s9468_s15 + $0xf8] sm:$0xf] %vm6124_vm4, %v6918_v56  ;;  %v6916_v9 = vpack.c.bf16 %v5544_v51, %v5544_v51  ;;  %v5547_v47 = vmax.f32 %v5291_v6, %v5419_v22  ;;  %v5417_v25 = vmul.f32 0.2, %v5289_v38  ;;  %v4414_v16 = vadd.f32 %v7583_v37, %v10687_v43  ;;  %v7722_v11 = vpop.f32.mrf.mxu1 }
 0x27f   : > { %v5294_v45 = vadd.f32 %v9838_v39, %v5159_v18  ;;  %v5157_v58 = vadd.f32 %v9877_v15, %v4411_v19  ;;  %v4095_v50 = vpop.f32.mrf.mxu0  ;;  %v10693_v18 = vld [vmem:[#allocation23_spill] sm:$0xff] }
 0x280   : > { %6185 = vst.msk [vmem:[%s9468_s15 + $0xf0] sm:$0xf] %vm6124_vm4, %v6916_v9  ;;  %v6919_v41 = vpack.c.bf16 %v5547_v47, %v5547_v47  ;;  %v5545_v52 = vmax.f32 %v5289_v38, %v5417_v25  ;;  %v5160_v14 = vadd.f32 %v7715_v35, %v4414_v16  ;;  %v4412_v32 = vadd.f32 %v4095_v50, %v10688_v2  ;;  %v4870_v30 = vpop.f32.mrf.mxu1  ;;  %v10694_v16 = vld [vmem:[#allocation13_spill] sm:$0xff] }
 0x281   : > { %v5422_v63 = vmul.f32 0.2, %v5294_v45  ;;  %v5292_v28 = vadd.f32 %v9838_v39, %v5157_v58  ;;  %v7586_v10 = vpop.f32.mrf.mxu0 }
 0x282   : > { %6188 = vst.msk [vmem:[%s9468_s15 + $0xfc] sm:$0xf] %vm6124_vm4, %v6919_v41  ;;  %v6917_v44 = vpack.c.bf16 %v5545_v52, %v5545_v52  ;;  %v5295_v4 = vadd.f32 %v9838_v39, %v5160_v14  ;;  %v5158_v15 = vadd.f32 %v4841_v49, %v4412_v32  ;;  %v4417_v7 = vadd.f32 %v7586_v10, %v10689_v42  ;;  %v7723_v53 = vpop.f32.mrf.mxu1  ;;  %v10695_v32 = vld [vmem:[#allocation14_spill] sm:$0xff] }
 0x283   : > { %v5550_v33 = vmax.f32 %v5294_v45, %v5422_v63  ;;  %v5420_v8 = vmul.f32 0.2, %v5292_v28  ;;  %v4108_v35 = vpop.f32.mrf.mxu0 }
 0x284   : > { %6186 = vst.msk [vmem:[%s9468_s15 + $0xf4] sm:$0xf] %vm6124_vm4, %v6917_v44  ;;  %v5423_v46 = vmul.f32 0.2, %v5295_v4  ;;  %v5293_v60 = vadd.f32 %v9838_v39, %v5158_v15  ;;  %v5163_v3 = vadd.f32 %v7718_v62, %v4417_v7  ;;  %v4415_v59 = vadd.f32 %v4108_v35, %v10690_v17  ;;  %v4873_v21 = vpop.f32.mrf.mxu1  ;;  %v10696_v7 = vld [vmem:[#allocation24_spill] sm:$0xff] }
 0x285   : > { %v6922_v27 = vpack.c.bf16 %v5550_v33, %v5550_v33  ;;  %v5548_v1 = vmax.f32 %v5292_v28, %v5420_v8  ;;  %v7587_v49 = vpop.f32.mrf.mxu0 }
 0x286   : > { %v5551_v31 = vmax.f32 %v5295_v4, %v5423_v46  ;;  %v5421_v55 = vmul.f32 0.2, %v5293_v60  ;;  %v5298_v61 = vadd.f32 %v9838_v39, %v5163_v3  ;;  %v5161_v40 = vadd.f32 %v4854_v57, %v4415_v59  ;;  %v9931_v34 = vpop.f32.mrf.mxu1 }
 0x287   : > { %6191 = vst.msk [vmem:[%s9468_s15 + $0x108] sm:$0xf] %vm6124_vm4, %v6922_v27  ;;  %v6920_v48 = vpack.c.bf16 %v5548_v1, %v5548_v1  ;;  %v4418_v62 = vadd.f32 %v7587_v49, %v10691_v20  ;;  %v4111_v29 = vpop.f32.mrf.mxu0  ;;  %v10697_v49 = vld [vmem:[#allocation26_spill] sm:$0xff] }
 0x288   : > { %v6923_v5 = vpack.c.bf16 %v5551_v31, %v5551_v31  ;;  %v5549_v6 = vmax.f32 %v5293_v60, %v5421_v55  ;;  %v5426_v54 = vmul.f32 0.2, %v5298_v61  ;;  %v5296_v36 = vadd.f32 %v9838_v39, %v5161_v40  ;;  %v9937_v26 = vpop.f32.mrf.mxu1 }
 0x289   : > { %6189 = vst.msk [vmem:[%s9468_s15 + $0x100] sm:$0xf] %vm6124_vm4, %v6920_v48  ;;  %v5164_v57 = vadd.f32 %v9901_v23, %v4418_v62  ;;  %v4416_v24 = vadd.f32 %v4111_v29, %v10692_v13  ;;  %v7590_v56 = vpop.f32.mrf.mxu0  ;;  %v10698_v62 = vld [vmem:[#allocation17_spill] sm:$0xff] }
 0x28a   : > { %6192 = vst.msk [vmem:[%s9468_s15 + $0x10c] sm:$0xf] %vm6124_vm4, %v6923_v5  ;;  %v6921_v51 = vpack.c.bf16 %v5549_v6, %v5549_v6  ;;  %v5554_v22 = vmax.f32 %v5298_v61, %v5426_v54  ;;  %v5424_v38 = vmul.f32 0.2, %v5296_v36  ;;  %v4421_v12 = vadd.f32 %v7590_v56, %v10693_v18  ;;  %v7727_v19 = vpop.f32.mrf.mxu1 }
 0x28b   : > { %v5299_v37 = vadd.f32 %v9838_v39, %v5164_v57  ;;  %v5162_v9 = vadd.f32 %v9907_v0, %v4416_v24  ;;  %v4124_v47 = vpop.f32.mrf.mxu0  ;;  %v10699_v57 = vld [vmem:[#allocation19_spill] sm:$0xff] }
 0x28c   : > { %6190 = vst.msk [vmem:[%s9468_s15 + $0x104] sm:$0xf] %vm6124_vm4, %v6921_v51  ;;  %v6926_v23 = vpack.c.bf16 %v5554_v22, %v5554_v22  ;;  %v5552_v25 = vmax.f32 %v5296_v36, %v5424_v38  ;;  %v5167_v43 = vadd.f32 %v7722_v11, %v4421_v12  ;;  %v4419_v45 = vadd.f32 %v4124_v47, %v10694_v16  ;;  %v4889_v58 = vpop.f32.mrf.mxu1  ;;  %v10700_v12 = vld [vmem:[#allocation28_spill] sm:$0xff] }
 0x28d   : > { %v5427_v50 = vmul.f32 0.2, %v5299_v37  ;;  %v5297_v41 = vadd.f32 %v9838_v39, %v5162_v9  ;;  %v7591_v52 = vpop.f32.mrf.mxu0 }
 0x28e   : > { %6195 = vst.msk [vmem:[%s9468_s15 + $0x118] sm:$0xf] %vm6124_vm4, %v6926_v23  ;;  %v6924_v14 = vpack.c.bf16 %v5552_v25, %v5552_v25  ;;  %v5302_v2 = vadd.f32 %v9838_v39, %v5167_v43  ;;  %v5165_v0 = vadd.f32 %v4870_v30, %v4419_v45  ;;  %v4422_v63 = vadd.f32 %v7591_v52, %v10695_v32  ;;  %v7730_v28 = vpop.f32.mrf.mxu1  ;;  %v10701_v45 = vld [vmem:[#allocation31_spill] sm:$0xff] }
 0x28f   : > { %v5555_v10 = vmax.f32 %v5299_v37, %v5427_v50  ;;  %v5425_v44 = vmul.f32 0.2, %v5297_v41  ;;  %v4127_v11 = vpop.f32.mrf.mxu0 }
 0x290   : > { %6193 = vst.msk [vmem:[%s9468_s15 + $0x110] sm:$0xf] %vm6124_vm4, %v6924_v14  ;;  %v5430_v4 = vmul.f32 0.2, %v5302_v2  ;;  %v5300_v15 = vadd.f32 %v9838_v39, %v5165_v0  ;;  %v5168_v42 = vadd.f32 %v7723_v53, %v4422_v63  ;;  %v4420_v33 = vadd.f32 %v4127_v11, %v10696_v7  ;;  %v4902_v8 = vpop.f32.mrf.mxu1  ;;  %v10702_v63 = vld [vmem:[#allocation21_spill] sm:$0xff] }
 0x291   : > { %v6927_v35 = vpack.c.bf16 %v5555_v10, %v5555_v10  ;;  %v5553_v46 = vmax.f32 %v5297_v41, %v5425_v44  ;;  %v7594_v30 = vpop.f32.mrf.mxu0 }
 0x292   : > { %v5558_v60 = vmax.f32 %v5302_v2, %v5430_v4  ;;  %v5428_v3 = vmul.f32 0.2, %v5300_v15  ;;  %v5303_v17 = vadd.f32 %v9838_v39, %v5168_v42  ;;  %v5166_v59 = vadd.f32 %v4873_v21, %v4420_v33  ;;  %v9961_v27 = vpop.f32.mrf.mxu1 }
 0x293   : > { %6196 = vst.msk [vmem:[%s9468_s15 + $0x11c] sm:$0xf] %vm6124_vm4, %v6927_v35  ;;  %v6925_v1 = vpack.c.bf16 %v5553_v46, %v5553_v46  ;;  %v4425_v53 = vadd.f32 %v7594_v30, %v10697_v49  ;;  %v4140_v31 = vpop.f32.mrf.mxu0  ;;  %v10703_v30 = vld [vmem:[#allocation22_spill] sm:$0xff] }
 0x294   : > { %v6930_v55 = vpack.c.bf16 %v5558_v60, %v5558_v60  ;;  %v5556_v61 = vmax.f32 %v5300_v15, %v5428_v3  ;;  %v5431_v40 = vmul.f32 0.2, %v5303_v17  ;;  %v5301_v48 = vadd.f32 %v9838_v39, %v5166_v59  ;;  %v9967_v20 = vpop.f32.mrf.mxu1 }
 0x295   : > { %6194 = vst.msk [vmem:[%s9468_s15 + $0x114] sm:$0xf] %vm6124_vm4, %v6925_v1  ;;  %v5171_v21 = vadd.f32 %v9931_v34, %v4425_v53  ;;  %v4423_v29 = vadd.f32 %v4140_v31, %v10698_v62  ;;  %v7595_v5 = vpop.f32.mrf.mxu0  ;;  %v10704_v53 = vld [vmem:[#allocation32_spill] sm:$0xff] }
 0x296   : > { %6199 = vst.msk [vmem:[%s9468_s15 + $0x128] sm:$0xf] %vm6124_vm4, %v6930_v55  ;;  %v6928_v6 = vpack.c.bf16 %v5556_v61, %v5556_v61  ;;  %v5559_v54 = vmax.f32 %v5303_v17, %v5431_v40  ;;  %v5429_v36 = vmul.f32 0.2, %v5301_v48  ;;  %v4426_v13 = vadd.f32 %v7595_v5, %v10699_v57  ;;  %v7734_v24 = vpop.f32.mrf.mxu1 }
 0x297   : > { %v5306_v56 = vadd.f32 %v9838_v39, %v5171_v21  ;;  %v5169_v51 = vadd.f32 %v9937_v26, %v4423_v29  ;;  %v4143_v22 = vpop.f32.mrf.mxu0  ;;  %v10705_v21 = vld [vmem:[#allocation34_spill] sm:$0xff] }
 0x298   : > { %6197 = vst.msk [vmem:[%s9468_s15 + $0x120] sm:$0xf] %vm6124_vm4, %v6928_v6  ;;  %v6931_v34 = vpack.c.bf16 %v5559_v54, %v5559_v54  ;;  %v5557_v38 = vmax.f32 %v5301_v48, %v5429_v36  ;;  %v5172_v18 = vadd.f32 %v7727_v19, %v4426_v13  ;;  %v4424_v37 = vadd.f32 %v4143_v22, %v10700_v12  ;;  %v4918_v9 = vpop.f32.mrf.mxu1  ;;  %v10706_v13 = vld [vmem:[#allocation25_spill] sm:$0xff] }
 0x299   : > { %v5434_v47 = vmul.f32 0.2, %v5306_v56  ;;  %v5304_v23 = vadd.f32 %v9838_v39, %v5169_v51  ;;  %v7598_v25 = vpop.f32.mrf.mxu0 }
 0x29a   : > { %6200 = vst.msk [vmem:[%s9468_s15 + $0x12c] sm:$0xf] %vm6124_vm4, %v6931_v34  ;;  %v6929_v43 = vpack.c.bf16 %v5557_v38, %v5557_v38  ;;  %v5307_v16 = vadd.f32 %v9838_v39, %v5172_v18  ;;  %v5170_v26 = vadd.f32 %v4889_v58, %v4424_v37  ;;  %v4429_v50 = vadd.f32 %v7598_v25, %v10701_v45  ;;  %v7735_v41 = vpop.f32.mrf.mxu1  ;;  %v10707_v37 = vld [vmem:[#allocation27_spill] sm:$0xff] }
 0x29b   : > { %v5562_v52 = vmax.f32 %v5306_v56, %v5434_v47  ;;  %v5432_v14 = vmul.f32 0.2, %v5304_v23  ;;  %v4156_v19 = vpop.f32.mrf.mxu0 }
 0x29c   : > { %6198 = vst.msk [vmem:[%s9468_s15 + $0x124] sm:$0xf] %vm6124_vm4, %v6929_v43  ;;  %v5435_v2 = vmul.f32 0.2, %v5307_v16  ;;  %v5305_v0 = vadd.f32 %v9838_v39, %v5170_v26  ;;  %v5175_v32 = vadd.f32 %v7730_v28, %v4429_v50  ;;  %v4427_v10 = vadd.f32 %v4156_v19, %v10702_v63  ;;  %v4921_v44 = vpop.f32.mrf.mxu1  ;;  %v10708_v50 = vld [vmem:[#allocation36_spill] sm:$0xff] }
 0x29d   : > { %v6934_v11 = vpack.c.bf16 %v5562_v52, %v5562_v52  ;;  %v5560_v4 = vmax.f32 %v5304_v23, %v5432_v14  ;;  %v7599_v58 = vpop.f32.mrf.mxu0 }
 0x29e   : > { %v5563_v15 = vmax.f32 %v5307_v16, %v5435_v2  ;;  %v5433_v42 = vmul.f32 0.2, %v5305_v0  ;;  %v5310_v7 = vadd.f32 %v9838_v39, %v5175_v32  ;;  %v5173_v33 = vadd.f32 %v4902_v8, %v4427_v10  ;;  %v9991_v35 = vpop.f32.mrf.mxu1 }
 0x29f   : > { %6203 = vst.msk [vmem:[%s9468_s15 + $0x138] sm:$0xf] %vm6124_vm4, %v6934_v11  ;;  %v6932_v46 = vpack.c.bf16 %v5560_v4, %v5560_v4  ;;  %v4430_v28 = vadd.f32 %v7599_v58, %v10703_v30  ;;  %v4159_v60 = vpop.f32.mrf.mxu0  ;;  %v10709_v58 = vld [vmem:[#allocation39_spill] sm:$0xff] }
 0x2a0   : > { %v6935_v3 = vpack.c.bf16 %v5563_v15, %v5563_v15  ;;  %v5561_v17 = vmax.f32 %v5305_v0, %v5433_v42  ;;  %v5438_v59 = vmul.f32 0.2, %v5310_v7  ;;  %v5308_v1 = vadd.f32 %v9838_v39, %v5173_v33  ;;  %v9997_v49 = vpop.f32.mrf.mxu1 }
 0x2a1   : > { %6201 = vst.msk [vmem:[%s9468_s15 + $0x130] sm:$0xf] %vm6124_vm4, %v6932_v46  ;;  %v5176_v8 = vadd.f32 %v9961_v27, %v4430_v28  ;;  %v4428_v31 = vadd.f32 %v4159_v60, %v10704_v53  ;;  %v7602_v55 = vpop.f32.mrf.mxu0  ;;  %v10710_v28 = vld [vmem:[#allocation29_spill] sm:$0xff] }
 0x2a2   : > { %6204 = vst.msk [vmem:[%s9468_s15 + $0x13c] sm:$0xf] %vm6124_vm4, %v6935_v3  ;;  %v6933_v61 = vpack.c.bf16 %v5561_v17, %v5561_v17  ;;  %v5566_v40 = vmax.f32 %v5310_v7, %v5438_v59  ;;  %v5436_v48 = vmul.f32 0.2, %v5308_v1  ;;  %v4433_v62 = vadd.f32 %v7602_v55, %v10705_v21  ;;  %v7739_v29 = vpop.f32.mrf.mxu1 }
 0x2a3   : > { %v5311_v5 = vadd.f32 %v9838_v39, %v5176_v8  ;;  %v5174_v6 = vadd.f32 %v9967_v20, %v4428_v31  ;;  %v4172_v54 = vpop.f32.mrf.mxu0  ;;  %v10711_v8 = vld [vmem:[#allocation30_spill] sm:$0xff] }
 0x2a4   : > { %6202 = vst.msk [vmem:[%s9468_s15 + $0x134] sm:$0xf] %vm6124_vm4, %v6933_v61  ;;  %v6938_v27 = vpack.c.bf16 %v5566_v40, %v5566_v40  ;;  %v5564_v36 = vmax.f32 %v5308_v1, %v5436_v48  ;;  %v5179_v57 = vadd.f32 %v7734_v24, %v4433_v62  ;;  %v4431_v56 = vadd.f32 %v4172_v54, %v10706_v13  ;;  %v4937_v51 = vpop.f32.mrf.mxu1  ;;  %v10712_v62 = vld [vmem:[#allocation40_spill] sm:$0xff] }
 0x2a5   : > { %v5439_v22 = vmul.f32 0.2, %v5311_v5  ;;  %v5309_v34 = vadd.f32 %v9838_v39, %v5174_v6  ;;  %v7603_v38 = vpop.f32.mrf.mxu0 }
 0x2a6   : > { %6207 = vst.msk [vmem:[%s9468_s15 + $0x148] sm:$0xf] %vm6124_vm4, %v6938_v27  ;;  %v6936_v18 = vpack.c.bf16 %v5564_v36, %v5564_v36  ;;  %v5314_v12 = vadd.f32 %v9838_v39, %v5179_v57  ;;  %v5177_v20 = vadd.f32 %v4918_v9, %v4431_v56  ;;  %v4434_v47 = vadd.f32 %v7603_v38, %v10707_v37  ;;  %v7742_v23 = vpop.f32.mrf.mxu1  ;;  %v10713_v56 = vld [vmem:[#allocation42_spill] sm:$0xff] }
 0x2a7   : > { %v5567_v25 = vmax.f32 %v5311_v5, %v5439_v22  ;;  %v5437_v43 = vmul.f32 0.2, %v5309_v34  ;;  %v4175_v24 = vpop.f32.mrf.mxu0 }
 0x2a8   : > { %6205 = vst.msk [vmem:[%s9468_s15 + $0x140] sm:$0xf] %vm6124_vm4, %v6936_v18  ;;  %v5442_v16 = vmul.f32 0.2, %v5314_v12  ;;  %v5312_v26 = vadd.f32 %v9838_v39, %v5177_v20  ;;  %v5180_v45 = vadd.f32 %v7735_v41, %v4434_v47  ;;  %v4432_v52 = vadd.f32 %v4175_v24, %v10708_v50  ;;  %v4950_v14 = vpop.f32.mrf.mxu1  ;;  %v10714_v47 = vld [vmem:[#allocation33_spill] sm:$0xff] }
 0x2a9   : > { %v6939_v19 = vpack.c.bf16 %v5567_v25, %v5567_v25  ;;  %v5565_v2 = vmax.f32 %v5309_v34, %v5437_v43  ;;  %v7606_v9 = vpop.f32.mrf.mxu0 }
 0x2aa   : > { %v5570_v0 = vmax.f32 %v5314_v12, %v5442_v16  ;;  %v5440_v32 = vmul.f32 0.2, %v5312_v26  ;;  %v5315_v63 = vadd.f32 %v9838_v39, %v5180_v45  ;;  %v5178_v10 = vadd.f32 %v4921_v44, %v4432_v52  ;;  %v10021_v11 = vpop.f32.mrf.mxu1 }
 0x2ab   : > { %6208 = vst.msk [vmem:[%s9468_s15 + $0x14c] sm:$0xf] %vm6124_vm4, %v6939_v19  ;;  %v6937_v4 = vpack.c.bf16 %v5565_v2, %v5565_v2  ;;  %v4437_v41 = vadd.f32 %v7606_v9, %v10709_v58  ;;  %v4188_v15 = vpop.f32.mrf.mxu0  ;;  %v10715_v9 = vld [vmem:[#allocation35_spill] sm:$0xff] }
 0x2ac   : > { %v6942_v42 = vpack.c.bf16 %v5570_v0, %v5570_v0  ;;  %v5568_v7 = vmax.f32 %v5312_v26, %v5440_v32  ;;  %v5443_v33 = vmul.f32 0.2, %v5315_v63  ;;  %v5313_v46 = vadd.f32 %v9838_v39, %v5178_v10  ;;  %v10027_v30 = vpop.f32.mrf.mxu1 }
 0x2ad   : > { %6206 = vst.msk [vmem:[%s9468_s15 + $0x144] sm:$0xf] %vm6124_vm4, %v6937_v4  ;;  %v5183_v44 = vadd.f32 %v9991_v35, %v4437_v41  ;;  %v4435_v60 = vadd.f32 %v4188_v15, %v10710_v28  ;;  %v7607_v3 = vpop.f32.mrf.mxu0  ;;  %v10716_v41 = vld [vmem:[#allocation44_spill] sm:$0xff] }
 0x2ae   : > { %6211 = vst.msk [vmem:[%s9468_s15 + $0x158] sm:$0xf] %vm6124_vm4, %v6942_v42  ;;  %v6940_v17 = vpack.c.bf16 %v5568_v7, %v5568_v7  ;;  %v5571_v59 = vmax.f32 %v5315_v63, %v5443_v33  ;;  %v5441_v1 = vmul.f32 0.2, %v5313_v46  ;;  %v4438_v53 = vadd.f32 %v7607_v3, %v10711_v8  ;;  %v7746_v31 = vpop.f32.mrf.mxu1 }
 0x2af   : > { %v5318_v55 = vadd.f32 %v9838_v39, %v5183_v44  ;;  %v5181_v61 = vadd.f32 %v9997_v49, %v4435_v60  ;;  %v4191_v40 = vpop.f32.mrf.mxu0  ;;  %v10717_v44 = vld [vmem:[#allocation47_spill] sm:$0xff] }
 0x2b0   : > { %6209 = vst.msk [vmem:[%s9468_s15 + $0x150] sm:$0xf] %vm6124_vm4, %v6940_v17  ;;  %v6943_v35 = vpack.c.bf16 %v5571_v59, %v5571_v59  ;;  %v5569_v48 = vmax.f32 %v5313_v46, %v5441_v1  ;;  %v5184_v21 = vadd.f32 %v7739_v29, %v4438_v53  ;;  %v4436_v5 = vadd.f32 %v4191_v40, %v10712_v62  ;;  %v4966_v6 = vpop.f32.mrf.mxu1  ;;  %v10718_v53 = vld [vmem:[#allocation37_spill] sm:$0xff] }
 0x2b1   : > { %v5446_v54 = vmul.f32 0.2, %v5318_v55  ;;  %v5316_v27 = vadd.f32 %v9838_v39, %v5181_v61  ;;  %v7610_v36 = vpop.f32.mrf.mxu0 }
 0x2b2   : > { %6212 = vst.msk [vmem:[%s9468_s15 + $0x15c] sm:$0xf] %vm6124_vm4, %v6943_v35  ;;  %v6941_v57 = vpack.c.bf16 %v5569_v48, %v5569_v48  ;;  %v5319_v13 = vadd.f32 %v9838_v39, %v5184_v21  ;;  %v5182_v49 = vadd.f32 %v4937_v51, %v4436_v5  ;;  %v4441_v22 = vadd.f32 %v7610_v36, %v10713_v56  ;;  %v7747_v34 = vpop.f32.mrf.mxu1  ;;  %v10719_v5 = vld [vmem:[#allocation38_spill] sm:$0xff] }
 0x2b3   : > { %v5574_v38 = vmax.f32 %v5318_v55, %v5446_v54  ;;  %v5444_v18 = vmul.f32 0.2, %v5316_v27  ;;  %v4204_v29 = vpop.f32.mrf.mxu0 }
 0x2b4   : > { %6210 = vst.msk [vmem:[%s9468_s15 + $0x154] sm:$0xf] %vm6124_vm4, %v6941_v57  ;;  %v5447_v12 = vmul.f32 0.2, %v5319_v13  ;;  %v5317_v20 = vadd.f32 %v9838_v39, %v5182_v49  ;;  %v5187_v37 = vadd.f32 %v7742_v23, %v4441_v22  ;;  %v4439_v25 = vadd.f32 %v4204_v29, %v10714_v47  ;;  %v4969_v43 = vpop.f32.mrf.mxu1  ;;  %v10720_v22 = vld [vmem:[#allocation48_spill] sm:$0xff] }
 0x2b5   : > { %v6946_v24 = vpack.c.bf16 %v5574_v38, %v5574_v38  ;;  %v5572_v16 = vmax.f32 %v5316_v27, %v5444_v18  ;;  %v7611_v51 = vpop.f32.mrf.mxu0 }
 0x2b6   : > { %v5575_v26 = vmax.f32 %v5319_v13, %v5447_v12  ;;  %v5445_v45 = vmul.f32 0.2, %v5317_v20  ;;  %v5322_v50 = vadd.f32 %v9838_v39, %v5187_v37  ;;  %v5185_v52 = vadd.f32 %v4950_v14, %v4439_v25  ;;  %v10051_v19 = vpop.f32.mrf.mxu1 }
 0x2b7   : > { %6215 = vst.msk [vmem:[%s9468_s15 + $0x168] sm:$0xf] %vm6124_vm4, %v6946_v24  ;;  %v6944_v2 = vpack.c.bf16 %v5572_v16, %v5572_v16  ;;  %v4442_v23 = vadd.f32 %v7611_v51, %v10715_v9  ;;  %v4207_v0 = vpop.f32.mrf.mxu0  ;;  %v10721_v51 = vld [vmem:[#allocation50_spill] sm:$0xff] }
 0x2b8   : > { %v6947_v32 = vpack.c.bf16 %v5575_v26, %v5575_v26  ;;  %v5573_v63 = vmax.f32 %v5317_v20, %v5445_v45  ;;  %v5450_v10 = vmul.f32 0.2, %v5322_v50  ;;  %v5320_v4 = vadd.f32 %v9838_v39, %v5185_v52  ;;  %v10057_v58 = vpop.f32.mrf.mxu1 }
 0x2b9   : > { %6213 = vst.msk [vmem:[%s9468_s15 + $0x160] sm:$0xf] %vm6124_vm4, %v6944_v2  ;;  %v5188_v14 = vadd.f32 %v10021_v11, %v4442_v23  ;;  %v4440_v15 = vadd.f32 %v4207_v0, %v10716_v41  ;;  %v7614_v42 = vpop.f32.mrf.mxu0  ;;  %v10722_v23 = vld [vmem:[#allocation41_spill] sm:$0xff] }
 0x2ba   : > { %6216 = vst.msk [vmem:[%s9468_s15 + $0x16c] sm:$0xf] %vm6124_vm4, %v6947_v32  ;;  %v6945_v7 = vpack.c.bf16 %v5573_v63, %v5573_v63  ;;  %v5578_v33 = vmax.f32 %v5322_v50, %v5450_v10  ;;  %v5448_v46 = vmul.f32 0.2, %v5320_v4  ;;  %v4445_v28 = vadd.f32 %v7614_v42, %v10717_v44  ;;  %v7751_v60 = vpop.f32.mrf.mxu1 }
 0x2bb   : > { %v5323_v3 = vadd.f32 %v9838_v39, %v5188_v14  ;;  %v5186_v17 = vadd.f32 %v10027_v30, %v4440_v15  ;;  %v4220_v59 = vpop.f32.mrf.mxu0  ;;  %v10723_v14 = vld [vmem:[#allocation43_spill] sm:$0xff] }
 0x2bc   : > { %6214 = vst.msk [vmem:[%s9468_s15 + $0x164] sm:$0xf] %vm6124_vm4, %v6945_v7  ;;  %v6950_v11 = vpack.c.bf16 %v5578_v33, %v5578_v33  ;;  %v5576_v1 = vmax.f32 %v5320_v4, %v5448_v46  ;;  %v5191_v8 = vadd.f32 %v7746_v31, %v4445_v28  ;;  %v4443_v55 = vadd.f32 %v4220_v59, %v10718_v53  ;;  %v4985_v61 = vpop.f32.mrf.mxu1  ;;  %v10724_v28 = vld [vmem:[#allocation52_spill] sm:$0xff] }
 0x2bd   : > { %v5451_v40 = vmul.f32 0.2, %v5323_v3  ;;  %v5321_v35 = vadd.f32 %v9838_v39, %v5186_v17  ;;  %v7615_v48 = vpop.f32.mrf.mxu0 }
 0x2be   : > { %6219 = vst.msk [vmem:[%s9468_s15 + $0x178] sm:$0xf] %vm6124_vm4, %v6950_v11  ;;  %v6948_v21 = vpack.c.bf16 %v5576_v1, %v5576_v1  ;;  %v5326_v62 = vadd.f32 %v9838_v39, %v5191_v8  ;;  %v5189_v30 = vadd.f32 %v4966_v6, %v4443_v55  ;;  %v4446_v54 = vadd.f32 %v7615_v48, %v10719_v5  ;;  %v7754_v27 = vpop.f32.mrf.mxu1  ;;  %v10725_v55 = vld [vmem:[#allocation55_spill] sm:$0xff] }
 0x2bf   : > { %v5579_v36 = vmax.f32 %v5323_v3, %v5451_v40  ;;  %v5449_v57 = vmul.f32 0.2, %v5321_v35  ;;  %v4223_v31 = vpop.f32.mrf.mxu0 }
 0x2c0   : > { %6217 = vst.msk [vmem:[%s9468_s15 + $0x170] sm:$0xf] %vm6124_vm4, %v6948_v21  ;;  %v5454_v13 = vmul.f32 0.2, %v5326_v62  ;;  %v5324_v49 = vadd.f32 %v9838_v39, %v5189_v30  ;;  %v5192_v56 = vadd.f32 %v7747_v34, %v4446_v54  ;;  %v4444_v38 = vadd.f32 %v4223_v31, %v10720_v22  ;;  %v4998_v18 = vpop.f32.mrf.mxu1  ;;  %v10726_v54 = vld [vmem:[#allocation45_spill] sm:$0xff] }
 0x2c1   : > { %v6951_v29 = vpack.c.bf16 %v5579_v36, %v5579_v36  ;;  %v5577_v12 = vmax.f32 %v5321_v35, %v5449_v57  ;;  %v7618_v6 = vpop.f32.mrf.mxu0 }
 0x2c2   : > { %v5582_v20 = vmax.f32 %v5326_v62, %v5454_v13  ;;  %v5452_v37 = vmul.f32 0.2, %v5324_v49  ;;  %v5327_v47 = vadd.f32 %v9838_v39, %v5192_v56  ;;  %v5190_v25 = vadd.f32 %v4969_v43, %v4444_v38  ;;  %v10081_v24 = vpop.f32.mrf.mxu1 }
 0x2c3   : > { %6220 = vst.msk [vmem:[%s9468_s15 + $0x17c] sm:$0xf] %vm6124_vm4, %v6951_v29  ;;  %v6949_v16 = vpack.c.bf16 %v5577_v12, %v5577_v12  ;;  %v4449_v34 = vadd.f32 %v7618_v6, %v10721_v51  ;;  %v4236_v26 = vpop.f32.mrf.mxu0  ;;  %v10727_v6 = vld [vmem:[#allocation46_spill] sm:$0xff] }
 0x2c4   : > { %v6954_v45 = vpack.c.bf16 %v5582_v20, %v5582_v20  ;;  %v5580_v50 = vmax.f32 %v5324_v49, %v5452_v37  ;;  %v5455_v52 = vmul.f32 0.2, %v5327_v47  ;;  %v5325_v2 = vadd.f32 %v9838_v39, %v5190_v25  ;;  %v10087_v9 = vpop.f32.mrf.mxu1 }
 0x2c5   : > { %6218 = vst.msk [vmem:[%s9468_s15 + $0x174] sm:$0xf] %vm6124_vm4, %v6949_v16  ;;  %v5195_v43 = vadd.f32 %v10051_v19, %v4449_v34  ;;  %v4447_v0 = vadd.f32 %v4236_v26, %v10722_v23  ;;  %v7619_v32 = vpop.f32.mrf.mxu0  ;;  %v10728_v34 = vld [vmem:[#allocation56_spill] sm:$0xff] }
 0x2c6   : > { %6223 = vst.msk [vmem:[%s9468_s15 + $0x188] sm:$0xf] %vm6124_vm4, %v6954_v45  ;;  %v6952_v63 = vpack.c.bf16 %v5580_v50, %v5580_v50  ;;  %v5583_v10 = vmax.f32 %v5327_v47, %v5455_v52  ;;  %v5453_v4 = vmul.f32 0.2, %v5325_v2  ;;  %v4450_v41 = vadd.f32 %v7619_v32, %v10723_v14  ;;  %v7758_v15 = vpop.f32.mrf.mxu1 }
 0x2c7   : > { %v5330_v42 = vadd.f32 %v9838_v39, %v5195_v43  ;;  %v5193_v7 = vadd.f32 %v10057_v58, %v4447_v0  ;;  %v4239_v33 = vpop.f32.mrf.mxu0  ;;  %v10729_v43 = vld [vmem:[#allocation58_spill] sm:$0xff] }
 0x2c8   : > { %6221 = vst.msk [vmem:[%s9468_s15 + $0x180] sm:$0xf] %vm6124_vm4, %v6952_v63  ;;  %v6955_v19 = vpack.c.bf16 %v5583_v10, %v5583_v10  ;;  %v5581_v46 = vmax.f32 %v5325_v2, %v5453_v4  ;;  %v5196_v44 = vadd.f32 %v7751_v60, %v4450_v41  ;;  %v4448_v3 = vadd.f32 %v4239_v33, %v10724_v28  ;;  %v5014_v17 = vpop.f32.mrf.mxu1  ;;  %v10730_v41 = vld [vmem:[#allocation49_spill] sm:$0xff] }
 0x2c9   : > { %v5458_v59 = vmul.f32 0.2, %v5330_v42  ;;  %v5328_v11 = vadd.f32 %v9838_v39, %v5193_v7  ;;  %v7622_v1 = vpop.f32.mrf.mxu0 }
 0x2ca   : > { %6224 = vst.msk [vmem:[%s9468_s15 + $0x18c] sm:$0xf] %vm6124_vm4, %v6955_v19  ;;  %v6953_v8 = vpack.c.bf16 %v5581_v46, %v5581_v46  ;;  %v5331_v53 = vadd.f32 %v9838_v39, %v5196_v44  ;;  %v5194_v58 = vadd.f32 %v4985_v61, %v4448_v3  ;;  %v4453_v40 = vadd.f32 %v7622_v1, %v10725_v55  ;;  %v7759_v35 = vpop.f32.mrf.mxu1  ;;  %v10134_v19 = vld [vmem:[%s10233_s2] ss:$0 sm:$0xff] }
 0x2cb   : > { %v5586_v48 = vmax.f32 %v5330_v42, %v5458_v59  ;;  %v5456_v21 = vmul.f32 0.2, %v5328_v11  ;;  %v4252_v60 = vpop.f32.mrf.mxu0 }
 0x2cc   : > { %6222 = vst.msk [vmem:[%s9468_s15 + $0x184] sm:$0xf] %vm6124_vm4, %v6953_v8  ;;  %v5459_v62 = vmul.f32 0.2, %v5331_v53  ;;  %v5329_v30 = vadd.f32 %v9838_v39, %v5194_v58  ;;  %v5199_v5 = vadd.f32 %v7754_v27, %v4453_v40  ;;  %v4451_v36 = vadd.f32 %v4252_v60, %v10726_v54  ;;  %v5017_v57 = vpop.f32.mrf.mxu1  ;;  %v10732_v40 = vld [vmem:[#allocation60_spill] sm:$0xff] }
 0x2cd   : > { %v6958_v31 = vpack.c.bf16 %v5586_v48, %v5586_v48  ;;  %v5584_v13 = vmax.f32 %v5328_v11, %v5456_v21  ;;  %v7623_v61 = vpop.f32.mrf.mxu0 }
 0x2ce   : > { %v5587_v49 = vmax.f32 %v5331_v53, %v5459_v62  ;;  %v5457_v56 = vmul.f32 0.2, %v5329_v30  ;;  %v5334_v22 = vadd.f32 %v9838_v39, %v5199_v5  ;;  %v5197_v38 = vadd.f32 %v4998_v18, %v4451_v36  ;;  %v10111_v29 = vpop.f32.mrf.mxu1 }
 0x2cf   : > { %6227 = vst.msk [vmem:[%s9468_s15 + $0x198] sm:$0xf] %vm6124_vm4, %v6958_v31  ;;  %v6956_v12 = vpack.c.bf16 %v5584_v13, %v5584_v13  ;;  %v4454_v27 = vadd.f32 %v7623_v61, %v10727_v6  ;;  %v4255_v20 = vpop.f32.mrf.mxu0  ;;  %v10733_v61 = vld [vmem:[#allocation63_spill] sm:$0xff] }
 0x2d0   : > { %v6959_v37 = vpack.c.bf16 %v5587_v49, %v5587_v49  ;;  %v5585_v47 = vmax.f32 %v5329_v30, %v5457_v56  ;;  %v5462_v25 = vmul.f32 0.2, %v5334_v22  ;;  %v5332_v16 = vadd.f32 %v9838_v39, %v5197_v38  ;;  %v10117_v51 = vpop.f32.mrf.mxu1 }
 0x2d1   : > { %6225 = vst.msk [vmem:[%s9468_s15 + $0x190] sm:$0xf] %vm6124_vm4, %v6956_v12  ;;  %v5200_v18 = vadd.f32 %v10081_v24, %v4454_v27  ;;  %v4452_v26 = vadd.f32 %v4255_v20, %v10728_v34  ;;  %v7626_v45 = vpop.f32.mrf.mxu0 }
 0x2d2   : > { %6228 = vst.msk [vmem:[%s9468_s15 + $0x19c] sm:$0xf] %vm6124_vm4, %v6959_v37  ;;  %v6957_v50 = vpack.c.bf16 %v5585_v47, %v5585_v47  ;;  %v5590_v52 = vmax.f32 %v5334_v22, %v5462_v25  ;;  %v5460_v2 = vmul.f32 0.2, %v5332_v16  ;;  %v4457_v23 = vadd.f32 %v7626_v45, %v10729_v43  ;;  %v7763_v0 = vpop.f32.mrf.mxu1 }
 0x2d3   : > { %v5335_v32 = vadd.f32 %v9838_v39, %v5200_v18  ;;  %v5198_v63 = vadd.f32 %v10087_v9, %v4452_v26  ;;  %v4268_v10 = vpop.f32.mrf.mxu0  ;;  %v10735_v18 = vld [vmem:[#allocation54_spill] sm:$0xff] }
 0x2d4   : > { %6226 = vst.msk [vmem:[%s9468_s15 + $0x194] sm:$0xf] %vm6124_vm4, %v6957_v50  ;;  %v6962_v24 = vpack.c.bf16 %v5590_v52, %v5590_v52  ;;  %v5588_v4 = vmax.f32 %v5332_v16, %v5460_v2  ;;  %v5203_v14 = vadd.f32 %v7758_v15, %v4457_v23  ;;  %v4455_v42 = vadd.f32 %v4268_v10, %v10730_v41  ;;  %v5033_v7 = vpop.f32.mrf.mxu1  ;;  %v10731_v15 = vld [vmem:[#allocation51_spill] sm:$0xff]  ;;  %v10736_v23 = vld [vmem:[#allocation64_spill] sm:$0xff] }
 0x2d5   : > { %v5463_v33 = vmul.f32 0.2, %v5335_v32  ;;  %v5333_v39 = vadd.f32 %v10134_v19, %v5198_v63  ;;  %v7627_v46 = vpop.f32.mrf.mxu0 }
 0x2d6   : > { %6231 = vst.msk [vmem:[%s9468_s15 + $0x1a8] sm:$0xf] %vm6124_vm4, %v6962_v24  ;;  %v6960_v9 = vpack.c.bf16 %v5588_v4, %v5588_v4  ;;  %v5338_v44 = vadd.f32 %v10134_v19, %v5203_v14  ;;  %v5201_v28 = vadd.f32 %v5014_v17, %v4455_v42  ;;  %v4458_v3 = vadd.f32 %v7627_v46, %v10731_v15  ;;  %v10737_v42 = vld [vmem:[#allocation66_spill] sm:$0xff]  ;;  %v10738_v15 = vld [vmem:[#allocation57_spill] sm:$0xff] }
 0x2d7   : > { %v7766_v59 = vpop.f32.mrf.mxu1  ;;  %v5591_v11 = vmax.f32 %v5335_v32, %v5463_v33  ;;  %v5461_v1 = vmul.f32 0.2, %v5333_v39  ;;  %v4271_v8 = vpop.f32.mrf.mxu0 }
 0x2d8   : > { %6229 = vst.msk [vmem:[%s9468_s15 + $0x1a0] sm:$0xf] %vm6124_vm4, %v6960_v9  ;;  %v5466_v53 = vmul.f32 0.2, %v5338_v44  ;;  %v5336_v58 = vadd.f32 %v10134_v19, %v5201_v28  ;;  %v5204_v55 = vadd.f32 %v7759_v35, %v4458_v3  ;;  %v4456_v48 = vadd.f32 %v4271_v8, %v10732_v40 }
 0x2d9   : > { %v5046_v21 = vpop.f32.mrf.mxu1  ;;  %v6963_v60 = vpack.c.bf16 %v5591_v11, %v5591_v11  ;;  %v5589_v62 = vmax.f32 %v5333_v39, %v5461_v1  ;;  %v7630_v17 = vpop.f32.mrf.mxu0 }
 0x2da   : > { %v5594_v30 = vmax.f32 %v5338_v44, %v5466_v53  ;;  %v5464_v5 = vmul.f32 0.2, %v5336_v58  ;;  %v5339_v54 = vadd.f32 %v10134_v19, %v5204_v55  ;;  %v5202_v36 = vadd.f32 %v5017_v57, %v4456_v48  ;;  %v10734_v57 = vld [vmem:[#allocation53_spill] sm:$0xff] }
 0x2db   : > { %v7767_v31 = vpop.f32.mrf.mxu1  ;;  %6232 = vst.msk [vmem:[%s9468_s15 + $0x1ac] sm:$0xf] %vm6124_vm4, %v6963_v60  ;;  %v6961_v13 = vpack.c.bf16 %v5589_v62, %v5589_v62  ;;  %v4461_v49 = vadd.f32 %v7630_v17, %v10733_v61  ;;  %v4284_v35 = vpop.f32.mrf.mxu0  ;;  %v10739_v60 = vld [vmem:[#allocation59_spill] sm:$0xff] }
 0x2dc   : > { %v6966_v56 = vpack.c.bf16 %v5594_v30, %v5594_v30  ;;  %v5592_v22 = vmax.f32 %v5336_v58, %v5464_v5  ;;  %v5467_v38 = vmul.f32 0.2, %v5339_v54  ;;  %v5337_v12 = vadd.f32 %v10134_v19, %v5202_v36 }
 0x2dd   : > { %v10150_v6 = vpop.f32.mrf.mxu1  ;;  %6230 = vst.msk [vmem:[%s9468_s15 + $0x1a4] sm:$0xf] %vm6124_vm4, %v6961_v13  ;;  %v5207_v27 = vadd.f32 %v10111_v29, %v4461_v49  ;;  %v4459_v20 = vadd.f32 %v4284_v35, %v10734_v57  ;;  %v7631_v37 = vpop.f32.mrf.mxu0  ;;  %v10740_v13 = vld [vmem:[#allocation68_spill] sm:$0xff] }
 0x2de   : > { %6235 = vst.msk [vmem:[%s9468_s15 + $0x1b8] sm:$0xf] %vm6124_vm4, %v6966_v56  ;;  %v6964_v47 = vpack.c.bf16 %v5592_v22, %v5592_v22  ;;  %v5595_v25 = vmax.f32 %v5339_v54, %v5467_v38  ;;  %v5465_v16 = vmul.f32 0.2, %v5337_v12  ;;  %v4462_v34 = vadd.f32 %v7631_v37, %v10735_v18  ;;  %v10741_v38 = vld [vmem:[#allocation71_spill] sm:$0xff] }
 0x2df   : > { %v7770_v26 = vpop.f32.mrf.mxu1  ;;  %v5342_v45 = vadd.f32 %v10134_v19, %v5207_v27  ;;  %v5205_v50 = vadd.f32 %v10117_v51, %v4459_v20  ;;  %v4287_v52 = vpop.f32.mrf.mxu0 }
 0x2e0   : > { %6233 = vst.msk [vmem:[%s9468_s15 + $0x1b0] sm:$0xf] %vm6124_vm4, %v6964_v47  ;;  %v6967_v29 = vpack.c.bf16 %v5595_v25, %v5595_v25  ;;  %v5593_v2 = vmax.f32 %v5337_v12, %v5465_v16  ;;  %v5208_v43 = vadd.f32 %v7763_v0, %v4462_v34  ;;  %v4460_v32 = vadd.f32 %v4287_v52, %v10736_v23  ;;  %v10742_v25 = vld [vmem:[#allocation61_spill] sm:$0xff] }
 0x2e1   : > { %v5470_v63 = vmul.f32 0.2, %v5342_v45  ;;  %v5340_v10 = vadd.f32 %v10134_v19, %v5205_v50  ;;  %v7634_v24 = vpop.f32.mrf.mxu0  ;;  %v5062_v4 = vpop.f32.mrf.mxu1 }
 0x2e2   : > { %6236 = vst.msk [vmem:[%s9468_s15 + $0x1bc] sm:$0xf] %vm6124_vm4, %v6967_v29  ;;  %v6965_v14 = vpack.c.bf16 %v5593_v2, %v5593_v2  ;;  %v5343_v41 = vadd.f32 %v10134_v19, %v5208_v43  ;;  %v5206_v51 = vadd.f32 %v5033_v7, %v4460_v32  ;;  %v4465_v33 = vadd.f32 %v7634_v24, %v10737_v42  ;;  %v10743_v2 = vld [vmem:[#allocation62_spill] sm:$0xff] }
 0x2e3   : > { %v5598_v39 = vmax.f32 %v5342_v45, %v5470_v63  ;;  %v5468_v46 = vmul.f32 0.2, %v5340_v10  ;;  %v4300_v9 = vpop.f32.mrf.mxu0  ;;  %v7771_v53 = vpop.f32.mrf.mxu1 }
 0x2e4   : > { %6234 = vst.msk [vmem:[%s9468_s15 + $0x1b4] sm:$0xf] %vm6124_vm4, %v6965_v14  ;;  %v5471_v0 = vmul.f32 0.2, %v5343_v41  ;;  %v5341_v44 = vadd.f32 %v10134_v19, %v5206_v51  ;;  %v5211_v28 = vadd.f32 %v7766_v59, %v4465_v33  ;;  %v4463_v3 = vadd.f32 %v4300_v9, %v10738_v15  ;;  %v10744_v14 = vld [vmem:[#allocation72_spill] sm:$0xff] }
 0x2e5   : > { %v6970_v11 = vpack.c.bf16 %v5598_v39, %v5598_v39  ;;  %v5596_v1 = vmax.f32 %v5340_v10, %v5468_v46  ;;  %v7635_v8 = vpop.f32.mrf.mxu0  ;;  %v5065_v35 = vpop.f32.mrf.mxu1 }
 0x2e6   : > { %v5599_v7 = vmax.f32 %v5343_v41, %v5471_v0  ;;  %v5469_v58 = vmul.f32 0.2, %v5341_v44  ;;  %v5346_v55 = vadd.f32 %v10134_v19, %v5211_v28  ;;  %v5209_v40 = vadd.f32 %v5046_v21, %v4463_v3  ;;  %v10745_v28 = vld [vmem:[#allocation76_spill] sm:$0xff] }
 0x2e7   : > { %6239 = vst.msk [vmem:[%s9468_s15 + $0x1c8] sm:$0xf] %vm6124_vm4, %v6970_v11  ;;  %v6968_v48 = vpack.c.bf16 %v5596_v1, %v5596_v1  ;;  %v4466_v62 = vadd.f32 %v7635_v8, %v10739_v60  ;;  %v4303_v17 = vpop.f32.mrf.mxu0  ;;  %v7774_v50 = vpop.f32.mrf.mxu1 }
 0x2e8   : > { %v6971_v59 = vpack.c.bf16 %v5599_v7, %v5599_v7  ;;  %v5597_v30 = vmax.f32 %v5341_v44, %v5469_v58  ;;  %v5474_v5 = vmul.f32 0.2, %v5346_v55  ;;  %v5344_v54 = vadd.f32 %v10134_v19, %v5209_v40 }
 0x2e9   : > { %6237 = vst.msk [vmem:[%s9468_s15 + $0x1c0] sm:$0xf] %vm6124_vm4, %v6968_v48  ;;  %v5212_v36 = vadd.f32 %v7767_v31, %v4466_v62  ;;  %v4464_v61 = vadd.f32 %v4303_v17, %v10740_v13  ;;  %v7638_v49 = vpop.f32.mrf.mxu0  ;;  %v5078_v33 = vpop.f32.mrf.mxu1 }
 0x2ea   : > { %6240 = vst.msk [vmem:[%s9468_s15 + $0x1cc] sm:$0xf] %vm6124_vm4, %v6971_v59  ;;  %v6969_v21 = vpack.c.bf16 %v5597_v30, %v5597_v30  ;;  %v5602_v56 = vmax.f32 %v5346_v55, %v5474_v5  ;;  %v5472_v22 = vmul.f32 0.2, %v5344_v54  ;;  %v4469_v12 = vadd.f32 %v7638_v49, %v10741_v38  ;;  %v10746_v55 = vld [vmem:[#allocation65_spill] sm:$0xff]  ;;  %v10747_v59 = vld [vmem:[#allocation67_spill] sm:$0xff] }
 0x2eb   : > { %v5347_v27 = vadd.f32 %v10134_v19, %v5212_v36  ;;  %v5210_v57 = vadd.f32 %v10150_v6, %v4464_v61  ;;  %v4316_v20 = vpop.f32.mrf.mxu0  ;;  %v7775_v58 = vpop.f32.mrf.mxu1 }
 0x2ec   : > { %6238 = vst.msk [vmem:[%s9468_s15 + $0x1c4] sm:$0xf] %vm6124_vm4, %v6969_v21  ;;  %v6974_v31 = vpack.c.bf16 %v5602_v56, %v5602_v56  ;;  %v5600_v37 = vmax.f32 %v5344_v54, %v5472_v22  ;;  %v5215_v47 = vadd.f32 %v7770_v26, %v4469_v12  ;;  %v4467_v16 = vadd.f32 %v4316_v20, %v10742_v25 }
 0x2ed   : > { %v5475_v18 = vmul.f32 0.2, %v5347_v27  ;;  %v5345_v34 = vadd.f32 %v10134_v19, %v5210_v57  ;;  %v7639_v45 = vpop.f32.mrf.mxu0  ;;  %v5081_v38 = vpop.f32.mrf.mxu1 }
 0x2ee   : > { %6243 = vst.msk [vmem:[%s9468_s15 + $0x1d8] sm:$0xf] %vm6124_vm4, %v6974_v31  ;;  %v6972_v52 = vpack.c.bf16 %v5600_v37, %v5600_v37  ;;  %v5350_v29 = vadd.f32 %v10134_v19, %v5215_v47  ;;  %v5213_v6 = vadd.f32 %v5062_v4, %v4467_v16  ;;  %v4470_v43 = vadd.f32 %v7639_v45, %v10743_v2 }
 0x2ef   : > { %v5603_v23 = vmax.f32 %v5347_v27, %v5475_v18  ;;  %v5473_v32 = vmul.f32 0.2, %v5345_v34  ;;  %v4319_v63 = vpop.f32.mrf.mxu0 }
 0x2f0   : > { %6241 = vst.msk [vmem:[%s9468_s15 + $0x1d0] sm:$0xf] %vm6124_vm4, %v6972_v52  ;;  %v5478_v26 = vmul.f32 0.2, %v5350_v29  ;;  %v5348_v10 = vadd.f32 %v10134_v19, %v5213_v6  ;;  %v5216_v24 = vadd.f32 %v7771_v53, %v4470_v43  ;;  %v4468_v41 = vadd.f32 %v4319_v63, %v10744_v14 }
 0x2f1   : > { %v6975_v51 = vpack.c.bf16 %v5603_v23, %v5603_v23  ;;  %v5601_v42 = vmax.f32 %v5345_v34, %v5473_v32  ;;  %v7642_v39 = vpop.f32.mrf.mxu0 }
 0x2f2   : > { %v5606_v4 = vmax.f32 %v5350_v29, %v5478_v26  ;;  %v5476_v46 = vmul.f32 0.2, %v5348_v10  ;;  %v5351_v9 = vadd.f32 %v10134_v19, %v5216_v24  ;;  %v5214_v0 = vadd.f32 %v5065_v35, %v4468_v41  ;;  %v10748_v35 = vld [vmem:[#allocation79_spill] sm:$0xff] }
 0x2f3   : > { %6244 = vst.msk [vmem:[%s9468_s15 + $0x1dc] sm:$0xf] %vm6124_vm4, %v6975_v51  ;;  %v6973_v44 = vpack.c.bf16 %v5601_v42, %v5601_v42  ;;  %v4473_v15 = vadd.f32 %v7642_v39, %v10745_v28  ;;  %v4332_v3 = vpop.f32.mrf.mxu0 }
 0x2f4   : > { %v6978_v11 = vpack.c.bf16 %v5606_v4, %v5606_v4  ;;  %v5604_v1 = vmax.f32 %v5348_v10, %v5476_v46  ;;  %v5479_v8 = vmul.f32 0.2, %v5351_v9  ;;  %v5349_v53 = vadd.f32 %v10134_v19, %v5214_v0 }
 0x2f5   : > { %6242 = vst.msk [vmem:[%s9468_s15 + $0x1d4] sm:$0xf] %vm6124_vm4, %v6973_v44  ;;  %v5219_v7 = vadd.f32 %v7774_v50, %v4473_v15  ;;  %v4471_v40 = vadd.f32 %v4332_v3, %v10746_v55  ;;  %v7643_v48 = vpop.f32.mrf.mxu0 }
 0x2f6   : > { %6247 = vst.msk [vmem:[%s9468_s15 + $0x1e8] sm:$0xf] %vm6124_vm4, %v6978_v11  ;;  %v6976_v60 = vpack.c.bf16 %v5604_v1, %v5604_v1  ;;  %v5607_v62 = vmax.f32 %v5351_v9, %v5479_v8  ;;  %v5477_v17 = vmul.f32 0.2, %v5349_v53  ;;  %v4474_v30 = vadd.f32 %v7643_v48, %v10747_v59 }
 0x2f7   : > { %v5354_v5 = vadd.f32 %v10134_v19, %v5219_v7  ;;  %v5217_v54 = vadd.f32 %v5078_v33, %v4471_v40  ;;  %v4335_v36 = vpop.f32.mrf.mxu0 }
 0x2f8   : > { %6245 = vst.msk [vmem:[%s9468_s15 + $0x1e0] sm:$0xf] %vm6124_vm4, %v6976_v60  ;;  %v6979_v13 = vpack.c.bf16 %v5607_v62, %v5607_v62  ;;  %v5605_v61 = vmax.f32 %v5349_v53, %v5477_v17  ;;  %v5220_v49 = vadd.f32 %v7775_v58, %v4474_v30  ;;  %v4472_v21 = vadd.f32 %v4335_v36, %v10748_v35 }
 0x2f9   : > { %v5482_v56 = vmul.f32 0.2, %v5354_v5  ;;  %v5352_v22 = vadd.f32 %v10134_v19, %v5217_v54 }
 0x2fa   : > { %6248 = vst.msk [vmem:[%s9468_s15 + $0x1ec] sm:$0xf] %vm6124_vm4, %v6979_v13  ;;  %v6977_v12 = vpack.c.bf16 %v5605_v61, %v5605_v61  ;;  %v5355_v27 = vadd.f32 %v10134_v19, %v5220_v49  ;;  %v5218_v57 = vadd.f32 %v5081_v38, %v4472_v21 }
 0x2fb   : > { %v5610_v20 = vmax.f32 %v5354_v5, %v5482_v56  ;;  %v5480_v31 = vmul.f32 0.2, %v5352_v22 }
 0x2fc   : > { %6246 = vst.msk [vmem:[%s9468_s15 + $0x1e4] sm:$0xf] %vm6124_vm4, %v6977_v12  ;;  %v5483_v37 = vmul.f32 0.2, %v5355_v27  ;;  %v5353_v47 = vadd.f32 %v10134_v19, %v5218_v57 }
 0x2fd   : > { %v6982_v25 = vpack.c.bf16 %v5610_v20, %v5610_v20  ;;  %v5608_v16 = vmax.f32 %v5352_v22, %v5480_v31 }
 0x2fe   : > { %v5611_v18 = vmax.f32 %v5355_v27, %v5483_v37  ;;  %v5481_v34 = vmul.f32 0.2, %v5353_v47 }
 0x2ff   : > { %6251 = vst.msk [vmem:[%s9468_s15 + $0x1f8] sm:$0xf] %vm6124_vm4, %v6982_v25  ;;  %v6980_v45 = vpack.c.bf16 %v5608_v16, %v5608_v16 }
 0x300   : > { %v6983_v50 = vpack.c.bf16 %v5611_v18, %v5611_v18  ;;  %v5609_v52 = vmax.f32 %v5353_v47, %v5481_v34 }
 0x301   : > { %6249 = vst.msk [vmem:[%s9468_s15 + $0x1f0] sm:$0xf] %vm6124_vm4, %v6980_v45 }
 0x302   : > { %6252 = vst.msk [vmem:[%s9468_s15 + $0x1fc] sm:$0xf] %vm6124_vm4, %v6983_v50  ;;  %v6981_v29 = vpack.c.bf16 %v5609_v52, %v5609_v52 }
 0x304   : > { %6250 = vst.msk [vmem:[%s9468_s15 + $0x1f4] sm:$0xf] %vm6124_vm4, %v6981_v29 }
 0x305 PF: > { %s13_s12 = sadd.s32 1, %s7865_s12  }
 0x306   : > { %p10_p5 = scmp.ge.s32.totalorder %s13_s12, 4  }
 0x308   :  { %12 = sbr.rel (!%p10_p5) target bundleno = 1 (0x1), region = 65 }

// kernel: discriminator_forward.9
= control target key start
LH: loop header
LB: loop body
LE: loop exit
PB: predicated region body
PF: predicated region fallthrough
CT: control target
= control target key end

     0   :  { %s789_s12 = smov 0   ;;  %s971_s0 = inlined_call_operand.vmem [shape: bf16[512,16], index: 0, kind: input, shape index: {}]   ;;  %s972_s1 = inlined_call_operand.vmem [shape: f32[1,16], index: 1, kind: input, shape index: {}]   ;;  %s973_s2 = inlined_call_operand.vmem [shape: f32[1,16], index: 2, kind: input, shape index: {}]   ;;  %s974_s3 = inlined_call_operand.vmem [shape: bf16[512,16], index: 3, kind: output, shape index: {}]  }
   0x1 LB: > { %s597_s13 = sadd.s32 4294967295, %s767_s12   ;;  %p601_p0 = scmp.ge.s32.totalorder %s767_s12, 1  ;;  %s767_s12 = sphi %s789_s12, %s13_s12  }
   0x2   : > { %p138_p1 = scmp.lt.s32.totalorder %s767_s12, 3 }
   0x4   : > { %p139_p2 = pnand %p601_p0, %p138_p1 }
   0x5   : > { %s602_s14 = sshll.u32 (!%p139_p2), %s597_s13, 5 }
   0x6   : > { %142 = sbr.rel (%p139_p2) target bundleno = 67 (0x43), region = 32  ;;  %p163_p3 = scmp.lt.s32.totalorder (!%p139_p2), %s602_s14, 63 }
   0xb   : > { %s976_s14 = smov (!%p163_p3, %s602_s14), 63  ;;  %v810_v0 = vld [vmem:[%s972_s1] ss:$0 sm:$0xff]  ;;  %vm508_vm0 = vcmask 125952  }
   0xc   : > { %s603_s15 = sshll.u32 %s976_s14, 2  ;;  %v819_v9 = vld [vmem:[%s973_s2] ss:$0 sm:$0xff] }
   0xd   : > { %s805_s18 = scalar_lea.vmem %s971_s0, %s603_s15  ;;  %s843_s25 = scalar_lea.vmem %s974_s3, %s603_s15 }
   0xe   : > { %v675_v1 = vld [vmem:[%s805_s18] sm:$0xff]   ;;  %v738_v2 = vld [vmem:[%s805_s18 + $0x8] sm:$0xff]   ;;  %v739_v3 = vld [vmem:[%s805_s18 + $0x10] sm:$0xff]  }
   0xf   : > { %v676_v4 = vunpack.c.l.bf16 %v675_v1  ;;  %v677_v5 = vunpack.c.h.bf16 %v675_v1  ;;  %v680_v6 = vunpack.c.l.bf16 %v738_v2  ;;  %v681_v7 = vunpack.c.h.bf16 %v738_v2  ;;  %v740_v8 = vld [vmem:[%s805_s18 + $0x18] sm:$0xff]   ;;  %v741_v22 = vld [vmem:[%s805_s18 + $0x20] sm:$0xff]   ;;  %v742_v47 = vld [vmem:[%s805_s18 + $0x28] sm:$0xff]  }
  0x10   : > { %v684_v10 = vunpack.c.l.bf16 %v739_v3  ;;  %v685_v11 = vunpack.c.h.bf16 %v739_v3  ;;  %v688_v12 = vunpack.c.l.bf16 %v740_v8  ;;  %v689_v13 = vunpack.c.h.bf16 %v740_v8  ;;  %v743_v52 = vld [vmem:[%s805_s18 + $0x30] sm:$0xff]   ;;  %v744_v57 = vld [vmem:[%s805_s18 + $0x38] sm:$0xff]  }
  0x11   : > { %v245_v14 = vmul.f32 %v676_v4, %v810_v0  ;;  %v246_v15 = vmul.f32 %v677_v5, %v810_v0  ;;  %v247_v16 = vmul.f32 %v680_v6, %v810_v0  ;;  %v248_v17 = vmul.f32 %v681_v7, %v810_v0 }
  0x12   : > { %v249_v18 = vmul.f32 %v684_v10, %v810_v0  ;;  %v250_v19 = vmul.f32 %v685_v11, %v810_v0  ;;  %v251_v20 = vmul.f32 %v688_v12, %v810_v0  ;;  %v252_v21 = vmul.f32 %v689_v13, %v810_v0 }
  0x13   : > { %v284_v23 = vadd.f32 %v819_v9, %v245_v14  ;;  %v285_v24 = vadd.f32 %v819_v9, %v246_v15  ;;  %v286_v25 = vadd.f32 %v819_v9, %v247_v16  ;;  %v287_v26 = vadd.f32 %v819_v9, %v248_v17 }
  0x14   : > { %v288_v27 = vadd.f32 %v819_v9, %v249_v18  ;;  %v289_v28 = vadd.f32 %v819_v9, %v250_v19  ;;  %v290_v29 = vadd.f32 %v819_v9, %v251_v20  ;;  %v291_v30 = vadd.f32 %v819_v9, %v252_v21 }
  0x15   : > { %v316_v31 = vmul.f32 0.2, %v284_v23  ;;  %v317_v32 = vmul.f32 0.2, %v285_v24  ;;  %v318_v33 = vmul.f32 0.2, %v286_v25  ;;  %v692_v34 = vunpack.c.l.bf16 %v741_v22 }
  0x16   : > { %v319_v35 = vmul.f32 0.2, %v287_v26  ;;  %v320_v36 = vmul.f32 0.2, %v288_v27  ;;  %v321_v37 = vmul.f32 0.2, %v289_v28  ;;  %v693_v38 = vunpack.c.h.bf16 %v741_v22 }
  0x17   : > { %v348_v39 = vmax.f32 %v284_v23, %v316_v31  ;;  %v349_v40 = vmax.f32 %v285_v24, %v317_v32  ;;  %v350_v41 = vmax.f32 %v286_v25, %v318_v33  ;;  %v322_v42 = vmul.f32 0.2, %v290_v29  ;;  %v745_v24 = vld [vmem:[%s805_s18 + $0x40] sm:$0xff]  }
  0x18   : > { %v351_v43 = vmax.f32 %v287_v26, %v319_v35  ;;  %v352_v44 = vmax.f32 %v288_v27, %v320_v36  ;;  %v353_v45 = vmax.f32 %v289_v28, %v321_v37  ;;  %v323_v46 = vmul.f32 0.2, %v291_v30  ;;  %v746_v37 = vld [vmem:[%s805_s18 + $0x48] sm:$0xff]  }
  0x19   : > { %v642_v48 = vpack.c.bf16 %v348_v39, %v348_v39  ;;  %v643_v49 = vpack.c.bf16 %v349_v40, %v349_v40  ;;  %v644_v50 = vpack.c.bf16 %v350_v41, %v350_v41  ;;  %v354_v51 = vmax.f32 %v290_v29, %v322_v42  ;;  %v747_v42 = vld [vmem:[%s805_s18 + $0x50] sm:$0xff]  }
  0x1a   : > { %v645_v53 = vpack.c.bf16 %v351_v43, %v351_v43  ;;  %v646_v54 = vpack.c.bf16 %v352_v44, %v352_v44  ;;  %v647_v55 = vpack.c.bf16 %v353_v45, %v353_v45  ;;  %v355_v56 = vmax.f32 %v291_v30, %v323_v46 }
  0x1b   : > { %509 = vst.msk [vmem:[%s843_s25] sm:$0xf] %vm508_vm0, %v642_v48  ;;  %510 = vst.msk [vmem:[%s843_s25 + $0x4] sm:$0xf] %vm508_vm0, %v643_v49  ;;  %v648_v58 = vpack.c.bf16 %v354_v51, %v354_v51  ;;  %v253_v59 = vmul.f32 %v692_v34, %v810_v0  ;;  %v254_v60 = vmul.f32 %v693_v38, %v810_v0  ;;  %v696_v61 = vunpack.c.l.bf16 %v742_v47 }
  0x1c   : > { %511 = vst.msk [vmem:[%s843_s25 + $0x8] sm:$0xf] %vm508_vm0, %v644_v50  ;;  %512 = vst.msk [vmem:[%s843_s25 + $0xc] sm:$0xf] %vm508_vm0, %v645_v53  ;;  %v649_v62 = vpack.c.bf16 %v355_v56, %v355_v56  ;;  %v697_v63 = vunpack.c.h.bf16 %v742_v47  ;;  %v700_v1 = vunpack.c.l.bf16 %v743_v52  ;;  %v701_v2 = vunpack.c.h.bf16 %v743_v52  ;;  %v748_v47 = vld [vmem:[%s805_s18 + $0x58] sm:$0xff]  }
  0x1d   : > { %513 = vst.msk [vmem:[%s843_s25 + $0x10] sm:$0xf] %vm508_vm0, %v646_v54  ;;  %514 = vst.msk [vmem:[%s843_s25 + $0x14] sm:$0xf] %vm508_vm0, %v647_v55  ;;  %v292_v3 = vadd.f32 %v819_v9, %v253_v59  ;;  %v293_v4 = vadd.f32 %v819_v9, %v254_v60  ;;  %v255_v5 = vmul.f32 %v696_v61, %v810_v0  ;;  %v704_v6 = vunpack.c.l.bf16 %v744_v57 }
  0x1e   : > { %515 = vst.msk [vmem:[%s843_s25 + $0x18] sm:$0xf] %vm508_vm0, %v648_v58  ;;  %516 = vst.msk [vmem:[%s843_s25 + $0x1c] sm:$0xf] %vm508_vm0, %v649_v62  ;;  %v256_v7 = vmul.f32 %v697_v63, %v810_v0  ;;  %v257_v8 = vmul.f32 %v700_v1, %v810_v0  ;;  %v258_v10 = vmul.f32 %v701_v2, %v810_v0  ;;  %v705_v11 = vunpack.c.h.bf16 %v744_v57 }
  0x1f   : > { %v324_v12 = vmul.f32 0.2, %v292_v3  ;;  %v325_v13 = vmul.f32 0.2, %v293_v4  ;;  %v294_v14 = vadd.f32 %v819_v9, %v255_v5  ;;  %v259_v15 = vmul.f32 %v704_v6, %v810_v0 }
  0x20   : > { %v295_v16 = vadd.f32 %v819_v9, %v256_v7  ;;  %v296_v17 = vadd.f32 %v819_v9, %v257_v8  ;;  %v297_v18 = vadd.f32 %v819_v9, %v258_v10  ;;  %v260_v19 = vmul.f32 %v705_v11, %v810_v0 }
  0x21   : > { %v356_v20 = vmax.f32 %v292_v3, %v324_v12  ;;  %v357_v21 = vmax.f32 %v293_v4, %v325_v13  ;;  %v326_v22 = vmul.f32 0.2, %v294_v14  ;;  %v298_v23 = vadd.f32 %v819_v9, %v259_v15 }
  0x22   : > { %v327_v25 = vmul.f32 0.2, %v295_v16  ;;  %v328_v26 = vmul.f32 0.2, %v296_v17  ;;  %v329_v27 = vmul.f32 0.2, %v297_v18  ;;  %v299_v28 = vadd.f32 %v819_v9, %v260_v19 }
  0x23   : > { %v650_v29 = vpack.c.bf16 %v356_v20, %v356_v20  ;;  %v651_v30 = vpack.c.bf16 %v357_v21, %v357_v21  ;;  %v358_v31 = vmax.f32 %v294_v14, %v326_v22  ;;  %v330_v32 = vmul.f32 0.2, %v298_v23  ;;  %v749_v14 = vld [vmem:[%s805_s18 + $0x60] sm:$0xff]  }
  0x24   : > { %v359_v33 = vmax.f32 %v295_v16, %v327_v25  ;;  %v360_v34 = vmax.f32 %v296_v17, %v328_v26  ;;  %v361_v35 = vmax.f32 %v297_v18, %v329_v27  ;;  %v331_v36 = vmul.f32 0.2, %v299_v28  ;;  %v750_v27 = vld [vmem:[%s805_s18 + $0x68] sm:$0xff]  }
  0x25   : > { %517 = vst.msk [vmem:[%s843_s25 + $0x20] sm:$0xf] %vm508_vm0, %v650_v29  ;;  %518 = vst.msk [vmem:[%s843_s25 + $0x24] sm:$0xf] %vm508_vm0, %v651_v30  ;;  %v652_v38 = vpack.c.bf16 %v358_v31, %v358_v31  ;;  %v362_v39 = vmax.f32 %v298_v23, %v330_v32  ;;  %v708_v40 = vunpack.c.l.bf16 %v745_v24  ;;  %v709_v41 = vunpack.c.h.bf16 %v745_v24  ;;  %v751_v32 = vld [vmem:[%s805_s18 + $0x70] sm:$0xff]  }
  0x26   : > { %v653_v43 = vpack.c.bf16 %v359_v33, %v359_v33  ;;  %v654_v44 = vpack.c.bf16 %v360_v34, %v360_v34  ;;  %v655_v45 = vpack.c.bf16 %v361_v35, %v361_v35  ;;  %v363_v46 = vmax.f32 %v299_v28, %v331_v36 }
  0x27   : > { %519 = vst.msk [vmem:[%s843_s25 + $0x28] sm:$0xf] %vm508_vm0, %v652_v38  ;;  %v656_v48 = vpack.c.bf16 %v362_v39, %v362_v39  ;;  %v261_v49 = vmul.f32 %v708_v40, %v810_v0  ;;  %v262_v50 = vmul.f32 %v709_v41, %v810_v0  ;;  %v712_v51 = vunpack.c.l.bf16 %v746_v37 }
  0x28   : > { %520 = vst.msk [vmem:[%s843_s25 + $0x2c] sm:$0xf] %vm508_vm0, %v653_v43  ;;  %521 = vst.msk [vmem:[%s843_s25 + $0x30] sm:$0xf] %vm508_vm0, %v654_v44  ;;  %v657_v52 = vpack.c.bf16 %v363_v46, %v363_v46  ;;  %v713_v53 = vunpack.c.h.bf16 %v746_v37  ;;  %v716_v54 = vunpack.c.l.bf16 %v747_v42  ;;  %v717_v55 = vunpack.c.h.bf16 %v747_v42  ;;  %v752_v37 = vld [vmem:[%s805_s18 + $0x78] sm:$0xff]  }
  0x29   : > { %522 = vst.msk [vmem:[%s843_s25 + $0x34] sm:$0xf] %vm508_vm0, %v655_v45  ;;  %523 = vst.msk [vmem:[%s843_s25 + $0x38] sm:$0xf] %vm508_vm0, %v656_v48  ;;  %v300_v56 = vadd.f32 %v819_v9, %v261_v49  ;;  %v301_v57 = vadd.f32 %v819_v9, %v262_v50  ;;  %v263_v58 = vmul.f32 %v712_v51, %v810_v0  ;;  %v720_v59 = vunpack.c.l.bf16 %v748_v47 }
  0x2a   : > { %524 = vst.msk [vmem:[%s843_s25 + $0x3c] sm:$0xf] %vm508_vm0, %v657_v52  ;;  %v264_v60 = vmul.f32 %v713_v53, %v810_v0  ;;  %v265_v61 = vmul.f32 %v716_v54, %v810_v0  ;;  %v266_v62 = vmul.f32 %v717_v55, %v810_v0  ;;  %v721_v63 = vunpack.c.h.bf16 %v748_v47 }
  0x2b   : > { %v332_v1 = vmul.f32 0.2, %v300_v56  ;;  %v333_v2 = vmul.f32 0.2, %v301_v57  ;;  %v302_v3 = vadd.f32 %v819_v9, %v263_v58  ;;  %v267_v4 = vmul.f32 %v720_v59, %v810_v0 }
  0x2c   : > { %v303_v5 = vadd.f32 %v819_v9, %v264_v60  ;;  %v304_v6 = vadd.f32 %v819_v9, %v265_v61  ;;  %v305_v7 = vadd.f32 %v819_v9, %v266_v62  ;;  %v268_v8 = vmul.f32 %v721_v63, %v810_v0 }
  0x2d   : > { %v364_v10 = vmax.f32 %v300_v56, %v332_v1  ;;  %v365_v11 = vmax.f32 %v301_v57, %v333_v2  ;;  %v334_v12 = vmul.f32 0.2, %v302_v3  ;;  %v306_v13 = vadd.f32 %v819_v9, %v267_v4 }
  0x2e   : > { %v335_v15 = vmul.f32 0.2, %v303_v5  ;;  %v336_v16 = vmul.f32 0.2, %v304_v6  ;;  %v337_v17 = vmul.f32 0.2, %v305_v7  ;;  %v307_v18 = vadd.f32 %v819_v9, %v268_v8 }
  0x2f   : > { %v658_v19 = vpack.c.bf16 %v364_v10, %v364_v10  ;;  %v659_v20 = vpack.c.bf16 %v365_v11, %v365_v11  ;;  %v366_v21 = vmax.f32 %v302_v3, %v334_v12  ;;  %v338_v22 = vmul.f32 0.2, %v306_v13 }
  0x30   : > { %v367_v23 = vmax.f32 %v303_v5, %v335_v15  ;;  %v368_v24 = vmax.f32 %v304_v6, %v336_v16  ;;  %v369_v25 = vmax.f32 %v305_v7, %v337_v17  ;;  %v339_v26 = vmul.f32 0.2, %v307_v18 }
  0x31   : > { %525 = vst.msk [vmem:[%s843_s25 + $0x40] sm:$0xf] %vm508_vm0, %v658_v19  ;;  %526 = vst.msk [vmem:[%s843_s25 + $0x44] sm:$0xf] %vm508_vm0, %v659_v20  ;;  %v660_v28 = vpack.c.bf16 %v366_v21, %v366_v21  ;;  %v370_v29 = vmax.f32 %v306_v13, %v338_v22  ;;  %v724_v30 = vunpack.c.l.bf16 %v749_v14  ;;  %v725_v31 = vunpack.c.h.bf16 %v749_v14 }
  0x32   : > { %v661_v33 = vpack.c.bf16 %v367_v23, %v367_v23  ;;  %v662_v34 = vpack.c.bf16 %v368_v24, %v368_v24  ;;  %v663_v35 = vpack.c.bf16 %v369_v25, %v369_v25  ;;  %v371_v36 = vmax.f32 %v307_v18, %v339_v26 }
  0x33   : > { %527 = vst.msk [vmem:[%s843_s25 + $0x48] sm:$0xf] %vm508_vm0, %v660_v28  ;;  %v664_v38 = vpack.c.bf16 %v370_v29, %v370_v29  ;;  %v269_v39 = vmul.f32 %v724_v30, %v810_v0  ;;  %v270_v40 = vmul.f32 %v725_v31, %v810_v0  ;;  %v728_v41 = vunpack.c.l.bf16 %v750_v27 }
  0x34   : > { %528 = vst.msk [vmem:[%s843_s25 + $0x4c] sm:$0xf] %vm508_vm0, %v661_v33  ;;  %529 = vst.msk [vmem:[%s843_s25 + $0x50] sm:$0xf] %vm508_vm0, %v662_v34  ;;  %v665_v42 = vpack.c.bf16 %v371_v36, %v371_v36  ;;  %v729_v43 = vunpack.c.h.bf16 %v750_v27  ;;  %v732_v44 = vunpack.c.l.bf16 %v751_v32  ;;  %v733_v45 = vunpack.c.h.bf16 %v751_v32 }
  0x35   : > { %530 = vst.msk [vmem:[%s843_s25 + $0x54] sm:$0xf] %vm508_vm0, %v663_v35  ;;  %531 = vst.msk [vmem:[%s843_s25 + $0x58] sm:$0xf] %vm508_vm0, %v664_v38  ;;  %v308_v46 = vadd.f32 %v819_v9, %v269_v39  ;;  %v309_v47 = vadd.f32 %v819_v9, %v270_v40  ;;  %v271_v48 = vmul.f32 %v728_v41, %v810_v0  ;;  %v736_v49 = vunpack.c.l.bf16 %v752_v37 }
  0x36   : > { %532 = vst.msk [vmem:[%s843_s25 + $0x5c] sm:$0xf] %vm508_vm0, %v665_v42  ;;  %v272_v50 = vmul.f32 %v729_v43, %v810_v0  ;;  %v273_v51 = vmul.f32 %v732_v44, %v810_v0  ;;  %v274_v52 = vmul.f32 %v733_v45, %v810_v0  ;;  %v737_v53 = vunpack.c.h.bf16 %v752_v37 }
  0x37   : > { %v340_v54 = vmul.f32 0.2, %v308_v46  ;;  %v341_v55 = vmul.f32 0.2, %v309_v47  ;;  %v310_v56 = vadd.f32 %v819_v9, %v271_v48  ;;  %v275_v57 = vmul.f32 %v736_v49, %v810_v0 }
  0x38   : > { %v311_v58 = vadd.f32 %v819_v9, %v272_v50  ;;  %v312_v59 = vadd.f32 %v819_v9, %v273_v51  ;;  %v313_v60 = vadd.f32 %v819_v9, %v274_v52  ;;  %v276_v61 = vmul.f32 %v737_v53, %v810_v0 }
  0x39   : > { %v372_v62 = vmax.f32 %v308_v46, %v340_v54  ;;  %v373_v63 = vmax.f32 %v309_v47, %v341_v55  ;;  %v342_v1 = vmul.f32 0.2, %v310_v56  ;;  %v314_v2 = vadd.f32 %v819_v9, %v275_v57 }
  0x3a   : > { %v343_v3 = vmul.f32 0.2, %v311_v58  ;;  %v344_v4 = vmul.f32 0.2, %v312_v59  ;;  %v345_v5 = vmul.f32 0.2, %v313_v60  ;;  %v315_v6 = vadd.f32 %v819_v9, %v276_v61 }
  0x3b   : > { %v666_v7 = vpack.c.bf16 %v372_v62, %v372_v62  ;;  %v667_v8 = vpack.c.bf16 %v373_v63, %v373_v63  ;;  %v374_v10 = vmax.f32 %v310_v56, %v342_v1  ;;  %v346_v11 = vmul.f32 0.2, %v314_v2 }
  0x3c   : > { %v375_v0 = vmax.f32 %v311_v58, %v343_v3  ;;  %v376_v12 = vmax.f32 %v312_v59, %v344_v4  ;;  %v377_v13 = vmax.f32 %v313_v60, %v345_v5  ;;  %v347_v14 = vmul.f32 0.2, %v315_v6 }
  0x3d   : > { %533 = vst.msk [vmem:[%s843_s25 + $0x60] sm:$0xf] %vm508_vm0, %v666_v7  ;;  %534 = vst.msk [vmem:[%s843_s25 + $0x64] sm:$0xf] %vm508_vm0, %v667_v8  ;;  %v668_v15 = vpack.c.bf16 %v374_v10, %v374_v10  ;;  %v378_v9 = vmax.f32 %v314_v2, %v346_v11 }
  0x3e   : > { %v669_v16 = vpack.c.bf16 %v375_v0, %v375_v0  ;;  %v670_v17 = vpack.c.bf16 %v376_v12, %v376_v12  ;;  %v671_v18 = vpack.c.bf16 %v377_v13, %v377_v13  ;;  %v379_v19 = vmax.f32 %v315_v6, %v347_v14 }
  0x3f   : > { %535 = vst.msk [vmem:[%s843_s25 + $0x68] sm:$0xf] %vm508_vm0, %v668_v15  ;;  %v672_v20 = vpack.c.bf16 %v378_v9, %v378_v9 }
  0x40   : > { %536 = vst.msk [vmem:[%s843_s25 + $0x6c] sm:$0xf] %vm508_vm0, %v669_v16  ;;  %537 = vst.msk [vmem:[%s843_s25 + $0x70] sm:$0xf] %vm508_vm0, %v670_v17  ;;  %v673_v21 = vpack.c.bf16 %v379_v19, %v379_v19 }
  0x41   : > { %538 = vst.msk [vmem:[%s843_s25 + $0x74] sm:$0xf] %vm508_vm0, %v671_v18  ;;  %539 = vst.msk [vmem:[%s843_s25 + $0x78] sm:$0xf] %vm508_vm0, %v672_v20 }
  0x42   : > { %540 = vst.msk [vmem:[%s843_s25 + $0x7c] sm:$0xf] %vm508_vm0, %v673_v21 }
  0x43 PF: > { %s13_s12 = sadd.s32 1, %s767_s12  }
  0x44   : > { %p10_p4 = scmp.ge.s32.totalorder %s13_s12, 4  }
  0x46   :  { %12 = sbr.rel (!%p10_p4) target bundleno = 1 (0x1), region = 62 }

// kernel: discriminator_forward.8
= control target key start
LH: loop header
LB: loop body
LE: loop exit
PB: predicated region body
PF: predicated region fallthrough
CT: control target
= control target key end

     0   :  { %s2555_s12 = smov 0   ;;  %s3363_s0 = inlined_call_operand.vmem [shape: bf16[2,17,17,32], index: 0, kind: input, shape index: {}]   ;;  %s3364_s1 = inlined_call_operand.vmem [shape: bf16[4,32,16], index: 1, kind: input, shape index: {}]   ;;  %s3365_s2 = inlined_call_operand.vmem [shape: bf16[512,16], index: 2, kind: output, shape index: {0}]   ;;  %s3366_s3 = inlined_call_operand.vmem [shape: f32[2,8,16], index: 3, kind: output, shape index: {1}]  }
   0x1 LB: > { %s2561_s13 = sadd.s32 4294967295, %s2533_s12   ;;  %p2088_p0 = scmp.ge.s32.totalorder %s2533_s12, 1  ;;  %s2533_s12 = sphi %s2555_s12, %s14_s12  }
   0x2   : > { %p140_p1 = scmp.lt.s32.totalorder %s2533_s12, 3 }
   0x4   : > { %p141_p2 = pnand %p2088_p0, %p140_p1 }
   0x6   : > { %144 = sbr.rel (%p141_p2) target bundleno = 387 (0x183), region = 28 }
   0xb   : > { %v2502_v0 = vld [vmem:[%s3364_s1 + $0x8] sm:$0xff]   ;;  %p168_p3 = scmp.lt.s32.totalorder %s2561_s13, 1  ;;  %v2503_v1 = vld [vmem:[%s3364_s1 + $0x18] sm:$0xff]   ;;  %v2504_v2 = vld [vmem:[%s3364_s1] sm:$0xff]   ;;  %vm239_vm0 = vsmask.f32 3328 }
   0xc   : > { %2385 = vmatprep.subr.bf16.mxu1 %v2502_v0  ;;  %2349 = vmatprep.subr.bf16.mxu0 %v2503_v1  ;;  %v2505_v3 = vld [vmem:[%s3364_s1 + $0x10] sm:$0xff]   ;;  %vm240_vm1 = vsmask.f32 7440  ;;  %v2585_v4 = vld [vmem:[%s3364_s1 + $0x28] sm:$0xff]   ;;  %vm691_vm2 = vcmask 261120   ;;  %v2509_v5 = vld [vmem:[%s3364_s1 + $0x38] sm:$0xff]  }
   0xd   : > { %s2576_s20 = scalar_select %p168_p3, %s2561_s13, 1  ;;  %2386 = vmatpush3.bf16.msra.mxu1 %v2502_v0  ;;  %2350 = vmatpush3.bf16.msra.mxu0 %v2503_v1  ;;  %v2519_v33 = vld [vmem:[%s3364_s1 + $0x30] sm:$0xff]   ;;  %vm2611_vm3 = vmor %vm239_vm0, %vm240_vm1  ;;  %vm1788_vm4 = vcmask 125952   ;;  %vm1821_vm5 = vcmask 130048   ;;  %vm1992_vm6 = vcmask 1040384   ;;  %vm1994_vm7 = vcmask 1041408  }
   0xe   : > { %2387 = vmatprep.subr.bf16.mxu1 %v2504_v2  ;;  %2351 = vmatprep.subr.bf16.mxu0 %v2505_v3  ;;  %s2090_s8 = sshll.u32 %s2561_s13, 5 }
   0xf   : > { %s2493_s23 = smul.u32 204, %s2576_s20  ;;  %p174_p4 = scmp.lt.s32.totalorder %s2090_s8, 63 }
  0x10   : > { %s2092_s14 = sshll.u32 %s2576_s20, 3 }
  0x11   : > { %s2590_s28 = scalar_lea.vmem %s3363_s0, %s2493_s23  ;;  %2388 = vmatpush3.bf16.msra.mxu1 %v2504_v2  ;;  %2352 = vmatpush3.bf16.msra.mxu0 %v2505_v3  ;;  %s3394_s8 = smov (!%p174_p4, %s2090_s8), 63 }
  0x12   : > { %v184_v6 = vld [vmem:[%s2590_s28] sm:$0xf]  ;;  %v185_v7 = vld [vmem:[%s2590_s28 + $0x4] sm:$0xf]  ;;  %v187_v8 = vld [vmem:[%s2590_s28 + $0xc] sm:$0xf]  ;;  %2457 = vmatprep.subr.bf16.mxu1 %v2509_v5  ;;  %2421 = vmatprep.subr.bf16.mxu0 %v2585_v4  ;;  %s182_s17 = scalar_lea.vmem %s3366_s3, %s2092_s14 }
  0x13   : > { %v243_v9 = vshrl.u32 %v184_v6, 16  ;;  %v246_v10 = vshll.u32 %v184_v6, 16  ;;  %v252_v11 = vshll.u32 %v185_v7, 16  ;;  %v256_v12 = vshrl.u32 %v185_v7, 16  ;;  %v188_v13 = vld [vmem:[%s2590_s28 + $0x10] sm:$0xf] }
  0x14   : > { %v2131_v14 = vcombine.low %v184_v6, %v185_v7  ;;  %v267_v15 = vshrl.u32 %v187_v8, 16  ;;  %v270_v16 = vshll.u32 %v187_v8, 16  ;;  %v276_v17 = vshll.u32 %v188_v13, 16  ;;  %v186_v18 = vld [vmem:[%s2590_s28 + $0x8] sm:$0x1]  ;;  %s2091_s9 = sshll.u32 %s3394_s8, 2 }
  0x15   : > { %v245_v19 = vrot.slane %v243_v9, 4  ;;  %v248_v20 = vrot.slane %v246_v10, 5  ;;  %v254_v21 = vrot.slane %v252_v11, 5  ;;  %v258_v22 = vrot.slane %v256_v12, 4  ;;  %v189_v23 = vld [vmem:[%s2590_s28 + $0x14] sm:$0x1]  ;;  %s3072_s13 = scalar_lea.vmem %s3365_s2, %s2091_s9 }
  0x16   : > { %2389 = vmatprep.mubr.msk.bf16.mxu1 %vm691_vm2, %v2131_v14  ;;  %v269_v24 = vrot.slane %v267_v15, 4  ;;  %v272_v25 = vrot.slane %v270_v16, 5  ;;  %v278_v26 = vrot.slane %v276_v17, 5  ;;  %v280_v27 = vshrl.u32 %v188_v13, 16  ;;  %v190_v28 = vld [vmem:[%s2590_s28 + $0x18] sm:$0xf] }
  0x17   : > { %v2604_v29 = vcombine.low %v187_v8, %v188_v13  ;;  %v249_v30 = vor.u32 %v248_v20, %v245_v19  ;;  %v259_v31 = vor.u32 %v258_v22, %v254_v21  ;;  %v262_v32 = vshll.u32 %v186_v18, 16  ;;  %v191_v38 = vld [vmem:[%s2590_s28 + $0x1c] sm:$0xf]  ;;  %v193_v48 = vld [vmem:[%s2590_s28 + $0x24] sm:$0xf] }
  0x18   : > { %v282_v34 = vrot.slane %v280_v27, 4  ;;  %v273_v36 = vor.u32 %v272_v25, %v269_v24  ;;  %v286_v37 = vshll.u32 %v189_v23, 16  ;;  %v291_v39 = vshrl.u32 %v190_v28, 16  ;;  %v194_v53 = vld [vmem:[%s2590_s28 + $0x28] sm:$0xf]  ;;  %v2518_v10 = vld [vmem:[%s3364_s1 + $0x20] sm:$0xff]  }
  0x19   : > { %2390 = vmatmul.mubr.msk.bf16.vlgmr.msra.gmra.mxu1 %vm691_vm2, %v2604_v29  ;;  %v250_v40 = vrot.slane %v249_v30, 4  ;;  %v260_v41 = vrot.slane %v259_v31, 4  ;;  %v264_v42 = vrot.slane %v262_v32, 5  ;;  %v294_v43 = vshll.u32 %v190_v28, 16  ;;  %v192_v58 = vld [vmem:[%s2590_s28 + $0x20] sm:$0x1] }
  0x1a   : > { %v274_v44 = vrot.slane %v273_v36, 4  ;;  %v283_v45 = vor.u32 %v282_v34, %v278_v26  ;;  %v288_v46 = vrot.slane %v286_v37, 5  ;;  %2458 = vmatpush3.bf16.msra.mxu1 %v2509_v5  ;;  %v293_v47 = vrot.slane %v291_v39, 4  ;;  %v195_v63 = vld [vmem:[%s2590_s28 + $0x2c] sm:$0x1] }
  0x1b   : > { %v255_v49 = vsel %vm2611_vm3, %v250_v40, %v254_v21  ;;  %v265_v50 = vsel %vm2611_vm3, %v260_v41, %v264_v42  ;;  %v296_v51 = vrot.slane %v294_v43, 5  ;;  %v300_v52 = vshll.u32 %v191_v38, 16  ;;  %2459 = vmatprep.subr.bf16.mxu1 %v2519_v33  ;;  %v196_v5 = vld [vmem:[%s2590_s28 + $0x30] sm:$0xf]  ;;  %v197_v18 = vld [vmem:[%s2590_s28 + $0x34] sm:$0xf] }
  0x1c   : > { %v2097_v54 = vcombine.low %v255_v49, %v265_v50  ;;  %v279_v55 = vsel %vm2611_vm3, %v274_v44, %v278_v26  ;;  %v284_v56 = vrot.slane %v283_v45, 4  ;;  %v304_v57 = vshrl.u32 %v191_v38, 16  ;;  %v198_v39 = vld [vmem:[%s2590_s28 + $0x38] sm:$0x1]  ;;  %v201_v40 = vld [vmem:[%s2590_s28 + $0x44] sm:$0x1] }
  0x1d   : > { %v302_v59 = vrot.slane %v300_v52, 5  ;;  %v2627_v60 = vcombine.low %v190_v28, %v191_v38  ;;  %v315_v61 = vshrl.u32 %v193_v48, 16  ;;  %v318_v62 = vshll.u32 %v193_v48, 16  ;;  %v199_v28 = vld [vmem:[%s2590_s28 + $0x3c] sm:$0xf] }
  0x1e   : > { %2353 = vmatprep.mubr.msk.bf16.mxu0 %vm691_vm2, %v2097_v54  ;;  %v289_v0 = vsel %vm2611_vm3, %v284_v56, %v288_v46  ;;  %v306_v1 = vrot.slane %v304_v57, 4  ;;  %v324_v2 = vshll.u32 %v194_v53, 16  ;;  %v328_v3 = vshrl.u32 %v194_v53, 16  ;;  %2460 = vmatpush3.bf16.msra.mxu1 %v2519_v33  ;;  %v202_v45 = vld [vmem:[%s2590_s28 + $0x48] sm:$0xf] }
  0x1f   : > { %v2634_v6 = vcombine.low %v279_v55, %v289_v0  ;;  %2393 = vmatprep.mubr.msk.bf16.mxu1 %vm691_vm2, %v2627_v60  ;;  %v317_v7 = vrot.slane %v315_v61, 4  ;;  %v320_v8 = vrot.slane %v318_v62, 5  ;;  %v2638_v9 = vcombine.low %v193_v48, %v194_v53  ;;  %v203_v62 = vld [vmem:[%s2590_s28 + $0x4c] sm:$0xf] }
  0x20   : > { %v326_v11 = vrot.slane %v324_v2, 5  ;;  %v330_v12 = vrot.slane %v328_v3, 4  ;;  %v297_v13 = vor.u32 %v296_v51, %v293_v47  ;;  %v307_v14 = vor.u32 %v306_v1, %v302_v59 }
  0x21   : > { %2354 = vmatmul.mubr.msk.bf16.vlgmr.msra.gmra.mxu0 %vm691_vm2, %v2634_v6  ;;  %2394 = vmatmul.mubr.msk.bf16.gmra.mxu1 %vm691_vm2, %v2638_v9  ;;  %v310_v15 = vshll.u32 %v192_v58, 16  ;;  %v321_v16 = vor.u32 %v320_v8, %v317_v7  ;;  %v334_v17 = vshll.u32 %v195_v63, 16  ;;  %v339_v19 = vshrl.u32 %v196_v5, 16 }
  0x22   : > { %2422 = vmatpush3.bf16.msra.mxu0 %v2585_v4  ;;  %v298_v20 = vrot.slane %v297_v13, 4  ;;  %v308_v21 = vrot.slane %v307_v14, 4  ;;  %v331_v22 = vor.u32 %v330_v12, %v326_v11  ;;  %v342_v23 = vshll.u32 %v196_v5, 16  ;;  %v200_v4 = vld [vmem:[%s2590_s28 + $0x40] sm:$0xf] }
  0x23   : > { %v312_v24 = vrot.slane %v310_v15, 5  ;;  %v322_v25 = vrot.slane %v321_v16, 4  ;;  %v336_v26 = vrot.slane %v334_v17, 5  ;;  %v341_v27 = vrot.slane %v339_v19, 4  ;;  %2423 = vmatprep.subr.bf16.mxu0 %v2518_v10  ;;  %v206_v16 = vld [vmem:[%s2590_s28 + $0x58] sm:$0xf] }
  0x24   : > { %v303_v30 = vsel %vm2611_vm3, %v298_v20, %v302_v59  ;;  %v332_v31 = vrot.slane %v331_v22, 4  ;;  %v344_v32 = vrot.slane %v342_v23, 5  ;;  %v348_v33 = vshll.u32 %v197_v18, 16 }
  0x25   : > { %v313_v34 = vsel %vm2611_vm3, %v308_v21, %v312_v24  ;;  %v327_v36 = vsel %vm2611_vm3, %v322_v25, %v326_v11  ;;  %v352_v37 = vshrl.u32 %v197_v18, 16  ;;  %v2657_v38 = vcombine.low %v196_v5, %v197_v18  ;;  %v205_v11 = vld [vmem:[%s2590_s28 + $0x54] sm:$0xf]  ;;  %v204_v21 = vld [vmem:[%s2590_s28 + $0x50] sm:$0x1] }
  0x26   : > { %v2661_v41 = vcombine.low %v303_v30, %v313_v34  ;;  %v337_v42 = vsel %vm2611_vm3, %v332_v31, %v336_v26  ;;  %v350_v43 = vrot.slane %v348_v33, 5  ;;  %v363_v44 = vshrl.u32 %v199_v28, 16  ;;  %2424 = vmatpush3.bf16.msra.mxu0 %v2518_v10  ;;  %v207_v26 = vld [vmem:[%s2590_s28 + $0x5c] sm:$0x1] }
  0x27   : > { %v2666_v46 = vcombine.low %v327_v36, %v337_v42  ;;  %v354_v47 = vrot.slane %v352_v37, 4  ;;  %2397 = vmatprep.mubr.msk.bf16.mxu1 %vm691_vm2, %v2657_v38  ;;  %v366_v48 = vshll.u32 %v199_v28, 16  ;;  %v372_v49 = vshll.u32 %v200_v4, 16 }
  0x28   : > { %2357 = vmatprep.mubr.msk.bf16.mxu0 %vm691_vm2, %v2661_v41  ;;  %v365_v50 = vrot.slane %v363_v44, 4  ;;  %v376_v51 = vshrl.u32 %v200_v4, 16  ;;  %v2672_v52 = vcombine.low %v199_v28, %v200_v4  ;;  %v345_v53 = vor.u32 %v344_v32, %v341_v27  ;;  %v208_v32 = vld [vmem:[%s2590_s28 + $0x60] sm:$0xf] }
  0x29   : > { %2358 = vmatmul.mubr.msk.bf16.gmra.mxu0 %vm691_vm2, %v2666_v46  ;;  %v368_v54 = vrot.slane %v366_v48, 5  ;;  %v374_v55 = vrot.slane %v372_v49, 5  ;;  %v355_v56 = vor.u32 %v354_v47, %v350_v43  ;;  %v358_v57 = vshll.u32 %v198_v39, 16  ;;  %v209_v47 = vld [vmem:[%s2590_s28 + $0x64] sm:$0xf] }
  0x2a   : > { %v378_v58 = vrot.slane %v376_v51, 4  ;;  %2398 = vmatmul.mubr.msk.bf16.gmra.mxu1 %vm691_vm2, %v2672_v52  ;;  %v346_v59 = vrot.slane %v345_v53, 4  ;;  %v382_v61 = vshll.u32 %v201_v40, 16  ;;  %v387_v63 = vshrl.u32 %v202_v45, 16 }
  0x2b   : > { %v356_v0 = vrot.slane %v355_v56, 4  ;;  %v360_v1 = vrot.slane %v358_v57, 5  ;;  %v369_v2 = vor.u32 %v368_v54, %v365_v50  ;;  %v390_v3 = vshll.u32 %v202_v45, 16 }
  0x2c   : > { %v351_v5 = vsel %vm2611_vm3, %v346_v59, %v350_v43  ;;  %v379_v7 = vor.u32 %v378_v58, %v374_v55  ;;  %v384_v8 = vrot.slane %v382_v61, 5  ;;  %v389_v10 = vrot.slane %v387_v63, 4  ;;  %v211_v58 = vld [vmem:[%s2590_s28 + $0x6c] sm:$0xf] }
  0x2d   : > { %v361_v12 = vsel %vm2611_vm3, %v356_v0, %v360_v1  ;;  %v370_v13 = vrot.slane %v369_v2, 4  ;;  %v392_v14 = vrot.slane %v390_v3, 5  ;;  %v396_v15 = vshll.u32 %v203_v62, 16  ;;  %v212_v0 = vld [vmem:[%s2590_s28 + $0x70] sm:$0xf] }
  0x2e   : > { %v2685_v17 = vcombine.low %v351_v5, %v361_v12  ;;  %v380_v18 = vrot.slane %v379_v7, 4  ;;  %v400_v19 = vshrl.u32 %v203_v62, 16  ;;  %v2687_v20 = vcombine.low %v202_v45, %v203_v62  ;;  %v210_v12 = vld [vmem:[%s2590_s28 + $0x68] sm:$0x1] }
  0x2f   : > { %v375_v22 = vsel %vm2611_vm3, %v370_v13, %v374_v55  ;;  %v398_v23 = vrot.slane %v396_v15, 5  ;;  %v411_v24 = vshrl.u32 %v205_v11, 16  ;;  %v414_v25 = vshll.u32 %v205_v11, 16  ;;  %v213_v13 = vld [vmem:[%s2590_s28 + $0x74] sm:$0x1] }
  0x30   : > { %2361 = vmatprep.mubr.msk.bf16.mxu0 %vm691_vm2, %v2685_v17  ;;  %v385_v27 = vsel %vm2611_vm3, %v380_v18, %v384_v8  ;;  %v402_v28 = vrot.slane %v400_v19, 4  ;;  %2401 = vmatprep.mubr.msk.bf16.mxu1 %vm691_vm2, %v2687_v20  ;;  %v420_v30 = vshll.u32 %v206_v16, 16  ;;  %v424_v31 = vshrl.u32 %v206_v16, 16  ;;  %v214_v19 = vld [vmem:[%s2590_s28 + $0x78] sm:$0xf] }
  0x31   : > { %v2700_v33 = vcombine.low %v375_v22, %v385_v27  ;;  %v413_v4 = vrot.slane %v411_v24, 4  ;;  %v416_v34 = vrot.slane %v414_v25, 5  ;;  %v2702_v36 = vcombine.low %v205_v11, %v206_v16 }
  0x32   : > { %v422_v37 = vrot.slane %v420_v30, 5  ;;  %v426_v39 = vrot.slane %v424_v31, 4  ;;  %v393_v40 = vor.u32 %v392_v14, %v389_v10  ;;  %v403_v42 = vor.u32 %v402_v28, %v398_v23 }
  0x33   : > { %2362 = vmatmul.mubr.msk.bf16.gmra.mxu0 %vm691_vm2, %v2700_v33  ;;  %2402 = vmatmul.mubr.msk.bf16.gmra.mxu1 %vm691_vm2, %v2702_v36  ;;  %v406_v43 = vshll.u32 %v204_v21, 16  ;;  %v417_v44 = vor.u32 %v416_v34, %v413_v4  ;;  %v430_v45 = vshll.u32 %v207_v26, 16  ;;  %v435_v48 = vshrl.u32 %v208_v32, 16  ;;  %v215_v4 = vld [vmem:[%s2590_s28 + $0x7c] sm:$0xf] }
  0x34   : > { %v394_v49 = vrot.slane %v393_v40, 4  ;;  %v404_v50 = vrot.slane %v403_v42, 4  ;;  %v427_v51 = vor.u32 %v426_v39, %v422_v37  ;;  %v438_v53 = vshll.u32 %v208_v32, 16 }
  0x35   : > { %v408_v54 = vrot.slane %v406_v43, 5  ;;  %v418_v55 = vrot.slane %v417_v44, 4  ;;  %v432_v56 = vrot.slane %v430_v45, 5  ;;  %v437_v57 = vrot.slane %v435_v48, 4  ;;  %v217_v48 = vld [vmem:[%s2590_s28 + $0x84] sm:$0xf] }
  0x36   : > { %v399_v59 = vsel %vm2611_vm3, %v394_v49, %v398_v23  ;;  %v428_v61 = vrot.slane %v427_v51, 4  ;;  %v440_v62 = vrot.slane %v438_v53, 5  ;;  %v444_v63 = vshll.u32 %v209_v47, 16 }
  0x37   : > { %v409_v1 = vsel %vm2611_vm3, %v404_v50, %v408_v54  ;;  %v423_v2 = vsel %vm2611_vm3, %v418_v55, %v422_v37  ;;  %v448_v3 = vshrl.u32 %v209_v47, 16  ;;  %v2717_v5 = vcombine.low %v208_v32, %v209_v47  ;;  %v218_v54 = vld [vmem:[%s2590_s28 + $0x88] sm:$0xf] }
  0x38   : > { %v2719_v7 = vcombine.low %v399_v59, %v409_v1  ;;  %v433_v8 = vsel %vm2611_vm3, %v428_v61, %v432_v56  ;;  %v446_v10 = vrot.slane %v444_v63, 5  ;;  %v459_v11 = vshrl.u32 %v211_v58, 16  ;;  %v216_v59 = vld [vmem:[%s2590_s28 + $0x80] sm:$0x1]  ;;  %v219_v1 = vld [vmem:[%s2590_s28 + $0x8c] sm:$0x1] }
  0x39   : > { %v2725_v14 = vcombine.low %v423_v2, %v433_v8  ;;  %v450_v15 = vrot.slane %v448_v3, 4  ;;  %2405 = vmatprep.mubr.msk.bf16.mxu1 %vm691_vm2, %v2717_v5  ;;  %v462_v16 = vshll.u32 %v211_v58, 16  ;;  %v468_v18 = vshll.u32 %v212_v0, 16 }
  0x3a   : > { %2365 = vmatprep.mubr.msk.bf16.mxu0 %vm691_vm2, %v2719_v7  ;;  %v461_v21 = vrot.slane %v459_v11, 4  ;;  %v472_v22 = vshrl.u32 %v212_v0, 16  ;;  %v2732_v23 = vcombine.low %v211_v58, %v212_v0  ;;  %v441_v24 = vor.u32 %v440_v62, %v437_v57  ;;  %v220_v11 = vld [vmem:[%s2590_s28 + $0x90] sm:$0xf] }
  0x3b   : > { %2366 = vmatmul.mubr.msk.bf16.gmra.mxu0 %vm691_vm2, %v2725_v14  ;;  %v464_v25 = vrot.slane %v462_v16, 5  ;;  %v470_v26 = vrot.slane %v468_v18, 5  ;;  %v451_v27 = vor.u32 %v450_v15, %v446_v10  ;;  %v454_v28 = vshll.u32 %v210_v12, 16 }
  0x3c   : > { %v474_v30 = vrot.slane %v472_v22, 4  ;;  %2406 = vmatmul.mubr.msk.bf16.gmra.mxu1 %vm691_vm2, %v2732_v23  ;;  %v442_v31 = vrot.slane %v441_v24, 4  ;;  %v478_v32 = vshll.u32 %v213_v13, 16  ;;  %v483_v34 = vshrl.u32 %v214_v19, 16 }
  0x3d   : > { %v452_v37 = vrot.slane %v451_v27, 4  ;;  %v456_v39 = vrot.slane %v454_v28, 5  ;;  %v465_v40 = vor.u32 %v464_v25, %v461_v21  ;;  %v486_v42 = vshll.u32 %v214_v19, 16  ;;  %v221_v27 = vld [vmem:[%s2590_s28 + $0x94] sm:$0xf] }
  0x3e   : > { %v447_v43 = vsel %vm2611_vm3, %v442_v31, %v446_v10  ;;  %v475_v44 = vor.u32 %v474_v30, %v470_v26  ;;  %v480_v45 = vrot.slane %v478_v32, 5  ;;  %v485_v47 = vrot.slane %v483_v34, 4 }
  0x3f   : > { %v457_v49 = vsel %vm2611_vm3, %v452_v37, %v456_v39  ;;  %v466_v50 = vrot.slane %v465_v40, 4  ;;  %v488_v51 = vrot.slane %v486_v42, 5  ;;  %v492_v53 = vshll.u32 %v215_v4, 16  ;;  %v223_v42 = vld [vmem:[%s2590_s28 + $0x9c] sm:$0xf] }
  0x40   : > { %v2745_v55 = vcombine.low %v447_v43, %v457_v49  ;;  %v476_v56 = vrot.slane %v475_v44, 4  ;;  %v496_v57 = vshrl.u32 %v215_v4, 16  ;;  %v2747_v58 = vcombine.low %v214_v19, %v215_v4 }
  0x41   : > { %v471_v61 = vsel %vm2611_vm3, %v466_v50, %v470_v26  ;;  %v494_v62 = vrot.slane %v492_v53, 5  ;;  %v507_v63 = vshrl.u32 %v217_v48, 16  ;;  %v510_v0 = vshll.u32 %v217_v48, 16 }
  0x42   : > { %2369 = vmatprep.mubr.msk.bf16.mxu0 %vm691_vm2, %v2745_v55  ;;  %v481_v2 = vsel %vm2611_vm3, %v476_v56, %v480_v45  ;;  %v498_v3 = vrot.slane %v496_v57, 4  ;;  %2409 = vmatprep.mubr.msk.bf16.mxu1 %vm691_vm2, %v2747_v58  ;;  %v516_v8 = vshll.u32 %v218_v54, 16  ;;  %v520_v10 = vshrl.u32 %v218_v54, 16 }
  0x43   : > { %v2760_v12 = vcombine.low %v471_v61, %v481_v2  ;;  %v509_v13 = vrot.slane %v507_v63, 4  ;;  %v512_v15 = vrot.slane %v510_v0, 5  ;;  %v2762_v16 = vcombine.low %v217_v48, %v218_v54  ;;  %v224_v48 = vld [vmem:[%s2590_s28 + $0xa0] sm:$0xf]  ;;  %v222_v61 = vld [vmem:[%s2590_s28 + $0x98] sm:$0x1] }
  0x44   : > { %v518_v18 = vrot.slane %v516_v8, 5  ;;  %v522_v19 = vrot.slane %v520_v10, 4  ;;  %v489_v21 = vor.u32 %v488_v51, %v485_v47  ;;  %v499_v22 = vor.u32 %v498_v3, %v494_v62  ;;  %v226_v3 = vld [vmem:[%s2590_s28 + $0xa8] sm:$0xf] }
  0x45   : > { %2370 = vmatmul.mubr.msk.bf16.gmra.mxu0 %vm691_vm2, %v2760_v12  ;;  %2410 = vmatmul.mubr.msk.bf16.gmra.mxu1 %vm691_vm2, %v2762_v16  ;;  %v502_v24 = vshll.u32 %v216_v59, 16  ;;  %v513_v25 = vor.u32 %v512_v15, %v509_v13  ;;  %v526_v26 = vshll.u32 %v219_v1, 16  ;;  %v531_v28 = vshrl.u32 %v220_v11, 16 }
  0x46   : > { %v490_v30 = vrot.slane %v489_v21, 4  ;;  %v500_v31 = vrot.slane %v499_v22, 4  ;;  %v523_v32 = vor.u32 %v522_v19, %v518_v18  ;;  %v534_v4 = vshll.u32 %v220_v11, 16 }
  0x47   : > { %v504_v34 = vrot.slane %v502_v24, 5  ;;  %v514_v37 = vrot.slane %v513_v25, 4  ;;  %v528_v39 = vrot.slane %v526_v26, 5  ;;  %v533_v40 = vrot.slane %v531_v28, 4  ;;  %v227_v26 = vld [vmem:[%s2590_s28 + $0xac] sm:$0xf] }
  0x48   : > { %v495_v43 = vsel %vm2611_vm3, %v490_v30, %v494_v62  ;;  %v524_v44 = vrot.slane %v523_v32, 4  ;;  %v536_v45 = vrot.slane %v534_v4, 5  ;;  %v540_v47 = vshll.u32 %v221_v27, 16  ;;  %v225_v62 = vld [vmem:[%s2590_s28 + $0xa4] sm:$0x1] }
  0x49   : > { %v505_v49 = vsel %vm2611_vm3, %v500_v31, %v504_v34  ;;  %v519_v50 = vsel %vm2611_vm3, %v514_v37, %v518_v18  ;;  %v544_v51 = vshrl.u32 %v221_v27, 16  ;;  %v2777_v53 = vcombine.low %v220_v11, %v221_v27 }
  0x4a   : > { %v2779_v54 = vcombine.low %v495_v43, %v505_v49  ;;  %v529_v56 = vsel %vm2611_vm3, %v524_v44, %v528_v39  ;;  %v542_v57 = vrot.slane %v540_v47, 5  ;;  %v555_v59 = vshrl.u32 %v223_v42, 16  ;;  %v230_v47 = vld [vmem:[%s2590_s28 + $0xb8] sm:$0xf] }
  0x4b   : > { %v2785_v63 = vcombine.low %v519_v50, %v529_v56  ;;  %v546_v0 = vrot.slane %v544_v51, 4  ;;  %2413 = vmatprep.mubr.msk.bf16.mxu1 %vm691_vm2, %v2777_v53  ;;  %v558_v1 = vshll.u32 %v223_v42, 16  ;;  %v564_v2 = vshll.u32 %v224_v48, 16 }
  0x4c   : > { %2373 = vmatprep.mubr.msk.bf16.mxu0 %vm691_vm2, %v2779_v54  ;;  %v557_v8 = vrot.slane %v555_v59, 4  ;;  %v568_v10 = vshrl.u32 %v224_v48, 16  ;;  %v2792_v11 = vcombine.low %v223_v42, %v224_v48  ;;  %v537_v13 = vor.u32 %v536_v45, %v533_v40  ;;  %v229_v40 = vld [vmem:[%s2590_s28 + $0xb4] sm:$0xf] }
  0x4d   : > { %2374 = vmatmul.mubr.msk.bf16.gmra.mxu0 %vm691_vm2, %v2785_v63  ;;  %v560_v15 = vrot.slane %v558_v1, 5  ;;  %v566_v18 = vrot.slane %v564_v2, 5  ;;  %v547_v19 = vor.u32 %v546_v0, %v542_v57  ;;  %v550_v21 = vshll.u32 %v222_v61, 16 }
  0x4e   : > { %v570_v22 = vrot.slane %v568_v10, 4  ;;  %2414 = vmatmul.mubr.msk.bf16.gmra.mxu1 %vm691_vm2, %v2792_v11  ;;  %v538_v24 = vrot.slane %v537_v13, 4  ;;  %v574_v25 = vshll.u32 %v225_v62, 16  ;;  %v579_v27 = vshrl.u32 %v226_v3, 16  ;;  %v228_v62 = vld [vmem:[%s2590_s28 + $0xb0] sm:$0x1] }
  0x4f   : > { %v548_v28 = vrot.slane %v547_v19, 4  ;;  %v552_v30 = vrot.slane %v550_v21, 5  ;;  %v561_v31 = vor.u32 %v560_v15, %v557_v8  ;;  %v582_v32 = vshll.u32 %v226_v3, 16  ;;  %v231_v8 = vld [vmem:[%s2590_s28 + $0xbc] sm:$0x1] }
  0x50   : > { %v543_v4 = vsel %vm2611_vm3, %v538_v24, %v542_v57  ;;  %v571_v34 = vor.u32 %v570_v22, %v566_v18  ;;  %v576_v37 = vrot.slane %v574_v25, 5  ;;  %v581_v39 = vrot.slane %v579_v27, 4 }
  0x51   : > { %v553_v42 = vsel %vm2611_vm3, %v548_v28, %v552_v30  ;;  %v562_v43 = vrot.slane %v561_v31, 4  ;;  %v584_v44 = vrot.slane %v582_v32, 5  ;;  %v588_v45 = vshll.u32 %v227_v26, 16 }
  0x52   : > { %v2805_v48 = vcombine.low %v543_v4, %v553_v42  ;;  %v572_v49 = vrot.slane %v571_v34, 4  ;;  %v592_v50 = vshrl.u32 %v227_v26, 16  ;;  %v2807_v51 = vcombine.low %v226_v3, %v227_v26 }
  0x53   : > { %v567_v56 = vsel %vm2611_vm3, %v562_v43, %v566_v18  ;;  %v590_v57 = vrot.slane %v588_v45, 5  ;;  %v603_v59 = vshrl.u32 %v229_v40, 16  ;;  %v606_v61 = vshll.u32 %v229_v40, 16 }
  0x54   : > { %2377 = vmatprep.mubr.msk.bf16.mxu0 %vm691_vm2, %v2805_v48  ;;  %v577_v0 = vsel %vm2611_vm3, %v572_v49, %v576_v37  ;;  %v594_v1 = vrot.slane %v592_v50, 4  ;;  %2417 = vmatprep.mubr.msk.bf16.mxu1 %vm691_vm2, %v2807_v51  ;;  %v612_v2 = vshll.u32 %v230_v47, 16  ;;  %v616_v3 = vshrl.u32 %v230_v47, 16 }
  0x55   : > { %v2110_v10 = vcombine.low %v567_v56, %v577_v0  ;;  %v605_v13 = vrot.slane %v603_v59, 4  ;;  %v608_v15 = vrot.slane %v606_v61, 5  ;;  %v2819_v18 = vcombine.low %v229_v40, %v230_v47 }
  0x56   : > { %v614_v19 = vrot.slane %v612_v2, 5  ;;  %v618_v21 = vrot.slane %v616_v3, 4  ;;  %v585_v22 = vor.u32 %v584_v44, %v581_v39  ;;  %v595_v24 = vor.u32 %v594_v1, %v590_v57 }
  0x57   : > { %2378 = vmatmul.mubr.msk.bf16.gmra.mxu0 %vm691_vm2, %v2110_v10  ;;  %2418 = vmatmul.mubr.msk.bf16.gmra.mxu1 %vm691_vm2, %v2819_v18  ;;  %v598_v25 = vshll.u32 %v228_v62, 16  ;;  %v609_v26 = vor.u32 %v608_v15, %v605_v13  ;;  %v622_v27 = vshll.u32 %v231_v8, 16 }
  0x58   : > { %v586_v28 = vrot.slane %v585_v22, 4  ;;  %v596_v30 = vrot.slane %v595_v24, 4  ;;  %v619_v31 = vor.u32 %v618_v21, %v614_v19  ;;  %2461 = vmatprep.mubr.msk.bf16.mxu1 %vm691_vm2, %v2634_v6 }
  0x59   : > { %v600_v32 = vrot.slane %v598_v25, 5  ;;  %v610_v4 = vrot.slane %v609_v26, 4  ;;  %v624_v34 = vrot.slane %v622_v27, 5 }
  0x5a   : > { %v591_v37 = vsel %vm2611_vm3, %v586_v28, %v590_v57  ;;  %v620_v39 = vrot.slane %v619_v31, 4 }
  0x5b   : > { %v601_v40 = vsel %vm2611_vm3, %v596_v30, %v600_v32  ;;  %v615_v42 = vsel %vm2611_vm3, %v610_v4, %v614_v19 }
  0x5c   : > { %v2111_v43 = vcombine.low %v591_v37, %v601_v40  ;;  %v625_v44 = vsel %vm2611_vm3, %v620_v39, %v624_v34 }
  0x5d   : > { %v2112_v45 = vcombine.low %v615_v42, %v625_v44 }
  0x5e   : > { %2381 = vmatprep.mubr.msk.bf16.mxu0 %vm691_vm2, %v2111_v43 }
  0x5f   : > { %2382 = vmatmul.mubr.msk.bf16.gmra.mxu0 %vm691_vm2, %v2112_v45  ;;  %2462 = vmatmul.mubr.msk.bf16.vlgmr.msra.gmra.mxu1 %vm691_vm2, %v2661_v41 }
  0x60   : > { %2425 = vmatprep.mubr.msk.bf16.mxu0 %vm691_vm2, %v2604_v29  ;;  %2465 = vmatprep.mubr.msk.bf16.mxu1 %vm691_vm2, %v2666_v46  ;;  %v232_v29 = vld [vmem:[%s2590_s28 + $0xc0] sm:$0xf] }
  0x61   : > { %v1421_v6 = vshrl.u32 %v232_v29, 16 }
  0x63   : > { %v1423_v46 = vrot.slane %v1421_v6, 4 }
  0x67   : > { %2426 = vmatmul.mubr.msk.bf16.vlgmr.msra.gmra.mxu0 %vm691_vm2, %v2627_v60  ;;  %2466 = vmatmul.mubr.msk.bf16.gmra.mxu1 %vm691_vm2, %v2685_v17  ;;  %v233_v60 = vld [vmem:[%s2590_s28 + $0xc4] sm:$0xf] }
  0x68   : > { %2429 = vmatprep.mubr.msk.bf16.mxu0 %vm691_vm2, %v2638_v9  ;;  %2469 = vmatprep.mubr.msk.bf16.mxu1 %vm691_vm2, %v2700_v33  ;;  %v1424_v9 = vshll.u32 %v232_v29, 16  ;;  %v1434_v41 = vshrl.u32 %v233_v60, 16  ;;  %v234_v33 = vld [vmem:[%s2590_s28 + $0xc8] sm:$0x1] }
  0x6f   : > { %2430 = vmatmul.mubr.msk.bf16.gmra.mxu0 %vm691_vm2, %v2657_v38  ;;  %2470 = vmatmul.mubr.msk.bf16.gmra.mxu1 %vm691_vm2, %v2719_v7  ;;  %v1430_v38 = vshll.u32 %v233_v60, 16  ;;  %v1440_v7 = vshll.u32 %v234_v33, 16 }
  0x70   : > { %2433 = vmatprep.mubr.msk.bf16.mxu0 %vm691_vm2, %v2672_v52  ;;  %2473 = vmatprep.mubr.msk.bf16.mxu1 %vm691_vm2, %v2725_v14  ;;  %v1426_v52 = vrot.slane %v1424_v9, 5 }
  0x71   : > { %v1432_v17 = vrot.slane %v1430_v38, 5 }
  0x77   : > { %2434 = vmatmul.mubr.msk.bf16.gmra.mxu0 %vm691_vm2, %v2687_v20  ;;  %2474 = vmatmul.mubr.msk.bf16.gmra.mxu1 %vm691_vm2, %v2745_v55  ;;  %v1436_v20 = vrot.slane %v1434_v41, 4  ;;  %v1442_v55 = vrot.slane %v1440_v7, 5 }
  0x78   : > { %2437 = vmatprep.mubr.msk.bf16.mxu0 %vm691_vm2, %v2702_v36  ;;  %2477 = vmatprep.mubr.msk.bf16.mxu1 %vm691_vm2, %v2760_v12  ;;  %v1427_v36 = vor.u32 %v1426_v52, %v1423_v46 }
  0x7a   : > { %v1428_v14 = vrot.slane %v1427_v36, 4 }
  0x7f   : > { %2438 = vmatmul.mubr.msk.bf16.gmra.mxu0 %vm691_vm2, %v2717_v5  ;;  %2478 = vmatmul.mubr.msk.bf16.gmra.mxu1 %vm691_vm2, %v2779_v54  ;;  %v1437_v5 = vor.u32 %v1436_v20, %v1432_v17 }
  0x80   : > { %2441 = vmatprep.mubr.msk.bf16.mxu0 %vm691_vm2, %v2732_v23  ;;  %2481 = vmatprep.mubr.msk.bf16.mxu1 %vm691_vm2, %v2785_v63 }
  0x81   : > { %v1438_v23 = vrot.slane %v1437_v5, 4 }
  0x83   : > { %v1443_v12 = vsel %vm2611_vm3, %v1438_v23, %v1442_v55 }
  0x87   : > { %2442 = vmatmul.mubr.msk.bf16.gmra.mxu0 %vm691_vm2, %v2747_v58  ;;  %2482 = vmatmul.mubr.msk.bf16.gmra.mxu1 %vm691_vm2, %v2805_v48  ;;  %v1433_v58 = vsel %vm2611_vm3, %v1428_v14, %v1432_v17 }
  0x88   : > { %2445 = vmatprep.mubr.msk.bf16.mxu0 %vm691_vm2, %v2762_v16  ;;  %2485 = vmatprep.mubr.msk.bf16.mxu1 %vm691_vm2, %v2110_v10  ;;  %v2192_v16 = vcombine.low %v1433_v58, %v1443_v12 }
  0x8f   : > { %2446 = vmatmul.mubr.msk.bf16.gmra.mxu0 %vm691_vm2, %v2777_v53  ;;  %2486 = vmatmul.mubr.msk.bf16.gmra.mxu1 %vm691_vm2, %v2111_v43  ;;  %v2169_v53 = vcombine.low %v232_v29, %v233_v60 }
  0x90   : > { %2449 = vmatprep.mubr.msk.bf16.mxu0 %vm691_vm2, %v2792_v11  ;;  %2489 = vmatprep.mubr.msk.bf16.mxu1 %vm691_vm2, %v2112_v45 }
  0x97   : > { %2450 = vmatmul.mubr.msk.bf16.gmra.mxu0 %vm691_vm2, %v2807_v51  ;;  %2490 = vmatmul.mubr.msk.bf16.gmra.mxu1 %vm691_vm2, %v2192_v16 }
  0x98   : > { %2453 = vmatprep.mubr.msk.bf16.mxu0 %vm691_vm2, %v2819_v18 }
  0x9f   : > { %2454 = vmatmul.mubr.msk.bf16.gmra.mxu0 %vm691_vm2, %v2169_v53 }
  0xd9   : > { %v2900_v54 = vpop.f32.mrf.mxu1 }
  0xdb   : > { %v2902_v63 = vpop.f32.mrf.mxu1 }
  0xdd   : > { %v2904_v11 = vpop.f32.mrf.mxu1 }
  0xdf   : > { %v2906_v35 = vpop.f32.mrf.mxu1 }
  0xe1   : > { %v2908_v47 = vpop.f32.mrf.mxu0  ;;  %v2910_v48 = vpop.f32.mrf.mxu1 }
  0xe3   : > { %v2912_v49 = vpop.f32.mrf.mxu0  ;;  %v2914_v50 = vpop.f32.mrf.mxu1 }
  0xe5   : > { %v2916_v51 = vpop.f32.mrf.mxu0  ;;  %v2918_v56 = vpop.f32.mrf.mxu1 }
  0xe7   : > { %v2920_v57 = vpop.f32.mrf.mxu0  ;;  %v2922_v59 = vpop.f32.mrf.mxu1 }
  0xe9   : > { %v2924_v61 = vpop.f32.mrf.mxu0 }
  0xea   : > { %v2926_v62 = vpop.f32.mrf.mxu1 }
  0xeb   : > { %v2928_v0 = vpop.f32.mrf.mxu0 }
  0xec   : > { %v2930_v1 = vpop.f32.mrf.mxu1 }
  0xed   : > { %v2932_v2 = vpop.f32.mrf.mxu0 }
  0xee   : > { %v2934_v3 = vpop.f32.mrf.mxu1 }
  0xef   : > { %v2936_v8 = vpop.f32.mrf.mxu0 }
  0xf0   : > { %v2938_v10 = vpop.f32.mrf.mxu1 }
  0xf3   : > { %v2940_v13 = vpop.f32.mrf.mxu0  ;;  %v2942_v15 = vpop.f32.mrf.mxu1 }
  0xf5   : > { %v2944_v18 = vpop.f32.mrf.mxu0  ;;  %v2946_v19 = vpop.f32.mrf.mxu1 }
  0xf7   : > { %v2948_v21 = vpop.f32.mrf.mxu0  ;;  %v2950_v22 = vpop.f32.mrf.mxu1 }
  0xf9   : > { %v2952_v24 = vpop.f32.mrf.mxu0  ;;  %v2954_v25 = vpop.f32.mrf.mxu1 }
  0xfb   : > { %v2956_v26 = vpop.f32.mrf.mxu0 }
  0xfc   : > { %v2958_v27 = vpop.f32.mrf.mxu1 }
  0xfd   : > { %v2960_v28 = vpop.f32.mrf.mxu0 }
  0xfe   : > { %v2962_v30 = vpop.f32.mrf.mxu1 }
  0xff   : > { %v2964_v31 = vpop.f32.mrf.mxu0 }
 0x100   : > { %v2966_v32 = vpop.f32.mrf.mxu1 }
 0x101   : > { %v2968_v4 = vpop.f32.mrf.mxu0 }
 0x102   : > { %v2970_v34 = vpop.f32.mrf.mxu1 }
 0x105   : > { %v2972_v37 = vpop.f32.mrf.mxu0  ;;  %v2974_v39 = vpop.f32.mrf.mxu1 }
 0x107   : > { %v2976_v40 = vpop.f32.mrf.mxu0  ;;  %v2978_v42 = vpop.f32.mrf.mxu1 }
 0x109   : > { %v2980_v43 = vpop.f32.mrf.mxu0  ;;  %v2982_v44 = vpop.f32.mrf.mxu1 }
 0x10b   : > { %v2984_v45 = vpop.f32.mrf.mxu0  ;;  %v2986_v29 = vpop.f32.mrf.mxu1 }
 0x10d   : > { %v2988_v60 = vpop.f32.mrf.mxu0 }
 0x10e   : > { %v2990_v6 = vpop.f32.mrf.mxu1 }
 0x10f   : > { %v2992_v9 = vpop.f32.mrf.mxu0 }
 0x110   : > { %v2994_v38 = vpop.f32.mrf.mxu1 }
 0x111   : > { %v2996_v41 = vpop.f32.mrf.mxu0 }
 0x112   : > { %v2998_v46 = vpop.f32.mrf.mxu1 }
 0x113   : > { %3369 = vst [vmem:[#allocation2_spill] sm:$0xff] %v2998_v46  ;;  %v3000_v52 = vpop.f32.mrf.mxu0 }
 0x114   : > { %v3002_v17 = vpop.f32.mrf.mxu1 }
 0x115   : > { %3370 = vst [vmem:[#allocation3_spill] sm:$0xff] %v3002_v17 }
 0x117   : > { %v3004_v20 = vpop.f32.mrf.mxu0  ;;  %v3006_v33 = vpop.f32.mrf.mxu1 }
 0x118   : > { %3371 = vst [vmem:[#allocation4_spill] sm:$0xff] %v3006_v33 }
 0x119   : > { %v3008_v36 = vpop.f32.mrf.mxu0  ;;  %v3010_v5 = vpop.f32.mrf.mxu1 }
 0x11a   : > { %3372 = vst [vmem:[#allocation5_spill] sm:$0xff] %v3010_v5 }
 0x11b   : > { %v3012_v7 = vpop.f32.mrf.mxu0  ;;  %v3014_v14 = vpop.f32.mrf.mxu1 }
 0x11c   : > { %3373 = vst [vmem:[#allocation6_spill] sm:$0xff] %v3012_v7  ;;  %3374 = vst [vmem:[#allocation7_spill] sm:$0xff] %v3014_v14  ;;  %v1084_v14 = vadd.f32 %v2900_v54, %v2908_v47  ;;  %v1087_v7 = vadd.f32 %v2904_v11, %v2916_v51  ;;  %v1092_v54 = vadd.f32 %v2914_v50, %v2928_v0 }
 0x11d   : > { %v3016_v23 = vpop.f32.mrf.mxu0  ;;  %v3018_v55 = vpop.f32.mrf.mxu1  ;;  %v3043_v47 = vadd.f32 %v2918_v56, %v2932_v2  ;;  %v3047_v11 = vadd.f32 %v2922_v59, %v2936_v8  ;;  %v3055_v50 = vadd.f32 %v2930_v1, %v2944_v18  ;;  %v3059_v56 = vadd.f32 %v2934_v3, %v2948_v21 }
 0x11e   : > { %3375 = vst [vmem:[#allocation8_spill] sm:$0xff] %v3016_v23  ;;  %3376 = vst [vmem:[#allocation9_spill] sm:$0xff] %v3018_v55  ;;  %v3067_v59 = vadd.f32 %v2942_v15, %v2956_v26  ;;  %v3078_v0 = vadd.f32 %v2946_v19, %v2960_v28  ;;  %v3082_v1 = vadd.f32 %v2950_v22, %v2964_v31 }
 0x11f   : > { %v3021_v58 = vpop.f32.mrf.mxu0  ;;  %v2463_v12 = vpop.f32.mrf.mxu1  ;;  %v3086_v8 = vadd.f32 %v2954_v25, %v2968_v4  ;;  %v3098_v21 = vadd.f32 %v2966_v32, %v2980_v43  ;;  %v3102_v22 = vadd.f32 %v2970_v34, %v2984_v45  ;;  %v3112_v26 = vadd.f32 %v2978_v42, %v2992_v9  ;;  %v3382_v43 = vld [vmem:[#allocation2_spill] sm:$0xff] }
 0x120   : > { %3377 = vst [vmem:[#allocation10_spill] sm:$0xff] %v3021_v58  ;;  %v1076_v58 = vadd.f32 %v2902_v63, %v2912_v49  ;;  %v3122_v4 = vadd.f32 %v2986_v29, %v3000_v52  ;;  %v3126_v34 = vadd.f32 %v2990_v6, %v3004_v20  ;;  %v3384_v6 = vld [vmem:[#allocation3_spill] sm:$0xff] }
 0x121   : > { %v3023_v16 = vpop.f32.mrf.mxu0  ;;  %v1501_v53 = vpop.f32.mrf.mxu1 }
 0x122   : > { %3378 = vst [vmem:[#allocation11_spill] sm:$0xff] %v3023_v16 }
 0x123   : > { %v3025_v33 = vpop.f32.mrf.mxu0  ;;  %v2464_v17 = vpop.f32.mrf.mxu1  ;;  %v3381_v42 = vld [vmem:[#allocation6_spill] sm:$0xff] }
 0x124   : > { %3379 = vst [vmem:[#allocation12_spill] sm:$0xff] %v3025_v33  ;;  %v1079_v33 = vadd.f32 %v2906_v35, %v2920_v57  ;;  %v3051_v35 = vadd.f32 %v2926_v62, %v2940_v13  ;;  %v3063_v57 = vadd.f32 %v2938_v10, %v2952_v24  ;;  %v3090_v10 = vadd.f32 %v2958_v27, %v2972_v37 }
 0x125   : > { %v3027_v5 = vpop.f32.mrf.mxu0  ;;  %v1504_v46 = vpop.f32.mrf.mxu1  ;;  %v3094_v13 = vadd.f32 %v2962_v30, %v2976_v40  ;;  %v3106_v24 = vadd.f32 %v2974_v39, %v2988_v60  ;;  %v3116_v27 = vadd.f32 %v2982_v44, %v2996_v41  ;;  %v3132_v40 = vadd.f32 %v2994_v38, %v3008_v36  ;;  %v3383_v41 = vld [vmem:[#allocation8_spill] sm:$0xff] }
 0x126   : > { %3380 = vst [vmem:[#allocation13_spill] sm:$0xff] %v3027_v5  ;;  %v1100_v5 = vadd.f32 %v2910_v48, %v2924_v61  ;;  %v3136_v44 = vadd.f32 %v3382_v43, %v3381_v42  ;;  %v3142_v52 = vadd.f32 %v3384_v6, %v3383_v41 }
 0x127   : > { %v2427_v23 = vpop.f32.mrf.mxu0  ;;  %v2467_v55 = vpop.f32.mrf.mxu1 }
 0x128   : > { %v1390_v16 = vadd.f32 %v2427_v23, %v1084_v14 }
 0x129   : > { %v1261_v63 = vpop.f32.mrf.mxu0  ;;  %v1517_v49 = vpop.f32.mrf.mxu1 }
 0x12a   : > { %v1630_v51 = vadd.f32 %v2463_v12, %v1390_v16  ;;  %v1388_v48 = vadd.f32 %v1261_v63, %v1076_v58 }
 0x12b   : > { %v2428_v61 = vpop.f32.mrf.mxu0  ;;  %v3074_v62 = vpop.f32.mrf.mxu1 }
 0x12c   : > { %v2247_v2 = vpack.c.bf16 %v1630_v51, %v1630_v51  ;;  %v1628_v3 = vadd.f32 %v1501_v53, %v1388_v48  ;;  %v1391_v15 = vadd.f32 %v2428_v61, %v1087_v7  ;;  %v1825_v23 = vsel %vm1821_vm5, %v1630_v51, 0.0 }
 0x12d   : > { %v1264_v18 = vpop.f32.mrf.mxu0  ;;  %v1520_v19 = vpop.f32.mrf.mxu1 }
 0x12e   : > { %1791 = vst.msk [vmem:[%s3072_s13 + $0x8] sm:$0xf] %vm1788_vm4, %v2247_v2  ;;  %v2245_v25 = vpack.c.bf16 %v1628_v3, %v1628_v3  ;;  %v1631_v28 = vadd.f32 %v2464_v17, %v1391_v15  ;;  %v1389_v30 = vadd.f32 %v1264_v18, %v1079_v33  ;;  %v1891_v37 = vmul.f32 %v1628_v3, %v1628_v3 }
 0x12f   : > { %v2431_v31 = vpop.f32.mrf.mxu0  ;;  %v3118_v32 = vpop.f32.mrf.mxu1  ;;  %v1893_v17 = vmul.f32 %v1630_v51, %v1630_v51  ;;  %v1822_v38 = vsel %vm1821_vm5, %v1628_v3, 0.0 }
 0x130   : > { %1789 = vst.msk [vmem:[%s3072_s13] sm:$0xf] %vm1788_vm4, %v2245_v25  ;;  %v1394_v39 = vadd.f32 %v2431_v31, %v1100_v5  ;;  %v2248_v45 = vpack.c.bf16 %v1631_v28, %v1631_v28  ;;  %v1629_v29 = vadd.f32 %v1504_v46, %v1389_v30  ;;  %v1923_v58 = vsel %vm1821_vm5, %v1891_v37, 0.0 }
 0x131   : > { %v1277_v60 = vpop.f32.mrf.mxu0  ;;  %v3138_v9 = vpop.f32.mrf.mxu1  ;;  %v1894_v53 = vmul.f32 %v1631_v28, %v1631_v28  ;;  %v1926_v2 = vsel %vm1821_vm5, %v1893_v17, 0.0  ;;  %v1827_v18 = vsel %vm1821_vm5, %v1631_v28, 0.0 }
 0x132   : > { %v1634_v20 = vadd.f32 %v2467_v55, %v1394_v39  ;;  %v1392_v33 = vadd.f32 %v1277_v60, %v1092_v54  ;;  %1792 = vst.msk [vmem:[%s3072_s13 + $0xc] sm:$0xf] %vm1788_vm4, %v2248_v45  ;;  %v2246_v36 = vpack.c.bf16 %v1629_v29, %v1629_v29  ;;  %v1823_v5 = vsel %vm1821_vm5, %v1629_v29, 0.0 }
 0x133   : > { %v1892_v7 = vmul.f32 %v1629_v29, %v1629_v29  ;;  %v2432_v46 = vpop.f32.mrf.mxu0  ;;  %v2472_v14 = vpop.f32.mrf.mxu1  ;;  %v1824_v12 = vadd.f32 %v1823_v5, %v1822_v38  ;;  %v1928_v45 = vsel %vm1821_vm5, %v1894_v53, 0.0 }
 0x134   : > { %v2251_v16 = vpack.c.bf16 %v1634_v20, %v1634_v20  ;;  %1790 = vst.msk [vmem:[%s3072_s13 + $0x4] sm:$0xf] %vm1788_vm4, %v2246_v36  ;;  %v1632_v54 = vadd.f32 %v1517_v49, %v1392_v33  ;;  %v1395_v63 = vadd.f32 %v2432_v46, %v3043_v47  ;;  %v1897_v29 = vmul.f32 %v1634_v20, %v1634_v20  ;;  %v3385_v46 = vld [vmem:[#allocation10_spill] sm:$0xff] }
 0x135   : > { %v1924_v55 = vsel %vm1821_vm5, %v1892_v7, 0.0  ;;  %v1280_v48 = vpop.f32.mrf.mxu0  ;;  %v3154_v61 = vpop.f32.mrf.mxu1  ;;  %v1826_v3 = vadd.f32 %v1825_v23, %v1824_v12  ;;  %v3386_v23 = vld [vmem:[#allocation4_spill] sm:$0xff] }
 0x136   : > { %v1925_v51 = vadd.f32 %v1924_v55, %v1923_v58  ;;  %1795 = vst.msk [vmem:[%s3072_s13 + $0x18] sm:$0xf] %vm1788_vm4, %v2251_v16  ;;  %v1393_v15 = vadd.f32 %v1280_v48, %v3047_v11  ;;  %v2249_v25 = vpack.c.bf16 %v1632_v54, %v1632_v54  ;;  %v1895_v30 = vmul.f32 %v1632_v54, %v1632_v54 }
 0x137   : > { %v1635_v49 = vadd.f32 %v3074_v62, %v1395_v63  ;;  %v2435_v31 = vpop.f32.mrf.mxu0  ;;  %v3162_v47 = vpop.f32.mrf.mxu1  ;;  %v1828_v39 = vadd.f32 %v1827_v18, %v1826_v3  ;;  %v1829_v11 = vsel %vm1821_vm5, %v1632_v54, 0.0  ;;  %v3179_v58 = vadd.f32 %v3386_v23, %v3385_v46  ;;  %v3387_v18 = vld [vmem:[#allocation11_spill] sm:$0xff] }
 0x138   : > { %v1927_v37 = vadd.f32 %v1926_v2, %v1925_v51  ;;  %v1633_v42 = vadd.f32 %v1520_v19, %v1393_v15  ;;  %v1398_v43 = vadd.f32 %v2435_v31, %v3051_v35  ;;  %1793 = vst.msk [vmem:[%s3072_s13 + $0x10] sm:$0xf] %vm1788_vm4, %v2249_v25  ;;  %v1930_v19 = vsel %vm1821_vm5, %v1895_v30, 0.0  ;;  %v3388_v25 = vld [vmem:[#allocation5_spill] sm:$0xff] }
 0x139   : > { %v2252_v28 = vpack.c.bf16 %v1635_v49, %v1635_v49  ;;  %v1293_v60 = vpop.f32.mrf.mxu0  ;;  %v1549_v62 = vpop.f32.mrf.mxu1  ;;  %v1830_v41 = vadd.f32 %v1829_v11, %v1828_v39  ;;  %v1833_v55 = vsel %vm1821_vm5, %v1634_v20, 0.0  ;;  %v1898_v54 = vmul.f32 %v1635_v49, %v1635_v49 }
 0x13a   : > { %v1929_v6 = vadd.f32 %v1928_v45, %v1927_v37  ;;  %v2250_v17 = vpack.c.bf16 %v1633_v42, %v1633_v42  ;;  %v1831_v33 = vsel %vm1821_vm5, %v1633_v42, 0.0  ;;  %v1896_v35 = vmul.f32 %v1633_v42, %v1633_v42  ;;  %v3389_v42 = vld [vmem:[#allocation12_spill] sm:$0xff] }
 0x13b   : > { %1796 = vst.msk [vmem:[%s3072_s13 + $0x1c] sm:$0xf] %vm1788_vm4, %v2252_v28  ;;  %v1638_v38 = vadd.f32 %v3118_v32, %v1398_v43  ;;  %v1396_v36 = vadd.f32 %v1293_v60, %v3055_v50  ;;  %v2436_v5 = vpop.f32.mrf.mxu0  ;;  %v3175_v7 = vpop.f32.mrf.mxu1  ;;  %v1832_v16 = vadd.f32 %v1831_v33, %v1830_v41  ;;  %v3191_v30 = vadd.f32 %v3388_v25, %v3387_v18  ;;  %v3390_v43 = vld [vmem:[#allocation7_spill] sm:$0xff] }
 0x13c   : > { %v1931_v12 = vadd.f32 %v1930_v19, %v1929_v6  ;;  %1794 = vst.msk [vmem:[%s3072_s13 + $0x14] sm:$0xf] %vm1788_vm4, %v2250_v17  ;;  %v1399_v53 = vadd.f32 %v2436_v5, %v3059_v56  ;;  %v1932_v32 = vsel %vm1821_vm5, %v1896_v35, 0.0  ;;  %v1934_v56 = vsel %vm1821_vm5, %v1897_v29, 0.0 }
 0x13d   : > { %v2255_v50 = vpack.c.bf16 %v1638_v38, %v1638_v38  ;;  %v1296_v63 = vpop.f32.mrf.mxu0  ;;  %v3186_v48 = vpop.f32.mrf.mxu1  ;;  %v1834_v2 = vadd.f32 %v1833_v55, %v1832_v16  ;;  %v1636_v51 = vadd.f32 %v3138_v9, %v1396_v36  ;;  %v1835_v20 = vsel %vm1821_vm5, %v1635_v49, 0.0 }
 0x13e   : > { %v1933_v3 = vadd.f32 %v1932_v32, %v1931_v12  ;;  %v1639_v15 = vadd.f32 %v2472_v14, %v1399_v53  ;;  %v1397_v31 = vadd.f32 %v1296_v63, %v3063_v57  ;;  %v3202_v9 = vadd.f32 %v3390_v43, %v3389_v42 }
 0x13f   : > { %1799 = vst.msk [vmem:[%s3072_s13 + $0x28] sm:$0xf] %vm1788_vm4, %v2255_v50  ;;  %v2439_v37 = vpop.f32.mrf.mxu0  ;;  %v3198_v39 = vpop.f32.mrf.mxu1  ;;  %v2253_v45 = vpack.c.bf16 %v1636_v51, %v1636_v51  ;;  %v1836_v11 = vadd.f32 %v1835_v20, %v1834_v2  ;;  %v1936_v29 = vsel %vm1821_vm5, %v1898_v54, 0.0  ;;  %v1837_v28 = vsel %vm1821_vm5, %v1636_v51, 0.0 }
 0x140   : > { %v1935_v14 = vadd.f32 %v1934_v56, %v1933_v3  ;;  %v1899_v49 = vmul.f32 %v1636_v51, %v1636_v51  ;;  %v2256_v60 = vpack.c.bf16 %v1639_v15, %v1639_v15  ;;  %v1637_v33 = vadd.f32 %v3154_v61, %v1397_v31  ;;  %v3391_v3 = vld [vmem:[#allocation13_spill] sm:$0xff] }
 0x141   : > { %v1309_v41 = vpop.f32.mrf.mxu0  ;;  %v3206_v6 = vpop.f32.mrf.mxu1  ;;  %1797 = vst.msk [vmem:[%s3072_s13 + $0x20] sm:$0xf] %vm1788_vm4, %v2253_v45  ;;  %v1838_v57 = vadd.f32 %v1837_v28, %v1836_v11  ;;  %v1402_v19 = vadd.f32 %v2439_v37, %v3067_v59  ;;  %v1901_v35 = vmul.f32 %v1638_v38, %v1638_v38  ;;  %v1902_v5 = vmul.f32 %v1639_v15, %v1639_v15  ;;  %v3392_v51 = vld [vmem:[#allocation9_spill] sm:$0xff] }
 0x142   : > { %v1937_v17 = vadd.f32 %v1936_v29, %v1935_v14  ;;  %v1938_v36 = vsel %vm1821_vm5, %v1899_v49, 0.0  ;;  %1800 = vst.msk [vmem:[%s3072_s13 + $0x2c] sm:$0xf] %vm1788_vm4, %v2256_v60  ;;  %v1400_v46 = vadd.f32 %v1309_v41, %v3078_v0  ;;  %v2254_v53 = vpack.c.bf16 %v1637_v33, %v1637_v33 }
 0x143   : > { %v2440_v23 = vpop.f32.mrf.mxu0  ;;  %v3216_v12 = vpop.f32.mrf.mxu1  ;;  %v1839_v55 = vsel %vm1821_vm5, %v1637_v33, 0.0  ;;  %v1900_v54 = vmul.f32 %v1637_v33, %v1637_v33  ;;  %v1642_v59 = vadd.f32 %v3162_v47, %v1402_v19  ;;  %v3225_v0 = vadd.f32 %v3392_v51, %v3391_v3 }
 0x144   : > { %v1939_v16 = vadd.f32 %v1938_v36, %v1937_v17  ;;  %v1840_v61 = vadd.f32 %v1839_v55, %v1838_v57  ;;  %v1640_v32 = vadd.f32 %v1549_v62, %v1400_v46  ;;  %v1403_v50 = vadd.f32 %v2440_v23, %v3082_v1  ;;  %1798 = vst.msk [vmem:[%s3072_s13 + $0x24] sm:$0xf] %vm1788_vm4, %v2254_v53 }
 0x145   : > { %v1312_v63 = vpop.f32.mrf.mxu0  ;;  %v3221_v2 = vpop.f32.mrf.mxu1  ;;  %v1841_v18 = vsel %vm1821_vm5, %v1638_v38, 0.0  ;;  %v1940_v25 = vsel %vm1821_vm5, %v1900_v54, 0.0  ;;  %v1942_v47 = vsel %vm1821_vm5, %v1901_v35, 0.0  ;;  %v2259_v20 = vpack.c.bf16 %v1642_v59, %v1642_v59 }
 0x146   : > { %v1401_v56 = vadd.f32 %v1312_v63, %v3086_v8  ;;  %v1842_v62 = vadd.f32 %v1841_v18, %v1840_v61  ;;  %v1941_v1 = vadd.f32 %v1940_v25, %v1939_v16  ;;  %v1843_v42 = vsel %vm1821_vm5, %v1639_v15, 0.0 }
 0x147   : > { %v2443_v31 = vpop.f32.mrf.mxu0  ;;  %v3233_v37 = vpop.f32.mrf.mxu1  ;;  %v1944_v43 = vsel %vm1821_vm5, %v1902_v5, 0.0  ;;  %v2257_v38 = vpack.c.bf16 %v1640_v32, %v1640_v32  ;;  %v1903_v14 = vmul.f32 %v1640_v32, %v1640_v32  ;;  %1803 = vst.msk [vmem:[%s3072_s13 + $0x38] sm:$0xf] %vm1788_vm4, %v2259_v20  ;;  %v1643_v8 = vadd.f32 %v3175_v7, %v1403_v50 }
 0x148   : > { %v1943_v45 = vadd.f32 %v1942_v47, %v1941_v1  ;;  %v1844_v11 = vadd.f32 %v1843_v42, %v1842_v62  ;;  %v1641_v29 = vadd.f32 %v3186_v48, %v1401_v56  ;;  %v1905_v60 = vmul.f32 %v1642_v59, %v1642_v59 }
 0x149   : > { %v1325_v28 = vpop.f32.mrf.mxu0  ;;  %v3241_v49 = vpop.f32.mrf.mxu1  ;;  %1801 = vst.msk [vmem:[%s3072_s13 + $0x30] sm:$0xf] %vm1788_vm4, %v2257_v38  ;;  %v1845_v15 = vsel %vm1821_vm5, %v1640_v32, 0.0  ;;  %v1406_v41 = vadd.f32 %v2443_v31, %v3090_v10  ;;  %v1946_v19 = vsel %vm1821_vm5, %v1903_v14, 0.0  ;;  %v2260_v7 = vpack.c.bf16 %v1643_v8, %v1643_v8 }
 0x14a   : > { %v1404_v57 = vadd.f32 %v1325_v28, %v3094_v13  ;;  %v1846_v17 = vadd.f32 %v1845_v15, %v1844_v11  ;;  %v1945_v33 = vadd.f32 %v1944_v43, %v1943_v45  ;;  %v1906_v36 = vmul.f32 %v1643_v8, %v1643_v8 }
 0x14b   : > { %v2444_v48 = vpop.f32.mrf.mxu0  ;;  %v3249_v35 = vpop.f32.mrf.mxu1  ;;  %v2258_v5 = vpack.c.bf16 %v1641_v29, %v1641_v29  ;;  %v1847_v46 = vsel %vm1821_vm5, %v1641_v29, 0.0  ;;  %v1904_v23 = vmul.f32 %v1641_v29, %v1641_v29  ;;  %1804 = vst.msk [vmem:[%s3072_s13 + $0x3c] sm:$0xf] %vm1788_vm4, %v2260_v7  ;;  %v1646_v13 = vadd.f32 %v3198_v39, %v1406_v41 }
 0x14c   : > { %v1947_v16 = vadd.f32 %v1946_v19, %v1945_v33  ;;  %v1848_v10 = vadd.f32 %v1847_v46, %v1846_v17  ;;  %v1644_v53 = vadd.f32 %v3206_v6, %v1404_v57  ;;  %v1849_v61 = vsel %vm1821_vm5, %v1642_v59, 0.0 }
 0x14d   : > { %v1328_v55 = vpop.f32.mrf.mxu0  ;;  %v3256_v54 = vpop.f32.mrf.mxu1  ;;  %1802 = vst.msk [vmem:[%s3072_s13 + $0x34] sm:$0xf] %vm1788_vm4, %v2258_v5  ;;  %v1948_v32 = vsel %vm1821_vm5, %v1904_v23, 0.0  ;;  %v1407_v50 = vadd.f32 %v2444_v48, %v3098_v21  ;;  %v1950_v3 = vsel %vm1821_vm5, %v1905_v60, 0.0  ;;  %v2263_v6 = vpack.c.bf16 %v1646_v13, %v1646_v13 }
 0x14e   : > { %v1405_v63 = vadd.f32 %v1328_v55, %v3102_v22  ;;  %v1850_v51 = vadd.f32 %v1849_v61, %v1848_v10  ;;  %v1949_v39 = vadd.f32 %v1948_v32, %v1947_v16  ;;  %v1851_v59 = vsel %vm1821_vm5, %v1643_v8, 0.0 }
 0x14f   : > { %v2447_v18 = vpop.f32.mrf.mxu0  ;;  %v3265_v25 = vpop.f32.mrf.mxu1  ;;  %v1952_v56 = vsel %vm1821_vm5, %v1906_v36, 0.0  ;;  %v2261_v47 = vpack.c.bf16 %v1644_v53, %v1644_v53  ;;  %v1907_v62 = vmul.f32 %v1644_v53, %v1644_v53  ;;  %1807 = vst.msk [vmem:[%s3072_s13 + $0x48] sm:$0xf] %vm1788_vm4, %v2263_v6  ;;  %v1647_v22 = vadd.f32 %v3216_v12, %v1407_v50 }
 0x150   : > { %v1951_v1 = vadd.f32 %v1950_v3, %v1949_v39  ;;  %v1852_v21 = vadd.f32 %v1851_v59, %v1850_v51  ;;  %v1645_v20 = vadd.f32 %v3221_v2, %v1405_v63  ;;  %v1909_v43 = vmul.f32 %v1646_v13, %v1646_v13 }
 0x151   : > { %v1341_v31 = vpop.f32.mrf.mxu0  ;;  %v1597_v42 = vpop.f32.mrf.mxu1  ;;  %1805 = vst.msk [vmem:[%s3072_s13 + $0x40] sm:$0xf] %vm1788_vm4, %v2261_v47  ;;  %v1853_v38 = vsel %vm1821_vm5, %v1644_v53, 0.0  ;;  %v1410_v14 = vadd.f32 %v2447_v18, %v3106_v24  ;;  %v1954_v29 = vsel %vm1821_vm5, %v1907_v62, 0.0  ;;  %v2264_v12 = vpack.c.bf16 %v1647_v22, %v1647_v22 }
 0x152   : > { %v1408_v45 = vadd.f32 %v1341_v31, %v3112_v26  ;;  %v1854_v11 = vadd.f32 %v1853_v38, %v1852_v21  ;;  %v1953_v8 = vadd.f32 %v1952_v56, %v1951_v1  ;;  %v1910_v2 = vmul.f32 %v1647_v22, %v1647_v22 }
 0x153   : > { %v2448_v28 = vpop.f32.mrf.mxu0  ;;  %v2262_v60 = vpack.c.bf16 %v1645_v20, %v1645_v20  ;;  %v1855_v15 = vsel %vm1821_vm5, %v1645_v20, 0.0  ;;  %v1908_v41 = vmul.f32 %v1645_v20, %v1645_v20  ;;  %v3280_v57 = vpop.f32.mrf.mxu1  ;;  %1808 = vst.msk [vmem:[%s3072_s13 + $0x4c] sm:$0xf] %vm1788_vm4, %v2264_v12  ;;  %v1650_v26 = vadd.f32 %v3233_v37, %v1410_v14 }
 0x154   : > { %v1955_v17 = vadd.f32 %v1954_v29, %v1953_v8  ;;  %v1856_v24 = vadd.f32 %v1855_v15, %v1854_v11  ;;  %v1648_v33 = vadd.f32 %v3241_v49, %v1408_v45  ;;  %v1857_v7 = vsel %vm1821_vm5, %v1646_v13, 0.0 }
 0x155   : > { %v1344_v19 = vpop.f32.mrf.mxu0  ;;  %1806 = vst.msk [vmem:[%s3072_s13 + $0x44] sm:$0xf] %vm1788_vm4, %v2262_v60  ;;  %v1956_v48 = vsel %vm1821_vm5, %v1908_v41, 0.0  ;;  %v1411_v36 = vadd.f32 %v2448_v28, %v3116_v27  ;;  %v1958_v46 = vsel %vm1821_vm5, %v1909_v43, 0.0  ;;  %v2267_v37 = vpack.c.bf16 %v1650_v26, %v1650_v26  ;;  %v1600_v61 = vpop.f32.mrf.mxu1 }
 0x156   : > { %v1409_v5 = vadd.f32 %v1344_v19, %v3122_v4  ;;  %v1858_v23 = vadd.f32 %v1857_v7, %v1856_v24  ;;  %v1957_v16 = vadd.f32 %v1956_v48, %v1955_v17  ;;  %v1859_v49 = vsel %vm1821_vm5, %v1647_v22, 0.0 }
 0x157   : > { %v2451_v10 = vpop.f32.mrf.mxu0  ;;  %v1960_v13 = vsel %vm1821_vm5, %v1910_v2, 0.0  ;;  %v2265_v53 = vpack.c.bf16 %v1648_v33, %v1648_v33  ;;  %v1911_v55 = vmul.f32 %v1648_v33, %v1648_v33  ;;  %1811 = vst.msk [vmem:[%s3072_s13 + $0x58] sm:$0xf] %vm1788_vm4, %v2267_v37  ;;  %v1651_v4 = vadd.f32 %v3249_v35, %v1411_v36  ;;  %v2491_v22 = vpop.f32.mrf.mxu1 }
 0x158   : > { %v1959_v32 = vadd.f32 %v1958_v46, %v1957_v16  ;;  %v1860_v27 = vadd.f32 %v1859_v49, %v1858_v23  ;;  %v1649_v50 = vadd.f32 %v3256_v54, %v1409_v5  ;;  %v1913_v3 = vmul.f32 %v1650_v26, %v1650_v26 }
 0x159   : > { %v1357_v63 = vpop.f32.mrf.mxu0  ;;  %1809 = vst.msk [vmem:[%s3072_s13 + $0x50] sm:$0xf] %vm1788_vm4, %v2265_v53  ;;  %v1861_v51 = vsel %vm1821_vm5, %v1648_v33, 0.0  ;;  %v1414_v39 = vadd.f32 %v2451_v10, %v3126_v34  ;;  %v1962_v56 = vsel %vm1821_vm5, %v1911_v55, 0.0  ;;  %v2268_v47 = vpack.c.bf16 %v1651_v4, %v1651_v4  ;;  %v1613_v41 = vpop.f32.mrf.mxu1 }
 0x15a   : > { %v1412_v6 = vadd.f32 %v1357_v63, %v3132_v40  ;;  %v1862_v18 = vadd.f32 %v1861_v51, %v1860_v27  ;;  %v1961_v59 = vadd.f32 %v1960_v13, %v1959_v32  ;;  %v1914_v62 = vmul.f32 %v1651_v4, %v1651_v4 }
 0x15b   : > { %v2452_v35 = vpop.f32.mrf.mxu0  ;;  %v2266_v54 = vpack.c.bf16 %v1649_v50, %v1649_v50  ;;  %v1863_v1 = vsel %vm1821_vm5, %v1649_v50, 0.0  ;;  %v1912_v21 = vmul.f32 %v1649_v50, %v1649_v50  ;;  %1812 = vst.msk [vmem:[%s3072_s13 + $0x5c] sm:$0xf] %vm1788_vm4, %v2268_v47  ;;  %v1654_v34 = vadd.f32 %v3265_v25, %v1414_v39  ;;  %v2492_v13 = vpop.f32.mrf.mxu1 }
 0x15c   : > { %v1963_v20 = vadd.f32 %v1962_v56, %v1961_v59  ;;  %v1864_v31 = vadd.f32 %v1863_v1, %v1862_v18  ;;  %v1652_v40 = vadd.f32 %v1597_v42, %v1412_v6  ;;  %v1865_v38 = vsel %vm1821_vm5, %v1650_v26, 0.0 }
 0x15d   : > { %v1360_v43 = vpop.f32.mrf.mxu0  ;;  %1810 = vst.msk [vmem:[%s3072_s13 + $0x54] sm:$0xf] %vm1788_vm4, %v2266_v54  ;;  %v1964_v14 = vsel %vm1821_vm5, %v1912_v21, 0.0  ;;  %v1415_v45 = vadd.f32 %v2452_v35, %v3136_v44  ;;  %v1966_v8 = vsel %vm1821_vm5, %v1913_v3, 0.0  ;;  %v2271_v28 = vpack.c.bf16 %v1654_v34, %v1654_v34  ;;  %v1616_v56 = vpop.f32.mrf.mxu1 }
 0x15e   : > { %v1413_v11 = vadd.f32 %v1360_v43, %v3142_v52  ;;  %v1866_v29 = vadd.f32 %v1865_v38, %v1864_v31  ;;  %v1965_v12 = vadd.f32 %v1964_v14, %v1963_v20  ;;  %v1867_v42 = vsel %vm1821_vm5, %v1651_v4, 0.0 }
 0x15f   : > { %v2455_v25 = vpop.f32.mrf.mxu0  ;;  %v1968_v2 = vsel %vm1821_vm5, %v1914_v62, 0.0  ;;  %v2269_v60 = vpack.c.bf16 %v1652_v40, %v1652_v40  ;;  %v1915_v15 = vmul.f32 %v1652_v40, %v1652_v40  ;;  %1815 = vst.msk [vmem:[%s3072_s13 + $0x68] sm:$0xf] %vm1788_vm4, %v2271_v28  ;;  %v1655_v52 = vadd.f32 %v3280_v57, %v1415_v45 }
 0x160   : > { %v1967_v17 = vadd.f32 %v1966_v8, %v1965_v12  ;;  %v1868_v44 = vadd.f32 %v1867_v42, %v1866_v29  ;;  %v1653_v24 = vadd.f32 %v1600_v61, %v1413_v11  ;;  %v1873_v33 = vsel %vm1821_vm5, %v1654_v34, 0.0 }
 0x161   : > { %v1373_v26 = vpop.f32.mrf.mxu0  ;;  %1813 = vst.msk [vmem:[%s3072_s13 + $0x60] sm:$0xf] %vm1788_vm4, %v2269_v60  ;;  %v1869_v19 = vsel %vm1821_vm5, %v1652_v40, 0.0  ;;  %v1418_v7 = vadd.f32 %v2455_v25, %v3179_v58  ;;  %v1917_v36 = vmul.f32 %v1654_v34, %v1654_v34  ;;  %v2272_v23 = vpack.c.bf16 %v1655_v52, %v1655_v52 }
 0x162   : > { %v1416_v48 = vadd.f32 %v1373_v26, %v3191_v30  ;;  %v1870_v5 = vadd.f32 %v1869_v19, %v1868_v44  ;;  %v1969_v46 = vadd.f32 %v1968_v2, %v1967_v17  ;;  %v1970_v57 = vsel %vm1821_vm5, %v1915_v15, 0.0 }
 0x163   : > { %v2456_v16 = vpop.f32.mrf.mxu0  ;;  %v2270_v37 = vpack.c.bf16 %v1653_v24, %v1653_v24  ;;  %v1871_v10 = vsel %vm1821_vm5, %v1653_v24, 0.0  ;;  %v1916_v49 = vmul.f32 %v1653_v24, %v1653_v24  ;;  %1816 = vst.msk [vmem:[%s3072_s13 + $0x6c] sm:$0xf] %vm1788_vm4, %v2272_v23  ;;  %v1658_v58 = vadd.f32 %v2491_v22, %v1418_v7 }
 0x164   : > { %v1971_v53 = vadd.f32 %v1970_v57, %v1969_v46  ;;  %v1872_v55 = vadd.f32 %v1871_v10, %v1870_v5  ;;  %v1656_v61 = vadd.f32 %v1613_v41, %v1416_v48  ;;  %v1918_v32 = vmul.f32 %v1655_v52, %v1655_v52 }
 0x165   : > { %v1376_v30 = vpop.f32.mrf.mxu0  ;;  %1814 = vst.msk [vmem:[%s3072_s13 + $0x64] sm:$0xf] %vm1788_vm4, %v2270_v37  ;;  %v1972_v27 = vsel %vm1821_vm5, %v1916_v49, 0.0  ;;  %v1419_v4 = vadd.f32 %v2456_v16, %v3202_v9  ;;  %v2275_v51 = vpack.c.bf16 %v1658_v58, %v1658_v58  ;;  %v1974_v39 = vsel %vm1821_vm5, %v1917_v36, 0.0 }
 0x166   : > { %v1417_v50 = vadd.f32 %v1376_v30, %v3225_v0  ;;  %v1874_v63 = vadd.f32 %v1873_v33, %v1872_v55  ;;  %v1973_v3 = vadd.f32 %v1972_v27, %v1971_v53  ;;  %v1875_v6 = vsel %vm1821_vm5, %v1655_v52, 0.0 }
 0x167   : > { %v2273_v18 = vpack.c.bf16 %v1656_v61, %v1656_v61  ;;  %v1919_v59 = vmul.f32 %v1656_v61, %v1656_v61  ;;  %1819 = vst.msk [vmem:[%s3072_s13 + $0x78] sm:$0xf] %vm1788_vm4, %v2275_v51  ;;  %v1659_v62 = vadd.f32 %v2492_v13, %v1419_v4  ;;  %v1976_v54 = vsel %vm1821_vm5, %v1918_v32, 0.0 }
 0x168   : > { %v1975_v47 = vadd.f32 %v1974_v39, %v1973_v3  ;;  %v1876_v35 = vadd.f32 %v1875_v6, %v1874_v63  ;;  %v1657_v9 = vadd.f32 %v1616_v56, %v1417_v50  ;;  %v1877_v0 = vsel %vm1821_vm5, %v1656_v61, 0.0 }
 0x169   : > { %1817 = vst.msk [vmem:[%s3072_s13 + $0x70] sm:$0xf] %vm1788_vm4, %v2273_v18  ;;  %v1921_v1 = vmul.f32 %v1658_v58, %v1658_v58  ;;  %v2276_v20 = vpack.c.bf16 %v1659_v62, %v1659_v62  ;;  %v1978_v31 = vsel %vm1821_vm5, %v1919_v59, 0.0  ;;  %v1881_v45 = vsel %vm1821_vm5, %v1658_v58, 0.0 }
 0x16a   : > { %v1878_v21 = vadd.f32 %v1877_v0, %v1876_v35  ;;  %v1977_v22 = vadd.f32 %v1976_v54, %v1975_v47  ;;  %v2274_v34 = vpack.c.bf16 %v1657_v9, %v1657_v9  ;;  %v1879_v40 = vsel %vm1821_vm5, %v1657_v9, 0.0 }
 0x16b   : > { %v1920_v43 = vmul.f32 %v1657_v9, %v1657_v9  ;;  %1820 = vst.msk [vmem:[%s3072_s13 + $0x7c] sm:$0xf] %vm1788_vm4, %v2276_v20  ;;  %v1922_v11 = vmul.f32 %v1659_v62, %v1659_v62  ;;  %v1982_v28 = vsel %vm1821_vm5, %v1921_v1, 0.0  ;;  %v1883_v25 = vsel %vm1821_vm5, %v1659_v62, 0.0 }
 0x16c   : > { %v1979_v38 = vadd.f32 %v1978_v31, %v1977_v22  ;;  %v1880_v14 = vadd.f32 %v1879_v40, %v1878_v21  ;;  %1818 = vst.msk [vmem:[%s3072_s13 + $0x74] sm:$0xf] %vm1788_vm4, %v2274_v34 }
 0x16d   : > { %v1980_v8 = vsel %vm1821_vm5, %v1920_v43, 0.0  ;;  %v1984_v60 = vsel %vm1821_vm5, %v1922_v11, 0.0 }
 0x16e   : > { %v1882_v29 = vadd.f32 %v1881_v45, %v1880_v14  ;;  %v1981_v12 = vadd.f32 %v1980_v8, %v1979_v38 }
 0x170   : > { %v1884_v42 = vadd.f32 %v1883_v25, %v1882_v29  ;;  %v1983_v2 = vadd.f32 %v1982_v28, %v1981_v12 }
 0x172   : > { %v1885_v15 = vrot.slane %v1884_v42, 4  ;;  %v1985_v41 = vadd.f32 %v1984_v60, %v1983_v2 }
 0x174   : > { %v1886_v17 = vadd.f32 %v1885_v15, %v1884_v42  ;;  %v1986_v44 = vrot.slane %v1985_v41, 4 }
 0x176   : > { %v1887_v52 = vrot.slane %v1886_v17, 2  ;;  %v1987_v24 = vadd.f32 %v1986_v44, %v1985_v41 }
 0x178   : > { %v1888_v26 = vadd.f32 %v1887_v52, %v1886_v17  ;;  %v1988_v33 = vrot.slane %v1987_v24, 2 }
 0x17a   : > { %v1889_v19 = vrot.slane %v1888_v26, 1  ;;  %v1989_v7 = vadd.f32 %v1988_v33, %v1987_v24 }
 0x17c   : > { %v1990_v48 = vrot.slane %v1989_v7, 1  ;;  %v1890_v36 = vadd.f32 %v1889_v19, %v1888_v26 }
 0x17e   : > { %v1991_v5 = vadd.f32 %v1990_v48, %v1989_v7 }
 0x180   : > { %v1993_v46 = vsel %vm1992_vm6, %v1890_v36, %v1991_v5 }
 0x181   : > { %v1995_v23 = vsel %vm1994_vm7, %v1993_v46, 0.0 }
 0x182   : > { %1996 = vst.msk [vmem:[%s182_s17] sm:$0xff] %vm1821_vm5, %v1995_v23 }
 0x183 PF: > { %s14_s12 = sadd.s32 1, %s2533_s12  }
 0x184   : > { %p11_p5 = scmp.ge.s32.totalorder %s14_s12, 4  }
 0x186   :  { %13 = sbr.rel (!%p11_p5) target bundleno = 1 (0x1), region = 73 }

// kernel: discriminator_forward.11
= control target key start
LH: loop header
LB: loop body
LE: loop exit
PB: predicated region body
PF: predicated region fallthrough
CT: control target
= control target key end

     0   :  { %s417_s12 = smov 0   ;;  %s455_s0 = inlined_call_operand.vmem [shape: bf16[128,32], index: 0, kind: input, shape index: {}]   ;;  %s456_s1 = inlined_call_operand.vmem [shape: f32[1,32], index: 1, kind: input, shape index: {}]   ;;  %s457_s2 = inlined_call_operand.vmem [shape: f32[1,32], index: 2, kind: input, shape index: {}]   ;;  %s458_s3 = inlined_call_operand.vmem [shape: bf16[128,32], index: 3, kind: output, shape index: {}]  }
   0x1 LB: > { %s333_s13 = sadd.s32 4294967295, %s395_s12   ;;  %p337_p0 = scmp.ge.s32.totalorder %s395_s12, 1  ;;  %s395_s12 = sphi %s417_s12, %s13_s12  }
   0x2   : > { %p138_p1 = scmp.lt.s32.totalorder %s395_s12, 3 }
   0x4   : > { %p139_p2 = pnand %p337_p0, %p138_p1 }
   0x5   : > { %s338_s14 = sshll.u32 (!%p139_p2), %s333_s13, 3 }
   0x6   : > { %142 = sbr.rel (%p139_p2) target bundleno = 31 (0x1f), region = 32  ;;  %p163_p3 = scmp.lt.s32.totalorder (!%p139_p2), %s338_s14, 15 }
   0xb   : > { %s460_s14 = smov (!%p163_p3, %s338_s14), 15  ;;  %v342_v0 = vld [vmem:[%s456_s1] ss:$0 sm:$0xff]  ;;  %vm268_vm0 = vcmask 257024  }
   0xc   : > { %s339_s15 = sshll.u32 %s460_s14, 2  ;;  %v343_v9 = vld [vmem:[%s457_s2] ss:$0 sm:$0xff] }
   0xd   : > { %s166_s18 = scalar_lea.vmem %s455_s0, %s339_s15  ;;  %s172_s25 = scalar_lea.vmem %s458_s3, %s339_s15 }
   0xe   : > { %v363_v1 = vld [vmem:[%s166_s18] sm:$0xff]   ;;  %v378_v2 = vld [vmem:[%s166_s18 + $0x8] sm:$0xff]   ;;  %v379_v3 = vld [vmem:[%s166_s18 + $0x10] sm:$0xff]  }
   0xf   : > { %v364_v4 = vunpack.c.l.bf16 %v363_v1  ;;  %v365_v5 = vunpack.c.h.bf16 %v363_v1  ;;  %v368_v6 = vunpack.c.l.bf16 %v378_v2  ;;  %v369_v7 = vunpack.c.h.bf16 %v378_v2  ;;  %v380_v8 = vld [vmem:[%s166_s18 + $0x18] sm:$0xff]  }
  0x10   : > { %v372_v10 = vunpack.c.l.bf16 %v379_v3  ;;  %v373_v11 = vunpack.c.h.bf16 %v379_v3  ;;  %v376_v12 = vunpack.c.l.bf16 %v380_v8  ;;  %v377_v13 = vunpack.c.h.bf16 %v380_v8 }
  0x11   : > { %v197_v14 = vmul.f32 %v364_v4, %v342_v0  ;;  %v198_v15 = vmul.f32 %v365_v5, %v342_v0  ;;  %v199_v16 = vmul.f32 %v368_v6, %v342_v0  ;;  %v200_v17 = vmul.f32 %v369_v7, %v342_v0 }
  0x12   : > { %v201_v18 = vmul.f32 %v372_v10, %v342_v0  ;;  %v202_v19 = vmul.f32 %v373_v11, %v342_v0  ;;  %v203_v20 = vmul.f32 %v376_v12, %v342_v0  ;;  %v204_v21 = vmul.f32 %v377_v13, %v342_v0 }
  0x13   : > { %v212_v22 = vadd.f32 %v343_v9, %v197_v14  ;;  %v213_v23 = vadd.f32 %v343_v9, %v198_v15  ;;  %v214_v24 = vadd.f32 %v343_v9, %v199_v16  ;;  %v215_v25 = vadd.f32 %v343_v9, %v200_v17 }
  0x14   : > { %v216_v26 = vadd.f32 %v343_v9, %v201_v18  ;;  %v217_v27 = vadd.f32 %v343_v9, %v202_v19  ;;  %v218_v28 = vadd.f32 %v343_v9, %v203_v20  ;;  %v219_v29 = vadd.f32 %v343_v9, %v204_v21 }
  0x15   : > { %v220_v30 = vmul.f32 0.2, %v212_v22  ;;  %v221_v31 = vmul.f32 0.2, %v213_v23  ;;  %v222_v32 = vmul.f32 0.2, %v214_v24 }
  0x16   : > { %v223_v33 = vmul.f32 0.2, %v215_v25  ;;  %v224_v34 = vmul.f32 0.2, %v216_v26  ;;  %v225_v35 = vmul.f32 0.2, %v217_v27 }
  0x17   : > { %v228_v36 = vmax.f32 %v212_v22, %v220_v30  ;;  %v229_v37 = vmax.f32 %v213_v23, %v221_v31  ;;  %v230_v38 = vmax.f32 %v214_v24, %v222_v32  ;;  %v226_v39 = vmul.f32 0.2, %v218_v28 }
  0x18   : > { %v231_v40 = vmax.f32 %v215_v25, %v223_v33  ;;  %v232_v41 = vmax.f32 %v216_v26, %v224_v34  ;;  %v233_v42 = vmax.f32 %v217_v27, %v225_v35  ;;  %v227_v43 = vmul.f32 0.2, %v219_v29 }
  0x19   : > { %v354_v44 = vpack.c.bf16 %v228_v36, %v228_v36  ;;  %v355_v45 = vpack.c.bf16 %v229_v37, %v229_v37  ;;  %v356_v46 = vpack.c.bf16 %v230_v38, %v230_v38  ;;  %v234_v47 = vmax.f32 %v218_v28, %v226_v39 }
  0x1a   : > { %v357_v48 = vpack.c.bf16 %v231_v40, %v231_v40  ;;  %v358_v49 = vpack.c.bf16 %v232_v41, %v232_v41  ;;  %v359_v50 = vpack.c.bf16 %v233_v42, %v233_v42  ;;  %v235_v51 = vmax.f32 %v219_v29, %v227_v43 }
  0x1b   : > { %269 = vst.msk [vmem:[%s172_s25] sm:$0xf] %vm268_vm0, %v354_v44  ;;  %270 = vst.msk [vmem:[%s172_s25 + $0x4] sm:$0xf] %vm268_vm0, %v355_v45  ;;  %v360_v52 = vpack.c.bf16 %v234_v47, %v234_v47 }
  0x1c   : > { %271 = vst.msk [vmem:[%s172_s25 + $0x8] sm:$0xf] %vm268_vm0, %v356_v46  ;;  %272 = vst.msk [vmem:[%s172_s25 + $0xc] sm:$0xf] %vm268_vm0, %v357_v48  ;;  %v361_v53 = vpack.c.bf16 %v235_v51, %v235_v51 }
  0x1d   : > { %273 = vst.msk [vmem:[%s172_s25 + $0x10] sm:$0xf] %vm268_vm0, %v358_v49  ;;  %274 = vst.msk [vmem:[%s172_s25 + $0x14] sm:$0xf] %vm268_vm0, %v359_v50 }
  0x1e   : > { %275 = vst.msk [vmem:[%s172_s25 + $0x18] sm:$0xf] %vm268_vm0, %v360_v52  ;;  %276 = vst.msk [vmem:[%s172_s25 + $0x1c] sm:$0xf] %vm268_vm0, %v361_v53 }
  0x1f PF: > { %s13_s12 = sadd.s32 1, %s395_s12  }
  0x20   : > { %p10_p4 = scmp.ge.s32.totalorder %s13_s12, 4  }
  0x22   :  { %12 = sbr.rel (!%p10_p4) target bundleno = 1 (0x1), region = 62 }

// kernel: discriminator_forward.10
= control target key start
LH: loop header
LB: loop body
LE: loop exit
PB: predicated region body
PF: predicated region fallthrough
CT: control target
= control target key end

     0   :  { %s1270_s12 = smov 0   ;;  %s1490_s0 = inlined_call_operand.vmem [shape: bf16[2,9,9,64], index: 0, kind: input, shape index: {}]   ;;  %s1491_s1 = inlined_call_operand.vmem [shape: bf16[4,64,32], index: 1, kind: input, shape index: {}]   ;;  %s1492_s2 = inlined_call_operand.vmem [shape: bf16[128,32], index: 2, kind: output, shape index: {0}]   ;;  %s1493_s3 = inlined_call_operand.vmem [shape: f32[2,8,32], index: 3, kind: output, shape index: {1}]  }
   0x1 LB: > { %s1276_s13 = sadd.s32 4294967295, %s1248_s12   ;;  %p1018_p0 = scmp.ge.s32.totalorder %s1248_s12, 1  ;;  %s1248_s12 = sphi %s1270_s12, %s14_s12  }
   0x2   : > { %p140_p1 = scmp.lt.s32.totalorder %s1248_s12, 3 }
   0x4   : > { %p141_p2 = pnand %p1018_p0, %p140_p1 }
   0x5   : > { %p168_p3 = scmp.lt.s32.totalorder (!%p141_p2), %s1276_s13, 1  ;;  %s1020_s27 = sshll.u32 (!%p141_p2), %s1276_s13, 3 }
   0x6   : > { %144 = sbr.rel (%p141_p2) target bundleno = 288 (0x120), region = 28  ;;  %p174_p4 = scmp.lt.s32.totalorder (!%p141_p2), %s1020_s27, 15 }
   0xb   : > { %v1218_v0 = vld [vmem:[%s1491_s1 + $0x38] sm:$0xff]   ;;  %v1220_v2 = vld [vmem:[%s1491_s1 + $0x30] sm:$0xff]   ;;  %s1291_s20 = scalar_select %p168_p3, %s1276_s13, 1  ;;  %v1222_v4 = vld [vmem:[%s1491_s1 + $0x28] sm:$0xff]   ;;  %vm370_vm0 = vcmask 523264   ;;  %vm862_vm4 = vcmask 257024  }
   0xc   : > { %v1219_v1 = vld [vmem:[%s1491_s1 + $0x18] sm:$0xff]   ;;  %1145 = vmatprep.subr.bf16.mxu0 %v1218_v0  ;;  %v1221_v3 = vld [vmem:[%s1491_s1 + $0x10] sm:$0xff]   ;;  %v1223_v5 = vld [vmem:[%s1491_s1 + $0x8] sm:$0xff]   ;;  %vm210_vm1 = vsmask.f32 3328  ;;  %s1497_s27 = smov (!%p174_p4, %s1020_s27), 15 }
   0xd   : > { %1161 = vmatprep.subr.bf16.mxu1 %v1219_v1  ;;  %1146 = vmatpush3.bf16.msra.mxu0 %v1218_v0  ;;  %s1209_s25 = smul.u32 72, %s1291_s20  ;;  %v1224_v6 = vld [vmem:[%s1491_s1 + $0x20] sm:$0xff]   ;;  %vm211_vm2 = vsmask.f32 7440  ;;  %v1340_v29 = vld [vmem:[%s1491_s1 + $0x58] sm:$0xff]   ;;  %v1231_v53 = vld [vmem:[%s1491_s1 + $0x70] sm:$0xff]  }
   0xe   : > { %1162 = vmatpush3.bf16.msra.mxu1 %v1219_v1  ;;  %1147 = vmatprep.subr.bf16.mxu0 %v1220_v2  ;;  %v1225_v9 = vld [vmem:[%s1491_s1] sm:$0xff]   ;;  %vm1343_vm3 = vmor %vm210_vm1, %vm211_vm2  ;;  %v1229_v40 = vld [vmem:[%s1491_s1 + $0x78] sm:$0xff]   ;;  %s1021_s28 = sshll.u32 %s1497_s27, 2  ;;  %vm871_vm5 = vcmask 261120   ;;  %s1022_s4 = sshll.u32 %s1291_s20, 3  ;;  %vm922_vm6 = vcmask 1040384  }
   0xf   : > { %1163 = vmatprep.subr.bf16.mxu1 %v1221_v3  ;;  %s1306_s30 = scalar_lea.vmem %s1490_s0, %s1209_s25  ;;  %vm924_vm7 = vcmask 1041408   ;;  %s182_s7 = scalar_lea.vmem %s1493_s3, %s1022_s4 }
  0x10   : > { %v184_v7 = vld [vmem:[%s1306_s30] sm:$0xf]  ;;  %v1313_v8 = vld [vmem:[%s1306_s30 + $0x8] sm:$0xf]  ;;  %v185_v15 = vld [vmem:[%s1306_s30 + $0x4] sm:$0x1] }
  0x11   : > { %1148 = vmatpush3.bf16.msra.mxu0 %v1220_v2  ;;  %v214_v10 = vshrl.u32 %v184_v7, 16  ;;  %v217_v11 = vshll.u32 %v184_v7, 16  ;;  %v228_v12 = vshrl.u32 %v1313_v8, 16  ;;  %v231_v13 = vshll.u32 %v1313_v8, 16  ;;  %v187_v16 = vld [vmem:[%s1306_s30 + $0xc] sm:$0x1] }
  0x12   : > { %1164 = vmatpush3.bf16.msra.mxu1 %v1221_v3  ;;  %1149 = vmatprep.subr.bf16.mxu0 %v1222_v4  ;;  %v1043_v14 = vcombine.low %v184_v7, %v1313_v8  ;;  %v1324_v17 = vld [vmem:[%s1306_s30 + $0x10] sm:$0xf]  ;;  %v189_v20 = vld [vmem:[%s1306_s30 + $0x14] sm:$0x1]  ;;  %v1328_v21 = vld [vmem:[%s1306_s30 + $0x18] sm:$0xf] }
  0x13   : > { %1165 = vmatprep.subr.bf16.mxu1 %v1223_v5  ;;  %v216_v18 = vrot.slane %v214_v10, 4  ;;  %v219_v19 = vrot.slane %v217_v11, 5  ;;  %v1044_v22 = vcombine.low %v1324_v17, %v1328_v21  ;;  %v191_v23 = vld [vmem:[%s1306_s30 + $0x1c] sm:$0x1]  ;;  %v1335_v24 = vld [vmem:[%s1306_s30 + $0x20] sm:$0xf] }
  0x14   : > { %1169 = vmatprep.mubr.msk.bf16.mxu1 %vm370_vm0, %v1043_v14  ;;  %v223_v26 = vshll.u32 %v185_v15, 16  ;;  %v230_v27 = vrot.slane %v228_v12, 4  ;;  %v233_v28 = vrot.slane %v231_v13, 5  ;;  %v193_v30 = vld [vmem:[%s1306_s30 + $0x24] sm:$0x1]  ;;  %v237_v32 = vshll.u32 %v187_v16, 16 }
  0x15   : > { %1150 = vmatpush3.bf16.msra.mxu0 %v1222_v4  ;;  %v220_v25 = vor.u32 %v219_v19, %v216_v18  ;;  %v242_v33 = vshrl.u32 %v1324_v17, 16  ;;  %v245_v34 = vshll.u32 %v1324_v17, 16  ;;  %v251_v35 = vshll.u32 %v189_v20, 16  ;;  %v1368_v60 = vld [vmem:[%s1306_s30 + $0x28] sm:$0xf]  ;;  %v1230_v20 = vld [vmem:[%s1491_s1 + $0x50] sm:$0xff]  }
  0x16   : > { %1166 = vmatpush3.bf16.msra.mxu1 %v1223_v5  ;;  %1151 = vmatprep.subr.bf16.mxu0 %v1224_v6  ;;  %v225_v37 = vrot.slane %v223_v26, 5  ;;  %v234_v38 = vor.u32 %v233_v28, %v230_v27  ;;  %v256_v39 = vshrl.u32 %v1328_v21, 16  ;;  %v239_v41 = vrot.slane %v237_v32, 5  ;;  %v195_v1 = vld [vmem:[%s1306_s30 + $0x2c] sm:$0x1] }
  0x17   : > { %1167 = vmatprep.subr.bf16.mxu1 %v1225_v9  ;;  %v221_v36 = vrot.slane %v220_v25, 4  ;;  %v244_v42 = vrot.slane %v242_v33, 4  ;;  %v247_v43 = vrot.slane %v245_v34, 5  ;;  %v253_v44 = vrot.slane %v251_v35, 5  ;;  %v1374_v2 = vld [vmem:[%s1306_s30 + $0x30] sm:$0xf] }
  0x18   : > { %v235_v46 = vrot.slane %v234_v38, 4  ;;  %v258_v47 = vrot.slane %v256_v39, 4  ;;  %v259_v48 = vshll.u32 %v1328_v21, 16  ;;  %v265_v50 = vshll.u32 %v191_v23, 16  ;;  %v1380_v7 = vld [vmem:[%s1306_s30 + $0x38] sm:$0xf] }
  0x19   : > { %1152 = vmatpush3.bf16.msra.mxu0 %v1224_v6  ;;  %v226_v45 = vsel %vm1343_vm3, %v221_v36, %v225_v37  ;;  %v248_v49 = vor.u32 %v247_v43, %v244_v42  ;;  %v270_v51 = vshrl.u32 %v1335_v24, 16  ;;  %v273_v52 = vshll.u32 %v1335_v24, 16  ;;  %v1235_v13 = vld [vmem:[%s1491_s1 + $0x68] sm:$0xff]   ;;  %v197_v32 = vld [vmem:[%s1306_s30 + $0x34] sm:$0x1]  ;;  %v1237_v38 = vld [vmem:[%s1491_s1 + $0x60] sm:$0xff]  }
  0x1a   : > { %1168 = vmatpush3.bf16.msra.mxu1 %v1225_v9  ;;  %1177 = vmatprep.subr.bf16.mxu0 %v1340_v29  ;;  %v1364_v54 = vsel %vm1343_vm3, %v235_v46, %v239_v41  ;;  %v261_v55 = vrot.slane %v259_v48, 5  ;;  %v279_v56 = vshll.u32 %v193_v30, 16  ;;  %v267_v62 = vrot.slane %v265_v50, 5  ;;  %v199_v33 = vld [vmem:[%s1306_s30 + $0x3c] sm:$0x1] }
  0x1b   : > { %1193 = vmatprep.subr.bf16.mxu1 %v1229_v40  ;;  %v249_v57 = vrot.slane %v248_v49, 4  ;;  %v272_v58 = vrot.slane %v270_v51, 4  ;;  %v275_v59 = vrot.slane %v273_v52, 5  ;;  %v1031_v63 = vcombine.low %v226_v45, %v1364_v54  ;;  %v200_v45 = vld [vmem:[%s1306_s30 + $0x40] sm:$0xf] }
  0x1c   : > { %v262_v61 = vor.u32 %v261_v55, %v258_v47  ;;  %v284_v0 = vshrl.u32 %v1368_v60, 16  ;;  %v281_v4 = vrot.slane %v279_v56, 5  ;;  %v287_v5 = vshll.u32 %v1368_v60, 16  ;;  %v1234_v47 = vld [vmem:[%s1491_s1 + $0x48] sm:$0xff]   ;;  %v201_v50 = vld [vmem:[%s1306_s30 + $0x44] sm:$0x1]  ;;  %s1448_s30 = scalar_lea.vmem %s1492_s2, %s1021_s28 }
  0x1d   : > { %1170 = vmatmul.mubr.msk.bf16.vlgmr.msra.gmra.mxu1 %vm370_vm0, %v1044_v22  ;;  %v276_v3 = vor.u32 %v275_v59, %v272_v58  ;;  %v1045_v6 = vcombine.low %v1335_v24, %v1368_v60  ;;  %v254_v9 = vsel %vm1343_vm3, %v249_v57, %v253_v44  ;;  %1153 = vmatprep.mubr.msk.bf16.mxu0 %vm370_vm0, %v1031_v63  ;;  %v293_v12 = vshll.u32 %v195_v1, 16 }
  0x1e   : > { %1194 = vmatpush3.bf16.msra.mxu1 %v1229_v40  ;;  %v263_v10 = vrot.slane %v262_v61, 4  ;;  %v286_v11 = vrot.slane %v284_v0, 4  ;;  %v289_v15 = vrot.slane %v287_v5, 5  ;;  %v298_v16 = vshrl.u32 %v1374_v2, 16  ;;  %v1236_v0 = vld [vmem:[%s1491_s1 + $0x40] sm:$0xff]  }
  0x1f   : > { %1195 = vmatprep.subr.bf16.mxu1 %v1231_v53  ;;  %v277_v14 = vrot.slane %v276_v3, 4  ;;  %1173 = vmatprep.mubr.msk.bf16.mxu1 %vm370_vm0, %v1045_v6  ;;  %v301_v18 = vshll.u32 %v1374_v2, 16  ;;  %v295_v22 = vrot.slane %v293_v12, 5  ;;  %v312_v23 = vshrl.u32 %v1380_v7, 16 }
  0x20   : > { %v268_v19 = vsel %vm1343_vm3, %v263_v10, %v267_v62  ;;  %v315_v25 = vshll.u32 %v1380_v7, 16  ;;  %v1083_v27 = vcombine.low %v1364_v54, %v254_v9  ;;  %v290_v28 = vor.u32 %v289_v15, %v286_v11 }
  0x21   : > { %v1032_v26 = vcombine.low %v254_v9, %v268_v19  ;;  %v1046_v30 = vcombine.low %v1374_v2, %v1380_v7  ;;  %v282_v34 = vsel %vm1343_vm3, %v277_v14, %v281_v4  ;;  %v300_v35 = vrot.slane %v298_v16, 4 }
  0x22   : > { %1196 = vmatpush3.bf16.msra.mxu1 %v1231_v53  ;;  %v303_v36 = vrot.slane %v301_v18, 5  ;;  %v307_v37 = vshll.u32 %v197_v32, 16  ;;  %v291_v39 = vrot.slane %v290_v28, 4  ;;  %v314_v40 = vrot.slane %v312_v23, 4 }
  0x23   : > { %1197 = vmatprep.subr.bf16.mxu1 %v1235_v13  ;;  %1154 = vmatmul.mubr.msk.bf16.vlgmr.msra.gmra.mxu0 %vm370_vm0, %v1032_v26  ;;  %v317_v41 = vrot.slane %v315_v25, 5  ;;  %v321_v42 = vshll.u32 %v199_v33, 16  ;;  %v694_v51 = vshrl.u32 %v200_v45, 16  ;;  %v703_v54 = vshll.u32 %v201_v50, 16 }
  0x24   : > { %1178 = vmatpush3.bf16.msra.mxu0 %v1340_v29  ;;  %v304_v43 = vor.u32 %v303_v36, %v300_v35  ;;  %v309_v44 = vrot.slane %v307_v37, 5  ;;  %v296_v46 = vsel %vm1343_vm3, %v291_v39, %v295_v22  ;;  %v697_v29 = vshll.u32 %v200_v45, 16 }
  0x25   : > { %1174 = vmatmul.mubr.msk.bf16.gmra.mxu1 %vm370_vm0, %v1046_v30  ;;  %1179 = vmatprep.subr.bf16.mxu0 %v1230_v20  ;;  %v318_v48 = vor.u32 %v317_v41, %v314_v40  ;;  %v323_v49 = vrot.slane %v321_v42, 5  ;;  %v1033_v52 = vcombine.low %v282_v34, %v296_v46  ;;  %v696_v56 = vrot.slane %v694_v51, 4 }
  0x26   : > { %1198 = vmatpush3.bf16.msra.mxu1 %v1235_v13  ;;  %v305_v53 = vrot.slane %v304_v43, 4  ;;  %1201 = vmatprep.mubr.msk.bf16.mxu1 %vm370_vm0, %v1083_v27  ;;  %v1084_v57 = vcombine.low %v268_v19, %v282_v34  ;;  %v699_v59 = vrot.slane %v697_v29, 5  ;;  %v1063_v62 = vcombine.low %v1313_v8, %v1324_v17 }
  0x27   : > { %1199 = vmatprep.subr.bf16.mxu1 %v1237_v38  ;;  %v319_v55 = vrot.slane %v318_v48, 4  ;;  %1157 = vmatprep.mubr.msk.bf16.mxu0 %vm370_vm0, %v1033_v52  ;;  %v705_v4 = vrot.slane %v703_v54, 5  ;;  %v1064_v17 = vcombine.low %v1328_v21, %v1335_v24  ;;  %v1065_v9 = vcombine.low %v1368_v60, %v1374_v2 }
  0x28   : > { %1180 = vmatpush3.bf16.msra.mxu0 %v1230_v20  ;;  %v310_v58 = vsel %vm1343_vm3, %v305_v53, %v309_v44  ;;  %v700_v3 = vor.u32 %v699_v59, %v696_v56  ;;  %v1066_v10 = vcombine.low %v1380_v7, %v200_v45 }
  0x29   : > { %1181 = vmatprep.subr.bf16.mxu0 %v1234_v47  ;;  %v324_v61 = vsel %vm1343_vm3, %v319_v55, %v323_v49  ;;  %v1085_v1 = vcombine.low %v296_v46, %v310_v58 }
  0x2a   : > { %1200 = vmatpush3.bf16.msra.mxu1 %v1237_v38  ;;  %v1034_v63 = vcombine.low %v310_v58, %v324_v61  ;;  %v701_v5 = vrot.slane %v700_v3, 4 }
  0x2c   : > { %1158 = vmatmul.mubr.msk.bf16.gmra.mxu0 %vm370_vm0, %v1034_v63  ;;  %v706_v8 = vsel %vm1343_vm3, %v701_v5, %v705_v4 }
  0x2d   : > { %1202 = vmatmul.mubr.msk.bf16.vlgmr.msra.gmra.mxu1 %vm370_vm0, %v1084_v57  ;;  %1182 = vmatpush3.bf16.msra.mxu0 %v1234_v47  ;;  %v1086_v6 = vcombine.low %v324_v61, %v706_v8 }
  0x2e   : > { %1185 = vmatprep.mubr.msk.bf16.mxu0 %vm370_vm0, %v1063_v62  ;;  %1183 = vmatprep.subr.bf16.mxu0 %v1236_v0 }
  0x2f   : > { %1205 = vmatprep.mubr.msk.bf16.mxu1 %vm370_vm0, %v1085_v1 }
  0x31   : > { %1184 = vmatpush3.bf16.msra.mxu0 %v1236_v0 }
  0x34   : > { %1186 = vmatmul.mubr.msk.bf16.vlgmr.msra.gmra.mxu0 %vm370_vm0, %v1064_v17 }
  0x35   : > { %1206 = vmatmul.mubr.msk.bf16.gmra.mxu1 %vm370_vm0, %v1086_v6  ;;  %1189 = vmatprep.mubr.msk.bf16.mxu0 %vm370_vm0, %v1065_v9 }
  0x3c   : > { %1190 = vmatmul.mubr.msk.bf16.gmra.mxu0 %vm370_vm0, %v1066_v10 }
  0xdd   : > { %v1171_v31 = vpop.f32.mrf.mxu1 }
  0xdf   : > { %v538_v11 = vpop.f32.mrf.mxu1 }
  0xe1   : > { %v1172_v12 = vpop.f32.mrf.mxu1 }
  0xe3   : > { %v541_v21 = vpop.f32.mrf.mxu1  ;;  %v1155_v24 = vpop.f32.mrf.mxu0 }
  0xe4   : > { %v547_v27 = vadd.f32 %v1171_v31, %v1155_v24 }
  0xe5   : > { %v1175_v13 = vpop.f32.mrf.mxu1  ;;  %v417_v14 = vpop.f32.mrf.mxu0 }
  0xe6   : > { %v539_v32 = vadd.f32 %v538_v11, %v417_v14 }
  0xe7   : > { %v554_v15 = vpop.f32.mrf.mxu1  ;;  %v1156_v60 = vpop.f32.mrf.mxu0 }
  0xe8   : > { %v550_v37 = vadd.f32 %v1172_v12, %v1156_v60 }
  0xe9   : > { %v1176_v2 = vpop.f32.mrf.mxu1  ;;  %v420_v16 = vpop.f32.mrf.mxu0 }
  0xea   : > { %v542_v42 = vadd.f32 %v541_v21, %v420_v16 }
  0xeb   : > { %v557_v18 = vpop.f32.mrf.mxu1 }
  0xec   : > { %v1159_v19 = vpop.f32.mrf.mxu0 }
  0xed   : > { %v1203_v20 = vpop.f32.mrf.mxu1  ;;  %v563_v45 = vadd.f32 %v1175_v13, %v1159_v19 }
  0xee   : > { %v433_v22 = vpop.f32.mrf.mxu0 }
  0xef   : > { %v791_v7 = vpop.f32.mrf.mxu1  ;;  %v555_v51 = vadd.f32 %v554_v15, %v433_v22 }
  0xf0   : > { %v1160_v23 = vpop.f32.mrf.mxu0 }
  0xf1   : > { %v1204_v25 = vpop.f32.mrf.mxu1  ;;  %v566_v29 = vadd.f32 %v1176_v2, %v1160_v23 }
  0xf2   : > { %v436_v26 = vpop.f32.mrf.mxu0 }
  0xf3   : > { %v794_v30 = vpop.f32.mrf.mxu1  ;;  %v558_v57 = vadd.f32 %v557_v18, %v436_v26 }
  0xf4   : > { %v1187_v28 = vpop.f32.mrf.mxu0 }
  0xf5   : > { %v687_v33 = vadd.f32 %v1187_v28, %v547_v27  ;;  %v1207_v39 = vpop.f32.mrf.mxu1 }
  0xf6   : > { %v654_v34 = vpop.f32.mrf.mxu0 }
  0xf7   : > { %v824_v35 = vadd.f32 %v1203_v20, %v687_v33  ;;  %v685_v36 = vadd.f32 %v654_v34, %v539_v32  ;;  %v807_v50 = vpop.f32.mrf.mxu1 }
  0xf8   : > { %v1188_v38 = vpop.f32.mrf.mxu0 }
  0xf9   : > { %v1107_v40 = vpack.c.bf16 %v824_v35, %v824_v35  ;;  %v822_v41 = vadd.f32 %v791_v7, %v685_v36  ;;  %v688_v43 = vadd.f32 %v1188_v38, %v550_v37  ;;  %v895_v58 = vmul.f32 %v824_v35, %v824_v35  ;;  %v1208_v3 = vpop.f32.mrf.mxu1 }
  0xfa   : > { %v657_v44 = vpop.f32.mrf.mxu0  ;;  %v875_v5 = vsel %vm871_vm5, %v824_v35, 0.0 }
  0xfb   : > { %865 = vst.msk [vmem:[%s1448_s30 + $0x8] sm:$0xf] %vm862_vm4, %v1107_v40  ;;  %v1105_v46 = vpack.c.bf16 %v822_v41, %v822_v41  ;;  %v825_v47 = vadd.f32 %v1204_v25, %v688_v43  ;;  %v686_v48 = vadd.f32 %v657_v44, %v542_v42  ;;  %v893_v52 = vmul.f32 %v822_v41, %v822_v41  ;;  %v810_v18 = vpop.f32.mrf.mxu1 }
  0xfc   : > { %v1191_v49 = vpop.f32.mrf.mxu0  ;;  %v872_v62 = vsel %vm871_vm5, %v822_v41, 0.0  ;;  %v904_v21 = vsel %vm871_vm5, %v895_v58, 0.0 }
  0xfd   : > { %863 = vst.msk [vmem:[%s1448_s30] sm:$0xf] %vm862_vm4, %v1105_v46  ;;  %v691_v53 = vadd.f32 %v1191_v49, %v563_v45  ;;  %v1108_v54 = vpack.c.bf16 %v825_v47, %v825_v47  ;;  %v823_v55 = vadd.f32 %v794_v30, %v686_v48  ;;  %v901_v8 = vsel %vm871_vm5, %v893_v52, 0.0 }
  0xfe   : > { %v670_v56 = vpop.f32.mrf.mxu0  ;;  %v896_v9 = vmul.f32 %v825_v47, %v825_v47  ;;  %v877_v15 = vsel %vm871_vm5, %v825_v47, 0.0 }
  0xff   : > { %v828_v59 = vadd.f32 %v1207_v39, %v691_v53  ;;  %v689_v61 = vadd.f32 %v670_v56, %v555_v51  ;;  %866 = vst.msk [vmem:[%s1448_s30 + $0xc] sm:$0xf] %vm862_vm4, %v1108_v54  ;;  %v1106_v63 = vpack.c.bf16 %v823_v55, %v823_v55  ;;  %v873_v0 = vsel %vm871_vm5, %v823_v55, 0.0 }
 0x100   : > { %v894_v1 = vmul.f32 %v823_v55, %v823_v55  ;;  %v1192_v4 = vpop.f32.mrf.mxu0  ;;  %v874_v17 = vadd.f32 %v873_v0, %v872_v62  ;;  %v906_v7 = vsel %vm871_vm5, %v896_v9, 0.0 }
 0x101   : > { %v1111_v6 = vpack.c.bf16 %v828_v59, %v828_v59  ;;  %864 = vst.msk [vmem:[%s1448_s30 + $0x4] sm:$0xf] %vm862_vm4, %v1106_v63  ;;  %v826_v31 = vadd.f32 %v807_v50, %v689_v61  ;;  %v692_v11 = vadd.f32 %v1192_v4, %v566_v29  ;;  %v899_v32 = vmul.f32 %v828_v59, %v828_v59 }
 0x102   : > { %v902_v10 = vsel %vm871_vm5, %v894_v1, 0.0  ;;  %v673_v12 = vpop.f32.mrf.mxu0  ;;  %v876_v24 = vadd.f32 %v875_v5, %v874_v17  ;;  %v883_v37 = vsel %vm871_vm5, %v828_v59, 0.0 }
 0x103   : > { %v903_v13 = vadd.f32 %v902_v10, %v901_v8  ;;  %869 = vst.msk [vmem:[%s1448_s30 + $0x18] sm:$0xf] %vm862_vm4, %v1111_v6  ;;  %v690_v14 = vadd.f32 %v673_v12, %v558_v57  ;;  %v1109_v60 = vpack.c.bf16 %v826_v31, %v826_v31  ;;  %v897_v2 = vmul.f32 %v826_v31, %v826_v31 }
 0x104   : > { %v829_v16 = vadd.f32 %v1208_v3, %v692_v11  ;;  %v878_v20 = vadd.f32 %v877_v15, %v876_v24  ;;  %v879_v23 = vsel %vm871_vm5, %v826_v31, 0.0  ;;  %v912_v42 = vsel %vm871_vm5, %v899_v32, 0.0 }
 0x105   : > { %v905_v19 = vadd.f32 %v904_v21, %v903_v13  ;;  %v827_v22 = vadd.f32 %v810_v18, %v690_v14  ;;  %867 = vst.msk [vmem:[%s1448_s30 + $0x10] sm:$0xf] %vm862_vm4, %v1109_v60  ;;  %v908_v33 = vsel %vm871_vm5, %v897_v2, 0.0 }
 0x106   : > { %v1112_v25 = vpack.c.bf16 %v829_v16, %v829_v16  ;;  %v880_v26 = vadd.f32 %v879_v23, %v878_v20  ;;  %v900_v38 = vmul.f32 %v829_v16, %v829_v16  ;;  %v885_v43 = vsel %vm871_vm5, %v829_v16, 0.0 }
 0x107   : > { %v907_v27 = vadd.f32 %v906_v7, %v905_v19  ;;  %v1110_v28 = vpack.c.bf16 %v827_v22, %v827_v22  ;;  %v881_v30 = vsel %vm871_vm5, %v827_v22, 0.0  ;;  %v898_v34 = vmul.f32 %v827_v22, %v827_v22 }
 0x108   : > { %870 = vst.msk [vmem:[%s1448_s30 + $0x1c] sm:$0xf] %vm862_vm4, %v1112_v25  ;;  %v882_v36 = vadd.f32 %v881_v30, %v880_v26  ;;  %v914_v46 = vsel %vm871_vm5, %v900_v38, 0.0 }
 0x109   : > { %v909_v35 = vadd.f32 %v908_v33, %v907_v27  ;;  %868 = vst.msk [vmem:[%s1448_s30 + $0x14] sm:$0xf] %vm862_vm4, %v1110_v28  ;;  %v910_v39 = vsel %vm871_vm5, %v898_v34, 0.0 }
 0x10a   : > { %v884_v40 = vadd.f32 %v883_v37, %v882_v36 }
 0x10b   : > { %v911_v41 = vadd.f32 %v910_v39, %v909_v35 }
 0x10c   : > { %v886_v44 = vadd.f32 %v885_v43, %v884_v40 }
 0x10d   : > { %v913_v45 = vadd.f32 %v912_v42, %v911_v41 }
 0x10e   : > { %v887_v47 = vrot.slane %v886_v44, 4 }
 0x10f   : > { %v915_v48 = vadd.f32 %v914_v46, %v913_v45 }
 0x110   : > { %v888_v49 = vadd.f32 %v887_v47, %v886_v44 }
 0x111   : > { %v916_v50 = vrot.slane %v915_v48, 4 }
 0x112   : > { %v889_v51 = vrot.slane %v888_v49, 2 }
 0x113   : > { %v917_v52 = vadd.f32 %v916_v50, %v915_v48 }
 0x114   : > { %v890_v53 = vadd.f32 %v889_v51, %v888_v49 }
 0x115   : > { %v918_v29 = vrot.slane %v917_v52, 2 }
 0x116   : > { %v891_v54 = vrot.slane %v890_v53, 1 }
 0x117   : > { %v919_v55 = vadd.f32 %v918_v29, %v917_v52 }
 0x118   : > { %v892_v57 = vadd.f32 %v891_v54, %v890_v53 }
 0x119   : > { %v920_v56 = vrot.slane %v919_v55, 1 }
 0x11b   : > { %v921_v58 = vadd.f32 %v920_v56, %v919_v55 }
 0x11d   : > { %v923_v59 = vsel %vm922_vm6, %v892_v57, %v921_v58 }
 0x11e   : > { %v925_v61 = vsel %vm924_vm7, %v923_v59, 0.0 }
 0x11f   : > { %926 = vst.msk [vmem:[%s182_s7] sm:$0xff] %vm871_vm5, %v925_v61 }
 0x120 PF: > { %s14_s12 = sadd.s32 1, %s1248_s12  }
 0x121   : > { %p11_p5 = scmp.ge.s32.totalorder %s14_s12, 4  }
 0x123   :  { %13 = sbr.rel (!%p11_p5) target bundleno = 1 (0x1), region = 73 }

// kernel: tile.13
= control target key start
LH: loop header
LB: loop body
LE: loop exit
PB: predicated region body
PF: predicated region fallthrough
CT: control target
= control target key end

     0   :  { %s28_s0 = inlined_call_operand.vmem [shape: f32[64], index: 0, kind: input, shape index: {}]   ;;  %s29_s1 = inlined_call_operand.vmem [shape: f32[16,64], index: 1, kind: output, shape index: {}]  }
   0x1   :  { %v4_v0 = vld [vmem:[%s28_s0] ss:$0 sm:$0xff] }
   0x2   :  { %5 = vst [vmem:[%s29_s1] sm:$0xff] %v4_v0  ;;  %8 = vst [vmem:[%s29_s1 + $0x8] sm:$0xff] %v4_v0 }

// kernel: tile.14
= control target key start
LH: loop header
LB: loop body
LE: loop exit
PB: predicated region body
PF: predicated region fallthrough
CT: control target
= control target key end

     0   :  { %vm3_vm0 = vcmask 523264   ;;  %vm10_vm1 = vcmask 1048064   ;;  %s125_s0 = inlined_call_operand.vmem [shape: f32[16,64], index: 0, kind: input, shape index: {}]   ;;  %s126_s1 = inlined_call_operand.vmem [shape: f32[1,1024], index: 1, kind: output, shape index: {}]  }
   0x1   :  { %v75_v0 = vld [vmem:[%s125_s0 + $0x1] ss:$2 sm:$0xff]   ;;  %v2_v1 = vld [vmem:[%s125_s0] ss:$2 sm:$0xff]   ;;  %s84_s0 = smov 64  }
   0x2   :  { %8 = vrot.lane.b32.xlu0 %v75_v0, %s84_s0  ;;  %4 = vst.msk [vmem:[#allocation0] ss:$8 sm:$0xf] %vm3_vm0, %v2_v1   ;;  %5 = vst.msk [vmem:[#allocation0] ss:$8 sm:$0xf0] %vm3_vm0, %v2_v1  }
  0x74   :  { %v9_v2 = vpop.permute.xlu0 %8  }
  0x75   :  { %11 = vst.msk [vmem:[#allocation0] ss:$8 sm:$0xf] %vm10_vm1, %v9_v2   ;;  %12 = vst.msk [vmem:[#allocation0] ss:$8 sm:$0xf0] %vm10_vm1, %v9_v2  }
  0x7c   :  { %v17_v3 = vld [vmem:[#allocation0] sm:$0x1]  ;;  %v22_v4 = vld [vmem:[#allocation0 + $0x8] sm:$0x1]  ;;  %v28_v5 = vld [vmem:[#allocation0 + $0x10] sm:$0x1] }
  0x7d   :  { %20 = vst [vmem:[%s126_s1] sm:$0x1] %v17_v3  ;;  %76 = vst [vmem:[%s126_s1 + $0x1] sm:$0x1] %v22_v4  ;;  %v35_v6 = vld [vmem:[#allocation0 + $0x18] sm:$0x1] }
  0x7e   :  { %77 = vst [vmem:[%s126_s1 + $0x2] sm:$0x1] %v28_v5  ;;  %v42_v7 = vld [vmem:[#allocation0 + $0x20] sm:$0x1]  ;;  %v49_v8 = vld [vmem:[#allocation0 + $0x28] sm:$0x1] }
  0x7f   :  { %78 = vst [vmem:[%s126_s1 + $0x3] sm:$0x1] %v35_v6  ;;  %79 = vst [vmem:[%s126_s1 + $0x4] sm:$0x1] %v42_v7  ;;  %v56_v9 = vld [vmem:[#allocation0 + $0x30] sm:$0x1] }
  0x80   :  { %80 = vst [vmem:[%s126_s1 + $0x5] sm:$0x1] %v49_v8  ;;  %v63_v10 = vld [vmem:[#allocation0 + $0x38] sm:$0x1]  ;;  %81 = vst [vmem:[%s126_s1 + $0x6] sm:$0x1] %v56_v9 }
  0x81   :  { %82 = vst [vmem:[%s126_s1 + $0x7] sm:$0x1] %v63_v10 }

// kernel: discriminator_forward.12
= control target key start
LH: loop header
LB: loop body
LE: loop exit
PB: predicated region body
PF: predicated region fallthrough
CT: control target
= control target key end

     0   :  { %s1224_s12 = smov 0   ;;  %s1463_s0 = inlined_call_operand.vmem [shape: bf16[2,5,5,128], index: 0, kind: input, shape index: {}]   ;;  %s1464_s1 = inlined_call_operand.vmem [shape: bf16[4,128,64], index: 1, kind: input, shape index: {}]   ;;  %s1465_s2 = inlined_call_operand.vmem [shape: bf16[32,64], index: 2, kind: output, shape index: {0}]   ;;  %s1466_s3 = inlined_call_operand.vmem [shape: f32[2,8,64], index: 3, kind: output, shape index: {1}]  }
   0x1 LB: > { %s1230_s13 = sadd.s32 4294967295, %s1199_s12   ;;  %p938_p0 = scmp.ge.s32.totalorder %s1199_s12, 1  ;;  %s1199_s12 = sphi %s1224_s12, %s14_s12  }
   0x2   : > { %p140_p1 = scmp.lt.s32.totalorder %s1199_s12, 3 }
   0x4   : > { %p141_p2 = pnand %p938_p0, %p140_p1 }
   0x5   : > { %p168_p3 = scmp.lt.s32.totalorder (!%p141_p2), %s1230_s13, 1  ;;  %s940_s8 = sshll.u32 (!%p141_p2), %s1230_s13, 1 }
   0x6   : > { %144 = sbr.rel (%p141_p2) target bundleno = 297 (0x129), region = 28  ;;  %p174_p4 = scmp.lt.s32.totalorder (!%p141_p2), %s940_s8, 3 }
   0xb   : > { %v1157_v0 = vld [vmem:[%s1464_s1 + $0x78] sm:$0xff]   ;;  %v1201_v1 = vmov 0.0   ;;  %v1159_v3 = vld [vmem:[%s1464_s1 + $0x70] sm:$0xff]   ;;  %vm1202_vm0 = vmmov 0   ;;  %v1161_v5 = vld [vmem:[%s1464_s1 + $0x68] sm:$0xff]   ;;  %s1264_s26 = scalar_select %p168_p3, %s1230_s13, 1  ;;  %v212_v10 = vlaneseq }
   0xc   : > { %1065 = vmatprep.subr.bf16.mxu0 %v1201_v1  ;;  %1085 = vmatprep.subr.bf16.mxu1 %v1201_v1  ;;  %v1158_v2 = vld [vmem:[%s1464_s1 + $0x38] sm:$0xff]   ;;  %v1160_v4 = vld [vmem:[%s1464_s1 + $0x30] sm:$0xff]   ;;  %v1162_v6 = vld [vmem:[%s1464_s1 + $0x28] sm:$0xff]   ;;  %v1203_v14 = vmov 1983009808   ;;  %s1472_s8 = smov (!%p174_p4, %s940_s8), 3 }
   0xd   : > { %1066 = vmatpush3.bf16.msra.mxu0 %v1157_v0  ;;  %1081 = vmatprep.mubr.msk.bf16.mxu0 %vm1202_vm0, %v1201_v1  ;;  %v1163_v7 = vld [vmem:[%s1464_s1 + $0x60] sm:$0xff]   ;;  %s1145_s4 = smul.u32 20, %s1264_s26  ;;  %v1165_v9 = vld [vmem:[%s1464_s1 + $0x58] sm:$0xff]   ;;  %v1167_v12 = vld [vmem:[%s1464_s1 + $0x50] sm:$0xff]   ;;  %v210_v15 = vunpack.c.l.s4 %v1203_v14  ;;  %v213_v16 = vshrl.u32 %v212_v10, 7  ;;  %s941_s9 = sshll.u32 %s1472_s8, 2 }
   0xe   : > { %1086 = vmatpush3.bf16.msra.mxu1 %v1158_v2  ;;  %1067 = vmatprep.subr.bf16.mxu0 %v1201_v1  ;;  %v1164_v8 = vld [vmem:[%s1464_s1 + $0x20] sm:$0xff]   ;;  %v1166_v11 = vld [vmem:[%s1464_s1 + $0x18] sm:$0xff]   ;;  %v1168_v13 = vld [vmem:[%s1464_s1 + $0x10] sm:$0xff]   ;;  %vm241_vm1 = vsmask.f32 1280  ;;  %s177_s14 = scalar_lea.vmem %s1465_s2, %s941_s9  ;;  %vm818_vm8 = vcmask 519168  }
   0xf   : > { %1087 = vmatprep.subr.bf16.mxu1 %v1201_v1  ;;  %1101 = vmatprep.mubr.msk.bf16.mxu1 %vm1202_vm0, %v1201_v1  ;;  %s1286_s11 = scalar_lea.vmem %s1463_s0, %s1145_s4  ;;  %v1169_v18 = vld [vmem:[%s1464_s1 + $0x48] sm:$0xff]   ;;  %v211_v21 = vunpack.c.0.s8 %v210_v15  ;;  %vm242_vm2 = vsmask.f32 3336  ;;  %vm244_vm3 = vsmask.f32 5392  ;;  %v1171_v25 = vld [vmem:[%s1464_s1 + $0x40] sm:$0xff]  }
  0x10   : > { %v1296_v17 = vld [vmem:[%s1286_s11] sm:$0x7]  ;;  %v1303_v19 = vld [vmem:[%s1286_s11 + $0x4] sm:$0x7]  ;;  %v1306_v20 = vld [vmem:[%s1286_s11 + $0x8] sm:$0x7] }
  0x11   : > { %1068 = vmatpush3.bf16.msra.mxu0 %v1159_v3  ;;  %v1170_v22 = vld [vmem:[%s1464_s1 + $0x8] sm:$0xff]   ;;  %v1314_v24 = vsub.s32 %v211_v21, %v213_v16  ;;  %v1172_v30 = vld [vmem:[%s1464_s1] sm:$0xff]   ;;  %vm246_vm4 = vsmask.f32 7448  ;;  %v428_v31 = vcombine.low %v1296_v17, %v1303_v19  ;;  %vm243_vm5 = vmor %vm241_vm1, %vm242_vm2  ;;  %vm821_vm9 = vcmask 523264   ;;  %s942_s13 = sshll.u32 %s1264_s26, 3 }
  0x12   : > { %1088 = vmatpush3.bf16.msra.mxu1 %v1160_v4  ;;  %1069 = vmatprep.subr.bf16.mxu0 %v1201_v1  ;;  %v1312_v23 = vld [vmem:[%s1286_s11 + $0xc] sm:$0x7]  ;;  %vm1341_vm6 = vmor %vm243_vm5, %vm244_vm3  ;;  %v1347_v58 = vld [vmem:[%s1286_s11 + $0x10] sm:$0x7]  ;;  %vm842_vm10 = vcmask 1040384   ;;  %vm844_vm11 = vcmask 1041408   ;;  %s182_s17 = scalar_lea.vmem %s1466_s3, %s942_s13 }
  0x13   : > { %1089 = vmatprep.subr.bf16.mxu1 %v1201_v1  ;;  %v215_v26 = vrot.slane %v1296_v17, %v1314_v24  ;;  %v223_v27 = vrot.slane %v1303_v19, %v1314_v24  ;;  %v231_v28 = vrot.slane %v1306_v20, %v1314_v24  ;;  %v239_v29 = vrot.slane %v1312_v23, %v1314_v24  ;;  %vm1352_vm7 = vmor %vm1341_vm6, %vm246_vm4  ;;  %v1186_v45 = vld [vmem:[%s1464_s1 + $0xd0] sm:$0xff]  }
  0x14   : > { %v429_v32 = vcombine.low %v1306_v20, %v1312_v23  ;;  %v436_v63 = vrot.slane %v428_v31, %v1314_v24 }
  0x15   : > { %1070 = vmatpush3.bf16.msra.mxu0 %v1161_v5  ;;  %v216_v33 = vcombine.high %v215_v26, %v215_v26  ;;  %v224_v34 = vcombine.high %v223_v27, %v223_v27  ;;  %v232_v35 = vcombine.high %v231_v28, %v231_v28  ;;  %v240_v36 = vcombine.high %v239_v29, %v239_v29 }
  0x16   : > { %1090 = vmatpush3.bf16.msra.mxu1 %v1162_v6  ;;  %1071 = vmatprep.subr.bf16.mxu0 %v1201_v1  ;;  %v249_v37 = vshrl.u32 %v215_v26, 16  ;;  %v252_v38 = vshll.u32 %v215_v26, 16  ;;  %v263_v39 = vshrl.u32 %v223_v27, 16  ;;  %v266_v40 = vshll.u32 %v223_v27, 16 }
  0x17   : > { %1091 = vmatprep.subr.bf16.mxu1 %v1201_v1  ;;  %v258_v41 = vshll.u32 %v216_v33, 16  ;;  %v272_v42 = vshll.u32 %v224_v34, 16  ;;  %v277_v43 = vshrl.u32 %v231_v28, 16  ;;  %v280_v44 = vshll.u32 %v231_v28, 16  ;;  %v1180_v33 = vld [vmem:[%s1464_s1 + $0xe8] sm:$0xff]  }
  0x18   : > { %v251_v46 = vrot.slane %v249_v37, 6  ;;  %v254_v47 = vrot.slane %v252_v38, 7  ;;  %v265_v48 = vrot.slane %v263_v39, 6  ;;  %v268_v49 = vrot.slane %v266_v40, 7  ;;  %v1177_v37 = vld [vmem:[%s1464_s1 + $0xb0] sm:$0xff]   ;;  %v1182_v38 = vld [vmem:[%s1464_s1 + $0xe0] sm:$0xff]  }
  0x19   : > { %1072 = vmatpush3.bf16.msra.mxu0 %v1163_v7  ;;  %v260_v50 = vrot.slane %v258_v41, 7  ;;  %v274_v51 = vrot.slane %v272_v42, 7  ;;  %v279_v52 = vrot.slane %v277_v43, 6  ;;  %v282_v53 = vrot.slane %v280_v44, 7  ;;  %v1179_v41 = vld [vmem:[%s1464_s1 + $0xa8] sm:$0xff]   ;;  %v1184_v42 = vld [vmem:[%s1464_s1 + $0xd8] sm:$0xff]  }
  0x1a   : > { %1092 = vmatpush3.bf16.msra.mxu1 %v1164_v8  ;;  %1073 = vmatprep.subr.bf16.mxu0 %v1201_v1  ;;  %v255_v54 = vor.u32 %v254_v47, %v251_v46  ;;  %v269_v55 = vor.u32 %v268_v49, %v265_v48  ;;  %v286_v56 = vshll.u32 %v232_v35, 16  ;;  %v291_v57 = vshrl.u32 %v239_v29, 16  ;;  %v1181_v44 = vld [vmem:[%s1464_s1 + $0xa0] sm:$0xff]   ;;  %v1183_v48 = vld [vmem:[%s1464_s1 + $0x98] sm:$0xff]   ;;  %v1188_v49 = vld [vmem:[%s1464_s1 + $0xc8] sm:$0xff]  }
  0x1b   : > { %1093 = vmatprep.subr.bf16.mxu1 %v1201_v1  ;;  %v283_v60 = vor.u32 %v282_v53, %v279_v52  ;;  %v294_v61 = vshll.u32 %v239_v29, 16  ;;  %v300_v62 = vshll.u32 %v240_v36, 16  ;;  %v443_v4 = vrot.slane %v429_v32, %v1314_v24  ;;  %v1175_v32 = vld [vmem:[%s1464_s1 + $0xb8] sm:$0xff]   ;;  %v1185_v52 = vld [vmem:[%s1464_s1 + $0x90] sm:$0xff]   ;;  %v1190_v53 = vld [vmem:[%s1464_s1 + $0xc0] sm:$0xff]  }
  0x1c   : > { %v256_v0 = vrot.slane %v255_v54, 2  ;;  %v270_v2 = vrot.slane %v269_v55, 2  ;;  %v293_v3 = vrot.slane %v291_v57, 6  ;;  %v288_v6 = vrot.slane %v286_v56, 7  ;;  %v1187_v57 = vld [vmem:[%s1464_s1 + $0x88] sm:$0xff]  }
  0x1d   : > { %1074 = vmatpush3.bf16.msra.mxu0 %v1165_v9  ;;  %v284_v5 = vrot.slane %v283_v60, 2  ;;  %v296_v7 = vrot.slane %v294_v61, 7  ;;  %v444_v15 = vcombine.low %v436_v63, %v443_v4  ;;  %v553_v54 = vcombine.low %v1303_v19, %v1306_v20  ;;  %v1189_v19 = vld [vmem:[%s1464_s1 + $0x80] sm:$0xff]  }
  0x1e   : > { %1094 = vmatpush3.bf16.msra.mxu1 %v1166_v11  ;;  %1075 = vmatprep.subr.bf16.mxu0 %v1201_v1  ;;  %v261_v8 = vsel %vm1352_vm7, %v256_v0, %v260_v50  ;;  %v275_v9 = vsel %vm1352_vm7, %v270_v2, %v274_v51  ;;  %v302_v11 = vrot.slane %v300_v62, 7  ;;  %v554_v55 = vcombine.low %v1312_v23, %v1347_v58 }
  0x1f   : > { %1095 = vmatprep.subr.bf16.mxu1 %v1201_v1  ;;  %v297_v10 = vor.u32 %v296_v7, %v293_v3  ;;  %v321_v14 = vcombine.low %v261_v8, %v275_v9  ;;  %v289_v16 = vsel %vm1352_vm7, %v284_v5, %v288_v6  ;;  %v561_v59 = vrot.slane %v553_v54, %v1314_v24 }
  0x20   : > { %v701_v46 = vcombine.low %v275_v9, %v289_v16  ;;  %v568_v60 = vrot.slane %v554_v55, %v1314_v24 }
  0x21   : > { %1076 = vmatpush3.bf16.msra.mxu0 %v1167_v12  ;;  %v668_v12 = vrot.slane %v1347_v58, %v1314_v24  ;;  %v298_v17 = vrot.slane %v297_v10, 2  ;;  %v329_v27 = vrot.slane %v321_v14, %v1314_v24 }
  0x22   : > { %1096 = vmatpush3.bf16.msra.mxu1 %v1168_v13  ;;  %1077 = vmatprep.subr.bf16.mxu0 %v1201_v1  ;;  %v1176_v13 = vld [vmem:[%s1464_s1 + $0xf8] sm:$0xff]   ;;  %v709_v50 = vrot.slane %v701_v46, %v1314_v24  ;;  %v569_v20 = vcombine.low %v561_v59, %v568_v60 }
  0x23   : > { %1097 = vmatprep.subr.bf16.mxu1 %v1201_v1  ;;  %v671_v21 = vshrl.u32 %v668_v12, 16  ;;  %v669_v29 = vcombine.high %v668_v12, %v668_v12 }
  0x25   : > { %1078 = vmatpush3.bf16.msra.mxu0 %v1169_v18  ;;  %v303_v18 = vsel %vm1352_vm7, %v298_v17, %v302_v11  ;;  %v680_v36 = vshll.u32 %v669_v29, 16 }
  0x26   : > { %1098 = vmatpush3.bf16.msra.mxu1 %v1170_v22  ;;  %1079 = vmatprep.subr.bf16.mxu0 %v1201_v1  ;;  %v674_v22 = vshll.u32 %v668_v12, 16  ;;  %v322_v26 = vcombine.low %v289_v16, %v303_v18 }
  0x27   : > { %1099 = vmatprep.subr.bf16.mxu1 %v1201_v1  ;;  %v682_v40 = vrot.slane %v680_v36, 7 }
  0x28   : > { %v336_v28 = vrot.slane %v322_v26, %v1314_v24  ;;  %v676_v31 = vrot.slane %v674_v22, 7 }
  0x29   : > { %1080 = vmatpush3.bf16.msra.mxu0 %v1171_v25  ;;  %v1178_v25 = vld [vmem:[%s1464_s1 + $0xf0] sm:$0xff]  }
  0x2a   : > { %1100 = vmatpush3.bf16.msra.mxu1 %v1172_v30  ;;  %1105 = vmatprep.subr.bf16.mxu0 %v1201_v1  ;;  %v673_v30 = vrot.slane %v671_v21, 6  ;;  %v337_v34 = vcombine.low %v329_v27, %v336_v28 }
  0x2b   : > { %1125 = vmatprep.subr.bf16.mxu1 %v1201_v1 }
  0x2c   : > { %1082 = vmatmul.mubr.bf16.vlgmr.msra.gmra.mxu0 %v337_v34  ;;  %v677_v35 = vor.u32 %v676_v31, %v673_v30 }
  0x2d   : > { %1102 = vmatmul.mubr.bf16.vlgmr.msra.gmra.mxu1 %v444_v15  ;;  %1106 = vmatpush3.bf16.msra.mxu0 %v1175_v32 }
  0x2e   : > { %1126 = vmatpush3.bf16.msra.mxu1 %v1176_v13  ;;  %1141 = vmatprep.mubr.msk.bf16.mxu1 %vm1202_vm0, %v1201_v1  ;;  %v678_v39 = vrot.slane %v677_v35, 2 }
  0x2f   : > { %1127 = vmatprep.subr.bf16.mxu1 %v1201_v1  ;;  %1107 = vmatprep.subr.bf16.mxu0 %v1201_v1 }
  0x30   : > { %1121 = vmatprep.mubr.msk.bf16.mxu0 %vm1202_vm0, %v1201_v1  ;;  %v683_v43 = vsel %vm1352_vm7, %v678_v39, %v682_v40 }
  0x31   : > { %1108 = vmatpush3.bf16.msra.mxu0 %v1177_v37  ;;  %v702_v47 = vcombine.low %v303_v18, %v683_v43 }
  0x32   : > { %1128 = vmatpush3.bf16.msra.mxu1 %v1178_v25  ;;  %1109 = vmatprep.subr.bf16.mxu0 %v1201_v1 }
  0x33   : > { %1129 = vmatprep.subr.bf16.mxu1 %v1201_v1  ;;  %v716_v51 = vrot.slane %v702_v47, %v1314_v24 }
  0x35   : > { %1110 = vmatpush3.bf16.msra.mxu0 %v1179_v41  ;;  %v717_v56 = vcombine.low %v709_v50, %v716_v51 }
  0x36   : > { %1130 = vmatpush3.bf16.msra.mxu1 %v1180_v33  ;;  %1111 = vmatprep.subr.bf16.mxu0 %v1201_v1 }
  0x37   : > { %1131 = vmatprep.subr.bf16.mxu1 %v1201_v1 }
  0x39   : > { %1112 = vmatpush3.bf16.msra.mxu0 %v1181_v44 }
  0x3a   : > { %1132 = vmatpush3.bf16.msra.mxu1 %v1182_v38  ;;  %1113 = vmatprep.subr.bf16.mxu0 %v1201_v1 }
  0x3b   : > { %1133 = vmatprep.subr.bf16.mxu1 %v1201_v1 }
  0x3d   : > { %1114 = vmatpush3.bf16.msra.mxu0 %v1183_v48 }
  0x3e   : > { %1134 = vmatpush3.bf16.msra.mxu1 %v1184_v42  ;;  %1115 = vmatprep.subr.bf16.mxu0 %v1201_v1 }
  0x3f   : > { %1135 = vmatprep.subr.bf16.mxu1 %v1201_v1 }
  0x41   : > { %1116 = vmatpush3.bf16.msra.mxu0 %v1185_v52 }
  0x42   : > { %1136 = vmatpush3.bf16.msra.mxu1 %v1186_v45  ;;  %1117 = vmatprep.subr.bf16.mxu0 %v1201_v1 }
  0x43   : > { %1137 = vmatprep.subr.bf16.mxu1 %v1201_v1 }
  0x45   : > { %1118 = vmatpush3.bf16.msra.mxu0 %v1187_v57 }
  0x46   : > { %1138 = vmatpush3.bf16.msra.mxu1 %v1188_v49  ;;  %1119 = vmatprep.subr.bf16.mxu0 %v1201_v1 }
  0x47   : > { %1139 = vmatprep.subr.bf16.mxu1 %v1201_v1 }
  0x49   : > { %1120 = vmatpush3.bf16.msra.mxu0 %v1189_v19 }
  0x4a   : > { %1140 = vmatpush3.bf16.msra.mxu1 %v1190_v53 }
  0x4c   : > { %1122 = vmatmul.mubr.bf16.vlgmr.msra.gmra.mxu0 %v569_v20 }
  0x4d   : > { %1142 = vmatmul.mubr.bf16.vlgmr.msra.gmra.mxu1 %v717_v56 }
  0xec   : > { %v421_v63 = vpop.f32.mrf.mxu0 }
  0xed   : > { %v528_v23 = vpop.f32.mrf.mxu1 }
  0xee   : > { %v1083_v0 = vpop.f32.mrf.mxu0  ;;  %v529_v7 = vadd.f32 %v528_v23, %v421_v63 }
  0xef   : > { %v1103_v58 = vpop.f32.mrf.mxu1 }
  0xf0   : > { %v424_v2 = vpop.f32.mrf.mxu0 }
  0xf1   : > { %v531_v61 = vpop.f32.mrf.mxu1 }
  0xf2   : > { %v1084_v24 = vpop.f32.mrf.mxu0  ;;  %v532_v10 = vadd.f32 %v531_v61, %v424_v2 }
  0xf3   : > { %v1104_v62 = vpop.f32.mrf.mxu1 }
 0x10c   : > { %v653_v1 = vpop.f32.mrf.mxu0 }
 0x10d   : > { %v801_v3 = vpop.f32.mrf.mxu1  ;;  %v660_v8 = vadd.f32 %v653_v1, %v529_v7 }
 0x10e   : > { %v1123_v9 = vpop.f32.mrf.mxu0 }
 0x10f   : > { %v1143_v4 = vpop.f32.mrf.mxu1  ;;  %v808_v11 = vadd.f32 %v801_v3, %v660_v8 }
 0x110   : > { %v656_v12 = vpop.f32.mrf.mxu0 }
 0x111   : > { %v804_v5 = vpop.f32.mrf.mxu1  ;;  %v1027_v13 = vpack.c.bf16 %v808_v11, %v808_v11  ;;  %v661_v14 = vadd.f32 %v656_v12, %v532_v10  ;;  %v831_v16 = vmul.f32 %v808_v11, %v808_v11  ;;  %v822_v18 = vsel %vm821_vm9, %v808_v11, 0.0 }
 0x112   : > { %v1124_v15 = vpop.f32.mrf.mxu0 }
 0x113   : > { %v1144_v6 = vpop.f32.mrf.mxu1  ;;  %819 = vst.msk [vmem:[%s177_s14] sm:$0xf] %vm818_vm8, %v1027_v13  ;;  %v809_v17 = vadd.f32 %v804_v5, %v661_v14  ;;  %v833_v27 = vsel %vm821_vm9, %v831_v16, 0.0 }
 0x115   : > { %v1028_v21 = vpack.c.bf16 %v809_v17, %v809_v17  ;;  %v823_v22 = vsel %vm821_vm9, %v809_v17, 0.0  ;;  %v832_v25 = vmul.f32 %v809_v17, %v809_v17 }
 0x116   : > { %v824_v26 = vadd.f32 %v823_v22, %v822_v18 }
 0x117   : > { %820 = vst.msk [vmem:[%s177_s14 + $0x4] sm:$0xf] %vm818_vm8, %v1028_v21  ;;  %v834_v28 = vsel %vm821_vm9, %v832_v25, 0.0 }
 0x118   : > { %v825_v29 = vrot.slane %v824_v26, 4  ;;  %v835_v30 = vadd.f32 %v834_v28, %v833_v27 }
 0x11a   : > { %v826_v31 = vadd.f32 %v825_v29, %v824_v26  ;;  %v836_v32 = vrot.slane %v835_v30, 4 }
 0x11c   : > { %v827_v33 = vrot.slane %v826_v31, 2  ;;  %v837_v34 = vadd.f32 %v836_v32, %v835_v30 }
 0x11e   : > { %v828_v35 = vadd.f32 %v827_v33, %v826_v31  ;;  %v838_v36 = vrot.slane %v837_v34, 2 }
 0x120   : > { %v829_v37 = vrot.slane %v828_v35, 1  ;;  %v839_v38 = vadd.f32 %v838_v36, %v837_v34 }
 0x122   : > { %v840_v39 = vrot.slane %v839_v38, 1  ;;  %v830_v40 = vadd.f32 %v829_v37, %v828_v35 }
 0x124   : > { %v841_v41 = vadd.f32 %v840_v39, %v839_v38 }
 0x126   : > { %v843_v42 = vsel %vm842_vm10, %v830_v40, %v841_v41 }
 0x127   : > { %v845_v43 = vsel %vm844_vm11, %v843_v42, 0.0 }
 0x128   : > { %846 = vst.msk [vmem:[%s182_s17] sm:$0xff] %vm821_vm9, %v845_v43 }
 0x129 PF: > { %s14_s12 = sadd.s32 1, %s1199_s12  }
 0x12a   : > { %p11_p5 = scmp.ge.s32.totalorder %s14_s12, 4  }
 0x12c   :  { %13 = sbr.rel (!%p11_p5) target bundleno = 1 (0x1), region = 73 }

// kernel: discriminator_forward.13
= control target key start
LH: loop header
LB: loop body
LE: loop exit
PB: predicated region body
PF: predicated region fallthrough
CT: control target
= control target key end

     0   :  { %v26_v20 = vlaneseq  ;;  %v1135_v28 = vmov 1983009808   ;;  %s1398_s3 = inlined_call_operand.vmem [shape: bf16[1024,128], index: 3, kind: input, shape index: {}]   ;;  %s1399_s1 = inlined_call_operand.vmem [shape: f32[1,1024], index: 1, kind: input, shape index: {}]   ;;  %s1400_s2 = inlined_call_operand.vmem [shape: f32[1,1024], index: 2, kind: input, shape index: {}]   ;;  %s1401_s0 = inlined_call_operand.vmem [shape: bf16[2,1024], index: 0, kind: input, shape index: {}]   ;;  %s1402_s4 = inlined_call_operand.vmem [shape: f32[1,128], index: 4, kind: input, shape index: {}]   ;;  %s1403_s5 = inlined_call_operand.vmem [shape: f32[2,128], index: 5, kind: output, shape index: {}]  }
   0x1   :  { %v1067_v0 = vld [vmem:[%s1398_s3 + $0x78] sm:$0xff]   ;;  %v1071_v4 = vld [vmem:[%s1398_s3 + $0x70] sm:$0xff]   ;;  %v1075_v8 = vld [vmem:[%s1398_s3 + $0x68] sm:$0xff]   ;;  %v61_v29 = vunpack.c.l.s4 %v1135_v28 }
   0x2   :  { %v1068_v1 = vld [vmem:[%s1398_s3 + $0xf8] sm:$0xff]   ;;  %978 = vmatprep.subr.bf16.mxu0 %v1067_v0  ;;  %v1072_v5 = vld [vmem:[%s1398_s3 + $0xf0] sm:$0xff]   ;;  %v1076_v9 = vld [vmem:[%s1398_s3 + $0xe8] sm:$0xff]   ;;  %v1238_v25 = vshrl.u32 %v26_v20, 7 }
   0x3   :  { %v1069_v2 = vld [vmem:[%s1398_s3 + $0x38] sm:$0xff]   ;;  %1000 = vmatprep.subr.bf16.mxu1 %v1068_v1  ;;  %v1073_v6 = vld [vmem:[%s1398_s3 + $0x30] sm:$0xff]   ;;  %v1077_v10 = vld [vmem:[%s1398_s3 + $0x28] sm:$0xff]   ;;  %v62_v37 = vunpack.c.0.s8 %v61_v29 }
   0x4   :  { %v1070_v3 = vld [vmem:[%s1398_s3 + $0xb8] sm:$0xff]   ;;  %979 = vmatpush3.bf16.msra.mxu0 %v1069_v2  ;;  %v1074_v7 = vld [vmem:[%s1398_s3 + $0xb0] sm:$0xff]   ;;  %v1078_v11 = vld [vmem:[%s1398_s3 + $0xa8] sm:$0xff]   ;;  %v28_v32 = vsub.s32 0, %v1238_v25  ;;  %v32_v34 = vsub.s32 1, %v1238_v25  ;;  %v36_v36 = vsub.s32 2, %v1238_v25 }
   0x5   :  { %1001 = vmatpush3.bf16.msra.mxu1 %v1070_v3  ;;  %980 = vmatprep.subr.bf16.mxu0 %v1071_v4  ;;  %v1079_v12 = vld [vmem:[%s1398_s3 + $0x60] sm:$0xff]   ;;  %v1083_v16 = vld [vmem:[%s1398_s3 + $0x58] sm:$0xff]   ;;  %v1087_v21 = vld [vmem:[%s1398_s3 + $0x50] sm:$0xff]   ;;  %v40_v39 = vsub.s32 3, %v1238_v25  ;;  %v1275_v45 = vsub.s32 %v62_v37, %v1238_v25  ;;  %v44_v58 = vsub.s32 4, %v1238_v25  ;;  %v48_v59 = vsub.s32 5, %v1238_v25 }
   0x6   :  { %1002 = vmatprep.subr.bf16.mxu1 %v1072_v5  ;;  %v1080_v13 = vld [vmem:[%s1398_s3 + $0xe0] sm:$0xff]   ;;  %v1084_v17 = vld [vmem:[%s1398_s3 + $0xd8] sm:$0xff]   ;;  %v1088_v22 = vld [vmem:[%s1398_s3 + $0xd0] sm:$0xff]   ;;  %v52_v62 = vsub.s32 6, %v1238_v25  ;;  %v56_v63 = vsub.s32 7, %v1238_v25 }
   0x7   :  { %v1081_v14 = vld [vmem:[%s1398_s3 + $0x20] sm:$0xff]   ;;  %v1085_v18 = vld [vmem:[%s1398_s3 + $0x18] sm:$0xff]   ;;  %v1089_v23 = vld [vmem:[%s1398_s3 + $0x10] sm:$0xff]  }
   0x8   :  { %981 = vmatpush3.bf16.msra.mxu0 %v1073_v6  ;;  %v1082_v15 = vld [vmem:[%s1398_s3 + $0xa0] sm:$0xff]   ;;  %v1086_v19 = vld [vmem:[%s1398_s3 + $0x98] sm:$0xff]   ;;  %v1090_v24 = vld [vmem:[%s1398_s3 + $0x90] sm:$0xff]  }
   0x9   :  { %1003 = vmatpush3.bf16.msra.mxu1 %v1074_v7  ;;  %982 = vmatprep.subr.bf16.mxu0 %v1075_v8  ;;  %v1091_v26 = vld [vmem:[%s1398_s3 + $0x48] sm:$0xff]   ;;  %v1095_v33 = vld [vmem:[%s1398_s3 + $0x40] sm:$0xff]   ;;  %v1099_v46 = vld [vmem:[%s1398_s3 + $0x178] sm:$0xff]  }
   0xa   :  { %1004 = vmatprep.subr.bf16.mxu1 %v1076_v9  ;;  %v1092_v27 = vld [vmem:[%s1398_s3 + $0xc8] sm:$0xff]   ;;  %v1096_v35 = vld [vmem:[%s1398_s3 + $0xc0] sm:$0xff]   ;;  %v1100_v51 = vld [vmem:[%s1398_s3 + $0x1f8] sm:$0xff]  }
   0xb   :  { %v1093_v30 = vld [vmem:[%s1398_s3 + $0x8] sm:$0xff]   ;;  %v1097_v38 = vld [vmem:[%s1398_s3] sm:$0xff]   ;;  %v1103_v37 = vld [vmem:[%s1398_s3 + $0x170] sm:$0xff]  }
   0xc   :  { %983 = vmatpush3.bf16.msra.mxu0 %v1077_v10  ;;  %v1094_v31 = vld [vmem:[%s1398_s3 + $0x88] sm:$0xff]   ;;  %v1098_v40 = vld [vmem:[%s1398_s3 + $0x80] sm:$0xff]  }
   0xd   :  { %1005 = vmatpush3.bf16.msra.mxu1 %v1078_v11  ;;  %984 = vmatprep.subr.bf16.mxu0 %v1079_v12  ;;  %v24_v41 = vld [vmem:[%s1399_s1] sm:$0xff] }
   0xe   :  { %1006 = vmatprep.subr.bf16.mxu1 %v1080_v13  ;;  %v96_v42 = vld [vmem:[%s1400_s2] sm:$0xff]  ;;  %v29_v43 = vrot.slane %v24_v41, %v28_v32  ;;  %v33_v44 = vrot.slane %v24_v41, %v32_v34  ;;  %v37_v47 = vrot.slane %v24_v41, %v36_v36  ;;  %v41_v48 = vrot.slane %v24_v41, %v40_v39 }
   0xf   :  { %v101_v49 = vrot.slane %v96_v42, %v28_v32  ;;  %v105_v50 = vrot.slane %v96_v42, %v32_v34  ;;  %v21_v52 = vld [vmem:[%s1401_s0] sm:$0xff]  ;;  %v109_v54 = vrot.slane %v96_v42, %v36_v36  ;;  %v113_v55 = vrot.slane %v96_v42, %v40_v39  ;;  %v1102_v39 = vld [vmem:[%s1398_s3 + $0x1b8] sm:$0xff]  }
  0x10   :  { %985 = vmatpush3.bf16.msra.mxu0 %v1081_v14  ;;  %v58_v53 = vcombine.low %v29_v43, %v33_v44  ;;  %v59_v56 = vcombine.low %v37_v47, %v41_v48  ;;  %v22_v0 = vunpack.c.l.bf16 %v21_v52  ;;  %v45_v5 = vrot.slane %v24_v41, %v44_v58  ;;  %v1105_v43 = vld [vmem:[%s1398_s3 + $0x130] sm:$0xff]   ;;  %v1107_v44 = vld [vmem:[%s1398_s3 + $0x168] sm:$0xff]  }
  0x11   :  { %1007 = vmatpush3.bf16.msra.mxu1 %v1082_v15  ;;  %986 = vmatprep.subr.bf16.mxu0 %v1083_v16  ;;  %v130_v57 = vcombine.low %v101_v49, %v105_v50  ;;  %v131_v61 = vcombine.low %v109_v54, %v113_v55  ;;  %v49_v6 = vrot.slane %v24_v41, %v48_v59  ;;  %v1108_v47 = vld [vmem:[%s1398_s3 + $0x1e8] sm:$0xff]   ;;  %v1111_v50 = vld [vmem:[%s1398_s3 + $0x160] sm:$0xff]   ;;  %v1115_v55 = vld [vmem:[%s1398_s3 + $0x158] sm:$0xff]  }
  0x12   :  { %1008 = vmatprep.subr.bf16.mxu1 %v1084_v17  ;;  %v66_v60 = vrot.slane %v58_v53, %v1275_v45  ;;  %v73_v1 = vrot.slane %v59_v56, %v1275_v45  ;;  %v53_v8 = vrot.slane %v24_v41, %v52_v62  ;;  %v57_v9 = vrot.slane %v24_v41, %v56_v63  ;;  %v1109_v49 = vld [vmem:[%s1398_s3 + $0x128] sm:$0xff]   ;;  %v1113_v54 = vld [vmem:[%s1398_s3 + $0x120] sm:$0xff]  }
  0x13   :  { %v138_v2 = vrot.slane %v130_v57, %v1275_v45  ;;  %v145_v3 = vrot.slane %v131_v61, %v1275_v45  ;;  %v75_v12 = vcombine.low %v45_v5, %v49_v6  ;;  %v117_v13 = vrot.slane %v96_v42, %v44_v58  ;;  %v1114_v57 = vld [vmem:[%s1398_s3 + $0x1a0] sm:$0xff]   ;;  %v1116_v58 = vld [vmem:[%s1398_s3 + $0x1d8] sm:$0xff]   ;;  %v1121_v5 = vld [vmem:[%s1398_s3 + $0x110] sm:$0xff]  }
  0x14   :  { %987 = vmatpush3.bf16.msra.mxu0 %v1085_v18  ;;  %v74_v4 = vcombine.low %v66_v60, %v73_v1  ;;  %v76_v14 = vcombine.low %v53_v8, %v57_v9  ;;  %v121_v15 = vrot.slane %v96_v42, %v48_v59  ;;  %v125_v16 = vrot.slane %v96_v42, %v52_v62  ;;  %v1117_v61 = vld [vmem:[%s1398_s3 + $0x118] sm:$0xff]   ;;  %v1119_v62 = vld [vmem:[%s1398_s3 + $0x150] sm:$0xff]   ;;  %v1124_v8 = vld [vmem:[%s1398_s3 + $0x1c8] sm:$0xff]  }
  0x15   :  { %1009 = vmatpush3.bf16.msra.mxu1 %v1086_v19  ;;  %988 = vmatprep.subr.bf16.mxu0 %v1087_v21  ;;  %v146_v7 = vcombine.low %v138_v2, %v145_v3  ;;  %v129_v17 = vrot.slane %v96_v42, %v56_v63  ;;  %v83_v20 = vrot.slane %v75_v12, %v1275_v45  ;;  %v1118_v1 = vld [vmem:[%s1398_s3 + $0x198] sm:$0xff]   ;;  %v1120_v2 = vld [vmem:[%s1398_s3 + $0x1d0] sm:$0xff]   ;;  %v1125_v9 = vld [vmem:[%s1398_s3 + $0x108] sm:$0xff]  }
  0x16   :  { %1010 = vmatprep.subr.bf16.mxu1 %v1088_v22  ;;  %v94_v10 = vmul.f32 %v74_v4, %v22_v0  ;;  %v90_v21 = vrot.slane %v76_v14, %v1275_v45  ;;  %v147_v22 = vcombine.low %v117_v13, %v121_v15  ;;  %v1128_v12 = vld [vmem:[%s1398_s3 + $0x1c0] sm:$0xff]  }
  0x17   :  { %v1129_v13 = vld [vmem:[%s1398_s3 + $0x100] sm:$0xff]  }
  0x18   :  { %989 = vmatpush3.bf16.msra.mxu0 %v1089_v23  ;;  %v166_v11 = vadd.f32 %v146_v7, %v94_v10  ;;  %v148_v23 = vcombine.low %v125_v16, %v129_v17  ;;  %v1122_v7 = vld [vmem:[%s1398_s3 + $0x190] sm:$0xff]   ;;  %v1127_v10 = vld [vmem:[%s1398_s3 + $0x140] sm:$0xff]  }
  0x19   :  { %1011 = vmatpush3.bf16.msra.mxu1 %v1090_v24  ;;  %990 = vmatprep.subr.bf16.mxu0 %v1091_v26  ;;  %v23_v26 = vunpack.c.h.bf16 %v21_v52  ;;  %v1112_v52 = vld [vmem:[%s1398_s3 + $0x1e0] sm:$0xff]  }
  0x1a   :  { %1012 = vmatprep.subr.bf16.mxu1 %v1092_v27  ;;  %v168_v18 = vmul.f32 0.2, %v166_v11  ;;  %v162_v32 = vrot.slane %v148_v23, %v1275_v45  ;;  %v1130_v14 = vld [vmem:[%s1398_s3 + $0x180] sm:$0xff]  }
  0x1c   :  { %991 = vmatpush3.bf16.msra.mxu0 %v1093_v30  ;;  %v170_v19 = vmax.f32 %v166_v11, %v168_v18  ;;  %v91_v30 = vcombine.low %v83_v20, %v90_v21  ;;  %v1126_v11 = vld [vmem:[%s1398_s3 + $0x188] sm:$0xff]  }
  0x1d   :  { %1013 = vmatpush3.bf16.msra.mxu1 %v1094_v31  ;;  %992 = vmatprep.subr.bf16.mxu0 %v1095_v33  ;;  %v155_v31 = vrot.slane %v147_v22, %v1275_v45 }
  0x1e   :  { %1014 = vmatprep.subr.bf16.mxu1 %v1096_v35  ;;  %v181_v24 = vrot.slane %v170_v19, %v1275_v45  ;;  %v174_v25 = vcombine.high %v170_v19, %v170_v19  ;;  %v1101_v35 = vld [vmem:[%s1398_s3 + $0x138] sm:$0xff]   ;;  %v95_v41 = vmul.f32 %v91_v30, %v23_v26  ;;  %v913_v26 = vld [vmem:[%s1402_s4] ss:$0 sm:$0xff] }
  0x1f   :  { %v163_v42 = vcombine.low %v155_v31, %v162_v32 }
  0x20   :  { %993 = vmatpush3.bf16.msra.mxu0 %v1097_v38  ;;  %v189_v27 = vcombine.high %v181_v24, %v181_v24  ;;  %v188_v28 = vrot.slane %v174_v25, %v1275_v45  ;;  %v216_v29 = vpack.c.bf16 %v181_v24, %v181_v24 }
  0x21   :  { %1015 = vmatpush3.bf16.msra.mxu1 %v1098_v40  ;;  %1022 = vmatprep.subr.bf16.mxu0 %v1099_v46  ;;  %v1104_v40 = vld [vmem:[%s1398_s3 + $0x1f0] sm:$0xff]   ;;  %v167_v48 = vadd.f32 %v163_v42, %v95_v41 }
  0x22   :  { %1044 = vmatprep.subr.bf16.mxu1 %v1100_v51  ;;  %v217_v33 = vpack.c.bf16 %v189_v27, %v189_v27  ;;  %v190_v34 = vcombine.high %v188_v28, %v188_v28  ;;  %v218_v36 = vpack.c.bf16 %v188_v28, %v188_v28  ;;  %v1106_v46 = vld [vmem:[%s1398_s3 + $0x1b0] sm:$0xff]   ;;  %v1110_v51 = vld [vmem:[%s1398_s3 + $0x1a8] sm:$0xff]  }
  0x23   :  { %v169_v53 = vmul.f32 0.2, %v167_v48 }
  0x24   :  { %775 = vmatprep.mubr.bf16.mxu0 %v217_v33  ;;  %v219_v38 = vpack.c.bf16 %v190_v34, %v190_v34 }
  0x25   :  { %776 = vmatmul.mubr.bf16.vlgmr.msra.gmra.mxu0 %v216_v29  ;;  %v171_v56 = vmax.f32 %v167_v48, %v169_v53 }
  0x26   :  { %815 = vmatprep.mubr.bf16.mxu1 %v219_v38  ;;  %1023 = vmatpush3.bf16.msra.mxu0 %v1101_v35 }
  0x27   :  { %816 = vmatmul.mubr.bf16.vlgmr.msra.gmra.mxu1 %v218_v36  ;;  %1024 = vmatprep.subr.bf16.mxu0 %v1103_v37  ;;  %v198_v59 = vrot.slane %v171_v56, %v1275_v45  ;;  %v191_v60 = vcombine.high %v171_v56, %v171_v56 }
  0x28   :  { %1045 = vmatpush3.bf16.msra.mxu1 %v1102_v39 }
  0x29   :  { %1046 = vmatprep.subr.bf16.mxu1 %v1104_v40  ;;  %v206_v63 = vcombine.high %v198_v59, %v198_v59  ;;  %v205_v0 = vrot.slane %v191_v60, %v1275_v45  ;;  %v1123_v45 = vld [vmem:[%s1398_s3 + $0x148] sm:$0xff]   ;;  %v220_v15 = vpack.c.bf16 %v198_v59, %v198_v59 }
  0x2a   :  { %1025 = vmatpush3.bf16.msra.mxu0 %v1105_v43 }
  0x2b   :  { %1026 = vmatprep.subr.bf16.mxu0 %v1107_v44  ;;  %v221_v3 = vpack.c.bf16 %v206_v63, %v206_v63  ;;  %v207_v4 = vcombine.high %v205_v0, %v205_v0  ;;  %v222_v16 = vpack.c.bf16 %v205_v0, %v205_v0 }
  0x2c   :  { %1047 = vmatpush3.bf16.msra.mxu1 %v1106_v46 }
  0x2d   :  { %1048 = vmatprep.subr.bf16.mxu1 %v1108_v47  ;;  %855 = vmatprep.mubr.bf16.mxu0 %v221_v3  ;;  %v223_v6 = vpack.c.bf16 %v207_v4, %v207_v4 }
  0x2e   :  { %1027 = vmatpush3.bf16.msra.mxu0 %v1109_v49 }
  0x2f   :  { %1028 = vmatprep.subr.bf16.mxu0 %v1111_v50  ;;  %895 = vmatprep.mubr.bf16.mxu1 %v223_v6 }
  0x30   :  { %1049 = vmatpush3.bf16.msra.mxu1 %v1110_v51 }
  0x31   :  { %1050 = vmatprep.subr.bf16.mxu1 %v1112_v52 }
  0x32   :  { %1029 = vmatpush3.bf16.msra.mxu0 %v1113_v54 }
  0x33   :  { %1030 = vmatprep.subr.bf16.mxu0 %v1115_v55 }
  0x34   :  { %1051 = vmatpush3.bf16.msra.mxu1 %v1114_v57 }
  0x35   :  { %1052 = vmatprep.subr.bf16.mxu1 %v1116_v58 }
  0x36   :  { %1031 = vmatpush3.bf16.msra.mxu0 %v1117_v61 }
  0x37   :  { %1032 = vmatprep.subr.bf16.mxu0 %v1119_v62 }
  0x38   :  { %1053 = vmatpush3.bf16.msra.mxu1 %v1118_v1 }
  0x39   :  { %1054 = vmatprep.subr.bf16.mxu1 %v1120_v2 }
  0x3a   :  { %1033 = vmatpush3.bf16.msra.mxu0 %v1121_v5 }
  0x3b   :  { %1034 = vmatprep.subr.bf16.mxu0 %v1123_v45 }
  0x3c   :  { %1055 = vmatpush3.bf16.msra.mxu1 %v1122_v7 }
  0x3d   :  { %1056 = vmatprep.subr.bf16.mxu1 %v1124_v8 }
  0x3e   :  { %1035 = vmatpush3.bf16.msra.mxu0 %v1125_v9 }
  0x3f   :  { %1036 = vmatprep.subr.bf16.mxu0 %v1127_v10 }
  0x40   :  { %1057 = vmatpush3.bf16.msra.mxu1 %v1126_v11 }
  0x41   :  { %1058 = vmatprep.subr.bf16.mxu1 %v1128_v12 }
  0x42   :  { %1037 = vmatpush3.bf16.msra.mxu0 %v1129_v13 }
  0x44   :  { %1059 = vmatpush3.bf16.msra.mxu1 %v1130_v14 }
  0x45   :  { %856 = vmatmul.mubr.bf16.vlgmr.msra.gmra.mxu0 %v220_v15 }
  0x47   :  { %896 = vmatmul.mubr.bf16.vlgmr.msra.gmra.mxu1 %v222_v16 }
  0xe5   :  { %v994_v17 = vpop.f32.mrf.mxu0 }
  0xe7   :  { %v1016_v18 = vpop.f32.mrf.mxu1  ;;  %v995_v19 = vpop.f32.mrf.mxu0 }
  0xe8   :  { %v996_v25 = vadd.f32 %v995_v19, %v994_v17 }
  0xe9   :  { %v1017_v20 = vpop.f32.mrf.mxu1  ;;  %v997_v21 = vpop.f32.mrf.mxu0 }
  0xea   :  { %v778_v27 = vadd.f32 %v996_v25, %v913_v26  ;;  %v1018_v28 = vadd.f32 %v1017_v20, %v1016_v18 }
  0xeb   :  { %v1019_v22 = vpop.f32.mrf.mxu1  ;;  %v998_v23 = vpop.f32.mrf.mxu0 }
  0xec   :  { %v818_v32 = vadd.f32 %v1018_v28, %v778_v27 }
  0xed   :  { %v1020_v24 = vpop.f32.mrf.mxu1 }
 0x105   :  { %v1038_v29 = vpop.f32.mrf.mxu0 }
 0x107   :  { %v1060_v30 = vpop.f32.mrf.mxu1  ;;  %v1039_v31 = vpop.f32.mrf.mxu0 }
 0x108   :  { %v1040_v33 = vadd.f32 %v1039_v31, %v1038_v29 }
 0x109   :  { %v1061_v34 = vpop.f32.mrf.mxu1  ;;  %v1041_v35 = vpop.f32.mrf.mxu0 }
 0x10a   :  { %v858_v36 = vadd.f32 %v1040_v33, %v818_v32  ;;  %v1062_v37 = vadd.f32 %v1061_v34, %v1060_v30 }
 0x10b   :  { %v1063_v38 = vpop.f32.mrf.mxu1  ;;  %v1042_v39 = vpop.f32.mrf.mxu0 }
 0x10c   :  { %v898_v40 = vadd.f32 %v1062_v37, %v858_v36 }
 0x10d   :  { %v1064_v41 = vpop.f32.mrf.mxu1 }
 0x10e   :  { %v903_v42 = vsub.f32 0.0, %v898_v40 }
 0x110   :  { %v904_v43 = vmul.f32 1.442695, %v903_v42 }
 0x112   :  { %1131 = vpow2.f32 %v904_v43 }
 0x11f   :  { %v1132_v44 = vpop.eup %1131 }
 0x120   :  { %v906_v46 = vadd.f32 1.0, %v1132_v44 }
 0x122   :  { %1133 = vrcp.f32 %v906_v46 }
 0x12f   :  { %v1134_v47 = vpop.eup %1133 }
 0x130   :  { %908 = vst [vmem:[%s1403_s5] sm:$0x3] %v1134_v47 }

</bundles_post_ra>
